<compile_context>
chip_gen: v7x
topology: tpu7x:2x2x1
jax: 0.10.0
libtpu: 0.0.40
codegen_flags: <defaults>
</compile_context>

<pallas_src>
import math
from functools import partial

import jax
import jax.numpy as jnp
from jax.experimental import pallas as pl
from jax.experimental.pallas import tpu as pltpu

# ----- small, TPU-friendly config (consistent with the module's forward) -----
FEATURE_DIM = 16        # feature_dim
D_MODEL = 128           # d_model
N_HEAD = 4
HEAD_DIM = D_MODEL // N_HEAD
N_LAYERS = 2
DIM_FF = 256            # dim_feedforward
H = 8                   # image height (module's PE add only broadcasts for square inputs)
W = 8                   # image width
BATCH = 2
SEQ = H * W
LN_EPS = 1e-5

BF16 = jnp.bfloat16
F32 = jnp.float32


def _layer_norm(x, w, b):
    """LayerNorm with single-pass statistics (var = E[x^2] - mu^2), biased variance."""
    inv_d = 1.0 / x.shape[-1]
    mu = jnp.sum(x, axis=-1, keepdims=True) * inv_d
    ex2 = jnp.sum(x * x, axis=-1, keepdims=True) * inv_d
    var = ex2 - mu * mu
    return (x - mu) * jax.lax.rsqrt(var + LN_EPS) * w + b


def encoder_kernel(x_ref, wqkv_ref, bqkv_ref, wo_ref, bo_ref,
                   w1_ref, b1_ref, w2_ref, b2_ref,
                   ln1w_ref, ln1b_ref, ln2w_ref, ln2b_ref,
                   out_ref, *, exp_dtype):
    """One grid step processes BB batch elements collapsed into the token dimension.

    x_ref:   (BB, S, D) f32 tokens (1x1 conv + positional embedding already applied)
    out_ref: (BB, 1, D) f32 max-pooled output
    """
    BB, S, D = x_ref.shape
    BS = BB * S

    x = x_ref[...].reshape(BS, D)                     # f32 residual stream (B*S, D)

    for l in range(N_LAYERS):                         # static unroll over layers
        xb = x.astype(BF16)

        # ---- fused, lane-dense QKV projection: (BS,128) x (128,384) -------------
        # Softmax 1/sqrt(hd) is pre-folded into the q columns of wqkv/bqkv.
        qkv = jnp.dot(xb, wqkv_ref[l], preferred_element_type=F32) + bqkv_ref[l]
        qkv = qkv.astype(BF16)                        # (BS, 3D)

        # ---- per-head attention: static 32-lane slices of the fused qkv ---------
        ao_heads = []
        for h in range(N_HEAD):
            q_h = qkv[:, h * HEAD_DIM:(h + 1) * HEAD_DIM].reshape(BB, S, HEAD_DIM)
            k_h = qkv[:, D + h * HEAD_DIM:D + (h + 1) * HEAD_DIM].reshape(BB, S, HEAD_DIM)
            v_h = qkv[:, 2 * D + h * HEAD_DIM:2 * D + (h + 1) * HEAD_DIM].reshape(BB, S, HEAD_DIM)

            sc = jax.lax.dot_general(q_h, k_h, (((2,), (2,)), ((0,), (0,))),
                                     preferred_element_type=F32)      # (BB, S, S) f32
            sc = sc - jnp.max(sc, axis=-1, keepdims=True)
            p = jnp.exp(sc.astype(exp_dtype))         # bf16 exp on v6e/v7x, f32 on v5
            inv = pl.reciprocal(jnp.sum(p, axis=-1, keepdims=True).astype(F32), approx=True)
            p = (p * inv.astype(exp_dtype)).astype(BF16)
            ao_h = jax.lax.dot_general(p, v_h, (((2,), (1,)), ((0,), (0,))),
                                       preferred_element_type=F32)    # (BB, S, hd) f32
            ao_heads.append(ao_h.astype(BF16))

        # ---- output projection: head-major lane concat + one (128,128) matmul ---
        attn_cat = jnp.concatenate(ao_heads, axis=-1).reshape(BS, D)   # (BS, D) bf16
        attn = jnp.dot(attn_cat, wo_ref[l], preferred_element_type=F32)
        x = _layer_norm(x + attn + bo_ref[l], ln1w_ref[l], ln1b_ref[l])   # post-norm

        # ---- feed-forward (ReLU) ------------------------------------------------
        h1 = jnp.dot(x.astype(BF16), w1_ref[l], preferred_element_type=F32) + b1_ref[l]
        h1 = jnp.maximum(h1, 0.0)
        h2 = jnp.dot(h1.astype(BF16), w2_ref[l], preferred_element_type=F32) + b2_ref[l]
        x = _layer_norm(x + h2, ln2w_ref[l], ln2b_ref[l])

    # pool='max' over the sequence dimension, per batch element
    out_ref[...] = jnp.max(x.reshape(BB, S, D), axis=1, keepdims=True)


def _position_embedding(p, s2, s3):
    """Reproduces the torch PE construction: at spatial (i, j) add cat(embed_w[j], embed_h[i])."""
    d2 = D_MODEL // 2
    embed_w = p["w_emb"][:s2]      # torch: w_embedding(arange(size(2)))
    embed_h = p["h_emb"][:s3]      # torch: h_embedding(arange(size(3)))
    pe = jnp.concatenate([
        jnp.broadcast_to(embed_w[None, :, :], (s2, s3, d2)),   # depends on j
        jnp.broadcast_to(embed_h[:, None, :], (s2, s3, d2)),   # depends on i
    ], axis=-1)
    return pe.reshape(s2 * s3, D_MODEL)


def _prep_kernel_params(p):
    """Fold the softmax 1/sqrt(hd) into the q columns and bf16-cast the matmul weights."""
    scale = 1.0 / math.sqrt(HEAD_DIM)
    col_scale = jnp.concatenate([jnp.full((D_MODEL,), scale, F32),
                                 jnp.ones((2 * D_MODEL,), F32)])
    bf = lambda a: a.astype(BF16)
    return {
        "wqkv": bf(p["wqkv"] * col_scale),     # (L, D, 3D), lane-dense, q-cols pre-scaled
        "bqkv": p["bqkv"] * col_scale,         # (L, 1, 3D), f32 (added after f32 accumulation)
        "wo": bf(p["wo"]), "bo": p["bo"],
        "w1": bf(p["w1"]), "b1": p["b1"],
        "w2": bf(p["w2"]), "b2": p["b2"],
        "ln1w": p["ln1w"], "ln1b": p["ln1b"],
        "ln2w": p["ln2w"], "ln2b": p["ln2b"],
    }


def _device_kind():
    try:
        return jax.devices()[0].device_kind.lower()
    except Exception:
        return ""


def _auto_batch_block(B):
    """grid=(1,) on single-TC v5e/v6e; split the batch across the two TensorCores on v7x."""
    kind = _device_kind()
    if "v7" in kind and B > 1:
        return B // 2 if B % 2 == 0 else 1
    return B


def _auto_exp_dtype():
    """bf16 softmax exp on bf16-EUP chips (v6e/v7x); f32 on v5 (no bf16 VPU/EUP)."""
    return F32 if "v5" in _device_kind() else BF16


def _cost_estimate(B, S):
    BS, HB = B * S, N_HEAD * B
    flops = 2 * N_LAYERS * (BS * D_MODEL * 3 * D_MODEL           # fused QKV
                            + 2 * HB * S * S * HEAD_DIM          # QK^T + PV
                            + BS * D_MODEL * D_MODEL             # output projection
                            + 2 * BS * D_MODEL * DIM_FF)         # feed-forward
    transcendentals = N_LAYERS * HB * S * S                      # softmax exp
    weight_bytes = N_LAYERS * (
        2 * (3 * D_MODEL * D_MODEL + D_MODEL * D_MODEL + 2 * D_MODEL * DIM_FF)   # bf16 weights
        + 4 * (3 * D_MODEL + 2 * D_MODEL + DIM_FF + 4 * D_MODEL))                # f32 biases / LN
    bytes_accessed = BS * D_MODEL * 4 + weight_bytes + B * D_MODEL * 4
    return pl.CostEstimate(flops=flops, transcendentals=transcendentals,
                           bytes_accessed=bytes_accessed)


def transformer_encoder(features_nchw, p, batch_block=None):
    B, C, s2, s3 = features_nchw.shape
    assert s2 == s3, "module's PE add only broadcasts for square inputs"
    S = s2 * s3

    BB = _auto_batch_block(B) if batch_block is None else batch_block
    assert B % BB == 0

    # Tiny K=16 1x1 conv (per-token linear) + positional embedding in plain XLA so the
    # kernel receives a lane-dense (B, S, 128) activation.  Dropout is identity (inference).
    tokens = jnp.transpose(features_nchw, (0, 2, 3, 1)).reshape(B, S, C)
    x = (tokens @ p["wconv"] + p["bconv"] + _position_embedding(p, s2, s3)[None]).astype(F32)

    kp = _prep_kernel_params(p)

    L = N_LAYERS
    c3 = lambda b: (0, 0, 0)
    in_specs = [
        pl.BlockSpec((BB, S, D_MODEL), lambda b: (b, 0, 0)),     # tokens
        pl.BlockSpec((L, D_MODEL, 3 * D_MODEL), c3),             # wqkv (fused, lane-dense)
        pl.BlockSpec((L, 1, 3 * D_MODEL), c3),                   # bqkv (lane-dense)
        pl.BlockSpec((L, D_MODEL, D_MODEL), c3),                 # wo
        pl.BlockSpec((L, 1, D_MODEL), c3),                       # bo
        pl.BlockSpec((L, D_MODEL, DIM_FF), c3),                  # linear1 W
        pl.BlockSpec((L, 1, DIM_FF), c3),                        # linear1 b
        pl.BlockSpec((L, DIM_FF, D_MODEL), c3),                  # linear2 W
        pl.BlockSpec((L, 1, D_MODEL), c3),                       # linear2 b
        pl.BlockSpec((L, 1, D_MODEL), c3),                       # ln1 w
        pl.BlockSpec((L, 1, D_MODEL), c3),                       # ln1 b
        pl.BlockSpec((L, 1, D_MODEL), c3),                       # ln2 w
        pl.BlockSpec((L, 1, D_MODEL), c3),                       # ln2 b
    ]

    out = pl.pallas_call(
        partial(encoder_kernel, exp_dtype=_auto_exp_dtype()),
        out_shape=jax.ShapeDtypeStruct((B, 1, D_MODEL), jnp.float32),
        grid_spec=pltpu.PrefetchScalarGridSpec(
            num_scalar_prefetch=0,
            grid=(B // BB,),
            in_specs=in_specs,
            out_specs=pl.BlockSpec((BB, 1, D_MODEL), lambda b: (b, 0, 0)),
        ),
        compiler_params=pltpu.CompilerParams(dimension_semantics=("parallel",)),
        cost_estimate=_cost_estimate(B, S),
    )(x, kp["wqkv"], kp["bqkv"], kp["wo"], kp["bo"],
      kp["w1"], kp["b1"], kp["w2"], kp["b2"],
      kp["ln1w"], kp["ln1b"], kp["ln2w"], kp["ln2b"])
    return out[:, 0, :]                                          # (B, D)


def init_params(key):
    ks = jax.random.split(key, 12)
    n = lambda k, shape, s: (s * jax.random.normal(k, shape, jnp.float32))
    p = {
        "wconv": n(ks[0], (FEATURE_DIM, D_MODEL), 0.05),
        "bconv": n(ks[1], (1, D_MODEL), 0.01),
        "w_emb": n(ks[2], (W, D_MODEL // 2), 0.02),
        "h_emb": n(ks[3], (H, D_MODEL // 2), 0.02),
        "wqkv":  n(ks[4], (N_LAYERS, D_MODEL, 3 * D_MODEL), 0.05),
        "bqkv":  n(ks[5], (N_LAYERS, 1, 3 * D_MODEL), 0.01),
        "wo":    n(ks[6], (N_LAYERS, D_MODEL, D_MODEL), 0.05),
        "bo":    n(ks[7], (N_LAYERS, 1, D_MODEL), 0.01),
        "w1":    n(ks[8], (N_LAYERS, D_MODEL, DIM_FF), 0.05),
        "b1":    n(ks[9], (N_LAYERS, 1, DIM_FF), 0.01),
        "w2":    n(ks[10], (N_LAYERS, DIM_FF, D_MODEL), 0.05),
        "b2":    n(ks[11], (N_LAYERS, 1, D_MODEL), 0.01),
        "ln1w": jnp.ones((N_LAYERS, 1, D_MODEL), jnp.float32),
        "ln1b": jnp.zeros((N_LAYERS, 1, D_MODEL), jnp.float32),
        "ln2w": jnp.ones((N_LAYERS, 1, D_MODEL), jnp.float32),
        "ln2b": jnp.zeros((N_LAYERS, 1, D_MODEL), jnp.float32),
    }
    return p


def reference(features_nchw, p):
    """Pure-JAX f32 reference of the same forward pass (inference semantics)."""
    B, C, s2, s3 = features_nchw.shape
    tokens = jnp.transpose(features_nchw, (0, 2, 3, 1)).reshape(B, s2 * s3, C)
    x = tokens @ p["wconv"] + p["bconv"]
    x = x + _position_embedding(p, s2, s3)[None]
    for l in range(N_LAYERS):
        qkv = x @ p["wqkv"][l] + p["bqkv"][l]
        q, k, v = qkv[..., :D_MODEL], qkv[..., D_MODEL:2 * D_MODEL], qkv[..., 2 * D_MODEL:]
        split = lambda t: t.reshape(B, -1, N_HEAD, HEAD_DIM).transpose(0, 2, 1, 3)
        qh, kh, vh = split(q), split(k), split(v)
        sc = jnp.einsum("bhqd,bhkd->bhqk", qh, kh) / math.sqrt(HEAD_DIM)
        pr = jax.nn.softmax(sc, axis=-1)
        ao = jnp.einsum("bhqk,bhkd->bhqd", pr, vh).transpose(0, 2, 1, 3).reshape(B, -1, D_MODEL)
        ao = ao @ p["wo"][l] + p["bo"][l]
        x = _layer_norm(x + ao, p["ln1w"][l], p["ln1b"][l])
        ff = jax.nn.relu(x @ p["w1"][l] + p["b1"][l]) @ p["w2"][l] + p["b2"][l]
        x = _layer_norm(x + ff, p["ln2w"][l], p["ln2b"][l])
    return jnp.max(x, axis=1)


if __name__ == "__main__":
    key = jax.random.PRNGKey(0)
    kx, kp = jax.random.split(key)
    x = jax.random.normal(kx, (BATCH, FEATURE_DIM, H, W), jnp.float32)   # NCHW like PyTorch
    params = init_params(kp)

    out = transformer_encoder(x, params)
    out = jax.block_until_ready(out)

    ref = reference(x, params)
    assert out.shape == (BATCH, D_MODEL), out.shape
    err = float(jnp.max(jnp.abs(out - ref)))
    assert err < 5e-2, f"max abs error {err}"
    print("KERNEL_OK")
</pallas_src>

<mosaic_0001>
module attributes {stable_mosaic.version = 11 : i64} {
  func.func @encoder_kernel(%arg0: i32, %arg1: memref<2x64x128xf32, #tpu.memory_space<vmem>>, %arg2: memref<2x128x384xbf16, #tpu.memory_space<vmem>>, %arg3: memref<2x1x384xf32, #tpu.memory_space<vmem>>, %arg4: memref<2x128x128xbf16, #tpu.memory_space<vmem>>, %arg5: memref<2x1x128xf32, #tpu.memory_space<vmem>>, %arg6: memref<2x128x256xbf16, #tpu.memory_space<vmem>>, %arg7: memref<2x1x256xf32, #tpu.memory_space<vmem>>, %arg8: memref<2x256x128xbf16, #tpu.memory_space<vmem>>, %arg9: memref<2x1x128xf32, #tpu.memory_space<vmem>>, %arg10: memref<2x1x128xf32, #tpu.memory_space<vmem>>, %arg11: memref<2x1x128xf32, #tpu.memory_space<vmem>>, %arg12: memref<2x1x128xf32, #tpu.memory_space<vmem>>, %arg13: memref<2x1x128xf32, #tpu.memory_space<vmem>>, %arg14: memref<2x1x128xf32, #tpu.memory_space<vmem>>) attributes {dimension_semantics = [#tpu.dimension_semantics<parallel>], iteration_bounds = array<i64: 1>, scalar_prefetch = 0 : i64, scratch_operands = 0 : i64, tpu.core_type = #tpu.core_type<tc>, window_params = [{transform_indices = @transform_0, window_bounds = array<i64: 2, 64, 128>}, {pipeline_mode = #tpu.pipeline_mode<synchronous>, transform_indices = @transform_1, window_bounds = array<i64: 2, 128, 384>}, {pipeline_mode = #tpu.pipeline_mode<synchronous>, transform_indices = @transform_2, window_bounds = array<i64: 2, 1, 384>}, {pipeline_mode = #tpu.pipeline_mode<synchronous>, transform_indices = @transform_3, window_bounds = array<i64: 2, 128, 128>}, {pipeline_mode = #tpu.pipeline_mode<synchronous>, transform_indices = @transform_4, window_bounds = array<i64: 2, 1, 128>}, {pipeline_mode = #tpu.pipeline_mode<synchronous>, transform_indices = @transform_5, window_bounds = array<i64: 2, 128, 256>}, {pipeline_mode = #tpu.pipeline_mode<synchronous>, transform_indices = @transform_6, window_bounds = array<i64: 2, 1, 256>}, {pipeline_mode = #tpu.pipeline_mode<synchronous>, transform_indices = @transform_7, window_bounds = array<i64: 2, 256, 128>}, {pipeline_mode = #tpu.pipeline_mode<synchronous>, transform_indices = @transform_8, window_bounds = array<i64: 2, 1, 128>}, {pipeline_mode = #tpu.pipeline_mode<synchronous>, transform_indices = @transform_9, window_bounds = array<i64: 2, 1, 128>}, {pipeline_mode = #tpu.pipeline_mode<synchronous>, transform_indices = @transform_10, window_bounds = array<i64: 2, 1, 128>}, {pipeline_mode = #tpu.pipeline_mode<synchronous>, transform_indices = @transform_11, window_bounds = array<i64: 2, 1, 128>}, {pipeline_mode = #tpu.pipeline_mode<synchronous>, transform_indices = @transform_12, window_bounds = array<i64: 2, 1, 128>}, {transform_indices = @transform_13, window_bounds = array<i64: 2, 1, 128>}]} {
    %c0 = arith.constant 0 : index
    %c0_0 = arith.constant 0 : index
    %c0_1 = arith.constant 0 : index
    %0 = vector.load %arg1[%c0, %c0_0, %c0_1] : memref<2x64x128xf32, #tpu.memory_space<vmem>>, vector<2x64x128xf32>
    %1 = vector.shape_cast %0 : vector<2x64x128xf32> to vector<128x128xf32>
    %2 = arith.truncf %1 : vector<128x128xf32> to vector<128x128xbf16>
    %c0_2 = arith.constant 0 : index
    %c0_3 = arith.constant 0 : index
    %c0_4 = arith.constant 0 : index
    %3 = vector.load %arg2[%c0_2, %c0_3, %c0_4] : memref<2x128x384xbf16, #tpu.memory_space<vmem>>, vector<1x128x384xbf16>
    %4 = vector.shape_cast %3 : vector<1x128x384xbf16> to vector<128x384xbf16>
    %cst = arith.constant dense<0.000000e+00> : vector<128x384xf32>
    %5 = tpu.matmul %2, %4, %cst {dimension_numbers = #tpu.dot_dimension_numbers<[1], [0], [0], [1], [0, 0, 1, 1], [], []>} : vector<128x128xbf16>, vector<128x384xbf16>, vector<128x384xf32> -> vector<128x384xf32>
    %c0_5 = arith.constant 0 : index
    %c0_6 = arith.constant 0 : index
    %c0_7 = arith.constant 0 : index
    %6 = vector.load %arg3[%c0_5, %c0_6, %c0_7] : memref<2x1x384xf32, #tpu.memory_space<vmem>>, vector<1x1x384xf32>
    %7 = vector.shape_cast %6 : vector<1x1x384xf32> to vector<1x384xf32>
    %8 = vector.broadcast %7 : vector<1x384xf32> to vector<128x384xf32>
    %9 = arith.addf %5, %8 : vector<128x384xf32>
    %10 = arith.truncf %9 : vector<128x384xf32> to vector<128x384xbf16>
    %11 = vector.extract_strided_slice %10 {offsets = [0, 0], sizes = [128, 32], strides = [1, 1]} : vector<128x384xbf16> to vector<128x32xbf16>
    %12 = vector.shape_cast %11 : vector<128x32xbf16> to vector<2x64x32xbf16>
    %13 = vector.extract_strided_slice %10 {offsets = [0, 128], sizes = [128, 32], strides = [1, 1]} : vector<128x384xbf16> to vector<128x32xbf16>
    %14 = vector.shape_cast %13 : vector<128x32xbf16> to vector<2x64x32xbf16>
    %15 = vector.extract_strided_slice %10 {offsets = [0, 256], sizes = [128, 32], strides = [1, 1]} : vector<128x384xbf16> to vector<128x32xbf16>
    %16 = vector.shape_cast %15 : vector<128x32xbf16> to vector<2x64x32xbf16>
    %cst_8 = arith.constant dense<0.000000e+00> : vector<2x64x64xf32>
    %17 = tpu.matmul %12, %14, %cst_8 {dimension_numbers = #tpu.dot_dimension_numbers<[2], [2], [1], [1], [0, 0, 0, 1, 1, 1], [0], [0]>} : vector<2x64x32xbf16>, vector<2x64x32xbf16>, vector<2x64x64xf32> -> vector<2x64x64xf32>
    %cst_9 = arith.constant dense<0xFF800000> : vector<2x64xf32>
    %18 = vector.multi_reduction <maximumf>, %17, %cst_9 [2] : vector<2x64x64xf32> to vector<2x64xf32>
    %19 = vector.shape_cast %18 : vector<2x64xf32> to vector<2x64x1xf32>
    %20 = vector.broadcast %19 : vector<2x64x1xf32> to vector<2x64x64xf32>
    %21 = arith.subf %17, %20 : vector<2x64x64xf32>
    %22 = arith.truncf %21 : vector<2x64x64xf32> to vector<2x64x64xbf16>
    %23 = math.exp %22 : vector<2x64x64xbf16>
    %24 = arith.extf %23 : vector<2x64x64xbf16> to vector<2x64x64xf32>
    %cst_10 = arith.constant dense<0.000000e+00> : vector<2x64xf32>
    %25 = vector.multi_reduction <add>, %24, %cst_10 [2] : vector<2x64x64xf32> to vector<2x64xf32>
    %26 = vector.shape_cast %25 : vector<2x64xf32> to vector<2x64x1xf32>
    %27 = arith.truncf %26 : vector<2x64x1xf32> to vector<2x64x1xbf16>
    %28 = arith.extf %27 : vector<2x64x1xbf16> to vector<2x64x1xf32>
    %29 = tpu.reciprocal %28 {approx = true} : vector<2x64x1xf32> -> vector<2x64x1xf32>
    %30 = arith.truncf %29 : vector<2x64x1xf32> to vector<2x64x1xbf16>
    %31 = vector.broadcast %30 : vector<2x64x1xbf16> to vector<2x64x64xbf16>
    %32 = arith.mulf %23, %31 : vector<2x64x64xbf16>
    %cst_11 = arith.constant dense<0.000000e+00> : vector<2x64x32xf32>
    %33 = tpu.matmul %32, %16, %cst_11 {dimension_numbers = #tpu.dot_dimension_numbers<[2], [1], [1], [2], [0, 0, 0, 1, 1, 2], [0], [0]>} : vector<2x64x64xbf16>, vector<2x64x32xbf16>, vector<2x64x32xf32> -> vector<2x64x32xf32>
    %34 = arith.truncf %33 : vector<2x64x32xf32> to vector<2x64x32xbf16>
    %35 = vector.extract_strided_slice %10 {offsets = [0, 32], sizes = [128, 32], strides = [1, 1]} : vector<128x384xbf16> to vector<128x32xbf16>
    %36 = vector.shape_cast %35 : vector<128x32xbf16> to vector<2x64x32xbf16>
    %37 = vector.extract_strided_slice %10 {offsets = [0, 160], sizes = [128, 32], strides = [1, 1]} : vector<128x384xbf16> to vector<128x32xbf16>
    %38 = vector.shape_cast %37 : vector<128x32xbf16> to vector<2x64x32xbf16>
    %39 = vector.extract_strided_slice %10 {offsets = [0, 288], sizes = [128, 32], strides = [1, 1]} : vector<128x384xbf16> to vector<128x32xbf16>
    %40 = vector.shape_cast %39 : vector<128x32xbf16> to vector<2x64x32xbf16>
    %cst_12 = arith.constant dense<0.000000e+00> : vector<2x64x64xf32>
    %41 = tpu.matmul %36, %38, %cst_12 {dimension_numbers = #tpu.dot_dimension_numbers<[2], [2], [1], [1], [0, 0, 0, 1, 1, 1], [0], [0]>} : vector<2x64x32xbf16>, vector<2x64x32xbf16>, vector<2x64x64xf32> -> vector<2x64x64xf32>
    %cst_13 = arith.constant dense<0xFF800000> : vector<2x64xf32>
    %42 = vector.multi_reduction <maximumf>, %41, %cst_13 [2] : vector<2x64x64xf32> to vector<2x64xf32>
    %43 = vector.shape_cast %42 : vector<2x64xf32> to vector<2x64x1xf32>
    %44 = vector.broadcast %43 : vector<2x64x1xf32> to vector<2x64x64xf32>
    %45 = arith.subf %41, %44 : vector<2x64x64xf32>
    %46 = arith.truncf %45 : vector<2x64x64xf32> to vector<2x64x64xbf16>
    %47 = math.exp %46 : vector<2x64x64xbf16>
    %48 = arith.extf %47 : vector<2x64x64xbf16> to vector<2x64x64xf32>
    %cst_14 = arith.constant dense<0.000000e+00> : vector<2x64xf32>
    %49 = vector.multi_reduction <add>, %48, %cst_14 [2] : vector<2x64x64xf32> to vector<2x64xf32>
    %50 = vector.shape_cast %49 : vector<2x64xf32> to vector<2x64x1xf32>
    %51 = arith.truncf %50 : vector<2x64x1xf32> to vector<2x64x1xbf16>
    %52 = arith.extf %51 : vector<2x64x1xbf16> to vector<2x64x1xf32>
    %53 = tpu.reciprocal %52 {approx = true} : vector<2x64x1xf32> -> vector<2x64x1xf32>
    %54 = arith.truncf %53 : vector<2x64x1xf32> to vector<2x64x1xbf16>
    %55 = vector.broadcast %54 : vector<2x64x1xbf16> to vector<2x64x64xbf16>
    %56 = arith.mulf %47, %55 : vector<2x64x64xbf16>
    %cst_15 = arith.constant dense<0.000000e+00> : vector<2x64x32xf32>
    %57 = tpu.matmul %56, %40, %cst_15 {dimension_numbers = #tpu.dot_dimension_numbers<[2], [1], [1], [2], [0, 0, 0, 1, 1, 2], [0], [0]>} : vector<2x64x64xbf16>, vector<2x64x32xbf16>, vector<2x64x32xf32> -> vector<2x64x32xf32>
    %58 = arith.truncf %57 : vector<2x64x32xf32> to vector<2x64x32xbf16>
    %59 = vector.extract_strided_slice %10 {offsets = [0, 64], sizes = [128, 32], strides = [1, 1]} : vector<128x384xbf16> to vector<128x32xbf16>
    %60 = vector.shape_cast %59 : vector<128x32xbf16> to vector<2x64x32xbf16>
    %61 = vector.extract_strided_slice %10 {offsets = [0, 192], sizes = [128, 32], strides = [1, 1]} : vector<128x384xbf16> to vector<128x32xbf16>
    %62 = vector.shape_cast %61 : vector<128x32xbf16> to vector<2x64x32xbf16>
    %63 = vector.extract_strided_slice %10 {offsets = [0, 320], sizes = [128, 32], strides = [1, 1]} : vector<128x384xbf16> to vector<128x32xbf16>
    %64 = vector.shape_cast %63 : vector<128x32xbf16> to vector<2x64x32xbf16>
    %cst_16 = arith.constant dense<0.000000e+00> : vector<2x64x64xf32>
    %65 = tpu.matmul %60, %62, %cst_16 {dimension_numbers = #tpu.dot_dimension_numbers<[2], [2], [1], [1], [0, 0, 0, 1, 1, 1], [0], [0]>} : vector<2x64x32xbf16>, vector<2x64x32xbf16>, vector<2x64x64xf32> -> vector<2x64x64xf32>
    %cst_17 = arith.constant dense<0xFF800000> : vector<2x64xf32>
    %66 = vector.multi_reduction <maximumf>, %65, %cst_17 [2] : vector<2x64x64xf32> to vector<2x64xf32>
    %67 = vector.shape_cast %66 : vector<2x64xf32> to vector<2x64x1xf32>
    %68 = vector.broadcast %67 : vector<2x64x1xf32> to vector<2x64x64xf32>
    %69 = arith.subf %65, %68 : vector<2x64x64xf32>
    %70 = arith.truncf %69 : vector<2x64x64xf32> to vector<2x64x64xbf16>
    %71 = math.exp %70 : vector<2x64x64xbf16>
    %72 = arith.extf %71 : vector<2x64x64xbf16> to vector<2x64x64xf32>
    %cst_18 = arith.constant dense<0.000000e+00> : vector<2x64xf32>
    %73 = vector.multi_reduction <add>, %72, %cst_18 [2] : vector<2x64x64xf32> to vector<2x64xf32>
    %74 = vector.shape_cast %73 : vector<2x64xf32> to vector<2x64x1xf32>
    %75 = arith.truncf %74 : vector<2x64x1xf32> to vector<2x64x1xbf16>
    %76 = arith.extf %75 : vector<2x64x1xbf16> to vector<2x64x1xf32>
    %77 = tpu.reciprocal %76 {approx = true} : vector<2x64x1xf32> -> vector<2x64x1xf32>
    %78 = arith.truncf %77 : vector<2x64x1xf32> to vector<2x64x1xbf16>
    %79 = vector.broadcast %78 : vector<2x64x1xbf16> to vector<2x64x64xbf16>
    %80 = arith.mulf %71, %79 : vector<2x64x64xbf16>
    %cst_19 = arith.constant dense<0.000000e+00> : vector<2x64x32xf32>
    %81 = tpu.matmul %80, %64, %cst_19 {dimension_numbers = #tpu.dot_dimension_numbers<[2], [1], [1], [2], [0, 0, 0, 1, 1, 2], [0], [0]>} : vector<2x64x64xbf16>, vector<2x64x32xbf16>, vector<2x64x32xf32> -> vector<2x64x32xf32>
    %82 = arith.truncf %81 : vector<2x64x32xf32> to vector<2x64x32xbf16>
    %83 = vector.extract_strided_slice %10 {offsets = [0, 96], sizes = [128, 32], strides = [1, 1]} : vector<128x384xbf16> to vector<128x32xbf16>
    %84 = vector.shape_cast %83 : vector<128x32xbf16> to vector<2x64x32xbf16>
    %85 = vector.extract_strided_slice %10 {offsets = [0, 224], sizes = [128, 32], strides = [1, 1]} : vector<128x384xbf16> to vector<128x32xbf16>
    %86 = vector.shape_cast %85 : vector<128x32xbf16> to vector<2x64x32xbf16>
    %87 = vector.extract_strided_slice %10 {offsets = [0, 352], sizes = [128, 32], strides = [1, 1]} : vector<128x384xbf16> to vector<128x32xbf16>
    %88 = vector.shape_cast %87 : vector<128x32xbf16> to vector<2x64x32xbf16>
    %cst_20 = arith.constant dense<0.000000e+00> : vector<2x64x64xf32>
    %89 = tpu.matmul %84, %86, %cst_20 {dimension_numbers = #tpu.dot_dimension_numbers<[2], [2], [1], [1], [0, 0, 0, 1, 1, 1], [0], [0]>} : vector<2x64x32xbf16>, vector<2x64x32xbf16>, vector<2x64x64xf32> -> vector<2x64x64xf32>
    %cst_21 = arith.constant dense<0xFF800000> : vector<2x64xf32>
    %90 = vector.multi_reduction <maximumf>, %89, %cst_21 [2] : vector<2x64x64xf32> to vector<2x64xf32>
    %91 = vector.shape_cast %90 : vector<2x64xf32> to vector<2x64x1xf32>
    %92 = vector.broadcast %91 : vector<2x64x1xf32> to vector<2x64x64xf32>
    %93 = arith.subf %89, %92 : vector<2x64x64xf32>
    %94 = arith.truncf %93 : vector<2x64x64xf32> to vector<2x64x64xbf16>
    %95 = math.exp %94 : vector<2x64x64xbf16>
    %96 = arith.extf %95 : vector<2x64x64xbf16> to vector<2x64x64xf32>
    %cst_22 = arith.constant dense<0.000000e+00> : vector<2x64xf32>
    %97 = vector.multi_reduction <add>, %96, %cst_22 [2] : vector<2x64x64xf32> to vector<2x64xf32>
    %98 = vector.shape_cast %97 : vector<2x64xf32> to vector<2x64x1xf32>
    %99 = arith.truncf %98 : vector<2x64x1xf32> to vector<2x64x1xbf16>
    %100 = arith.extf %99 : vector<2x64x1xbf16> to vector<2x64x1xf32>
    %101 = tpu.reciprocal %100 {approx = true} : vector<2x64x1xf32> -> vector<2x64x1xf32>
    %102 = arith.truncf %101 : vector<2x64x1xf32> to vector<2x64x1xbf16>
    %103 = vector.broadcast %102 : vector<2x64x1xbf16> to vector<2x64x64xbf16>
    %104 = arith.mulf %95, %103 : vector<2x64x64xbf16>
    %cst_23 = arith.constant dense<0.000000e+00> : vector<2x64x32xf32>
    %105 = tpu.matmul %104, %88, %cst_23 {dimension_numbers = #tpu.dot_dimension_numbers<[2], [1], [1], [2], [0, 0, 0, 1, 1, 2], [0], [0]>} : vector<2x64x64xbf16>, vector<2x64x32xbf16>, vector<2x64x32xf32> -> vector<2x64x32xf32>
    %106 = arith.truncf %105 : vector<2x64x32xf32> to vector<2x64x32xbf16>
    %107 = tpu.concatenate %34, %58, %82, %106 in 2 : vector<2x64x32xbf16>, vector<2x64x32xbf16>, vector<2x64x32xbf16>, vector<2x64x32xbf16> -> vector<2x64x128xbf16>
    %108 = vector.shape_cast %107 : vector<2x64x128xbf16> to vector<128x128xbf16>
    %c0_24 = arith.constant 0 : index
    %c0_25 = arith.constant 0 : index
    %c0_26 = arith.constant 0 : index
    %109 = vector.load %arg4[%c0_24, %c0_25, %c0_26] : memref<2x128x128xbf16, #tpu.memory_space<vmem>>, vector<1x128x128xbf16>
    %110 = vector.shape_cast %109 : vector<1x128x128xbf16> to vector<128x128xbf16>
    %cst_27 = arith.constant dense<0.000000e+00> : vector<128x128xf32>
    %111 = tpu.matmul %108, %110, %cst_27 {dimension_numbers = #tpu.dot_dimension_numbers<[1], [0], [0], [1], [0, 0, 1, 1], [], []>} : vector<128x128xbf16>, vector<128x128xbf16>, vector<128x128xf32> -> vector<128x128xf32>
    %112 = arith.addf %1, %111 : vector<128x128xf32>
    %c0_28 = arith.constant 0 : index
    %c0_29 = arith.constant 0 : index
    %c0_30 = arith.constant 0 : index
    %113 = vector.load %arg5[%c0_28, %c0_29, %c0_30] : memref<2x1x128xf32, #tpu.memory_space<vmem>>, vector<1x1x128xf32>
    %114 = vector.shape_cast %113 : vector<1x1x128xf32> to vector<1x128xf32>
    %115 = vector.broadcast %114 : vector<1x128xf32> to vector<128x128xf32>
    %116 = arith.addf %112, %115 : vector<128x128xf32>
    %c0_31 = arith.constant 0 : index
    %c0_32 = arith.constant 0 : index
    %c0_33 = arith.constant 0 : index
    %117 = vector.load %arg10[%c0_31, %c0_32, %c0_33] : memref<2x1x128xf32, #tpu.memory_space<vmem>>, vector<1x1x128xf32>
    %118 = vector.shape_cast %117 : vector<1x1x128xf32> to vector<1x128xf32>
    %c0_34 = arith.constant 0 : index
    %c0_35 = arith.constant 0 : index
    %c0_36 = arith.constant 0 : index
    %119 = vector.load %arg11[%c0_34, %c0_35, %c0_36] : memref<2x1x128xf32, #tpu.memory_space<vmem>>, vector<1x1x128xf32>
    %120 = vector.shape_cast %119 : vector<1x1x128xf32> to vector<1x128xf32>
    %cst_37 = arith.constant dense<0.000000e+00> : vector<128xf32>
    %121 = vector.multi_reduction <add>, %116, %cst_37 [1] : vector<128x128xf32> to vector<128xf32>
    %122 = vector.shape_cast %121 : vector<128xf32> to vector<128x1xf32>
    %cst_38 = arith.constant 7.812500e-03 : f32
    %123 = vector.broadcast %cst_38 : f32 to vector<128x1xf32>
    %124 = arith.mulf %122, %123 : vector<128x1xf32>
    %125 = arith.mulf %116, %116 : vector<128x128xf32>
    %cst_39 = arith.constant dense<0.000000e+00> : vector<128xf32>
    %126 = vector.multi_reduction <add>, %125, %cst_39 [1] : vector<128x128xf32> to vector<128xf32>
    %127 = vector.shape_cast %126 : vector<128xf32> to vector<128x1xf32>
    %cst_40 = arith.constant 7.812500e-03 : f32
    %128 = vector.broadcast %cst_40 : f32 to vector<128x1xf32>
    %129 = arith.mulf %127, %128 : vector<128x1xf32>
    %130 = arith.mulf %124, %124 : vector<128x1xf32>
    %131 = arith.subf %129, %130 : vector<128x1xf32>
    %132 = vector.broadcast %124 : vector<128x1xf32> to vector<128x128xf32>
    %133 = arith.subf %116, %132 : vector<128x128xf32>
    %cst_41 = arith.constant 9.99999974E-6 : f32
    %134 = vector.broadcast %cst_41 : f32 to vector<128x1xf32>
    %135 = arith.addf %131, %134 : vector<128x1xf32>
    %136 = math.rsqrt %135 : vector<128x1xf32>
    %137 = vector.broadcast %136 : vector<128x1xf32> to vector<128x128xf32>
    %138 = arith.mulf %133, %137 : vector<128x128xf32>
    %139 = vector.broadcast %118 : vector<1x128xf32> to vector<128x128xf32>
    %140 = arith.mulf %138, %139 : vector<128x128xf32>
    %141 = vector.broadcast %120 : vector<1x128xf32> to vector<128x128xf32>
    %142 = arith.addf %140, %141 : vector<128x128xf32>
    %143 = arith.truncf %142 : vector<128x128xf32> to vector<128x128xbf16>
    %c0_42 = arith.constant 0 : index
    %c0_43 = arith.constant 0 : index
    %c0_44 = arith.constant 0 : index
    %144 = vector.load %arg6[%c0_42, %c0_43, %c0_44] : memref<2x128x256xbf16, #tpu.memory_space<vmem>>, vector<1x128x256xbf16>
    %145 = vector.shape_cast %144 : vector<1x128x256xbf16> to vector<128x256xbf16>
    %cst_45 = arith.constant dense<0.000000e+00> : vector<128x256xf32>
    %146 = tpu.matmul %143, %145, %cst_45 {dimension_numbers = #tpu.dot_dimension_numbers<[1], [0], [0], [1], [0, 0, 1, 1], [], []>} : vector<128x128xbf16>, vector<128x256xbf16>, vector<128x256xf32> -> vector<128x256xf32>
    %c0_46 = arith.constant 0 : index
    %c0_47 = arith.constant 0 : index
    %c0_48 = arith.constant 0 : index
    %147 = vector.load %arg7[%c0_46, %c0_47, %c0_48] : memref<2x1x256xf32, #tpu.memory_space<vmem>>, vector<1x1x256xf32>
    %148 = vector.shape_cast %147 : vector<1x1x256xf32> to vector<1x256xf32>
    %149 = vector.broadcast %148 : vector<1x256xf32> to vector<128x256xf32>
    %150 = arith.addf %146, %149 : vector<128x256xf32>
    %cst_49 = arith.constant 0.000000e+00 : f32
    %151 = vector.broadcast %cst_49 : f32 to vector<128x256xf32>
    %152 = arith.maximumf %150, %151 : vector<128x256xf32>
    %153 = arith.truncf %152 : vector<128x256xf32> to vector<128x256xbf16>
    %c0_50 = arith.constant 0 : index
    %c0_51 = arith.constant 0 : index
    %c0_52 = arith.constant 0 : index
    %154 = vector.load %arg8[%c0_50, %c0_51, %c0_52] : memref<2x256x128xbf16, #tpu.memory_space<vmem>>, vector<1x256x128xbf16>
    %155 = vector.shape_cast %154 : vector<1x256x128xbf16> to vector<256x128xbf16>
    %cst_53 = arith.constant dense<0.000000e+00> : vector<128x128xf32>
    %156 = tpu.matmul %153, %155, %cst_53 {dimension_numbers = #tpu.dot_dimension_numbers<[1], [0], [0], [1], [0, 0, 1, 1], [], []>} : vector<128x256xbf16>, vector<256x128xbf16>, vector<128x128xf32> -> vector<128x128xf32>
    %c0_54 = arith.constant 0 : index
    %c0_55 = arith.constant 0 : index
    %c0_56 = arith.constant 0 : index
    %157 = vector.load %arg9[%c0_54, %c0_55, %c0_56] : memref<2x1x128xf32, #tpu.memory_space<vmem>>, vector<1x1x128xf32>
    %158 = vector.shape_cast %157 : vector<1x1x128xf32> to vector<1x128xf32>
    %159 = vector.broadcast %158 : vector<1x128xf32> to vector<128x128xf32>
    %160 = arith.addf %156, %159 : vector<128x128xf32>
    %161 = arith.addf %142, %160 : vector<128x128xf32>
    %c0_57 = arith.constant 0 : index
    %c0_58 = arith.constant 0 : index
    %c0_59 = arith.constant 0 : index
    %162 = vector.load %arg12[%c0_57, %c0_58, %c0_59] : memref<2x1x128xf32, #tpu.memory_space<vmem>>, vector<1x1x128xf32>
    %163 = vector.shape_cast %162 : vector<1x1x128xf32> to vector<1x128xf32>
    %c0_60 = arith.constant 0 : index
    %c0_61 = arith.constant 0 : index
    %c0_62 = arith.constant 0 : index
    %164 = vector.load %arg13[%c0_60, %c0_61, %c0_62] : memref<2x1x128xf32, #tpu.memory_space<vmem>>, vector<1x1x128xf32>
    %165 = vector.shape_cast %164 : vector<1x1x128xf32> to vector<1x128xf32>
    %cst_63 = arith.constant dense<0.000000e+00> : vector<128xf32>
    %166 = vector.multi_reduction <add>, %161, %cst_63 [1] : vector<128x128xf32> to vector<128xf32>
    %167 = vector.shape_cast %166 : vector<128xf32> to vector<128x1xf32>
    %cst_64 = arith.constant 7.812500e-03 : f32
    %168 = vector.broadcast %cst_64 : f32 to vector<128x1xf32>
    %169 = arith.mulf %167, %168 : vector<128x1xf32>
    %170 = arith.mulf %161, %161 : vector<128x128xf32>
    %cst_65 = arith.constant dense<0.000000e+00> : vector<128xf32>
    %171 = vector.multi_reduction <add>, %170, %cst_65 [1] : vector<128x128xf32> to vector<128xf32>
    %172 = vector.shape_cast %171 : vector<128xf32> to vector<128x1xf32>
    %cst_66 = arith.constant 7.812500e-03 : f32
    %173 = vector.broadcast %cst_66 : f32 to vector<128x1xf32>
    %174 = arith.mulf %172, %173 : vector<128x1xf32>
    %175 = arith.mulf %169, %169 : vector<128x1xf32>
    %176 = arith.subf %174, %175 : vector<128x1xf32>
    %177 = vector.broadcast %169 : vector<128x1xf32> to vector<128x128xf32>
    %178 = arith.subf %161, %177 : vector<128x128xf32>
    %cst_67 = arith.constant 9.99999974E-6 : f32
    %179 = vector.broadcast %cst_67 : f32 to vector<128x1xf32>
    %180 = arith.addf %176, %179 : vector<128x1xf32>
    %181 = math.rsqrt %180 : vector<128x1xf32>
    %182 = vector.broadcast %181 : vector<128x1xf32> to vector<128x128xf32>
    %183 = arith.mulf %178, %182 : vector<128x128xf32>
    %184 = vector.broadcast %163 : vector<1x128xf32> to vector<128x128xf32>
    %185 = arith.mulf %183, %184 : vector<128x128xf32>
    %186 = vector.broadcast %165 : vector<1x128xf32> to vector<128x128xf32>
    %187 = arith.addf %185, %186 : vector<128x128xf32>
    %188 = arith.truncf %187 : vector<128x128xf32> to vector<128x128xbf16>
    %c1 = arith.constant 1 : index
    %c0_68 = arith.constant 0 : index
    %c0_69 = arith.constant 0 : index
    %189 = vector.load %arg2[%c1, %c0_68, %c0_69] : memref<2x128x384xbf16, #tpu.memory_space<vmem>>, vector<1x128x384xbf16>
    %190 = vector.shape_cast %189 : vector<1x128x384xbf16> to vector<128x384xbf16>
    %cst_70 = arith.constant dense<0.000000e+00> : vector<128x384xf32>
    %191 = tpu.matmul %188, %190, %cst_70 {dimension_numbers = #tpu.dot_dimension_numbers<[1], [0], [0], [1], [0, 0, 1, 1], [], []>} : vector<128x128xbf16>, vector<128x384xbf16>, vector<128x384xf32> -> vector<128x384xf32>
    %c1_71 = arith.constant 1 : index
    %c0_72 = arith.constant 0 : index
    %c0_73 = arith.constant 0 : index
    %192 = vector.load %arg3[%c1_71, %c0_72, %c0_73] : memref<2x1x384xf32, #tpu.memory_space<vmem>>, vector<1x1x384xf32>
    %193 = vector.shape_cast %192 : vector<1x1x384xf32> to vector<1x384xf32>
    %194 = vector.broadcast %193 : vector<1x384xf32> to vector<128x384xf32>
    %195 = arith.addf %191, %194 : vector<128x384xf32>
    %196 = arith.truncf %195 : vector<128x384xf32> to vector<128x384xbf16>
    %197 = vector.extract_strided_slice %196 {offsets = [0, 0], sizes = [128, 32], strides = [1, 1]} : vector<128x384xbf16> to vector<128x32xbf16>
    %198 = vector.shape_cast %197 : vector<128x32xbf16> to vector<2x64x32xbf16>
    %199 = vector.extract_strided_slice %196 {offsets = [0, 128], sizes = [128, 32], strides = [1, 1]} : vector<128x384xbf16> to vector<128x32xbf16>
    %200 = vector.shape_cast %199 : vector<128x32xbf16> to vector<2x64x32xbf16>
    %201 = vector.extract_strided_slice %196 {offsets = [0, 256], sizes = [128, 32], strides = [1, 1]} : vector<128x384xbf16> to vector<128x32xbf16>
    %202 = vector.shape_cast %201 : vector<128x32xbf16> to vector<2x64x32xbf16>
    %cst_74 = arith.constant dense<0.000000e+00> : vector<2x64x64xf32>
    %203 = tpu.matmul %198, %200, %cst_74 {dimension_numbers = #tpu.dot_dimension_numbers<[2], [2], [1], [1], [0, 0, 0, 1, 1, 1], [0], [0]>} : vector<2x64x32xbf16>, vector<2x64x32xbf16>, vector<2x64x64xf32> -> vector<2x64x64xf32>
    %cst_75 = arith.constant dense<0xFF800000> : vector<2x64xf32>
    %204 = vector.multi_reduction <maximumf>, %203, %cst_75 [2] : vector<2x64x64xf32> to vector<2x64xf32>
    %205 = vector.shape_cast %204 : vector<2x64xf32> to vector<2x64x1xf32>
    %206 = vector.broadcast %205 : vector<2x64x1xf32> to vector<2x64x64xf32>
    %207 = arith.subf %203, %206 : vector<2x64x64xf32>
    %208 = arith.truncf %207 : vector<2x64x64xf32> to vector<2x64x64xbf16>
    %209 = math.exp %208 : vector<2x64x64xbf16>
    %210 = arith.extf %209 : vector<2x64x64xbf16> to vector<2x64x64xf32>
    %cst_76 = arith.constant dense<0.000000e+00> : vector<2x64xf32>
    %211 = vector.multi_reduction <add>, %210, %cst_76 [2] : vector<2x64x64xf32> to vector<2x64xf32>
    %212 = vector.shape_cast %211 : vector<2x64xf32> to vector<2x64x1xf32>
    %213 = arith.truncf %212 : vector<2x64x1xf32> to vector<2x64x1xbf16>
    %214 = arith.extf %213 : vector<2x64x1xbf16> to vector<2x64x1xf32>
    %215 = tpu.reciprocal %214 {approx = true} : vector<2x64x1xf32> -> vector<2x64x1xf32>
    %216 = arith.truncf %215 : vector<2x64x1xf32> to vector<2x64x1xbf16>
    %217 = vector.broadcast %216 : vector<2x64x1xbf16> to vector<2x64x64xbf16>
    %218 = arith.mulf %209, %217 : vector<2x64x64xbf16>
    %cst_77 = arith.constant dense<0.000000e+00> : vector<2x64x32xf32>
    %219 = tpu.matmul %218, %202, %cst_77 {dimension_numbers = #tpu.dot_dimension_numbers<[2], [1], [1], [2], [0, 0, 0, 1, 1, 2], [0], [0]>} : vector<2x64x64xbf16>, vector<2x64x32xbf16>, vector<2x64x32xf32> -> vector<2x64x32xf32>
    %220 = arith.truncf %219 : vector<2x64x32xf32> to vector<2x64x32xbf16>
    %221 = vector.extract_strided_slice %196 {offsets = [0, 32], sizes = [128, 32], strides = [1, 1]} : vector<128x384xbf16> to vector<128x32xbf16>
    %222 = vector.shape_cast %221 : vector<128x32xbf16> to vector<2x64x32xbf16>
    %223 = vector.extract_strided_slice %196 {offsets = [0, 160], sizes = [128, 32], strides = [1, 1]} : vector<128x384xbf16> to vector<128x32xbf16>
    %224 = vector.shape_cast %223 : vector<128x32xbf16> to vector<2x64x32xbf16>
    %225 = vector.extract_strided_slice %196 {offsets = [0, 288], sizes = [128, 32], strides = [1, 1]} : vector<128x384xbf16> to vector<128x32xbf16>
    %226 = vector.shape_cast %225 : vector<128x32xbf16> to vector<2x64x32xbf16>
    %cst_78 = arith.constant dense<0.000000e+00> : vector<2x64x64xf32>
    %227 = tpu.matmul %222, %224, %cst_78 {dimension_numbers = #tpu.dot_dimension_numbers<[2], [2], [1], [1], [0, 0, 0, 1, 1, 1], [0], [0]>} : vector<2x64x32xbf16>, vector<2x64x32xbf16>, vector<2x64x64xf32> -> vector<2x64x64xf32>
    %cst_79 = arith.constant dense<0xFF800000> : vector<2x64xf32>
    %228 = vector.multi_reduction <maximumf>, %227, %cst_79 [2] : vector<2x64x64xf32> to vector<2x64xf32>
    %229 = vector.shape_cast %228 : vector<2x64xf32> to vector<2x64x1xf32>
    %230 = vector.broadcast %229 : vector<2x64x1xf32> to vector<2x64x64xf32>
    %231 = arith.subf %227, %230 : vector<2x64x64xf32>
    %232 = arith.truncf %231 : vector<2x64x64xf32> to vector<2x64x64xbf16>
    %233 = math.exp %232 : vector<2x64x64xbf16>
    %234 = arith.extf %233 : vector<2x64x64xbf16> to vector<2x64x64xf32>
    %cst_80 = arith.constant dense<0.000000e+00> : vector<2x64xf32>
    %235 = vector.multi_reduction <add>, %234, %cst_80 [2] : vector<2x64x64xf32> to vector<2x64xf32>
    %236 = vector.shape_cast %235 : vector<2x64xf32> to vector<2x64x1xf32>
    %237 = arith.truncf %236 : vector<2x64x1xf32> to vector<2x64x1xbf16>
    %238 = arith.extf %237 : vector<2x64x1xbf16> to vector<2x64x1xf32>
    %239 = tpu.reciprocal %238 {approx = true} : vector<2x64x1xf32> -> vector<2x64x1xf32>
    %240 = arith.truncf %239 : vector<2x64x1xf32> to vector<2x64x1xbf16>
    %241 = vector.broadcast %240 : vector<2x64x1xbf16> to vector<2x64x64xbf16>
    %242 = arith.mulf %233, %241 : vector<2x64x64xbf16>
    %cst_81 = arith.constant dense<0.000000e+00> : vector<2x64x32xf32>
    %243 = tpu.matmul %242, %226, %cst_81 {dimension_numbers = #tpu.dot_dimension_numbers<[2], [1], [1], [2], [0, 0, 0, 1, 1, 2], [0], [0]>} : vector<2x64x64xbf16>, vector<2x64x32xbf16>, vector<2x64x32xf32> -> vector<2x64x32xf32>
    %244 = arith.truncf %243 : vector<2x64x32xf32> to vector<2x64x32xbf16>
    %245 = vector.extract_strided_slice %196 {offsets = [0, 64], sizes = [128, 32], strides = [1, 1]} : vector<128x384xbf16> to vector<128x32xbf16>
    %246 = vector.shape_cast %245 : vector<128x32xbf16> to vector<2x64x32xbf16>
    %247 = vector.extract_strided_slice %196 {offsets = [0, 192], sizes = [128, 32], strides = [1, 1]} : vector<128x384xbf16> to vector<128x32xbf16>
    %248 = vector.shape_cast %247 : vector<128x32xbf16> to vector<2x64x32xbf16>
    %249 = vector.extract_strided_slice %196 {offsets = [0, 320], sizes = [128, 32], strides = [1, 1]} : vector<128x384xbf16> to vector<128x32xbf16>
    %250 = vector.shape_cast %249 : vector<128x32xbf16> to vector<2x64x32xbf16>
    %cst_82 = arith.constant dense<0.000000e+00> : vector<2x64x64xf32>
    %251 = tpu.matmul %246, %248, %cst_82 {dimension_numbers = #tpu.dot_dimension_numbers<[2], [2], [1], [1], [0, 0, 0, 1, 1, 1], [0], [0]>} : vector<2x64x32xbf16>, vector<2x64x32xbf16>, vector<2x64x64xf32> -> vector<2x64x64xf32>
    %cst_83 = arith.constant dense<0xFF800000> : vector<2x64xf32>
    %252 = vector.multi_reduction <maximumf>, %251, %cst_83 [2] : vector<2x64x64xf32> to vector<2x64xf32>
    %253 = vector.shape_cast %252 : vector<2x64xf32> to vector<2x64x1xf32>
    %254 = vector.broadcast %253 : vector<2x64x1xf32> to vector<2x64x64xf32>
    %255 = arith.subf %251, %254 : vector<2x64x64xf32>
    %256 = arith.truncf %255 : vector<2x64x64xf32> to vector<2x64x64xbf16>
    %257 = math.exp %256 : vector<2x64x64xbf16>
    %258 = arith.extf %257 : vector<2x64x64xbf16> to vector<2x64x64xf32>
    %cst_84 = arith.constant dense<0.000000e+00> : vector<2x64xf32>
    %259 = vector.multi_reduction <add>, %258, %cst_84 [2] : vector<2x64x64xf32> to vector<2x64xf32>
    %260 = vector.shape_cast %259 : vector<2x64xf32> to vector<2x64x1xf32>
    %261 = arith.truncf %260 : vector<2x64x1xf32> to vector<2x64x1xbf16>
    %262 = arith.extf %261 : vector<2x64x1xbf16> to vector<2x64x1xf32>
    %263 = tpu.reciprocal %262 {approx = true} : vector<2x64x1xf32> -> vector<2x64x1xf32>
    %264 = arith.truncf %263 : vector<2x64x1xf32> to vector<2x64x1xbf16>
    %265 = vector.broadcast %264 : vector<2x64x1xbf16> to vector<2x64x64xbf16>
    %266 = arith.mulf %257, %265 : vector<2x64x64xbf16>
    %cst_85 = arith.constant dense<0.000000e+00> : vector<2x64x32xf32>
    %267 = tpu.matmul %266, %250, %cst_85 {dimension_numbers = #tpu.dot_dimension_numbers<[2], [1], [1], [2], [0, 0, 0, 1, 1, 2], [0], [0]>} : vector<2x64x64xbf16>, vector<2x64x32xbf16>, vector<2x64x32xf32> -> vector<2x64x32xf32>
    %268 = arith.truncf %267 : vector<2x64x32xf32> to vector<2x64x32xbf16>
    %269 = vector.extract_strided_slice %196 {offsets = [0, 96], sizes = [128, 32], strides = [1, 1]} : vector<128x384xbf16> to vector<128x32xbf16>
    %270 = vector.shape_cast %269 : vector<128x32xbf16> to vector<2x64x32xbf16>
    %271 = vector.extract_strided_slice %196 {offsets = [0, 224], sizes = [128, 32], strides = [1, 1]} : vector<128x384xbf16> to vector<128x32xbf16>
    %272 = vector.shape_cast %271 : vector<128x32xbf16> to vector<2x64x32xbf16>
    %273 = vector.extract_strided_slice %196 {offsets = [0, 352], sizes = [128, 32], strides = [1, 1]} : vector<128x384xbf16> to vector<128x32xbf16>
    %274 = vector.shape_cast %273 : vector<128x32xbf16> to vector<2x64x32xbf16>
    %cst_86 = arith.constant dense<0.000000e+00> : vector<2x64x64xf32>
    %275 = tpu.matmul %270, %272, %cst_86 {dimension_numbers = #tpu.dot_dimension_numbers<[2], [2], [1], [1], [0, 0, 0, 1, 1, 1], [0], [0]>} : vector<2x64x32xbf16>, vector<2x64x32xbf16>, vector<2x64x64xf32> -> vector<2x64x64xf32>
    %cst_87 = arith.constant dense<0xFF800000> : vector<2x64xf32>
    %276 = vector.multi_reduction <maximumf>, %275, %cst_87 [2] : vector<2x64x64xf32> to vector<2x64xf32>
    %277 = vector.shape_cast %276 : vector<2x64xf32> to vector<2x64x1xf32>
    %278 = vector.broadcast %277 : vector<2x64x1xf32> to vector<2x64x64xf32>
    %279 = arith.subf %275, %278 : vector<2x64x64xf32>
    %280 = arith.truncf %279 : vector<2x64x64xf32> to vector<2x64x64xbf16>
    %281 = math.exp %280 : vector<2x64x64xbf16>
    %282 = arith.extf %281 : vector<2x64x64xbf16> to vector<2x64x64xf32>
    %cst_88 = arith.constant dense<0.000000e+00> : vector<2x64xf32>
    %283 = vector.multi_reduction <add>, %282, %cst_88 [2] : vector<2x64x64xf32> to vector<2x64xf32>
    %284 = vector.shape_cast %283 : vector<2x64xf32> to vector<2x64x1xf32>
    %285 = arith.truncf %284 : vector<2x64x1xf32> to vector<2x64x1xbf16>
    %286 = arith.extf %285 : vector<2x64x1xbf16> to vector<2x64x1xf32>
    %287 = tpu.reciprocal %286 {approx = true} : vector<2x64x1xf32> -> vector<2x64x1xf32>
    %288 = arith.truncf %287 : vector<2x64x1xf32> to vector<2x64x1xbf16>
    %289 = vector.broadcast %288 : vector<2x64x1xbf16> to vector<2x64x64xbf16>
    %290 = arith.mulf %281, %289 : vector<2x64x64xbf16>
    %cst_89 = arith.constant dense<0.000000e+00> : vector<2x64x32xf32>
    %291 = tpu.matmul %290, %274, %cst_89 {dimension_numbers = #tpu.dot_dimension_numbers<[2], [1], [1], [2], [0, 0, 0, 1, 1, 2], [0], [0]>} : vector<2x64x64xbf16>, vector<2x64x32xbf16>, vector<2x64x32xf32> -> vector<2x64x32xf32>
    %292 = arith.truncf %291 : vector<2x64x32xf32> to vector<2x64x32xbf16>
    %293 = tpu.concatenate %220, %244, %268, %292 in 2 : vector<2x64x32xbf16>, vector<2x64x32xbf16>, vector<2x64x32xbf16>, vector<2x64x32xbf16> -> vector<2x64x128xbf16>
    %294 = vector.shape_cast %293 : vector<2x64x128xbf16> to vector<128x128xbf16>
    %c1_90 = arith.constant 1 : index
    %c0_91 = arith.constant 0 : index
    %c0_92 = arith.constant 0 : index
    %295 = vector.load %arg4[%c1_90, %c0_91, %c0_92] : memref<2x128x128xbf16, #tpu.memory_space<vmem>>, vector<1x128x128xbf16>
    %296 = vector.shape_cast %295 : vector<1x128x128xbf16> to vector<128x128xbf16>
    %cst_93 = arith.constant dense<0.000000e+00> : vector<128x128xf32>
    %297 = tpu.matmul %294, %296, %cst_93 {dimension_numbers = #tpu.dot_dimension_numbers<[1], [0], [0], [1], [0, 0, 1, 1], [], []>} : vector<128x128xbf16>, vector<128x128xbf16>, vector<128x128xf32> -> vector<128x128xf32>
    %298 = arith.addf %187, %297 : vector<128x128xf32>
    %c1_94 = arith.constant 1 : index
    %c0_95 = arith.constant 0 : index
    %c0_96 = arith.constant 0 : index
    %299 = vector.load %arg5[%c1_94, %c0_95, %c0_96] : memref<2x1x128xf32, #tpu.memory_space<vmem>>, vector<1x1x128xf32>
    %300 = vector.shape_cast %299 : vector<1x1x128xf32> to vector<1x128xf32>
    %301 = vector.broadcast %300 : vector<1x128xf32> to vector<128x128xf32>
    %302 = arith.addf %298, %301 : vector<128x128xf32>
    %c1_97 = arith.constant 1 : index
    %c0_98 = arith.constant 0 : index
    %c0_99 = arith.constant 0 : index
    %303 = vector.load %arg10[%c1_97, %c0_98, %c0_99] : memref<2x1x128xf32, #tpu.memory_space<vmem>>, vector<1x1x128xf32>
    %304 = vector.shape_cast %303 : vector<1x1x128xf32> to vector<1x128xf32>
    %c1_100 = arith.constant 1 : index
    %c0_101 = arith.constant 0 : index
    %c0_102 = arith.constant 0 : index
    %305 = vector.load %arg11[%c1_100, %c0_101, %c0_102] : memref<2x1x128xf32, #tpu.memory_space<vmem>>, vector<1x1x128xf32>
    %306 = vector.shape_cast %305 : vector<1x1x128xf32> to vector<1x128xf32>
    %cst_103 = arith.constant dense<0.000000e+00> : vector<128xf32>
    %307 = vector.multi_reduction <add>, %302, %cst_103 [1] : vector<128x128xf32> to vector<128xf32>
    %308 = vector.shape_cast %307 : vector<128xf32> to vector<128x1xf32>
    %cst_104 = arith.constant 7.812500e-03 : f32
    %309 = vector.broadcast %cst_104 : f32 to vector<128x1xf32>
    %310 = arith.mulf %308, %309 : vector<128x1xf32>
    %311 = arith.mulf %302, %302 : vector<128x128xf32>
    %cst_105 = arith.constant dense<0.000000e+00> : vector<128xf32>
    %312 = vector.multi_reduction <add>, %311, %cst_105 [1] : vector<128x128xf32> to vector<128xf32>
    %313 = vector.shape_cast %312 : vector<128xf32> to vector<128x1xf32>
    %cst_106 = arith.constant 7.812500e-03 : f32
    %314 = vector.broadcast %cst_106 : f32 to vector<128x1xf32>
    %315 = arith.mulf %313, %314 : vector<128x1xf32>
    %316 = arith.mulf %310, %310 : vector<128x1xf32>
    %317 = arith.subf %315, %316 : vector<128x1xf32>
    %318 = vector.broadcast %310 : vector<128x1xf32> to vector<128x128xf32>
    %319 = arith.subf %302, %318 : vector<128x128xf32>
    %cst_107 = arith.constant 9.99999974E-6 : f32
    %320 = vector.broadcast %cst_107 : f32 to vector<128x1xf32>
    %321 = arith.addf %317, %320 : vector<128x1xf32>
    %322 = math.rsqrt %321 : vector<128x1xf32>
    %323 = vector.broadcast %322 : vector<128x1xf32> to vector<128x128xf32>
    %324 = arith.mulf %319, %323 : vector<128x128xf32>
    %325 = vector.broadcast %304 : vector<1x128xf32> to vector<128x128xf32>
    %326 = arith.mulf %324, %325 : vector<128x128xf32>
    %327 = vector.broadcast %306 : vector<1x128xf32> to vector<128x128xf32>
    %328 = arith.addf %326, %327 : vector<128x128xf32>
    %329 = arith.truncf %328 : vector<128x128xf32> to vector<128x128xbf16>
    %c1_108 = arith.constant 1 : index
    %c0_109 = arith.constant 0 : index
    %c0_110 = arith.constant 0 : index
    %330 = vector.load %arg6[%c1_108, %c0_109, %c0_110] : memref<2x128x256xbf16, #tpu.memory_space<vmem>>, vector<1x128x256xbf16>
    %331 = vector.shape_cast %330 : vector<1x128x256xbf16> to vector<128x256xbf16>
    %cst_111 = arith.constant dense<0.000000e+00> : vector<128x256xf32>
    %332 = tpu.matmul %329, %331, %cst_111 {dimension_numbers = #tpu.dot_dimension_numbers<[1], [0], [0], [1], [0, 0, 1, 1], [], []>} : vector<128x128xbf16>, vector<128x256xbf16>, vector<128x256xf32> -> vector<128x256xf32>
    %c1_112 = arith.constant 1 : index
    %c0_113 = arith.constant 0 : index
    %c0_114 = arith.constant 0 : index
    %333 = vector.load %arg7[%c1_112, %c0_113, %c0_114] : memref<2x1x256xf32, #tpu.memory_space<vmem>>, vector<1x1x256xf32>
    %334 = vector.shape_cast %333 : vector<1x1x256xf32> to vector<1x256xf32>
    %335 = vector.broadcast %334 : vector<1x256xf32> to vector<128x256xf32>
    %336 = arith.addf %332, %335 : vector<128x256xf32>
    %cst_115 = arith.constant 0.000000e+00 : f32
    %337 = vector.broadcast %cst_115 : f32 to vector<128x256xf32>
    %338 = arith.maximumf %336, %337 : vector<128x256xf32>
    %339 = arith.truncf %338 : vector<128x256xf32> to vector<128x256xbf16>
    %c1_116 = arith.constant 1 : index
    %c0_117 = arith.constant 0 : index
    %c0_118 = arith.constant 0 : index
    %340 = vector.load %arg8[%c1_116, %c0_117, %c0_118] : memref<2x256x128xbf16, #tpu.memory_space<vmem>>, vector<1x256x128xbf16>
    %341 = vector.shape_cast %340 : vector<1x256x128xbf16> to vector<256x128xbf16>
    %cst_119 = arith.constant dense<0.000000e+00> : vector<128x128xf32>
    %342 = tpu.matmul %339, %341, %cst_119 {dimension_numbers = #tpu.dot_dimension_numbers<[1], [0], [0], [1], [0, 0, 1, 1], [], []>} : vector<128x256xbf16>, vector<256x128xbf16>, vector<128x128xf32> -> vector<128x128xf32>
    %c1_120 = arith.constant 1 : index
    %c0_121 = arith.constant 0 : index
    %c0_122 = arith.constant 0 : index
    %343 = vector.load %arg9[%c1_120, %c0_121, %c0_122] : memref<2x1x128xf32, #tpu.memory_space<vmem>>, vector<1x1x128xf32>
    %344 = vector.shape_cast %343 : vector<1x1x128xf32> to vector<1x128xf32>
    %345 = vector.broadcast %344 : vector<1x128xf32> to vector<128x128xf32>
    %346 = arith.addf %342, %345 : vector<128x128xf32>
    %347 = arith.addf %328, %346 : vector<128x128xf32>
    %c1_123 = arith.constant 1 : index
    %c0_124 = arith.constant 0 : index
    %c0_125 = arith.constant 0 : index
    %348 = vector.load %arg12[%c1_123, %c0_124, %c0_125] : memref<2x1x128xf32, #tpu.memory_space<vmem>>, vector<1x1x128xf32>
    %349 = vector.shape_cast %348 : vector<1x1x128xf32> to vector<1x128xf32>
    %c1_126 = arith.constant 1 : index
    %c0_127 = arith.constant 0 : index
    %c0_128 = arith.constant 0 : index
    %350 = vector.load %arg13[%c1_126, %c0_127, %c0_128] : memref<2x1x128xf32, #tpu.memory_space<vmem>>, vector<1x1x128xf32>
    %351 = vector.shape_cast %350 : vector<1x1x128xf32> to vector<1x128xf32>
    %cst_129 = arith.constant dense<0.000000e+00> : vector<128xf32>
    %352 = vector.multi_reduction <add>, %347, %cst_129 [1] : vector<128x128xf32> to vector<128xf32>
    %353 = vector.shape_cast %352 : vector<128xf32> to vector<128x1xf32>
    %cst_130 = arith.constant 7.812500e-03 : f32
    %354 = vector.broadcast %cst_130 : f32 to vector<128x1xf32>
    %355 = arith.mulf %353, %354 : vector<128x1xf32>
    %356 = arith.mulf %347, %347 : vector<128x128xf32>
    %cst_131 = arith.constant dense<0.000000e+00> : vector<128xf32>
    %357 = vector.multi_reduction <add>, %356, %cst_131 [1] : vector<128x128xf32> to vector<128xf32>
    %358 = vector.shape_cast %357 : vector<128xf32> to vector<128x1xf32>
    %cst_132 = arith.constant 7.812500e-03 : f32
    %359 = vector.broadcast %cst_132 : f32 to vector<128x1xf32>
    %360 = arith.mulf %358, %359 : vector<128x1xf32>
    %361 = arith.mulf %355, %355 : vector<128x1xf32>
    %362 = arith.subf %360, %361 : vector<128x1xf32>
    %363 = vector.broadcast %355 : vector<128x1xf32> to vector<128x128xf32>
    %364 = arith.subf %347, %363 : vector<128x128xf32>
    %cst_133 = arith.constant 9.99999974E-6 : f32
    %365 = vector.broadcast %cst_133 : f32 to vector<128x1xf32>
    %366 = arith.addf %362, %365 : vector<128x1xf32>
    %367 = math.rsqrt %366 : vector<128x1xf32>
    %368 = vector.broadcast %367 : vector<128x1xf32> to vector<128x128xf32>
    %369 = arith.mulf %364, %368 : vector<128x128xf32>
    %370 = vector.broadcast %349 : vector<1x128xf32> to vector<128x128xf32>
    %371 = arith.mulf %369, %370 : vector<128x128xf32>
    %372 = vector.broadcast %351 : vector<1x128xf32> to vector<128x128xf32>
    %373 = arith.addf %371, %372 : vector<128x128xf32>
    %374 = vector.shape_cast %373 : vector<128x128xf32> to vector<2x64x128xf32>
    %cst_134 = arith.constant dense<0xFF800000> : vector<2x128xf32>
    %375 = vector.multi_reduction <maximumf>, %374, %cst_134 [1] : vector<2x64x128xf32> to vector<2x128xf32>
    %376 = vector.shape_cast %375 : vector<2x128xf32> to vector<2x1x128xf32>
    %c0_135 = arith.constant 0 : index
    %c0_136 = arith.constant 0 : index
    %c0_137 = arith.constant 0 : index
    %377 = vector.load %arg14[%c0_135, %c0_136, %c0_137] : memref<2x1x128xf32, #tpu.memory_space<vmem>>, vector<2x1x128xf32>
    tpu.vector_store %arg14[%c0_135, %c0_136, %c0_137], %376 {strides = array<i32>} : memref<2x1x128xf32, #tpu.memory_space<vmem>>, vector<2x1x128xf32>,
    return
  }
  func.func @transform_0(%arg0: i32) -> (i32, i32, i32) {
    %c0_i32 = arith.constant 0 : i32
    %c0_i32_0 = arith.constant 0 : i32
    %c0_i32_1 = arith.constant 0 : i32
    return %arg0, %c0_i32, %c0_i32_0 : i32, i32, i32
  }
  func.func @transform_1(%arg0: i32) -> (i32, i32, i32) {
    %c0_i32 = arith.constant 0 : i32
    %c0_i32_0 = arith.constant 0 : i32
    %c0_i32_1 = arith.constant 0 : i32
    %c0_i32_2 = arith.constant 0 : i32
    return %c0_i32, %c0_i32_0, %c0_i32_1 : i32, i32, i32
  }
  func.func @transform_2(%arg0: i32) -> (i32, i32, i32) {
    %c0_i32 = arith.constant 0 : i32
    %c0_i32_0 = arith.constant 0 : i32
    %c0_i32_1 = arith.constant 0 : i32
    %c0_i32_2 = arith.constant 0 : i32
    return %c0_i32, %c0_i32_0, %c0_i32_1 : i32, i32, i32
  }
  func.func @transform_3(%arg0: i32) -> (i32, i32, i32) {
    %c0_i32 = arith.constant 0 : i32
    %c0_i32_0 = arith.constant 0 : i32
    %c0_i32_1 = arith.constant 0 : i32
    %c0_i32_2 = arith.constant 0 : i32
    return %c0_i32, %c0_i32_0, %c0_i32_1 : i32, i32, i32
  }
  func.func @transform_4(%arg0: i32) -> (i32, i32, i32) {
    %c0_i32 = arith.constant 0 : i32
    %c0_i32_0 = arith.constant 0 : i32
    %c0_i32_1 = arith.constant 0 : i32
    %c0_i32_2 = arith.constant 0 : i32
    return %c0_i32, %c0_i32_0, %c0_i32_1 : i32, i32, i32
  }
  func.func @transform_5(%arg0: i32) -> (i32, i32, i32) {
    %c0_i32 = arith.constant 0 : i32
    %c0_i32_0 = arith.constant 0 : i32
    %c0_i32_1 = arith.constant 0 : i32
    %c0_i32_2 = arith.constant 0 : i32
    return %c0_i32, %c0_i32_0, %c0_i32_1 : i32, i32, i32
  }
  func.func @transform_6(%arg0: i32) -> (i32, i32, i32) {
    %c0_i32 = arith.constant 0 : i32
    %c0_i32_0 = arith.constant 0 : i32
    %c0_i32_1 = arith.constant 0 : i32
    %c0_i32_2 = arith.constant 0 : i32
    return %c0_i32, %c0_i32_0, %c0_i32_1 : i32, i32, i32
  }
  func.func @transform_7(%arg0: i32) -> (i32, i32, i32) {
    %c0_i32 = arith.constant 0 : i32
    %c0_i32_0 = arith.constant 0 : i32
    %c0_i32_1 = arith.constant 0 : i32
    %c0_i32_2 = arith.constant 0 : i32
    return %c0_i32, %c0_i32_0, %c0_i32_1 : i32, i32, i32
  }
  func.func @transform_8(%arg0: i32) -> (i32, i32, i32) {
    %c0_i32 = arith.constant 0 : i32
    %c0_i32_0 = arith.constant 0 : i32
    %c0_i32_1 = arith.constant 0 : i32
    %c0_i32_2 = arith.constant 0 : i32
    return %c0_i32, %c0_i32_0, %c0_i32_1 : i32, i32, i32
  }
  func.func @transform_9(%arg0: i32) -> (i32, i32, i32) {
    %c0_i32 = arith.constant 0 : i32
    %c0_i32_0 = arith.constant 0 : i32
    %c0_i32_1 = arith.constant 0 : i32
    %c0_i32_2 = arith.constant 0 : i32
    return %c0_i32, %c0_i32_0, %c0_i32_1 : i32, i32, i32
  }
  func.func @transform_10(%arg0: i32) -> (i32, i32, i32) {
    %c0_i32 = arith.constant 0 : i32
    %c0_i32_0 = arith.constant 0 : i32
    %c0_i32_1 = arith.constant 0 : i32
    %c0_i32_2 = arith.constant 0 : i32
    return %c0_i32, %c0_i32_0, %c0_i32_1 : i32, i32, i32
  }
  func.func @transform_11(%arg0: i32) -> (i32, i32, i32) {
    %c0_i32 = arith.constant 0 : i32
    %c0_i32_0 = arith.constant 0 : i32
    %c0_i32_1 = arith.constant 0 : i32
    %c0_i32_2 = arith.constant 0 : i32
    return %c0_i32, %c0_i32_0, %c0_i32_1 : i32, i32, i32
  }
  func.func @transform_12(%arg0: i32) -> (i32, i32, i32) {
    %c0_i32 = arith.constant 0 : i32
    %c0_i32_0 = arith.constant 0 : i32
    %c0_i32_1 = arith.constant 0 : i32
    %c0_i32_2 = arith.constant 0 : i32
    return %c0_i32, %c0_i32_0, %c0_i32_1 : i32, i32, i32
  }
  func.func @transform_13(%arg0: i32) -> (i32, i32, i32) {
    %c0_i32 = arith.constant 0 : i32
    %c0_i32_0 = arith.constant 0 : i32
    %c0_i32_1 = arith.constant 0 : i32
    return %arg0, %c0_i32, %c0_i32_0 : i32, i32, i32
  }
}

</mosaic_0001>

<bundles_post_ra>
// kernel: tpu_custom_call.1
= control target key start
LH: loop header
LB: loop body
LE: loop exit
PB: predicated region body
PF: predicated region fallthrough
CT: control target
= control target key end

     0   :  { %18 = vsyncpa [#allocation3], 0  ;;  %s14418_s0 = inlined_call_operand.hbm [shape: f32[2,64,128], index: 0, kind: input, shape index: {}]   ;;  %s14419_s1 = inlined_call_operand.hbm [shape: bf16[2,128,384], index: 1, kind: input, shape index: {}]   ;;  %s14420_s2 = inlined_call_operand.vmem [shape: f32[2,1,384], index: 2, kind: input, shape index: {}]   ;;  %s14421_s3 = inlined_call_operand.hbm [shape: bf16[2,128,128], index: 3, kind: input, shape index: {}]   ;;  %s14422_s4 = inlined_call_operand.vmem [shape: f32[2,1,128], index: 4, kind: input, shape index: {}]   ;;  %s14423_s5 = inlined_call_operand.hbm [shape: bf16[2,128,256], index: 5, kind: input, shape index: {}]   ;;  %s14424_s6 = inlined_call_operand.vmem [shape: f32[2,1,256], index: 6, kind: input, shape index: {}]   ;;  %s14425_s7 = inlined_call_operand.hbm [shape: bf16[2,256,128], index: 7, kind: input, shape index: {}]   ;;  %s14426_s8 = inlined_call_operand.vmem [shape: f32[2,1,128], index: 8, kind: input, shape index: {}]   ;;  %s14427_s9 = inlined_call_operand.vmem [shape: f32[2,1,128], index: 9, kind: input, shape index: {}]   ;;  %s14428_s10 = inlined_call_operand.vmem [shape: f32[2,1,128], index: 10, kind: input, shape index: {}]   ;;  %s14429_s11 = inlined_call_operand.vmem [shape: f32[2,1,128], index: 11, kind: input, shape index: {}]   ;;  %s14430_s12 = inlined_call_operand.vmem [shape: f32[2,1,128], index: 12, kind: input, shape index: {}]   ;;  %s14431_s13 = inlined_call_operand.hbm [shape: f32[2,1,128], index: 13, kind: output, shape index: {}]  }
   0x1   :  { %19 = vsyncpa [#allocation6], 0 }
   0x2   :  { %20 = vsyncpa [#allocation9], 0 }
   0x3   :  { %21 = vsyncpa [#allocation4], 0  ;;  %s10873_s25 = smov [#allocation5]   ;;  %s10733_s29 = scalar_lea.hbm %s14419_s1, 6144 }
   0x4   :  { %s39_s26 = sshll.u32 %s10873_s25, 4  ;;  %p10734_p0 = scmp.ne.s32.totalorder %s14419_s1, %s10733_s29  ;;  %s40_s26 = int_to_ptr.vmem [resolvable:$true] %s39_s26 }
   0x5   :  { %p10737_p1 = scmp.lt.u32.totalorder %s10733_s29, %s14419_s1 }
   0x7   :  { %p10739_p2 = pnand %p10737_p1, %p10734_p0 }
   0x9   :  { %10742 = shalt.err (!%p10739_p2)
}
   0xa   :  { %s10743_s17 = scalar_lea.vmem %s40_s26, 6144  ;;  %p10748_p4 = scmp.lt.s32.totalorder %s40_s26, %s40_s26 }
   0xb   :  { %p10744_p3 = scmp.ne.s32.totalorder %s40_s26, %s10743_s17  ;;  %p10749_p5 = scmp.lt.s32.totalorder %s10743_s17, %s10743_s17 }
   0xd   :  { %p10750_p6 = por %p10749_p5, %p10748_p4 }
   0xf   :  { %p10751_p7 = pnand %p10750_p6, %p10744_p3 }
  0x11   :  { %10754 = shalt.err (!%p10751_p7)
}
  0x12   :  { %s10874_s18 = smov 192   ;;  %s10875_s19 = smov 12  }
  0x13   :  { %45 = dma.hbm_to_vmem [thread:$0]  %s14419_s1, 6144, %s40_s26, [#allocation6], %s10874_s18, %s10874_s18, %s10875_s19  }
  0x14   :  { %s10876_s22 = smov [#allocation8]   ;;  %s10877_s24 = smov [#allocation2]  }
  0x15   :  { %s67_s23 = sshll.u32 %s10876_s22, 4  ;;  %s27_s25 = sshll.u32 %s10877_s24, 4  ;;  %s68_s23 = int_to_ptr.vmem [resolvable:$true] %s67_s23  ;;  %s28_s25 = int_to_ptr.vmem [resolvable:$true] %s27_s25 }
  0x16   :  { %s10755_s29 = scalar_lea.hbm %s14423_s5, 4096 }
  0x17   :  { %p10756_p8 = scmp.ne.s32.totalorder %s14423_s5, %s10755_s29  ;;  %p10759_p9 = scmp.lt.u32.totalorder %s10755_s29, %s14423_s5 }
  0x19   :  { %p10761_p10 = pnand %p10759_p9, %p10756_p8 }
  0x1b   :  { %10764 = shalt.err (!%p10761_p10)
}
  0x1c   :  { %s10765_s1 = scalar_lea.vmem %s68_s23, 4096  ;;  %p10770_p12 = scmp.lt.s32.totalorder %s68_s23, %s68_s23 }
  0x1d   :  { %p10766_p11 = scmp.ne.s32.totalorder %s68_s23, %s10765_s1  ;;  %p10771_p13 = scmp.lt.s32.totalorder %s10765_s1, %s10765_s1 }
  0x1f   :  { %p10772_p0 = por %p10771_p13, %p10770_p12 }
  0x21   :  { %p10773_p1 = pnand %p10772_p0, %p10766_p11 }
  0x23   :  { %10776 = shalt.err (!%p10773_p1)
}
  0x24   :  { %s10878_s26 = smov 128   ;;  %s10879_s17 = smov 8  }
  0x25   :  { %73 = dma.hbm_to_vmem [thread:$0]  %s14423_s5, 4096, %s68_s23, [#allocation9], %s10878_s26, %s10878_s26, %s10879_s17  }
  0x26   :  { %s10777_s22 = scalar_lea.hbm %s14418_s0, 2048 }
  0x27   :  { %p10778_p2 = scmp.ne.s32.totalorder %s14418_s0, %s10777_s22  ;;  %p10781_p3 = scmp.lt.u32.totalorder %s10777_s22, %s14418_s0 }
  0x29   :  { %p10783_p4 = pnand %p10781_p3, %p10778_p2 }
  0x2b   :  { %10786 = shalt.err (!%p10783_p4)
}
  0x2c   :  { %s10787_s30 = scalar_lea.vmem %s28_s25, 2048  ;;  %p10792_p6 = scmp.lt.s32.totalorder %s28_s25, %s28_s25 }
  0x2d   :  { %p10788_p5 = scmp.ne.s32.totalorder %s28_s25, %s10787_s30  ;;  %p10793_p7 = scmp.lt.s32.totalorder %s10787_s30, %s10787_s30 }
  0x2f   :  { %p10794_p8 = por %p10793_p7, %p10792_p6 }
  0x31   :  { %p10795_p9 = pnand %p10794_p8, %p10788_p5 }
  0x33   :  { %10798 = shalt.err (!%p10795_p9)
}
  0x34   :  { %33 = dma.hbm_to_vmem [thread:$0]  %s14418_s0, 2048, %s28_s25, [#allocation3], %s10878_s26, %s10878_s26, %s10879_s17  }
  0x35   :  { %s10880_s14 = smov [#allocation7]   ;;  %s10799_s18 = scalar_lea.hbm %s14421_s3, 2048 }
  0x36   :  { %s53_s15 = sshll.u32 %s10880_s14, 4  ;;  %p10800_p10 = scmp.ne.s32.totalorder %s14421_s3, %s10799_s18  ;;  %s54_s15 = int_to_ptr.vmem [resolvable:$true] %s53_s15 }
  0x37   :  { %p10803_p11 = scmp.lt.u32.totalorder %s10799_s18, %s14421_s3 }
  0x39   :  { %p10805_p12 = pnand %p10803_p11, %p10800_p10 }
  0x3b   :  { %10808 = shalt.err (!%p10805_p12)
}
  0x3c   :  { %s10809_s24 = scalar_lea.vmem %s54_s15, 2048  ;;  %p10814_p0 = scmp.lt.s32.totalorder %s54_s15, %s54_s15 }
  0x3d   :  { %p10810_p13 = scmp.ne.s32.totalorder %s54_s15, %s10809_s24  ;;  %p10815_p1 = scmp.lt.s32.totalorder %s10809_s24, %s10809_s24 }
  0x3f   :  { %p10816_p2 = por %p10815_p1, %p10814_p0 }
  0x41   :  { %p10817_p3 = pnand %p10816_p2, %p10810_p13 }
  0x43   :  { %10820 = shalt.err (!%p10817_p3)
}
  0x44   :  { %s10881_s0 = smov 64   ;;  %s10882_s25 = smov 4  }
  0x45   :  { %59 = dma.hbm_to_vmem [thread:$0]  %s14421_s3, 2048, %s54_s15, [#allocation6], %s10881_s0, %s10881_s0, %s10882_s25  }
  0x46   :  { %s10883_s27 = smov [#allocation10]   ;;  %s10821_s5 = scalar_lea.hbm %s14425_s7, 4096 }
  0x47   :  { %s81_s28 = sshll.u32 %s10883_s27, 4  ;;  %p10822_p4 = scmp.ne.s32.totalorder %s14425_s7, %s10821_s5  ;;  %s82_s28 = int_to_ptr.vmem [resolvable:$true] %s81_s28 }
  0x48   :  { %p10825_p5 = scmp.lt.u32.totalorder %s10821_s5, %s14425_s7 }
  0x4a   :  { %p10827_p6 = pnand %p10825_p5, %p10822_p4 }
  0x4c   :  { %10830 = shalt.err (!%p10827_p6)
}
  0x4d   :  { %s10831_s18 = scalar_lea.vmem %s82_s28, 4096  ;;  %p10836_p8 = scmp.lt.s32.totalorder %s82_s28, %s82_s28 }
  0x4e   :  { %p10832_p7 = scmp.ne.s32.totalorder %s82_s28, %s10831_s18  ;;  %p10837_p9 = scmp.lt.s32.totalorder %s10831_s18, %s10831_s18 }
  0x50   :  { %p10838_p10 = por %p10837_p9, %p10836_p8 }
  0x52   :  { %p10839_p11 = pnand %p10838_p10, %p10832_p7 }
  0x54   :  { %10842 = shalt.err (!%p10839_p11)
}
  0x55   :  { %87 = dma.hbm_to_vmem [thread:$0]  %s14425_s7, 4096, %s82_s28, [#allocation9], %s10881_s0, %s10881_s0, %s10882_s25  }
  0x56   :  { %10865 = dma.done.wait [#allocation3], 2048  }
  0x57   :  { %10866 = vsyncadd [#allocation3], 4294965248 }
  0x58   :  { %10867 = dma.done.wait [#allocation6], 8192  }
  0x59   :  { %10868 = vsyncadd [#allocation6], 4294959104 }
  0x5a   :  { %10869 = dma.done.wait [#allocation9], 8192  }
  0x5b   :  { %10870 = vsyncadd [#allocation9], 4294959104  ;;  %v14433_v0 = vmov 0   ;;  %v10045_v1 = vld [vmem:[#allocation5 + $0x4] ss:$12 sps:$4 sm:$0xff]   ;;  %v115_v10 = vld [vmem:[#allocation2 + $0x8] sm:$0xff]  ;;  %v172_v49 = vlaneseq }
  0x5c   :  { %347 = vmatprep.mubr.bf16.mxu0 %v14433_v0  ;;  %v10047_v2 = vld [vmem:[#allocation5] ss:$12 sps:$4 sm:$0xff]   ;;  %315 = vmatprep.subr.bf16.mxu0 %v10045_v1  ;;  %v10048_v3 = vld [vmem:[#allocation5 + $0x1c] ss:$12 sps:$4 sm:$0xff]   ;;  %v10050_v4 = vld [vmem:[#allocation5 + $0x18] ss:$12 sps:$4 sm:$0xff]  }
  0x5d   :  { %316 = vmatpush1.bf16.msra.mxu0 %v10047_v2  ;;  %v10051_v5 = vld [vmem:[#allocation5 + $0x34] ss:$12 sps:$4 sm:$0xff]   ;;  %v10053_v6 = vld [vmem:[#allocation5 + $0x30] ss:$12 sps:$4 sm:$0xff]   ;;  %v10054_v7 = vld [vmem:[#allocation5 + $0x4c] ss:$12 sps:$4 sm:$0xff]  }
  0x5e   :  { %317 = vmatprep.subr.bf16.mxu0 %v10048_v3  ;;  %v114_v8 = vld [vmem:[#allocation2] sm:$0xff]  ;;  %v10056_v9 = vld [vmem:[#allocation5 + $0x48] ss:$12 sps:$4 sm:$0xff]   ;;  %v10065_v20 = vld [vmem:[#allocation5 + $0x90] ss:$12 sps:$4 sm:$0xff]   ;;  %v11032_v50 = vshrl.u32 %v172_v49, 7 }
  0x5f   :  { %v10057_v11 = vld [vmem:[#allocation5 + $0x64] ss:$12 sps:$4 sm:$0xff]   ;;  %v130_v12 = vpack.c.bf16 %v115_v10, %v114_v8  ;;  %v10059_v13 = vld [vmem:[#allocation5 + $0x60] ss:$12 sps:$4 sm:$0xff]   ;;  %v10060_v14 = vld [vmem:[#allocation5 + $0x7c] ss:$12 sps:$4 sm:$0xff]  }
  0x60   :  { %v10069_v15 = vld [vmem:[#allocation5 + $0x8] ss:$12 sps:$4 sm:$0xff]   ;;  %v10070_v16 = vld [vmem:[#allocation5 + $0x20] ss:$12 sps:$4 sm:$0xff]   ;;  %v10062_v17 = vld [vmem:[#allocation5 + $0x78] ss:$12 sps:$4 sm:$0xff]  }
  0x61   :  { %318 = vmatpush1.bf16.msra.mxu0 %v10050_v4  ;;  %9340 = vmatprep.mubr.bf16.mxu1 %v130_v12  ;;  %v10063_v18 = vld [vmem:[#allocation5 + $0x94] ss:$12 sps:$4 sm:$0xff]   ;;  %v10071_v19 = vld [vmem:[#allocation5 + $0x38] ss:$12 sps:$4 sm:$0xff]   ;;  %v10072_v22 = vld [vmem:[#allocation5 + $0x50] ss:$12 sps:$4 sm:$0xff]  }
  0x62   :  { %319 = vmatprep.subr.bf16.mxu0 %v10051_v5  ;;  %9324 = vmatprep.subr.bf16.mxu1 %v10069_v15  ;;  %v10066_v21 = vld [vmem:[#allocation5 + $0xac] ss:$12 sps:$4 sm:$0xff]   ;;  %v10068_v23 = vld [vmem:[#allocation5 + $0xa8] ss:$12 sps:$4 sm:$0xff]   ;;  %v10076_v30 = vld [vmem:[#allocation5 + $0xb0] ss:$12 sps:$4 sm:$0xff]  }
  0x63   :  { %9325 = vmatpush3.bf16.msra.mxu1 %v10069_v15  ;;  %v10073_v24 = vld [vmem:[#allocation5 + $0x68] ss:$12 sps:$4 sm:$0xff]   ;;  %v10074_v25 = vld [vmem:[#allocation5 + $0x80] ss:$12 sps:$4 sm:$0xff]   ;;  %v117_v27 = vld [vmem:[#allocation2 + $0x18] sm:$0xff]  ;;  %14506 = vst [vmem:[#allocation16_spill] sm:$0xff] %v11032_v50 }
  0x64   :  { %9326 = vmatprep.subr.bf16.mxu1 %v10070_v16  ;;  %v116_v26 = vld [vmem:[#allocation2 + $0x10] sm:$0xff]  ;;  %v10075_v28 = vld [vmem:[#allocation5 + $0x98] ss:$12 sps:$4 sm:$0xff]   ;;  %v119_v32 = vld [vmem:[#allocation2 + $0x28] sm:$0xff]  ;;  %v11035_v51 = vsub.s32 0, %v11032_v50  ;;  %v11041_v53 = vsub.s32 1, %v11032_v50 }
  0x65   :  { %320 = vmatpush1.bf16.msra.mxu0 %v10053_v6  ;;  %v131_v29 = vpack.c.bf16 %v117_v27, %v116_v26  ;;  %v118_v31 = vld [vmem:[#allocation2 + $0x20] sm:$0xff]  ;;  %v120_v34 = vld [vmem:[#allocation2 + $0x30] sm:$0xff]  ;;  %v121_v35 = vld [vmem:[#allocation2 + $0x38] sm:$0xff]  ;;  %vm549_vm0 = vcmask 261120   ;;  %s10885_s20 = smov 96   ;;  %vm728_vm1 = vcmask 523264  }
  0x66   :  { %321 = vmatprep.subr.bf16.mxu0 %v10054_v7  ;;  %v132_v33 = vpack.c.bf16 %v119_v32, %v118_v31  ;;  %v122_v36 = vld [vmem:[#allocation2 + $0x40] sm:$0xff]  ;;  %v123_v37 = vld [vmem:[#allocation2 + $0x48] sm:$0xff]  ;;  %v133_v38 = vpack.c.bf16 %v121_v35, %v120_v34  ;;  %v124_v40 = vld [vmem:[#allocation2 + $0x50] sm:$0xff]  ;;  %14507 = vst [vmem:[#allocation17_spill] sm:$0xff] %v11035_v51  ;;  %v14432_v7 = vsub.s32 2, %v11032_v50  ;;  %s10886_s21 = smov 32  }
  0x67   :  { %9327 = vmatpush3.bf16.msra.mxu1 %v10070_v16  ;;  %v134_v39 = vpack.c.bf16 %v123_v37, %v122_v36  ;;  %v125_v41 = vld [vmem:[#allocation2 + $0x58] sm:$0xff]  ;;  %v126_v42 = vld [vmem:[#allocation2 + $0x60] sm:$0xff]  ;;  %v127_v43 = vld [vmem:[#allocation2 + $0x68] sm:$0xff]  ;;  %14508 = vst [vmem:[#allocation18_spill] sm:$0xff] %v11041_v53  ;;  %vm3079_vm2 = vcmask 785408  }
  0x68   :  { %9328 = vmatprep.subr.bf16.mxu1 %v10071_v19  ;;  %v135_v44 = vpack.c.bf16 %v125_v41, %v124_v40  ;;  %v136_v45 = vpack.c.bf16 %v127_v43, %v126_v42  ;;  %v128_v46 = vld [vmem:[#allocation2 + $0x70] sm:$0xff]  ;;  %v129_v47 = vld [vmem:[#allocation2 + $0x78] sm:$0xff]  ;;  %v170_v52 = vld [vmem:[%s14420_s2] sm:$0x7] }
  0x69   :  { %322 = vmatpush1.bf16.msra.mxu0 %v10056_v9  ;;  %v137_v48 = vpack.c.bf16 %v129_v47, %v128_v46  ;;  %v11044_v54 = vrot.slane %v170_v52, %v11035_v51  ;;  %v11047_v56 = vrot.slane %v170_v52, %v11041_v53  ;;  %v11076_v15 = vrot.slane %v170_v52, %v14432_v7 }
  0x6a   :  { %323 = vmatprep.subr.bf16.mxu0 %v10057_v11 }
  0x6b   :  { %9329 = vmatpush3.bf16.msra.mxu1 %v10071_v19 }
  0x6c   :  { %9330 = vmatprep.subr.bf16.mxu1 %v10072_v22 }
  0x6d   :  { %324 = vmatpush1.bf16.msra.mxu0 %v10059_v13 }
  0x6e   :  { %325 = vmatprep.subr.bf16.mxu0 %v10060_v14 }
  0x6f   :  { %9331 = vmatpush3.bf16.msra.mxu1 %v10072_v22 }
  0x70   :  { %9332 = vmatprep.subr.bf16.mxu1 %v10073_v24 }
  0x71   :  { %326 = vmatpush1.bf16.msra.mxu0 %v10062_v17 }
  0x72   :  { %327 = vmatprep.subr.bf16.mxu0 %v10063_v18 }
  0x73   :  { %9333 = vmatpush3.bf16.msra.mxu1 %v10073_v24 }
  0x74   :  { %9334 = vmatprep.subr.bf16.mxu1 %v10074_v25 }
  0x75   :  { %328 = vmatpush1.bf16.msra.mxu0 %v10065_v20 }
  0x76   :  { %329 = vmatprep.subr.bf16.mxu0 %v10066_v21 }
  0x77   :  { %9335 = vmatpush3.bf16.msra.mxu1 %v10074_v25 }
  0x78   :  { %9336 = vmatprep.subr.bf16.mxu1 %v10075_v28 }
  0x79   :  { %330 = vmatpush1.bf16.msra.mxu0 %v10068_v23 }
  0x7b   :  { %9337 = vmatpush3.bf16.msra.mxu1 %v10075_v28 }
  0x7c   :  { %348 = vmatmul.mubr.bf16.vlgmr.msra.gmra.mrb[0].mxu0 %v130_v12  ;;  %9338 = vmatprep.subr.bf16.mxu1 %v10076_v30 }
  0x7d   :  { %357 = vmatprep.mubr.bf16.mxu0 %v14433_v0 }
  0x7f   :  { %9339 = vmatpush3.bf16.msra.mxu1 %v10076_v30 }
  0x82   :  { %9341 = vmatmul.mubr.bf16.vlgmr.msra.gmra.mrb[0].mxu1 %v131_v29 }
  0x83   :  { %9344 = vmatprep.mubr.bf16.mxu1 %v132_v33 }
  0x84   :  { %358 = vmatmul.mubr.bf16.gmra.mrb[4].mxu0 %v131_v29 }
  0x85   :  { %367 = vmatprep.mubr.bf16.mxu0 %v14433_v0 }
  0x8a   :  { %9345 = vmatmul.mubr.bf16.gmra.mrb[4].mxu1 %v133_v38 }
  0x8b   :  { %9348 = vmatprep.mubr.bf16.mxu1 %v134_v39 }
  0x8c   :  { %368 = vmatmul.mubr.bf16.gmra.mrb[8].mxu0 %v132_v33 }
  0x8d   :  { %377 = vmatprep.mubr.bf16.mxu0 %v14433_v0 }
  0x92   :  { %9349 = vmatmul.mubr.bf16.gmra.mrb[8].mxu1 %v135_v44 }
  0x93   :  { %9352 = vmatprep.mubr.bf16.mxu1 %v136_v45 }
  0x94   :  { %378 = vmatmul.mubr.bf16.gmra.mrb[12].mxu0 %v133_v38 }
  0x95   :  { %387 = vmatprep.mubr.bf16.mxu0 %v14433_v0 }
  0x9a   :  { %9353 = vmatmul.mubr.bf16.gmra.mrb[12].mxu1 %v137_v48 }
  0x9c   :  { %388 = vmatmul.mubr.bf16.gmra.mrb[16].mxu0 %v134_v39 }
  0x9d   :  { %397 = vmatprep.mubr.bf16.mxu0 %v14433_v0 }
  0xa4   :  { %398 = vmatmul.mubr.bf16.gmra.mrb[20].mxu0 %v135_v44 }
  0xa5   :  { %407 = vmatprep.mubr.bf16.mxu0 %v14433_v0 }
  0xac   :  { %408 = vmatmul.mubr.bf16.gmra.mrb[24].mxu0 %v136_v45 }
  0xad   :  { %417 = vmatprep.mubr.bf16.mxu0 %v14433_v0 }
  0xb4   :  { %418 = vmatmul.mubr.bf16.gmra.mrb[28].mxu0 %v137_v48 }
 0x14f   :  { %v349_v55 = vpop.f32.mrb[0].mxu0 }
 0x150   :  { %v351_v57 = vpop.f32.mrb[1].mxu0  ;;  %v350_v59 = vadd.f32 %v349_v55, %v11044_v54 }
 0x151   :  { %v353_v58 = vpop.f32.mrb[2].mxu0  ;;  %v352_v62 = vadd.f32 %v351_v57, %v11047_v56 }
 0x152   :  { %v354_v60 = vadd.f32 %v353_v58, %v11044_v54  ;;  %v355_v61 = vpop.f32.mrb[3].mxu0 }
 0x153   :  { %v356_v63 = vadd.f32 %v355_v61, %v11047_v56 }
 0x154   :  { %v11053_v1 = vpack.c.bf16 %v354_v60, %v350_v59 }
 0x155   :  { %v11055_v2 = vpack.c.bf16 %v356_v63, %v352_v62  ;;  %v9342_v18 = vpop.f32.mrb[0].mxu1 }
 0x156   :  { %9364 = vmatprep.mubr.msk.bf16.mxu1 %vm549_vm0, %v11053_v1  ;;  %v471_v20 = vadd.f32 %v9342_v18, %v11076_v15  ;;  %v462_v21 = vpop.f32.mrb[1].mxu1 }
 0x157   :  { %v359_v3 = vpop.f32.mrb[4].mxu0  ;;  %1123 = vrot.lane.b32.xlu0 %v11055_v2, %s10885_s20  ;;  %9964 = vmatprep.subr.msk.bf16.mxu1 %vm549_vm0, %v11055_v2  ;;  %v563_v4 = vsel %vm549_vm0, %v11055_v2, 0  ;;  %v463_v23 = vadd.f32 %v462_v21, %v11076_v15  ;;  %v9343_v24 = vpop.f32.mrb[2].mxu1 }
 0x158   :  { %v361_v5 = vpop.f32.mrb[5].mxu0  ;;  %9357 = vmatpush3.bf16.xpose.msra.mxu1 %v563_v4  ;;  %v360_v8 = vadd.f32 %v359_v3, %v11044_v54  ;;  %v474_v28 = vadd.f32 %v9343_v24, %v11076_v15  ;;  %v465_v29 = vpop.f32.mrb[3].mxu1 }
 0x159   :  { %v363_v6 = vpop.f32.mrb[6].mxu0  ;;  %v362_v11 = vadd.f32 %v361_v5, %v11047_v56  ;;  %v466_v32 = vadd.f32 %v465_v29, %v11076_v15 }
 0x15a   :  { %v364_v9 = vadd.f32 %v363_v6, %v11044_v54  ;;  %v365_v10 = vpop.f32.mrb[7].mxu0  ;;  %v11094_v34 = vpack.c.bf16 %v474_v28, %v471_v20 }
 0x15b   :  { %v366_v12 = vadd.f32 %v365_v10, %v11047_v56  ;;  %v11098_v36 = vpack.c.bf16 %v466_v32, %v463_v23 }
 0x15c   :  { %v11070_v13 = vpack.c.bf16 %v364_v9, %v360_v8 }
 0x15d   :  { %v11072_v14 = vpack.c.bf16 %v366_v12, %v362_v11  ;;  %v9346_v39 = vpop.f32.mrb[4].mxu1 }
 0x15e   :  { %v487_v41 = vadd.f32 %v9346_v39, %v11076_v15  ;;  %v478_v42 = vpop.f32.mrb[5].mxu1 }
 0x15f   :  { %v369_v16 = vpop.f32.mrb[8].mxu0  ;;  %1125 = vrot.lane.b32.xlu1 %v11072_v14, %s10885_s20  ;;  %9965 = vmatprep.subr.msk.bf16.mxu1 %vm549_vm0, %v11072_v14  ;;  %v566_v17 = vsel %vm549_vm0, %v11072_v14, 0  ;;  %v479_v44 = vadd.f32 %v478_v42, %v11076_v15  ;;  %v9347_v45 = vpop.f32.mrb[6].mxu1 }
 0x160   :  { %v371_v19 = vpop.f32.mrb[9].mxu0  ;;  %9359 = vmatpush3.bf16.xpose.msra.mxu1 %v566_v17  ;;  %v370_v25 = vadd.f32 %v369_v16, %v11044_v54  ;;  %v490_v49 = vadd.f32 %v9347_v45, %v11076_v15  ;;  %v481_v52 = vpop.f32.mrb[7].mxu1 }
 0x161   :  { %v373_v22 = vpop.f32.mrb[10].mxu0  ;;  %v372_v30 = vadd.f32 %v371_v19, %v11047_v56  ;;  %v482_v58 = vadd.f32 %v481_v52, %v11076_v15 }
 0x162   :  { %v374_v26 = vadd.f32 %v373_v22, %v11044_v54  ;;  %v375_v27 = vpop.f32.mrb[11].mxu0  ;;  %v11114_v60 = vpack.c.bf16 %v490_v49, %v487_v41 }
 0x163   :  { %v376_v31 = vadd.f32 %v375_v27, %v11047_v56  ;;  %v11118_v62 = vpack.c.bf16 %v482_v58, %v479_v44 }
 0x164   :  { %v11092_v33 = vpack.c.bf16 %v374_v26, %v370_v25 }
 0x165   :  { %v11096_v35 = vpack.c.bf16 %v376_v31, %v372_v30  ;;  %v9350_v4 = vpop.f32.mrb[8].mxu1 }
 0x166   :  { %v503_v6 = vadd.f32 %v9350_v4, %v11076_v15  ;;  %v494_v8 = vpop.f32.mrb[9].mxu1 }
 0x167   :  { %v379_v37 = vpop.f32.mrb[12].mxu0  ;;  %9966 = vmatprep.subr.msk.bf16.mxu1 %vm549_vm0, %v11096_v35  ;;  %v569_v38 = vsel %vm549_vm0, %v11096_v35, 0  ;;  %v495_v10 = vadd.f32 %v494_v8, %v11076_v15  ;;  %v9351_v11 = vpop.f32.mrb[10].mxu1 }
 0x168   :  { %v381_v40 = vpop.f32.mrb[13].mxu0  ;;  %9361 = vmatpush3.bf16.xpose.msra.mxu1 %v569_v38  ;;  %v380_v46 = vadd.f32 %v379_v37, %v11044_v54  ;;  %v506_v18 = vadd.f32 %v9351_v11, %v11076_v15  ;;  %v497_v19 = vpop.f32.mrb[11].mxu1 }
 0x169   :  { %v383_v43 = vpop.f32.mrb[14].mxu0  ;;  %v382_v55 = vadd.f32 %v381_v40, %v11047_v56  ;;  %v498_v22 = vadd.f32 %v497_v19, %v11076_v15 }
 0x16a   :  { %v384_v47 = vadd.f32 %v383_v43, %v11044_v54  ;;  %v385_v48 = vpop.f32.mrb[15].mxu0  ;;  %v11135_v24 = vpack.c.bf16 %v506_v18, %v503_v6 }
 0x16b   :  { %v386_v57 = vadd.f32 %v385_v48, %v11047_v56  ;;  %v11139_v26 = vpack.c.bf16 %v498_v22, %v495_v10 }
 0x16c   :  { %v11112_v59 = vpack.c.bf16 %v384_v47, %v380_v46 }
 0x16d   :  { %v11116_v61 = vpack.c.bf16 %v386_v57, %v382_v55  ;;  %v9354_v29 = vpop.f32.mrb[12].mxu1 }
 0x16e   :  { %v519_v32 = vadd.f32 %v9354_v29, %v11076_v15  ;;  %v510_v37 = vpop.f32.mrb[13].mxu1 }
 0x16f   :  { %v389_v63 = vpop.f32.mrb[16].mxu0  ;;  %9967 = vmatprep.subr.msk.bf16.mxu1 %vm549_vm0, %v11116_v61  ;;  %v572_v3 = vsel %vm549_vm0, %v11116_v61, 0  ;;  %v511_v39 = vadd.f32 %v510_v37, %v11076_v15  ;;  %v9355_v40 = vpop.f32.mrb[14].mxu1 }
 0x170   :  { %v391_v5 = vpop.f32.mrb[17].mxu0  ;;  %9363 = vmatpush3.bf16.xpose.msra.mxu1 %v572_v3  ;;  %v390_v12 = vadd.f32 %v389_v63, %v11044_v54  ;;  %v522_v43 = vadd.f32 %v9355_v40, %v11076_v15  ;;  %v513_v44 = vpop.f32.mrb[15].mxu1 }
 0x171   :  { %v393_v9 = vpop.f32.mrb[18].mxu0  ;;  %9388 = vmatprep.subr.bf16.mxu1 %v11098_v36  ;;  %v392_v20 = vadd.f32 %v391_v5, %v11047_v56  ;;  %v514_v47 = vadd.f32 %v513_v44, %v11076_v15 }
 0x172   :  { %v394_v16 = vadd.f32 %v393_v9, %v11044_v54  ;;  %v395_v17 = vpop.f32.mrb[19].mxu0  ;;  %v11163_v49 = vpack.c.bf16 %v522_v43, %v519_v32 }
 0x173   :  { %v396_v21 = vadd.f32 %v395_v17, %v11047_v56  ;;  %v11168_v55 = vpack.c.bf16 %v514_v47, %v511_v39 }
 0x174   :  { %v11133_v23 = vpack.c.bf16 %v394_v16, %v390_v12 }
 0x175   :  { %v11137_v25 = vpack.c.bf16 %v396_v21, %v392_v20 }
 0x176   :  { %9380 = vmatprep.mubr.msk.bf16.mxu0 %vm549_vm0, %v11133_v23 }
 0x177   :  { %v399_v27 = vpop.f32.mrb[20].mxu0  ;;  %9365 = vmatmul.mubr.msk.bf16.vlgmr.msra.gmra.mrb[16].mxu1 %vm549_vm0, %v11070_v13  ;;  %9968 = vmatprep.subr.msk.bf16.mxu0 %vm549_vm0, %v11137_v25  ;;  %v652_v28 = vsel %vm549_vm0, %v11137_v25, 0 }
 0x178   :  { %v400_v30 = vadd.f32 %v399_v27, %v11044_v54  ;;  %v401_v31 = vpop.f32.mrb[21].mxu0  ;;  %9368 = vmatprep.mubr.msk.bf16.mxu1 %vm549_vm0, %v11092_v33  ;;  %9373 = vmatpush3.bf16.xpose.msra.mxu0 %v652_v28 }
 0x179   :  { %v403_v38 = vpop.f32.mrb[22].mxu0  ;;  %9389 = vmatpush3.bf16.msra.mxu1 %v11098_v36  ;;  %v402_v45 = vadd.f32 %v401_v31, %v11047_v56 }
 0x17a   :  { %v404_v41 = vadd.f32 %v403_v38, %v11044_v54  ;;  %v405_v42 = vpop.f32.mrb[23].mxu0  ;;  %9390 = vmatprep.subr.bf16.mxu1 %v11094_v34 }
 0x17b   :  { %v406_v46 = vadd.f32 %v405_v42, %v11047_v56 }
 0x17c   :  { %v11161_v48 = vpack.c.bf16 %v404_v41, %v400_v30 }
 0x17d   :  { %v11165_v52 = vpack.c.bf16 %v406_v46, %v402_v45  ;;  %9391 = vmatpush3.bf16.msra.mxu1 %v11094_v34 }
 0x17e   :  { %9392 = vmatprep.subr.bf16.mxu1 %v11118_v62 }
 0x17f   :  { %v409_v57 = vpop.f32.mrb[24].mxu0  ;;  %9369 = vmatmul.mubr.msk.bf16.gmra.mrb[20].mxu1 %vm549_vm0, %v11112_v59  ;;  %9969 = vmatprep.subr.msk.bf16.mxu0 %vm549_vm0, %v11165_v52  ;;  %v655_v15 = vsel %vm549_vm0, %v11165_v52, 0 }
 0x180   :  { %v410_v58 = vadd.f32 %v409_v57, %v11044_v54  ;;  %v411_v63 = vpop.f32.mrb[25].mxu0  ;;  %9375 = vmatpush3.bf16.xpose.msra.mxu0 %v655_v15 }
 0x181   :  { %v413_v3 = vpop.f32.mrb[26].mxu0  ;;  %9393 = vmatpush3.bf16.msra.mxu1 %v11118_v62  ;;  %v412_v6 = vadd.f32 %v411_v63, %v11047_v56 }
 0x182   :  { %v414_v4 = vadd.f32 %v413_v3, %v11044_v54  ;;  %v415_v5 = vpop.f32.mrb[27].mxu0  ;;  %9394 = vmatprep.subr.bf16.mxu1 %v11114_v60 }
 0x183   :  { %v416_v8 = vadd.f32 %v415_v5, %v11047_v56 }
 0x184   :  { %v11183_v9 = vpack.c.bf16 %v414_v4, %v410_v58 }
 0x185   :  { %v11185_v10 = vpack.c.bf16 %v416_v8, %v412_v6  ;;  %9395 = vmatpush3.bf16.msra.mxu1 %v11114_v60 }
 0x186   :  { %9404 = vmatprep.subr.bf16.mxu1 %v11139_v26 }
 0x187   :  { %v419_v11 = vpop.f32.mrb[28].mxu0  ;;  %9970 = vmatprep.subr.msk.bf16.mxu0 %vm549_vm0, %v11185_v10  ;;  %v658_v12 = vsel %vm549_vm0, %v11185_v10, 0 }
 0x188   :  { %v420_v16 = vadd.f32 %v419_v11, %v11044_v54  ;;  %v421_v17 = vpop.f32.mrb[29].mxu0  ;;  %9377 = vmatpush3.bf16.xpose.msra.mxu0 %v658_v12 }
 0x189   :  { %v423_v18 = vpop.f32.mrb[30].mxu0  ;;  %v422_v21 = vadd.f32 %v421_v17, %v11047_v56 }
 0x18a   :  { %v424_v19 = vadd.f32 %v423_v18, %v11044_v54  ;;  %v425_v20 = vpop.f32.mrb[31].mxu0 }
 0x18b   :  { %v426_v22 = vadd.f32 %v425_v20, %v11047_v56 }
 0x18c   :  { %v11197_v27 = vpack.c.bf16 %v424_v19, %v420_v16 }
 0x18d   :  { %v11199_v28 = vpack.c.bf16 %v426_v22, %v422_v21 }
 0x18f   :  { %9971 = vmatprep.subr.msk.bf16.mxu0 %vm549_vm0, %v11199_v28  ;;  %v661_v29 = vsel %vm549_vm0, %v11199_v28, 0 }
 0x190   :  { %9379 = vmatpush3.bf16.xpose.msra.mxu0 %v661_v29 }
 0x197   :  { %9381 = vmatmul.mubr.msk.bf16.vlgmr.msra.gmra.mrb[32].mxu0 %vm549_vm0, %v11161_v48 }
 0x198   :  { %9384 = vmatprep.mubr.msk.bf16.mxu0 %vm549_vm0, %v11183_v9 }
 0x19f   :  { %9385 = vmatmul.mubr.msk.bf16.gmra.mrb[36].mxu0 %vm549_vm0, %v11197_v27 }
 0x1c9   :  { %v1124_v54 = vpop.permute.xlu0 %1123 }
 0x1ca   :  { %9972 = vmatprep.subr.msk.bf16.mxu0 %vm549_vm0, %v1124_v54  ;;  %v1144_v56 = vsel %vm549_vm0, %v1124_v54, 0 }
 0x1cb   :  { %9421 = vmatpush3.bf16.xpose.msra.mxu0 %v1144_v56 }
 0x1d1   :  { %v1126_v30 = vpop.permute.xlu1 %1125 }
 0x1d2   :  { %9973 = vmatprep.subr.msk.bf16.mxu0 %vm549_vm0, %v1126_v30  ;;  %v1147_v31 = vsel %vm549_vm0, %v1126_v30, 0 }
 0x1d3   :  { %9423 = vmatpush3.bf16.xpose.msra.mxu0 %v1147_v31 }
 0x24a   :  { %v9366_v32 = vpop.f32.mrb[16].mxu1 }
 0x24b   :  { %v608_v37 = vpop.f32.mrb[17].mxu1  ;;  %v735_v38 = vsel %vm728_vm1, %v9366_v32, -inf }
 0x24c   :  { %736 = vmax.xlane.f32.xlu1 %v735_v38  ;;  %v9367_v39 = vpop.f32.mrb[18].mxu1  ;;  %v729_v40 = vsel %vm728_vm1, %v608_v37, -inf }
 0x24d   :  { %730 = vmax.xlane.f32.xlu0 %v729_v40  ;;  %v611_v41 = vpop.f32.mrb[19].mxu1  ;;  %v738_v42 = vsel %vm728_vm1, %v9367_v39, -inf }
 0x24e   :  { %v732_v43 = vsel %vm728_vm1, %v611_v41, -inf }
 0x250   :  { %739 = vmax.xlane.f32.xlu1 %v738_v42 }
 0x251   :  { %733 = vmax.xlane.f32.xlu0 %v732_v43 }
 0x252   :  { %v9370_v44 = vpop.f32.mrb[20].mxu1 }
 0x253   :  { %v11219_v45 = vpop.f32.mrb[21].mxu1  ;;  %v747_v46 = vsel %vm728_vm1, %v9370_v44, -inf }
 0x254   :  { %v9371_v47 = vpop.f32.mrb[22].mxu1  ;;  %v741_v58 = vsel %vm728_vm1, %v11219_v45, -inf }
 0x255   :  { %748 = vmax.xlane.f32.xlu0 %v747_v46  ;;  %v627_v57 = vpop.f32.mrb[23].mxu1  ;;  %v750_v15 = vsel %vm728_vm1, %v9371_v47, -inf }
 0x256   :  { %751 = vmax.xlane.f32.xlu1 %v750_v15  ;;  %v744_v63 = vsel %vm728_vm1, %v627_v57, -inf }
 0x259   :  { %742 = vmax.xlane.f32.xlu0 %v741_v58 }
 0x25a   :  { %745 = vmax.xlane.f32.xlu1 %v744_v63 }
 0x26a   :  { %v11226_v3 = vpop.f32.mrb[32].mxu0 }
 0x26b   :  { %v11228_v4 = vpop.f32.mrb[33].mxu0  ;;  %v759_v5 = vsel %vm728_vm1, %v11226_v3, -inf }
 0x26c   :  { %v11232_v6 = vpop.f32.mrb[34].mxu0  ;;  %760 = vmax.xlane.f32.xlu0 %v759_v5  ;;  %v753_v12 = vsel %vm728_vm1, %v11228_v4, -inf }
 0x26d   :  { %v11234_v8 = vpop.f32.mrb[35].mxu0  ;;  %v762_v11 = vsel %vm728_vm1, %v11232_v6, -inf }
 0x26e   :  { %763 = vmax.xlane.f32.xlu1 %v762_v11  ;;  %v756_v16 = vsel %vm728_vm1, %v11234_v8, -inf }
 0x270   :  { %754 = vmax.xlane.f32.xlu0 %v753_v12 }
 0x272   :  { %v11242_v17 = vpop.f32.mrb[36].mxu0  ;;  %757 = vmax.xlane.f32.xlu1 %v756_v16 }
 0x273   :  { %v11244_v18 = vpop.f32.mrb[37].mxu0  ;;  %v771_v19 = vsel %vm728_vm1, %v11242_v17, -inf }
 0x274   :  { %v11248_v20 = vpop.f32.mrb[38].mxu0  ;;  %772 = vmax.xlane.f32.xlu0 %v771_v19  ;;  %v765_v22 = vsel %vm728_vm1, %v11244_v18, -inf }
 0x275   :  { %v11250_v21 = vpop.f32.mrb[39].mxu0  ;;  %v774_v29 = vsel %vm728_vm1, %v11248_v20, -inf }
 0x276   :  { %v768_v54 = vsel %vm728_vm1, %v11250_v21, -inf }
 0x278   :  { %766 = vmax.xlane.f32.xlu0 %v765_v22 }
 0x283   :  { %1236 = vrot.lane.b32.xlu1 %v11137_v25, %s10885_s20 }
 0x287   :  { %1129 = vrot.lane.b32.xlu1 %v11116_v61, %s10885_s20 }
 0x28e   :  { %1127 = vrot.lane.b32.xlu0 %v11096_v35, %s10885_s20 }
 0x2ab   :  { %775 = vmax.xlane.f32.xlu1 %v774_v29 }
 0x2af   :  { %769 = vmax.xlane.f32.xlu1 %v768_v54 }
 0x2c0   :  { %1238 = vrot.lane.b32.xlu1 %v11165_v52, %s10885_s20 }
 0x2d9   :  { %v737_v56 = vpop.xlane.xlu1 %736 }
 0x2da   :  { %v731_v30 = vpop.xlane.xlu0 %730  ;;  %v779_v38 = vsub.f32 %v9366_v32, %v737_v56 }
 0x2db   :  { %v777_v43 = vsub.f32 %v608_v37, %v731_v30 }
 0x2dd   :  { %v740_v31 = vpop.xlane.xlu1 %739 }
 0x2de   :  { %v780_v40 = vsub.f32 %v9367_v39, %v740_v31  ;;  %v734_v42 = vpop.xlane.xlu0 %733 }
 0x2df   :  { %v778_v46 = vsub.f32 %v611_v41, %v734_v42 }
 0x2e0   :  { %v794_v15 = vpack.c.bf16 %v780_v40, %v779_v38 }
 0x2e1   :  { %v793_v58 = vpack.c.bf16 %v778_v46, %v777_v43 }
 0x2e2   :  { %v805_v63 = vmul.bf16 1069105081, %v794_v15  ;;  %v749_v5 = vpop.xlane.xlu0 %748 }
 0x2e3   :  { %v802_v11 = vmul.bf16 1069105081, %v793_v58  ;;  %v783_v12 = vsub.f32 %v9370_v44, %v749_v5  ;;  %v752_v16 = vpop.xlane.xlu1 %751 }
 0x2e4   :  { %10205 = vpow.bf16 %v805_v63  ;;  %v784_v19 = vsub.f32 %v9371_v47, %v752_v16 }
 0x2e5   :  { %10207 = vpow.bf16 %v802_v11 }
 0x2e6   :  { %v796_v22 = vpack.c.bf16 %v784_v19, %v783_v12  ;;  %v743_v29 = vpop.xlane.xlu0 %742 }
 0x2e7   :  { %v781_v54 = vsub.f32 %v11219_v45, %v743_v29  ;;  %v746_v7 = vpop.xlane.xlu1 %745 }
 0x2e8   :  { %v811_v32 = vmul.bf16 1069105081, %v796_v22  ;;  %v782_v39 = vsub.f32 %v627_v57, %v746_v7 }
 0x2ea   :  { %10209 = vpow.bf16 %v811_v32  ;;  %v795_v37 = vpack.c.bf16 %v782_v39, %v781_v54 }
 0x2ec   :  { %v808_v41 = vmul.bf16 1069105081, %v795_v37 }
 0x2ee   :  { %10211 = vpow.bf16 %v808_v41 }
 0x2ef   :  { %v11267_v56 = vpop.eup %10205 }
 0x2f0   :  { %v11269_v30 = vpop.eup %10207  ;;  %v827_v44 = vunpack.c.l.bf16 %v11267_v56  ;;  %v828_v47 = vunpack.c.h.bf16 %v11267_v56 }
 0x2f1   :  { %v825_v45 = vunpack.c.l.bf16 %v11269_v30  ;;  %v826_v7 = vunpack.c.h.bf16 %v11269_v30 }
 0x2f2   :  { %v847_v31 = vsel %vm728_vm1, %v827_v44, 0.0  ;;  %v850_v38 = vsel %vm728_vm1, %v828_v47, 0.0 }
 0x2f3   :  { %848 = vadd.xlane.f32.xlu0 %v847_v31  ;;  %851 = vadd.xlane.f32.xlu1 %v850_v38  ;;  %v841_v40 = vsel %vm728_vm1, %v825_v45, 0.0  ;;  %v844_v42 = vsel %vm728_vm1, %v826_v7, 0.0 }
 0x2f5   :  { %v11277_v57 = vpop.eup %10209 }
 0x2f6   :  { %v831_v43 = vunpack.c.l.bf16 %v11277_v57  ;;  %v832_v46 = vunpack.c.h.bf16 %v11277_v57 }
 0x2f7   :  { %842 = vadd.xlane.f32.xlu0 %v841_v40  ;;  %845 = vadd.xlane.f32.xlu1 %v844_v42 }
 0x2f8   :  { %v859_v63 = vsel %vm728_vm1, %v831_v43, 0.0  ;;  %v862_v5 = vsel %vm728_vm1, %v832_v46, 0.0 }
 0x2f9   :  { %v11283_v15 = vpop.eup %10211  ;;  %v761_v58 = vpop.xlane.xlu0 %760 }
 0x2fa   :  { %v830_v11 = vunpack.c.h.bf16 %v11283_v15  ;;  %v829_v12 = vunpack.c.l.bf16 %v11283_v15  ;;  %v787_v19 = vsub.f32 %v11226_v3, %v761_v58 }
 0x2fb   :  { %860 = vadd.xlane.f32.xlu0 %v859_v63  ;;  %863 = vadd.xlane.f32.xlu1 %v862_v5  ;;  %v764_v16 = vpop.xlane.xlu1 %763 }
 0x2fc   :  { %v788_v22 = vsub.f32 %v11232_v6, %v764_v16  ;;  %v856_v32 = vsel %vm728_vm1, %v830_v11, 0.0  ;;  %v853_v39 = vsel %vm728_vm1, %v829_v12, 0.0 }
 0x2fd   :  { %v755_v29 = vpop.xlane.xlu0 %754 }
 0x2fe   :  { %v798_v54 = vpack.c.bf16 %v788_v22, %v787_v19  ;;  %v785_v44 = vsub.f32 %v11228_v4, %v755_v29 }
 0x2ff   :  { %857 = vadd.xlane.f32.xlu1 %v856_v32  ;;  %854 = vadd.xlane.f32.xlu0 %v853_v39  ;;  %v758_v37 = vpop.xlane.xlu1 %757 }
 0x300   :  { %v817_v41 = vmul.bf16 1069105081, %v798_v54  ;;  %v786_v47 = vsub.f32 %v11234_v8, %v758_v37 }
 0x301   :  { %v773_v31 = vpop.xlane.xlu0 %772 }
 0x302   :  { %10213 = vpow.bf16 %v817_v41  ;;  %v797_v38 = vpack.c.bf16 %v786_v47, %v785_v44  ;;  %v791_v29 = vsub.f32 %v11242_v17, %v773_v31 }
 0x303   :  { %v11295_v45 = vpop.permute.xlu1 %1236 }
 0x304   :  { %v814_v3 = vmul.bf16 1069105081, %v797_v38 }
 0x305   :  { %v767_v6 = vpop.xlane.xlu0 %766 }
 0x306   :  { %10215 = vpow.bf16 %v814_v3  ;;  %v789_v37 = vsub.f32 %v11244_v18, %v767_v6 }
 0x307   :  { %v1130_v42 = vpop.permute.xlu1 %1129 }
 0x308   :  { %v1153_v5 = vsel %vm549_vm0, %v1130_v42, 0 }
 0x309   :  { %v1128_v7 = vpop.permute.xlu0 %1127 }
 0x30a   :  { %9974 = vmatprep.subr.msk.bf16.mxu0 %vm549_vm0, %v1128_v7  ;;  %v1150_v40 = vsel %vm549_vm0, %v1128_v7, 0 }
 0x30b   :  { %9425 = vmatpush3.bf16.xpose.msra.mxu0 %v1150_v40 }
 0x30c   :  { %9975 = vmatprep.subr.msk.bf16.mxu0 %vm549_vm0, %v1130_v42 }
 0x30d   :  { %v11300_v4 = vpop.eup %10213 }
 0x30e   :  { %v836_v8 = vunpack.c.h.bf16 %v11300_v4  ;;  %v835_v43 = vunpack.c.l.bf16 %v11300_v4 }
 0x310   :  { %v874_v46 = vsel %vm728_vm1, %v836_v8, 0.0  ;;  %v871_v58 = vsel %vm728_vm1, %v835_v43, 0.0 }
 0x311   :  { %v11306_v63 = vpop.eup %10215  ;;  %875 = vadd.xlane.f32.xlu1 %v874_v46  ;;  %872 = vadd.xlane.f32.xlu0 %v871_v58 }
 0x312   :  { %v834_v11 = vunpack.c.h.bf16 %v11306_v63  ;;  %v833_v12 = vunpack.c.l.bf16 %v11306_v63 }
 0x313   :  { %9427 = vmatpush3.bf16.xpose.msra.mxu0 %v1153_v5 }
 0x314   :  { %v868_v16 = vsel %vm728_vm1, %v834_v11, 0.0  ;;  %v865_v19 = vsel %vm728_vm1, %v833_v12, 0.0 }
 0x315   :  { %869 = vadd.xlane.f32.xlu1 %v868_v16  ;;  %866 = vadd.xlane.f32.xlu0 %v865_v19 }
 0x326   :  { %1113 = vrot.lane.b32.xlu1 %v11070_v13, %s10885_s20 }
 0x32b   :  { %1111 = vrot.lane.b32.xlu0 %v11053_v1, %s10885_s20 }
 0x338   :  { %v776_v22 = vpop.xlane.xlu1 %775 }
 0x339   :  { %v792_v54 = vsub.f32 %v11248_v20, %v776_v22 }
 0x33b   :  { %v800_v32 = vpack.c.bf16 %v792_v54, %v791_v29 }
 0x33c   :  { %v770_v39 = vpop.xlane.xlu1 %769 }
 0x33d   :  { %v823_v41 = vmul.bf16 1069105081, %v800_v32  ;;  %v790_v44 = vsub.f32 %v11250_v21, %v770_v39 }
 0x33f   :  { %10217 = vpow.bf16 %v823_v41  ;;  %v799_v47 = vpack.c.bf16 %v790_v44, %v789_v37 }
 0x340   :  { %v11349_v8 = vpop.permute.xlu1 %1238 }
 0x341   :  { %v820_v38 = vmul.bf16 1069105081, %v799_v47 }
 0x343   :  { %10219 = vpow.bf16 %v820_v38 }
 0x34a   :  { %v11321_v3 = vpop.eup %10217 }
 0x34b   :  { %v840_v7 = vunpack.c.h.bf16 %v11321_v3  ;;  %v839_v40 = vunpack.c.l.bf16 %v11321_v3 }
 0x34d   :  { %v886_v17 = vsel %vm728_vm1, %v840_v7, 0.0  ;;  %v883_v20 = vsel %vm728_vm1, %v839_v40, 0.0 }
 0x34e   :  { %v11327_v31 = vpop.eup %10219  ;;  %887 = vadd.xlane.f32.xlu1 %v886_v17  ;;  %884 = vadd.xlane.f32.xlu0 %v883_v20 }
 0x34f   :  { %v838_v18 = vunpack.c.h.bf16 %v11327_v31  ;;  %v837_v21 = vunpack.c.l.bf16 %v11327_v31 }
 0x351   :  { %v880_v6 = vsel %vm728_vm1, %v838_v18, 0.0  ;;  %v877_v42 = vsel %vm728_vm1, %v837_v21, 0.0 }
 0x352   :  { %881 = vadd.xlane.f32.xlu0 %v880_v6  ;;  %878 = vadd.xlane.f32.xlu1 %v877_v42 }
 0x363   :  { %1115 = vrot.lane.b32.xlu1 %v11092_v33, %s10885_s20 }
 0x367   :  { %1242 = vrot.lane.b32.xlu1 %v11199_v28, %s10885_s20 }
 0x368   :  { %1240 = vrot.lane.b32.xlu0 %v11185_v10, %s10885_s20 }
 0x36b   :  { %1226 = vrot.lane.b32.xlu1 %v11161_v48, %s10885_s20 }
 0x36c   :  { %1117 = vrot.lane.b32.xlu0 %v11112_v59, %s10885_s20 }
 0x36f   :  { %1230 = vrot.lane.b32.xlu1 %v11197_v27, %s10885_s20 }
 0x370   :  { %1224 = vrot.lane.b32.xlu0 %v11133_v23, %s10885_s20 }
 0x374   :  { %1228 = vrot.lane.b32.xlu0 %v11183_v9, %s10885_s20 }
 0x380   :  { %v849_v43 = vpop.xlane.xlu0 %848  ;;  %v852_v46 = vpop.xlane.xlu1 %851 }
 0x381   :  { %v890_v58 = vpack.c.bf16 %v852_v46, %v849_v43 }
 0x383   :  { %v899_v5 = vunpack.c.l.bf16 %v890_v58  ;;  %v900_v11 = vunpack.c.h.bf16 %v890_v58 }
 0x384   :  { %v843_v12 = vpop.xlane.xlu0 %842  ;;  %v846_v16 = vpop.xlane.xlu1 %845 }
 0x385   :  { %v889_v19 = vpack.c.bf16 %v846_v16, %v843_v12  ;;  %10221 = vrcp.f32 %v899_v5 }
 0x386   :  { %10223 = vrcp.f32 %v900_v11 }
 0x387   :  { %v897_v22 = vunpack.c.l.bf16 %v889_v19  ;;  %v898_v29 = vunpack.c.h.bf16 %v889_v19 }
 0x388   :  { %v861_v54 = vpop.xlane.xlu0 %860  ;;  %v864_v32 = vpop.xlane.xlu1 %863 }
 0x389   :  { %10225 = vrcp.f32 %v897_v22  ;;  %v892_v39 = vpack.c.bf16 %v864_v32, %v861_v54 }
 0x38a   :  { %10227 = vrcp.f32 %v898_v29 }
 0x38b   :  { %v903_v37 = vunpack.c.l.bf16 %v892_v39  ;;  %v904_v41 = vunpack.c.h.bf16 %v892_v39 }
 0x38c   :  { %v855_v44 = vpop.xlane.xlu0 %854  ;;  %v858_v47 = vpop.xlane.xlu1 %857 }
 0x38d   :  { %v891_v38 = vpack.c.bf16 %v858_v47, %v855_v44  ;;  %10229 = vrcp.f32 %v903_v37 }
 0x38e   :  { %10231 = vrcp.f32 %v904_v41 }
 0x38f   :  { %v901_v7 = vunpack.c.l.bf16 %v891_v38  ;;  %v902_v40 = vunpack.c.h.bf16 %v891_v38  ;;  %v10222_v17 = vpop.eup %10221 }
 0x390   :  { %v10224_v20 = vpop.eup %10223 }
 0x391   :  { %10233 = vrcp.f32 %v901_v7  ;;  %v930_v6 = vpack.c.bf16 %v10224_v20, %v10222_v17 }
 0x392   :  { %10235 = vrcp.f32 %v902_v40 }
 0x393   :  { %v10226_v18 = vpop.eup %10225  ;;  %v938_v58 = vmul.bf16 %v11267_v56, %v930_v6 }
 0x394   :  { %v10228_v21 = vpop.eup %10227 }
 0x395   :  { %v929_v42 = vpack.c.bf16 %v10228_v21, %v10226_v18 }
 0x397   :  { %v937_v43 = vmul.bf16 %v11269_v30, %v929_v42  ;;  %v10230_v46 = vpop.eup %10229 }
 0x398   :  { %v10232_v5 = vpop.eup %10231 }
 0x399   :  { %9396 = vmatprep.mubr.msk.bf16.mxu1 %vm728_vm1, %v937_v43  ;;  %v932_v16 = vpack.c.bf16 %v10232_v5, %v10230_v46  ;;  %v1257_v43 = vsel %vm549_vm0, %v11295_v45, 0  ;;  %v1260_v46 = vsel %vm549_vm0, %v11349_v8, 0 }
 0x39a   :  { %9397 = vmatmul.mubr.msk.bf16.vlgmr.msra.gmra.mrb[24].mxu1 %vm728_vm1, %v938_v58 }
 0x39b   :  { %v10234_v11 = vpop.eup %10233  ;;  %9405 = vmatpush3.bf16.msra.mxu1 %v11139_v26  ;;  %v940_v54 = vmul.bf16 %v11277_v57, %v932_v16 }
 0x39c   :  { %v10236_v12 = vpop.eup %10235  ;;  %9406 = vmatprep.subr.bf16.mxu1 %v11135_v24 }
 0x39d   :  { %v931_v19 = vpack.c.bf16 %v10236_v12, %v10234_v11 }
 0x39e   :  { %v873_v22 = vpop.xlane.xlu0 %872  ;;  %v876_v29 = vpop.xlane.xlu1 %875 }
 0x39f   :  { %9407 = vmatpush3.bf16.msra.mxu1 %v11135_v24  ;;  %v894_v30 = vpack.c.bf16 %v876_v29, %v873_v22  ;;  %v939_v56 = vmul.bf16 %v11283_v15, %v931_v19 }
 0x3a0   :  { %9408 = vmatprep.subr.bf16.mxu1 %v11168_v55 }
 0x3a1   :  { %v907_v32 = vunpack.c.l.bf16 %v894_v30  ;;  %v908_v39 = vunpack.c.h.bf16 %v894_v30  ;;  %9400 = vmatprep.mubr.msk.bf16.mxu1 %vm728_vm1, %v939_v56 }
 0x3a2   :  { %9401 = vmatmul.mubr.msk.bf16.gmra.mrb[28].mxu1 %vm728_vm1, %v940_v54  ;;  %v867_v37 = vpop.xlane.xlu0 %866  ;;  %v870_v41 = vpop.xlane.xlu1 %869 }
 0x3a3   :  { %9409 = vmatpush3.bf16.msra.mxu1 %v11168_v55  ;;  %v893_v44 = vpack.c.bf16 %v870_v41, %v867_v37  ;;  %10237 = vrcp.f32 %v907_v32 }
 0x3a4   :  { %9410 = vmatprep.subr.bf16.mxu1 %v11163_v49  ;;  %10239 = vrcp.f32 %v908_v39 }
 0x3a5   :  { %v905_v15 = vunpack.c.l.bf16 %v893_v44  ;;  %v906_v47 = vunpack.c.h.bf16 %v893_v44 }
 0x3a6   :  { %v1112_v38 = vpop.permute.xlu0 %1111  ;;  %v1114_v7 = vpop.permute.xlu1 %1113 }
 0x3a7   :  { %10241 = vrcp.f32 %v905_v15  ;;  %9411 = vmatpush3.bf16.msra.mxu1 %v11163_v49  ;;  %9428 = vmatprep.mubr.msk.bf16.mxu0 %vm549_vm0, %v1112_v38 }
 0x3a8   :  { %10243 = vrcp.f32 %v906_v47  ;;  %9976 = vmatprep.subr.msk.bf16.mxu1 %vm549_vm0, %v11295_v45  ;;  %9429 = vmatmul.mubr.msk.bf16.vlgmr.msra.gmra.mrb[40].mxu0 %vm549_vm0, %v1114_v7 }
 0x3ad   :  { %v10238_v57 = vpop.eup %10237 }
 0x3ae   :  { %v10240_v40 = vpop.eup %10239 }
 0x3af   :  { %v934_v18 = vpack.c.bf16 %v10240_v40, %v10238_v57 }
 0x3b1   :  { %v10242_v17 = vpop.eup %10241  ;;  %v942_v42 = vmul.bf16 %v11300_v4, %v934_v18 }
 0x3b2   :  { %v10244_v20 = vpop.eup %10243 }
 0x3b3   :  { %v933_v21 = vpack.c.bf16 %v10244_v20, %v10242_v17 }
 0x3b5   :  { %v941_v6 = vmul.bf16 %v11306_v63, %v933_v21 }
 0x3b7   :  { %9412 = vmatprep.mubr.msk.bf16.mxu1 %vm728_vm1, %v941_v6 }
 0x3b8   :  { %9413 = vmatmul.mubr.msk.bf16.vlgmr.msra.gmra.mrb[32].mxu1 %vm728_vm1, %v942_v42 }
 0x3b9   :  { %9437 = vmatpush3.bf16.xpose.msra.mxu1 %v1257_v43 }
 0x3ba   :  { %9977 = vmatprep.subr.msk.bf16.mxu1 %vm549_vm0, %v11349_v8 }
 0x3c1   :  { %9439 = vmatpush3.bf16.xpose.msra.mxu1 %v1260_v46 }
 0x3db   :  { %v885_v58 = vpop.xlane.xlu0 %884  ;;  %v888_v5 = vpop.xlane.xlu1 %887 }
 0x3dc   :  { %v896_v63 = vpack.c.bf16 %v888_v5, %v885_v58 }
 0x3de   :  { %v911_v11 = vunpack.c.l.bf16 %v896_v63  ;;  %v912_v4 = vunpack.c.h.bf16 %v896_v63 }
 0x3df   :  { %v882_v12 = vpop.xlane.xlu0 %881  ;;  %v879_v16 = vpop.xlane.xlu1 %878 }
 0x3e0   :  { %v895_v19 = vpack.c.bf16 %v882_v12, %v879_v16  ;;  %10245 = vrcp.f32 %v911_v11 }
 0x3e1   :  { %10247 = vrcp.f32 %v912_v4 }
 0x3e2   :  { %v909_v22 = vunpack.c.l.bf16 %v895_v19  ;;  %v910_v45 = vunpack.c.h.bf16 %v895_v19 }
 0x3e3   :  { %v1241_v29 = vpop.permute.xlu0 %1240  ;;  %v1116_v30 = vpop.permute.xlu1 %1115 }
 0x3e4   :  { %10249 = vrcp.f32 %v909_v22  ;;  %9432 = vmatprep.mubr.msk.bf16.mxu0 %vm549_vm0, %v1116_v30  ;;  %9978 = vmatprep.subr.msk.bf16.mxu1 %vm549_vm0, %v1241_v29  ;;  %v1263_v8 = vsel %vm549_vm0, %v1241_v29, 0 }
 0x3e5   :  { %10251 = vrcp.f32 %v910_v45  ;;  %9441 = vmatpush3.bf16.xpose.msra.mxu1 %v1263_v8 }
 0x3e7   :  { %v1118_v56 = vpop.permute.xlu0 %1117  ;;  %v1243_v54 = vpop.permute.xlu1 %1242 }
 0x3e8   :  { %9433 = vmatmul.mubr.msk.bf16.gmra.mrb[44].mxu0 %vm549_vm0, %v1118_v56  ;;  %9979 = vmatprep.subr.msk.bf16.mxu1 %vm549_vm0, %v1243_v54  ;;  %v1266_v37 = vsel %vm549_vm0, %v1243_v54, 0 }
 0x3ea   :  { %v10246_v32 = vpop.eup %10245 }
 0x3eb   :  { %v10248_v39 = vpop.eup %10247  ;;  %v1225_v57 = vpop.permute.xlu0 %1224 }
 0x3ec   :  { %v936_v15 = vpack.c.bf16 %v10248_v39, %v10246_v32  ;;  %v1227_v40 = vpop.permute.xlu1 %1226 }
 0x3ed   :  { %9443 = vmatpush3.bf16.xpose.msra.mxu1 %v1266_v37 }
 0x3ee   :  { %v10250_v41 = vpop.eup %10249  ;;  %v944_v7 = vmul.bf16 %v11321_v3, %v936_v15 }
 0x3ef   :  { %v10252_v44 = vpop.eup %10251  ;;  %v1229_v17 = vpop.permute.xlu0 %1228 }
 0x3f0   :  { %v935_v47 = vpack.c.bf16 %v10252_v44, %v10250_v41  ;;  %v1231_v20 = vpop.permute.xlu1 %1230 }
 0x3f2   :  { %v943_v38 = vmul.bf16 %v11327_v31, %v935_v47 }
 0x3f4   :  { %9416 = vmatprep.mubr.msk.bf16.mxu1 %vm728_vm1, %v943_v38 }
 0x3f5   :  { %9417 = vmatmul.mubr.msk.bf16.gmra.mrb[36].mxu1 %vm728_vm1, %v944_v7 }
 0x3f6   :  { %9444 = vmatprep.mubr.msk.bf16.mxu1 %vm549_vm0, %v1225_v57 }
 0x3fd   :  { %9445 = vmatmul.mubr.msk.bf16.vlgmr.msra.gmra.mrb[40].mxu1 %vm549_vm0, %v1227_v40 }
 0x3fe   :  { %9448 = vmatprep.mubr.msk.bf16.mxu1 %vm549_vm0, %v1229_v17 }
 0x405   :  { %9449 = vmatmul.mubr.msk.bf16.gmra.mrb[44].mxu1 %vm549_vm0, %v1231_v20 }
 0x46d   :  { %v11394_v18 = vpop.f32.mrb[24].mxu1 }
 0x46e   :  { %14509 = vst [vmem:[#allocation19_spill] sm:$0xff] %v11394_v18  ;;  %v11396_v31 = vpop.f32.mrb[25].mxu1 }
 0x46f   :  { %14510 = vst [vmem:[#allocation20_spill] sm:$0xff] %v11396_v31  ;;  %v11398_v3 = vpop.f32.mrb[26].mxu1 }
 0x470   :  { %14511 = vst [vmem:[#allocation21_spill] sm:$0xff] %v11398_v3  ;;  %v11402_v6 = vpop.f32.mrb[27].mxu1 }
 0x471   :  { %14512 = vst [vmem:[#allocation22_spill] sm:$0xff] %v11402_v6 }
 0x475   :  { %v11406_v43 = vpop.f32.mrb[28].mxu1 }
 0x476   :  { %14513 = vst [vmem:[#allocation23_spill] sm:$0xff] %v11406_v43  ;;  %v11408_v46 = vpop.f32.mrb[29].mxu1 }
 0x477   :  { %14514 = vst [vmem:[#allocation24_spill] sm:$0xff] %v11408_v46  ;;  %v11410_v58 = vpop.f32.mrb[30].mxu1 }
 0x478   :  { %14515 = vst [vmem:[#allocation25_spill] sm:$0xff] %v11410_v58  ;;  %v11414_v63 = vpop.f32.mrb[31].mxu1 }
 0x479   :  { %14516 = vst [vmem:[#allocation26_spill] sm:$0xff] %v11414_v63 }
 0x47b   :  { %v11418_v4 = vpop.f32.mrb[40].mxu0 }
 0x47c   :  { %v1189_v12 = vpop.f32.mrb[41].mxu0  ;;  %v1339_v29 = vsel %vm728_vm1, %v11418_v4, -inf }
 0x47d   :  { %v11420_v16 = vpop.f32.mrb[42].mxu0  ;;  %v1333_v19 = vsel %vm728_vm1, %v1189_v12, -inf }
 0x47e   :  { %1334 = vmax.xlane.f32.xlu0 %v1333_v19  ;;  %v1192_v22 = vpop.f32.mrb[43].mxu0  ;;  %v1342_v30 = vsel %vm728_vm1, %v11420_v16, -inf }
 0x47f   :  { %v1336_v45 = vsel %vm728_vm1, %v1192_v22, -inf }
 0x480   :  { %1337 = vmax.xlane.f32.xlu1 %v1336_v45 }
 0x482   :  { %1340 = vmax.xlane.f32.xlu0 %v1339_v29 }
 0x486   :  { %1343 = vmax.xlane.f32.xlu0 %v1342_v30 }
 0x48b   :  { %v11428_v8 = vpop.f32.mrb[32].mxu1 }
 0x48c   :  { %14517 = vst [vmem:[#allocation27_spill] sm:$0xff] %v11428_v8  ;;  %v11430_v56 = vpop.f32.mrb[33].mxu1 }
 0x48d   :  { %14518 = vst [vmem:[#allocation28_spill] sm:$0xff] %v11430_v56  ;;  %v11432_v54 = vpop.f32.mrb[34].mxu1 }
 0x48e   :  { %14519 = vst [vmem:[#allocation29_spill] sm:$0xff] %v11432_v54  ;;  %v11436_v39 = vpop.f32.mrb[35].mxu1 }
 0x48f   :  { %14520 = vst [vmem:[#allocation30_spill] sm:$0xff] %v11436_v39 }
 0x4bb   :  { %v11440_v41 = vpop.f32.mrb[44].mxu0 }
 0x4bc   :  { %v11442_v44 = vpop.f32.mrb[45].mxu0  ;;  %v1351_v57 = vsel %vm728_vm1, %v11440_v41, -inf }
 0x4bd   :  { %v11444_v15 = vpop.f32.mrb[46].mxu0  ;;  %v1345_v47 = vsel %vm728_vm1, %v11442_v44, -inf }
 0x4be   :  { %1346 = vmax.xlane.f32.xlu0 %v1345_v47  ;;  %v11448_v38 = vpop.f32.mrb[47].mxu0  ;;  %v1354_v40 = vsel %vm728_vm1, %v11444_v15, -inf }
 0x4bf   :  { %v1348_v7 = vsel %vm728_vm1, %v11448_v38, -inf }
 0x4c0   :  { %1349 = vmax.xlane.f32.xlu1 %v1348_v7 }
 0x4c2   :  { %1352 = vmax.xlane.f32.xlu0 %v1351_v57 }
 0x4c4   :  { %1355 = vmax.xlane.f32.xlu1 %v1354_v40 }
 0x4c8   :  { %v11456_v17 = vpop.f32.mrb[36].mxu1 }
 0x4c9   :  { %14521 = vst [vmem:[#allocation31_spill] sm:$0xff] %v11456_v17  ;;  %v11458_v20 = vpop.f32.mrb[37].mxu1 }
 0x4ca   :  { %14522 = vst [vmem:[#allocation32_spill] sm:$0xff] %v11458_v20  ;;  %v11460_v19 = vpop.f32.mrb[38].mxu1 }
 0x4cb   :  { %14523 = vst [vmem:[#allocation33_spill] sm:$0xff] %v11460_v19  ;;  %v11464_v29 = vpop.f32.mrb[39].mxu1 }
 0x4cc   :  { %14524 = vst [vmem:[#allocation34_spill] sm:$0xff] %v11464_v29 }
 0x4d0   :  { %v11468_v47 = vpop.f32.mrb[40].mxu1 }
 0x4d1   :  { %v11470_v7 = vpop.f32.mrb[41].mxu1 }
 0x4d2   :  { %v11472_v57 = vpop.f32.mrb[42].mxu1 }
 0x4d3   :  { %v11474_v40 = vpop.f32.mrb[43].mxu1 }
 0x4d5   :  { %1555 = vrot.lane.b32.xlu1 %v11094_v34, %s10885_s20 }
 0x4d8   :  { %v11478_v32 = vpop.f32.mrb[44].mxu1  ;;  %1553 = vrot.lane.b32.xlu0 %v11098_v36, %s10885_s20 }
 0x4d9   :  { %v11482_v45 = vpop.f32.mrb[45].mxu1  ;;  %1557 = vrot.lane.b32.xlu1 %v11118_v62, %s10885_s20 }
 0x4da   :  { %v11486_v30 = vpop.f32.mrb[46].mxu1 }
 0x4db   :  { %v11488_v37 = vpop.f32.mrb[47].mxu1 }
 0x4dc   :  { %1751 = vrot.lane.b32.xlu0 %v11055_v2, %s10881_s0 }
 0x4dd   :  { %1753 = vrot.lane.b32.xlu1 %v11072_v14, %s10881_s0 }
 0x4e0   :  { %1559 = vrot.lane.b32.xlu0 %v11114_v60, %s10885_s20 }
 0x4e1   :  { %1648 = vrot.lane.b32.xlu1 %v11135_v24, %s10885_s20 }
 0x4e4   :  { %1646 = vrot.lane.b32.xlu0 %v11139_v26, %s10885_s20 }
 0x4e5   :  { %1650 = vrot.lane.b32.xlu1 %v11168_v55, %s10885_s20 }
 0x4e8   :  { %1755 = vrot.lane.b32.xlu0 %v11096_v35, %s10881_s0 }
 0x50b   :  { %v1335_v5 = vpop.xlane.xlu0 %1334 }
 0x50c   :  { %v1381_v21 = vsub.f32 %v1189_v12, %v1335_v5 }
 0x50d   :  { %v1338_v11 = vpop.xlane.xlu1 %1337 }
 0x50e   :  { %v1382_v42 = vsub.f32 %v1192_v22, %v1338_v11 }
 0x50f   :  { %v1341_v0 = vpop.xlane.xlu0 %1340 }
 0x510   :  { %v1397_v50 = vpack.c.bf16 %v1382_v42, %v1381_v21  ;;  %v1383_v51 = vsub.f32 %v11418_v4, %v1341_v0 }
 0x512   :  { %v1406_v19 = vmul.bf16 1069105081, %v1397_v50 }
 0x513   :  { %v1344_v53 = vpop.xlane.xlu0 %1343 }
 0x514   :  { %v1384_v17 = vsub.f32 %v11420_v16, %v1344_v53  ;;  %10253 = vpow.bf16 %v1406_v19 }
 0x516   :  { %v1398_v20 = vpack.c.bf16 %v1384_v17, %v1383_v51 }
 0x518   :  { %v1409_v29 = vmul.bf16 1069105081, %v1398_v20 }
 0x51a   :  { %10255 = vpow.bf16 %v1409_v29 }
 0x51f   :  { %v11506_v8 = vpop.eup %10253 }
 0x520   :  { %v1430_v0 = vunpack.c.h.bf16 %v11506_v8  ;;  %v1429_v50 = vunpack.c.l.bf16 %v11506_v8 }
 0x522   :  { %v1448_v51 = vsel %vm728_vm1, %v1430_v0, 0.0  ;;  %v1445_v53 = vsel %vm728_vm1, %v1429_v50, 0.0 }
 0x525   :  { %v11508_v54 = vpop.eup %10255 }
 0x526   :  { %v1431_v56 = vunpack.c.l.bf16 %v11508_v54  ;;  %v1432_v5 = vunpack.c.h.bf16 %v11508_v54 }
 0x528   :  { %v1451_v21 = vsel %vm728_vm1, %v1431_v56, 0.0  ;;  %v1454_v42 = vsel %vm728_vm1, %v1432_v5, 0.0 }
 0x529   :  { %1452 = vadd.xlane.f32.xlu0 %v1451_v21  ;;  %1455 = vadd.xlane.f32.xlu1 %v1454_v42 }
 0x52d   :  { %1449 = vadd.xlane.f32.xlu1 %v1448_v51  ;;  %1446 = vadd.xlane.f32.xlu0 %v1445_v53 }
 0x54b   :  { %v1347_v11 = vpop.xlane.xlu0 %1346 }
 0x54c   :  { %v1385_v12 = vsub.f32 %v11442_v44, %v1347_v11 }
 0x54d   :  { %v1350_v4 = vpop.xlane.xlu1 %1349 }
 0x54e   :  { %v1386_v16 = vsub.f32 %v11448_v38, %v1350_v4 }
 0x54f   :  { %v1353_v22 = vpop.xlane.xlu0 %1352 }
 0x550   :  { %v1399_v56 = vpack.c.bf16 %v1386_v16, %v1385_v12  ;;  %v1387_v20 = vsub.f32 %v11440_v41, %v1353_v22 }
 0x551   :  { %v1356_v17 = vpop.xlane.xlu1 %1355 }
 0x552   :  { %v1388_v19 = vsub.f32 %v11444_v15, %v1356_v17  ;;  %v1412_v29 = vmul.bf16 1069105081, %v1399_v56 }
 0x553   :  { %v1554_v5 = vpop.permute.xlu0 %1553 }
 0x554   :  { %v1400_v21 = vpack.c.bf16 %v1388_v19, %v1387_v20  ;;  %9452 = vmatprep.subr.bf16.mxu1 %v1554_v5  ;;  %10257 = vpow.bf16 %v1412_v29 }
 0x555   :  { %9453 = vmatpush3.bf16.msra.mxu1 %v1554_v5  ;;  %v1556_v42 = vpop.permute.xlu1 %1555 }
 0x556   :  { %v1415_v0 = vmul.bf16 1069105081, %v1400_v21  ;;  %9454 = vmatprep.subr.bf16.mxu1 %v1556_v42 }
 0x557   :  { %v1752_v50 = vpop.permute.xlu0 %1751 }
 0x558   :  { %10259 = vpow.bf16 %v1415_v0  ;;  %9980 = vmatprep.subr.msk.bf16.mxu0 %vm549_vm0, %v1752_v50  ;;  %v1772_v44 = vsel %vm549_vm0, %v1752_v50, 0  ;;  %v1363_v0 = vsel %vm728_vm1, %v11468_v47, -inf  ;;  %v1360_v50 = vsel %vm728_vm1, %v11474_v40, -inf }
 0x559   :  { %9455 = vmatpush3.bf16.msra.mxu1 %v1556_v42  ;;  %9485 = vmatpush3.bf16.xpose.msra.mxu0 %v1772_v44  ;;  %v1558_v41 = vpop.permute.xlu1 %1557  ;;  %v1366_v42 = vsel %vm728_vm1, %v11472_v57, -inf  ;;  %v1357_v44 = vsel %vm728_vm1, %v11470_v7, -inf }
 0x55a   :  { %9456 = vmatprep.subr.bf16.mxu1 %v1558_v41 }
 0x55b   :  { %v1560_v15 = vpop.permute.xlu0 %1559 }
 0x55d   :  { %9457 = vmatpush3.bf16.msra.mxu1 %v1558_v41  ;;  %v1754_v38 = vpop.permute.xlu1 %1753  ;;  %v1375_v41 = vsel %vm728_vm1, %v11478_v32, -inf }
 0x55e   :  { %9458 = vmatprep.subr.bf16.mxu1 %v1560_v15  ;;  %9981 = vmatprep.subr.msk.bf16.mxu0 %vm549_vm0, %v1754_v38  ;;  %v1775_v53 = vsel %vm549_vm0, %v1754_v38, 0 }
 0x55f   :  { %v11525_v51 = vpop.permute.xlu0 %1646  ;;  %v11528_v11 = vpop.eup %10257 }
 0x560   :  { %v1434_v20 = vunpack.c.h.bf16 %v11528_v11  ;;  %v1433_v19 = vunpack.c.l.bf16 %v11528_v11 }
 0x561   :  { %9459 = vmatpush3.bf16.msra.mxu1 %v1560_v15  ;;  %9487 = vmatpush3.bf16.xpose.msra.mxu0 %v1775_v53  ;;  %v1369_v15 = vsel %vm728_vm1, %v11482_v45, -inf  ;;  %v1649_v38 = vpop.permute.xlu1 %1648  ;;  %v1378_v53 = vsel %vm728_vm1, %v11486_v30, -inf }
 0x562   :  { %9468 = vmatprep.subr.bf16.mxu1 %v11525_v51  ;;  %v1460_v5 = vsel %vm728_vm1, %v1434_v20, 0.0  ;;  %v1457_v21 = vsel %vm728_vm1, %v1433_v19, 0.0 }
 0x563   :  { %v11531_v4 = vpop.eup %10259  ;;  %v1756_v12 = vpop.permute.xlu0 %1755 }
 0x564   :  { %9982 = vmatprep.subr.msk.bf16.mxu0 %vm549_vm0, %v1756_v12  ;;  %v1436_v16 = vunpack.c.h.bf16 %v11531_v4  ;;  %v1435_v22 = vunpack.c.l.bf16 %v11531_v4  ;;  %v1778_v29 = vsel %vm549_vm0, %v1756_v12, 0 }
 0x565   :  { %v1651_v12 = vpop.permute.xlu1 %1650 }
 0x566   :  { %v1466_v56 = vsel %vm728_vm1, %v1436_v16, 0.0  ;;  %v1463_v17 = vsel %vm728_vm1, %v1435_v22, 0.0  ;;  %v1372_v16 = vsel %vm728_vm1, %v11488_v37, -inf }
 0x567   :  { %1467 = vadd.xlane.f32.xlu1 %v1466_v56  ;;  %1464 = vadd.xlane.f32.xlu0 %v1463_v17 }
 0x569   :  { %9489 = vmatpush3.bf16.xpose.msra.mxu0 %v1778_v29 }
 0x56b   :  { %1461 = vadd.xlane.f32.xlu1 %v1460_v5  ;;  %1458 = vadd.xlane.f32.xlu0 %v1457_v21 }
 0x56f   :  { %1367 = vmax.xlane.f32.xlu1 %v1366_v42  ;;  %1364 = vmax.xlane.f32.xlu0 %v1363_v0 }
 0x573   :  { %1361 = vmax.xlane.f32.xlu1 %v1360_v50  ;;  %1358 = vmax.xlane.f32.xlu0 %v1357_v44 }
 0x577   :  { %1376 = vmax.xlane.f32.xlu0 %v1375_v41 }
 0x57b   :  { %1370 = vmax.xlane.f32.xlu0 %v1369_v15 }
 0x584   :  { %1757 = vrot.lane.b32.xlu1 %v11116_v61, %s10881_s0 }
 0x588   :  { %1743 = vrot.lane.b32.xlu1 %v11053_v1, %s10881_s0 }
 0x58c   :  { %1745 = vrot.lane.b32.xlu1 %v11070_v13, %s10881_s0 }
 0x591   :  { %1652 = vrot.lane.b32.xlu0 %v11163_v49, %s10885_s20 }
 0x5b0   :  { %1379 = vmax.xlane.f32.xlu1 %v1378_v53 }
 0x5b4   :  { %1373 = vmax.xlane.f32.xlu1 %v1372_v16 }
 0x5b6   :  { %v1453_v22 = vpop.xlane.xlu0 %1452  ;;  %v1456_v56 = vpop.xlane.xlu1 %1455 }
 0x5b7   :  { %v1494_v17 = vpack.c.bf16 %v1456_v56, %v1453_v22 }
 0x5b9   :  { %v1503_v20 = vunpack.c.l.bf16 %v1494_v17  ;;  %v1504_v19 = vunpack.c.h.bf16 %v1494_v17 }
 0x5ba   :  { %v1447_v29 = vpop.xlane.xlu0 %1446  ;;  %v1450_v5 = vpop.xlane.xlu1 %1449 }
 0x5bb   :  { %v1493_v21 = vpack.c.bf16 %v1450_v5, %v1447_v29  ;;  %10261 = vrcp.f32 %v1503_v20 }
 0x5bc   :  { %10263 = vrcp.f32 %v1504_v19 }
 0x5bd   :  { %v1501_v42 = vunpack.c.l.bf16 %v1493_v21  ;;  %v1502_v0 = vunpack.c.h.bf16 %v1493_v21 }
 0x5bf   :  { %10265 = vrcp.f32 %v1501_v42 }
 0x5c0   :  { %10267 = vrcp.f32 %v1502_v0 }
 0x5c5   :  { %1858 = vrot.lane.b32.xlu1 %v11165_v52, %s10881_s0  ;;  %v10262_v50 = vpop.eup %10261 }
 0x5c6   :  { %v10264_v44 = vpop.eup %10263 }
 0x5c7   :  { %v1534_v53 = vpack.c.bf16 %v10264_v44, %v10262_v50 }
 0x5c9   :  { %v10266_v41 = vpop.eup %10265  ;;  %v1542_v56 = vmul.bf16 %v11508_v54, %v1534_v53 }
 0x5ca   :  { %v10268_v15 = vpop.eup %10267 }
 0x5cb   :  { %v1533_v16 = vpack.c.bf16 %v10268_v15, %v10266_v41 }
 0x5cd   :  { %v1541_v22 = vmul.bf16 %v11506_v8, %v1533_v16 }
 0x5cf   :  { %9460 = vmatprep.mubr.msk.bf16.mxu1 %vm728_vm1, %v1541_v22 }
 0x5d0   :  { %9461 = vmatmul.mubr.msk.bf16.vlgmr.msra.gmra.mrb[48].mxu1 %vm728_vm1, %v1542_v56 }
 0x5d1   :  { %9469 = vmatpush3.bf16.msra.mxu1 %v11525_v51 }
 0x5d2   :  { %9470 = vmatprep.subr.bf16.mxu1 %v1649_v38 }
 0x5d5   :  { %9471 = vmatpush3.bf16.msra.mxu1 %v1649_v38 }
 0x5d6   :  { %9472 = vmatprep.subr.bf16.mxu1 %v1651_v12 }
 0x5d9   :  { %9473 = vmatpush3.bf16.msra.mxu1 %v1651_v12 }
 0x5f4   :  { %v1465_v17 = vpop.xlane.xlu0 %1464  ;;  %v1468_v20 = vpop.xlane.xlu1 %1467 }
 0x5f5   :  { %v1496_v19 = vpack.c.bf16 %v1468_v20, %v1465_v17 }
 0x5f7   :  { %v1507_v29 = vunpack.c.l.bf16 %v1496_v19  ;;  %v1508_v5 = vunpack.c.h.bf16 %v1496_v19 }
 0x5f8   :  { %v1459_v21 = vpop.xlane.xlu0 %1458  ;;  %v1462_v42 = vpop.xlane.xlu1 %1461 }
 0x5f9   :  { %v1495_v8 = vpack.c.bf16 %v1462_v42, %v1459_v21  ;;  %10269 = vrcp.f32 %v1507_v29 }
 0x5fa   :  { %10271 = vrcp.f32 %v1508_v5 }
 0x5fb   :  { %v1505_v54 = vunpack.c.l.bf16 %v1495_v8  ;;  %v1506_v0 = vunpack.c.h.bf16 %v1495_v8 }
 0x5fc   :  { %v1365_v50 = vpop.xlane.xlu0 %1364  ;;  %v1368_v44 = vpop.xlane.xlu1 %1367 }
 0x5fd   :  { %10273 = vrcp.f32 %v1505_v54  ;;  %v1391_v51 = vsub.f32 %v11468_v47, %v1365_v50  ;;  %v1392_v38 = vsub.f32 %v11472_v57, %v1368_v44 }
 0x5fe   :  { %10275 = vrcp.f32 %v1506_v0 }
 0x5ff   :  { %v1402_v12 = vpack.c.bf16 %v1392_v38, %v1391_v51 }
 0x600   :  { %v1359_v41 = vpop.xlane.xlu0 %1358  ;;  %v1362_v15 = vpop.xlane.xlu1 %1361 }
 0x601   :  { %v1421_v53 = vmul.bf16 1069105081, %v1402_v12  ;;  %v1389_v16 = vsub.f32 %v11470_v7, %v1359_v41  ;;  %v1390_v22 = vsub.f32 %v11474_v40, %v1362_v15 }
 0x603   :  { %10277 = vpow.bf16 %v1421_v53  ;;  %v1401_v56 = vpack.c.bf16 %v1390_v22, %v1389_v16  ;;  %v10270_v17 = vpop.eup %10269 }
 0x604   :  { %v1377_v20 = vpop.xlane.xlu0 %1376  ;;  %v1758_v19 = vpop.permute.xlu1 %1757 }
 0x605   :  { %v10272_v29 = vpop.eup %10271  ;;  %v1418_v5 = vmul.bf16 1069105081, %v1401_v56  ;;  %9983 = vmatprep.subr.msk.bf16.mxu0 %vm549_vm0, %v1758_v19  ;;  %v1781_v47 = vsel %vm549_vm0, %v1758_v19, 0 }
 0x606   :  { %9491 = vmatpush3.bf16.xpose.msra.mxu0 %v1781_v47  ;;  %v1536_v7 = vpack.c.bf16 %v10272_v29, %v10270_v17  ;;  %v1395_v17 = vsub.f32 %v11478_v32, %v1377_v20 }
 0x607   :  { %v10274_v57 = vpop.eup %10273  ;;  %10279 = vpow.bf16 %v1418_v5 }
 0x608   :  { %v10276_v21 = vpop.eup %10275  ;;  %v1371_v42 = vpop.xlane.xlu0 %1370  ;;  %v1544_v44 = vmul.bf16 %v11531_v4, %v1536_v7 }
 0x609   :  { %v1744_v8 = vpop.permute.xlu1 %1743  ;;  %v1535_v40 = vpack.c.bf16 %v10276_v21, %v10274_v57  ;;  %v1393_v47 = vsub.f32 %v11482_v45, %v1371_v42 }
 0x60a   :  { %9492 = vmatprep.mubr.msk.bf16.mxu0 %vm549_vm0, %v1744_v8 }
 0x60b   :  { %v1543_v54 = vmul.bf16 %v11528_v11, %v1535_v40 }
 0x60c   :  { %v1653_v0 = vpop.permute.xlu0 %1652 }
 0x60d   :  { %v1746_v50 = vpop.permute.xlu1 %1745  ;;  %9464 = vmatprep.mubr.msk.bf16.mxu1 %vm728_vm1, %v1543_v54  ;;  %9474 = vmatprep.subr.bf16.mxu1 %v1653_v0 }
 0x60e   :  { %v11584_v51 = vpop.eup %10277  ;;  %9465 = vmatmul.mubr.msk.bf16.gmra.mrb[52].mxu1 %vm728_vm1, %v1544_v44  ;;  %9493 = vmatmul.mubr.msk.bf16.vlgmr.msra.gmra.mrb[48].mxu0 %vm549_vm0, %v1746_v50 }
 0x60f   :  { %9475 = vmatpush3.bf16.msra.mxu1 %v1653_v0  ;;  %v1440_v38 = vunpack.c.h.bf16 %v11584_v51  ;;  %v1439_v12 = vunpack.c.l.bf16 %v11584_v51 }
 0x611   :  { %v1478_v11 = vsel %vm728_vm1, %v1440_v38, 0.0  ;;  %v1475_v41 = vsel %vm728_vm1, %v1439_v12, 0.0 }
 0x612   :  { %v11592_v15 = vpop.eup %10279  ;;  %1479 = vadd.xlane.f32.xlu1 %v1478_v11  ;;  %1476 = vadd.xlane.f32.xlu0 %v1475_v41 }
 0x613   :  { %v1437_v4 = vunpack.c.l.bf16 %v11592_v15  ;;  %v1438_v16 = vunpack.c.h.bf16 %v11592_v15 }
 0x615   :  { %v1469_v53 = vsel %vm728_vm1, %v1437_v4, 0.0  ;;  %v1472_v22 = vsel %vm728_vm1, %v1438_v16, 0.0 }
 0x616   :  { %1470 = vadd.xlane.f32.xlu1 %v1469_v53 }
 0x61a   :  { %1473 = vadd.xlane.f32.xlu1 %v1472_v22 }
 0x628   :  { %1856 = vrot.lane.b32.xlu0 %v11137_v25, %s10881_s0 }
 0x62b   :  { %1747 = vrot.lane.b32.xlu1 %v11092_v33, %s10881_s0 }
 0x63d   :  { %v1380_v56 = vpop.xlane.xlu1 %1379 }
 0x63e   :  { %v1396_v19 = vsub.f32 %v11486_v30, %v1380_v56 }
 0x640   :  { %v1404_v29 = vpack.c.bf16 %v1396_v19, %v1395_v17 }
 0x641   :  { %v1374_v5 = vpop.xlane.xlu1 %1373 }
 0x642   :  { %v1427_v57 = vmul.bf16 1069105081, %v1404_v29  ;;  %v1394_v21 = vsub.f32 %v11488_v37, %v1374_v5 }
 0x644   :  { %10281 = vpow.bf16 %v1427_v57  ;;  %v1403_v8 = vpack.c.bf16 %v1394_v21, %v1393_v47 }
 0x645   :  { %v1859_v44 = vpop.permute.xlu1 %1858 }
 0x646   :  { %v1424_v7 = vmul.bf16 1069105081, %v1403_v8 }
 0x648   :  { %10283 = vpow.bf16 %v1424_v7 }
 0x64f   :  { %v11606_v40 = vpop.eup %10281 }
 0x650   :  { %v1443_v54 = vunpack.c.l.bf16 %v11606_v40  ;;  %v1444_v32 = vunpack.c.h.bf16 %v11606_v40 }
 0x652   :  { %v1487_v0 = vsel %vm728_vm1, %v1443_v54, 0.0  ;;  %v1490_v20 = vsel %vm728_vm1, %v1444_v32, 0.0 }
 0x653   :  { %v11611_v30 = vpop.eup %10283  ;;  %1488 = vadd.xlane.f32.xlu0 %v1487_v0 }
 0x654   :  { %v1442_v45 = vunpack.c.h.bf16 %v11611_v30  ;;  %v1441_v42 = vunpack.c.l.bf16 %v11611_v30 }
 0x656   :  { %v1484_v37 = vsel %vm728_vm1, %v1442_v45, 0.0  ;;  %v1481_v50 = vsel %vm728_vm1, %v1441_v42, 0.0 }
 0x657   :  { %1491 = vadd.xlane.f32.xlu0 %v1490_v20  ;;  %1485 = vadd.xlane.f32.xlu1 %v1484_v37 }
 0x65b   :  { %1482 = vadd.xlane.f32.xlu0 %v1481_v50 }
 0x668   :  { %1862 = vrot.lane.b32.xlu1 %v11199_v28, %s10881_s0 }
 0x66c   :  { %1850 = vrot.lane.b32.xlu1 %v11161_v48, %s10881_s0 }
 0x670   :  { %1854 = vrot.lane.b32.xlu1 %v11197_v27, %s10881_s0 }
 0x671   :  { %1860 = vrot.lane.b32.xlu0 %v11185_v10, %s10881_s0 }
 0x675   :  { %1749 = vrot.lane.b32.xlu0 %v11112_v59, %s10881_s0 }
 0x679   :  { %1848 = vrot.lane.b32.xlu0 %v11133_v23, %s10881_s0 }
 0x67d   :  { %1852 = vrot.lane.b32.xlu0 %v11183_v9, %s10881_s0 }
 0x69f   :  { %v1477_v38 = vpop.xlane.xlu0 %1476  ;;  %v1480_v12 = vpop.xlane.xlu1 %1479 }
 0x6a0   :  { %v1498_v11 = vpack.c.bf16 %v1480_v12, %v1477_v38  ;;  %v1880_v12 = vsel %vm549_vm0, %v1859_v44, 0 }
 0x6a2   :  { %v1511_v56 = vunpack.c.l.bf16 %v1498_v11  ;;  %v1512_v29 = vunpack.c.h.bf16 %v1498_v11 }
 0x6a3   :  { %v11632_v41 = vpop.f32.mrb[48].mxu1  ;;  %v1857_v4 = vpop.permute.xlu0 %1856 }
 0x6a4   :  { %v11634_v53 = vpop.f32.mrb[49].mxu1  ;;  %v1471_v16 = vpop.xlane.xlu1 %1470  ;;  %9984 = vmatprep.subr.msk.bf16.mxu1 %vm549_vm0, %v1857_v4  ;;  %10285 = vrcp.f32 %v1511_v56  ;;  %v1877_v38 = vsel %vm549_vm0, %v1857_v4, 0 }
 0x6a5   :  { %v11637_v22 = vpop.f32.mrb[50].mxu1  ;;  %10287 = vrcp.f32 %v1512_v29 }
 0x6a6   :  { %v11641_v19 = vpop.f32.mrb[51].mxu1 }
 0x6a8   :  { %v1474_v47 = vpop.xlane.xlu1 %1473 }
 0x6a9   :  { %v1497_v57 = vpack.c.bf16 %v1474_v47, %v1471_v16 }
 0x6ab   :  { %v1509_v21 = vunpack.c.l.bf16 %v1497_v57  ;;  %v1510_v8 = vunpack.c.h.bf16 %v1497_v57 }
 0x6ac   :  { %v1748_v7 = vpop.permute.xlu1 %1747 }
 0x6ad   :  { %10289 = vrcp.f32 %v1509_v21  ;;  %9496 = vmatprep.mubr.msk.bf16.mxu0 %vm549_vm0, %v1748_v7 }
 0x6ae   :  { %10291 = vrcp.f32 %v1510_v8  ;;  %v10286_v54 = vpop.eup %10285 }
 0x6af   :  { %v10288_v0 = vpop.eup %10287 }
 0x6b0   :  { %v1538_v20 = vpack.c.bf16 %v10288_v0, %v10286_v54 }
 0x6b2   :  { %v1546_v50 = vmul.bf16 %v11584_v51, %v1538_v20 }
 0x6b7   :  { %v10290_v32 = vpop.eup %10289 }
 0x6b8   :  { %v10292_v45 = vpop.eup %10291 }
 0x6b9   :  { %v1537_v37 = vpack.c.bf16 %v10292_v45, %v10290_v32 }
 0x6bb   :  { %v1545_v42 = vmul.bf16 %v11592_v15, %v1537_v37 }
 0x6bd   :  { %9476 = vmatprep.mubr.msk.bf16.mxu1 %vm728_vm1, %v1545_v42 }
 0x6be   :  { %9477 = vmatmul.mubr.msk.bf16.vlgmr.msra.gmra.mrb[56].mxu1 %vm728_vm1, %v1546_v50 }
 0x6bf   :  { %9501 = vmatpush3.bf16.xpose.msra.mxu1 %v1877_v38 }
 0x6c0   :  { %9985 = vmatprep.subr.msk.bf16.mxu1 %vm549_vm0, %v1859_v44 }
 0x6c7   :  { %9503 = vmatpush3.bf16.xpose.msra.mxu1 %v1880_v12 }
 0x6e0   :  { %v1489_v11 = vpop.xlane.xlu0 %1488 }
 0x6e1   :  { %v11653_v16 = vpop.f32.mrb[52].mxu1  ;;  %v11655_v56 = vpop.f32.mrb[48].mxu0 }
 0x6e2   :  { %v11657_v15 = vpop.f32.mrb[53].mxu1  ;;  %v1817_v51 = vpop.f32.mrb[49].mxu0  ;;  %v1959_v32 = vsel %vm728_vm1, %v11655_v56, -inf }
 0x6e3   :  { %14525 = vst [vmem:[#allocation35_spill] sm:$0xff] %v11657_v15  ;;  %v11659_v29 = vpop.f32.mrb[54].mxu1  ;;  %v11661_v47 = vpop.f32.mrb[50].mxu0  ;;  %v1953_v4 = vsel %vm728_vm1, %v1817_v51, -inf }
 0x6e4   :  { %v11666_v21 = vpop.f32.mrb[55].mxu1  ;;  %v1820_v44 = vpop.f32.mrb[51].mxu0  ;;  %1954 = vmax.xlane.f32.xlu0 %v1953_v4  ;;  %v1962_v38 = vsel %vm728_vm1, %v11661_v47, -inf }
 0x6e5   :  { %v1492_v7 = vpop.xlane.xlu0 %1491  ;;  %v1956_v54 = vsel %vm728_vm1, %v1820_v44, -inf  ;;  %v1486_v37 = vpop.xlane.xlu1 %1485 }
 0x6e6   :  { %v1500_v0 = vpack.c.bf16 %v1492_v7, %v1489_v11  ;;  %1957 = vmax.xlane.f32.xlu1 %v1956_v54 }
 0x6e8   :  { %v1515_v45 = vunpack.c.l.bf16 %v1500_v0  ;;  %v1516_v20 = vunpack.c.h.bf16 %v1500_v0  ;;  %1960 = vmax.xlane.f32.xlu0 %v1959_v32 }
 0x6e9   :  { %v1483_v42 = vpop.xlane.xlu0 %1482  ;;  %v1863_v7 = vpop.permute.xlu1 %1862 }
 0x6ea   :  { %v1499_v50 = vpack.c.bf16 %v1486_v37, %v1483_v42  ;;  %10293 = vrcp.f32 %v1515_v45  ;;  %v1886_v45 = vsel %vm549_vm0, %v1863_v7, 0 }
 0x6eb   :  { %10295 = vrcp.f32 %v1516_v20 }
 0x6ec   :  { %v1513_v12 = vunpack.c.l.bf16 %v1499_v50  ;;  %v1514_v4 = vunpack.c.h.bf16 %v1499_v50  ;;  %1963 = vmax.xlane.f32.xlu0 %v1962_v38 }
 0x6ed   :  { %v1861_v8 = vpop.permute.xlu0 %1860 }
 0x6ee   :  { %10297 = vrcp.f32 %v1513_v12  ;;  %9986 = vmatprep.subr.msk.bf16.mxu1 %vm549_vm0, %v1861_v8  ;;  %v1883_v11 = vsel %vm549_vm0, %v1861_v8, 0 }
 0x6ef   :  { %10299 = vrcp.f32 %v1514_v4  ;;  %9505 = vmatpush3.bf16.xpose.msra.mxu1 %v1883_v11  ;;  %v1851_v4 = vpop.permute.xlu1 %1850 }
 0x6f0   :  { %9987 = vmatprep.subr.msk.bf16.mxu1 %vm549_vm0, %v1863_v7 }
 0x6f1   :  { %v1750_v54 = vpop.permute.xlu0 %1749 }
 0x6f2   :  { %9497 = vmatmul.mubr.msk.bf16.gmra.mrb[52].mxu0 %vm549_vm0, %v1750_v54 }
 0x6f3   :  { %v1855_v7 = vpop.permute.xlu1 %1854 }
 0x6f4   :  { %v10294_v0 = vpop.eup %10293 }
 0x6f5   :  { %v10296_v32 = vpop.eup %10295  ;;  %v1849_v12 = vpop.permute.xlu0 %1848 }
 0x6f6   :  { %v1540_v42 = vpack.c.bf16 %v10296_v32, %v10294_v0 }
 0x6f7   :  { %9507 = vmatpush3.bf16.xpose.msra.mxu1 %v1886_v45 }
 0x6f8   :  { %v10298_v20 = vpop.eup %10297  ;;  %v1548_v8 = vmul.bf16 %v11606_v40, %v1540_v42 }
 0x6f9   :  { %v10300_v37 = vpop.eup %10299  ;;  %v1853_v11 = vpop.permute.xlu0 %1852 }
 0x6fa   :  { %v1539_v50 = vpack.c.bf16 %v10300_v37, %v10298_v20 }
 0x6fc   :  { %v1547_v38 = vmul.bf16 %v11611_v30, %v1539_v50 }
 0x6fe   :  { %9480 = vmatprep.mubr.msk.bf16.mxu1 %vm728_vm1, %v1547_v38 }
 0x6ff   :  { %9481 = vmatmul.mubr.msk.bf16.gmra.mrb[60].mxu1 %vm728_vm1, %v1548_v8 }
 0x700   :  { %9508 = vmatprep.mubr.msk.bf16.mxu1 %vm549_vm0, %v1849_v12 }
 0x707   :  { %9509 = vmatmul.mubr.msk.bf16.vlgmr.msra.gmra.mrb[64].mxu1 %vm549_vm0, %v1851_v4 }
 0x708   :  { %9512 = vmatprep.mubr.msk.bf16.mxu1 %vm549_vm0, %v1853_v11 }
 0x70f   :  { %9513 = vmatmul.mubr.msk.bf16.gmra.mrb[68].mxu1 %vm549_vm0, %v1855_v7 }
 0x771   :  { %v1955_v54 = vpop.xlane.xlu0 %1954 }
 0x772   :  { %v2001_v0 = vsub.f32 %v1817_v51, %v1955_v54 }
 0x773   :  { %v1958_v30 = vpop.xlane.xlu1 %1957 }
 0x774   :  { %v2002_v40 = vsub.f32 %v1820_v44, %v1958_v30 }
 0x775   :  { %v1961_v32 = vpop.xlane.xlu0 %1960 }
 0x776   :  { %v2017_v45 = vpack.c.bf16 %v2002_v40, %v2001_v0  ;;  %v2003_v37 = vsub.f32 %v11655_v56, %v1961_v32 }
 0x778   :  { %v2026_v44 = vmul.bf16 1069105081, %v2017_v45 }
 0x779   :  { %v1964_v20 = vpop.xlane.xlu0 %1963 }
 0x77a   :  { %v2004_v42 = vsub.f32 %v11661_v47, %v1964_v20  ;;  %10301 = vpow.bf16 %v2026_v44 }
 0x77c   :  { %v2018_v50 = vpack.c.bf16 %v2004_v42, %v2003_v37 }
 0x77e   :  { %v2029_v56 = vmul.bf16 1069105081, %v2018_v50 }
 0x780   :  { %10303 = vpow.bf16 %v2029_v56 }
 0x785   :  { %v11703_v0 = vpop.eup %10301 }
 0x786   :  { %v2049_v37 = vunpack.c.l.bf16 %v11703_v0  ;;  %v2050_v50 = vunpack.c.h.bf16 %v11703_v0 }
 0x788   :  { %v2065_v44 = vsel %vm728_vm1, %v2049_v37, 0.0 }
 0x78b   :  { %v11708_v45 = vpop.eup %10303 }
 0x78c   :  { %v2051_v56 = vunpack.c.l.bf16 %v11708_v45 }
 0x791   :  { %v11690_v38 = vpop.f32.mrb[56].mxu1 }
 0x792   :  { %14526 = vst [vmem:[#allocation36_spill] sm:$0xff] %v11690_v38  ;;  %v11692_v8 = vpop.f32.mrb[57].mxu1 }
 0x793   :  { %14527 = vst [vmem:[#allocation37_spill] sm:$0xff] %v11692_v8  ;;  %v11694_v12 = vpop.f32.mrb[58].mxu1 }
 0x794   :  { %14528 = vst [vmem:[#allocation38_spill] sm:$0xff] %v11694_v12  ;;  %v11698_v11 = vpop.f32.mrb[59].mxu1 }
 0x795   :  { %14529 = vst [vmem:[#allocation39_spill] sm:$0xff] %v11698_v11 }
 0x7c5   :  { %v9498_v47 = vpop.f32.mrb[52].mxu0 }
 0x7c6   :  { %v1833_v7 = vpop.f32.mrb[53].mxu0  ;;  %v1971_v20 = vsel %vm728_vm1, %v9498_v47, -inf }
 0x7c7   :  { %v9499_v54 = vpop.f32.mrb[54].mxu0  ;;  %v1965_v30 = vsel %vm728_vm1, %v1833_v7, -inf }
 0x7c8   :  { %1966 = vmax.xlane.f32.xlu0 %v1965_v30  ;;  %v1836_v40 = vpop.f32.mrb[55].mxu0  ;;  %v1974_v42 = vsel %vm728_vm1, %v9499_v54, -inf  ;;  %v2068_v30 = vsel %vm728_vm1, %v2050_v50, 0.0 }
 0x7c9   :  { %v1968_v32 = vsel %vm728_vm1, %v1836_v40, -inf }
 0x7ca   :  { %1969 = vmax.xlane.f32.xlu1 %v1968_v32  ;;  %v2052_v32 = vunpack.c.h.bf16 %v11708_v45 }
 0x7cc   :  { %1972 = vmax.xlane.f32.xlu0 %v1971_v20  ;;  %v2071_v20 = vsel %vm728_vm1, %v2051_v56, 0.0 }
 0x7ce   :  { %1975 = vmax.xlane.f32.xlu1 %v1974_v42 }
 0x7d0   :  { %2066 = vadd.xlane.f32.xlu0 %v2065_v44  ;;  %v2074_v44 = vsel %vm728_vm1, %v2052_v32, 0.0 }
 0x7d2   :  { %v11716_v51 = vpop.f32.mrb[60].mxu1  ;;  %2069 = vadd.xlane.f32.xlu1 %v2068_v30 }
 0x7d3   :  { %14530 = vst [vmem:[#allocation40_spill] sm:$0xff] %v11716_v51  ;;  %v11718_v4 = vpop.f32.mrb[61].mxu1 }
 0x7d4   :  { %14531 = vst [vmem:[#allocation41_spill] sm:$0xff] %v11718_v4  ;;  %v11721_v57 = vpop.f32.mrb[62].mxu1  ;;  %2072 = vadd.xlane.f32.xlu0 %v2071_v20 }
 0x7d5   :  { %14532 = vst [vmem:[#allocation42_spill] sm:$0xff] %v11721_v57  ;;  %v11725_v42 = vpop.f32.mrb[63].mxu1 }
 0x7d6   :  { %14533 = vst [vmem:[#allocation43_spill] sm:$0xff] %v11725_v42  ;;  %2075 = vadd.xlane.f32.xlu1 %v2074_v44 }
 0x7da   :  { %v11730_v17 = vpop.f32.mrb[64].mxu1 }
 0x7db   :  { %v11732_v30 = vpop.f32.mrb[65].mxu1 }
 0x7dc   :  { %v11734_v5 = vpop.f32.mrb[66].mxu1 }
 0x7dd   :  { %v11736_v56 = vpop.f32.mrb[67].mxu1 }
 0x7e2   :  { %v11738_v20 = vpop.f32.mrb[68].mxu1 }
 0x7e3   :  { %v11740_v39 = vpop.f32.mrb[69].mxu1 }
 0x7e4   :  { %v11742_v37 = vpop.f32.mrb[70].mxu1 }
 0x7e5   :  { %v11744_v51 = vpop.f32.mrb[71].mxu1 }
 0x7e7   :  { %2171 = vrot.lane.b32.xlu1 %v11094_v34, %s10881_s0 }
 0x7ea   :  { %2169 = vrot.lane.b32.xlu0 %v11098_v36, %s10881_s0 }
 0x7eb   :  { %2173 = vrot.lane.b32.xlu1 %v11118_v62, %s10881_s0 }
 0x855   :  { %v1967_v32 = vpop.xlane.xlu0 %1966 }
 0x856   :  { %v2005_v50 = vsub.f32 %v1833_v7, %v1967_v32  ;;  %v1983_v32 = vsel %vm728_vm1, %v11730_v17, -inf }
 0x857   :  { %v1970_v44 = vpop.xlane.xlu1 %1969 }
 0x858   :  { %v2006_v4 = vsub.f32 %v1836_v40, %v1970_v44  ;;  %v1977_v44 = vsel %vm728_vm1, %v11732_v30, -inf }
 0x859   :  { %v1973_v42 = vpop.xlane.xlu0 %1972 }
 0x85a   :  { %v2019_v57 = vpack.c.bf16 %v2006_v4, %v2005_v50  ;;  %v2007_v46 = vsub.f32 %v9498_v47, %v1973_v42  ;;  %v1980_v42 = vsel %vm728_vm1, %v11736_v56, -inf }
 0x85b   :  { %v1976_v43 = vpop.xlane.xlu1 %1975 }
 0x85c   :  { %v2032_v58 = vmul.bf16 1069105081, %v2019_v57  ;;  %v2008_v63 = vsub.f32 %v9499_v54, %v1976_v43 }
 0x85d   :  { %v2067_v18 = vpop.xlane.xlu0 %2066 }
 0x85e   :  { %10305 = vpow.bf16 %v2032_v58  ;;  %v2020_v3 = vpack.c.bf16 %v2008_v63, %v2007_v46 }
 0x85f   :  { %v2070_v31 = vpop.xlane.xlu1 %2069 }
 0x860   :  { %v2035_v6 = vmul.bf16 1069105081, %v2020_v3  ;;  %v2113_v8 = vpack.c.bf16 %v2070_v31, %v2067_v18 }
 0x861   :  { %v11752_v11 = vpop.xlane.xlu0 %2072 }
 0x862   :  { %10307 = vpow.bf16 %v2035_v6  ;;  %v2121_v38 = vunpack.c.l.bf16 %v2113_v8  ;;  %v2122_v12 = vunpack.c.h.bf16 %v2113_v8 }
 0x863   :  { %v2076_v15 = vpop.xlane.xlu1 %2075 }
 0x864   :  { %10309 = vrcp.f32 %v2121_v38 }
 0x865   :  { %10311 = vrcp.f32 %v2122_v12  ;;  %v2170_v7 = vpop.permute.xlu0 %2169  ;;  %v1986_v12 = vsel %vm728_vm1, %v11734_v5, -inf }
 0x866   :  { %9516 = vmatprep.subr.bf16.mxu0 %v2170_v7 }
 0x867   :  { %9517 = vmatpush3.bf16.msra.mxu0 %v2170_v7  ;;  %v2172_v57 = vpop.permute.xlu1 %2171  ;;  %v1989_v7 = vsel %vm728_vm1, %v11740_v39, -inf }
 0x868   :  { %9518 = vmatprep.subr.bf16.mxu0 %v2172_v57 }
 0x869   :  { %v11754_v43 = vpop.eup %10305 }
 0x86a   :  { %v2054_v46 = vunpack.c.h.bf16 %v11754_v43  ;;  %v2053_v3 = vunpack.c.l.bf16 %v11754_v43 }
 0x86b   :  { %9519 = vmatpush3.bf16.msra.mxu0 %v2172_v57  ;;  %v2174_v18 = vpop.permute.xlu1 %2173  ;;  %v1998_v57 = vsel %vm728_vm1, %v11742_v37, -inf }
 0x86c   :  { %9520 = vmatprep.subr.bf16.mxu0 %v2174_v18  ;;  %v2080_v31 = vsel %vm728_vm1, %v2054_v46, 0.0  ;;  %v2077_v6 = vsel %vm728_vm1, %v2053_v3, 0.0  ;;  %v1992_v46 = vsel %vm728_vm1, %v11744_v51, -inf }
 0x86d   :  { %v11760_v58 = vpop.eup %10307  ;;  %2081 = vadd.xlane.f32.xlu0 %v2080_v31  ;;  %2078 = vadd.xlane.f32.xlu1 %v2077_v6 }
 0x86e   :  { %v10310_v63 = vpop.eup %10309  ;;  %v2055_v38 = vunpack.c.l.bf16 %v11760_v58  ;;  %v2056_v54 = vunpack.c.h.bf16 %v11760_v58 }
 0x86f   :  { %v10312_v8 = vpop.eup %10311  ;;  %9521 = vmatpush3.bf16.msra.mxu0 %v2174_v18 }
 0x870   :  { %v2083_v4 = vsel %vm728_vm1, %v2055_v38, 0.0  ;;  %v2153_v47 = vpack.c.bf16 %v10312_v8, %v10310_v63  ;;  %v2086_v50 = vsel %vm728_vm1, %v2056_v54, 0.0 }
 0x871   :  { %1987 = vmax.xlane.f32.xlu1 %v1986_v12  ;;  %2084 = vadd.xlane.f32.xlu0 %v2083_v4 }
 0x872   :  { %v2161_v40 = vmul.bf16 %v11703_v0, %v2153_v47  ;;  %v1995_v0 = vsel %vm728_vm1, %v11738_v20, -inf }
 0x874   :  { %9524 = vmatprep.mubr.msk.bf16.mxu0 %vm728_vm1, %v2161_v40 }
 0x875   :  { %1981 = vmax.xlane.f32.xlu1 %v1980_v42  ;;  %2087 = vadd.xlane.f32.xlu0 %v2086_v50 }
 0x879   :  { %1984 = vmax.xlane.f32.xlu0 %v1983_v32 }
 0x87d   :  { %1978 = vmax.xlane.f32.xlu0 %v1977_v44 }
 0x881   :  { %1996 = vmax.xlane.f32.xlu0 %v1995_v0 }
 0x885   :  { %1990 = vmax.xlane.f32.xlu0 %v1989_v7 }
 0x886   :  { %2175 = vrot.lane.b32.xlu1 %v11114_v60, %s10881_s0 }
 0x89b   :  { %2365 = vrot.lane.b32.xlu0 %v11072_v14, %s10886_s21 }
 0x89f   :  { %2264 = vrot.lane.b32.xlu0 %v11163_v49, %s10881_s0 }
 0x8a3   :  { %2468 = vrot.lane.b32.xlu0 %v11137_v25, %s10886_s21 }
 0x8aa   :  { %1999 = vmax.xlane.f32.xlu1 %v1998_v57 }
 0x8ae   :  { %1993 = vmax.xlane.f32.xlu1 %v1992_v46 }
 0x8bf   :  { %2363 = vrot.lane.b32.xlu1 %v11055_v2, %s10886_s21  ;;  %v2114_v2 = vpack.c.bf16 %v2076_v15, %v11752_v11 }
 0x8c1   :  { %v2123_v14 = vunpack.c.l.bf16 %v2114_v2 }
 0x8c3   :  { %2258 = vrot.lane.b32.xlu1 %v11139_v26, %s10881_s0  ;;  %10313 = vrcp.f32 %v2123_v14 }
 0x8c7   :  { %2260 = vrot.lane.b32.xlu1 %v11135_v24, %s10881_s0 }
 0x8cb   :  { %2367 = vrot.lane.b32.xlu1 %v11096_v35, %s10886_s21  ;;  %v2124_v35 = vunpack.c.h.bf16 %v2114_v2 }
 0x8cd   :  { %10315 = vrcp.f32 %v2124_v35 }
 0x8cf   :  { %2262 = vrot.lane.b32.xlu1 %v11168_v55, %s10881_s0 }
 0x8d3   :  { %2369 = vrot.lane.b32.xlu1 %v11116_v61, %s10886_s21 }
 0x8d7   :  { %2355 = vrot.lane.b32.xlu1 %v11053_v1, %s10886_s21 }
 0x8db   :  { %2357 = vrot.lane.b32.xlu1 %v11070_v13, %s10886_s21  ;;  %v10314_v13 = vpop.eup %10313 }
 0x8df   :  { %2470 = vrot.lane.b32.xlu1 %v11165_v52, %s10886_s21  ;;  %v10316_v52 = vpop.eup %10315 }
 0x8e0   :  { %v2154_v8 = vpack.c.bf16 %v10316_v52, %v10314_v13 }
 0x8e2   :  { %v2162_v42 = vmul.bf16 %v11708_v45, %v2154_v8 }
 0x8e3   :  { %2361 = vrot.lane.b32.xlu1 %v11112_v59, %s10886_s21 }
 0x8fa   :  { %v2082_v25 = vpop.xlane.xlu0 %2081  ;;  %v2079_v61 = vpop.xlane.xlu1 %2078 }
 0x8fb   :  { %v2115_v3 = vpack.c.bf16 %v2082_v25, %v2079_v61 }
 0x8fd   :  { %v2125_v18 = vunpack.c.l.bf16 %v2115_v3  ;;  %v2126_v1 = vunpack.c.h.bf16 %v2115_v3 }
 0x8fe   :  { %v2085_v31 = vpop.xlane.xlu0 %2084  ;;  %v1988_v6 = vpop.xlane.xlu1 %1987 }
 0x8ff   :  { %10317 = vrcp.f32 %v2125_v18  ;;  %v2012_v47 = vsub.f32 %v11734_v5, %v1988_v6 }
 0x900   :  { %10319 = vrcp.f32 %v2126_v1 }
 0x902   :  { %v2088_v63 = vpop.xlane.xlu0 %2087  ;;  %v1982_v38 = vpop.xlane.xlu1 %1981 }
 0x903   :  { %v2116_v59 = vpack.c.bf16 %v2088_v63, %v2085_v31  ;;  %v2010_v0 = vsub.f32 %v11736_v56, %v1982_v38 }
 0x905   :  { %v2127_v15 = vunpack.c.l.bf16 %v2116_v59  ;;  %v2128_v11 = vunpack.c.h.bf16 %v2116_v59 }
 0x906   :  { %v1985_v12 = vpop.xlane.xlu0 %1984  ;;  %v2176_v4 = vpop.permute.xlu1 %2175 }
 0x907   :  { %10321 = vrcp.f32 %v2127_v15  ;;  %v2011_v54 = vsub.f32 %v11730_v17, %v1985_v12  ;;  %9522 = vmatprep.subr.bf16.mxu0 %v2176_v4 }
 0x908   :  { %10323 = vrcp.f32 %v2128_v11  ;;  %9523 = vmatpush3.bf16.msra.mxu0 %v2176_v4 }
 0x909   :  { %v10318_v40 = vpop.eup %10317  ;;  %v2022_v50 = vpack.c.bf16 %v2012_v47, %v2011_v54 }
 0x90a   :  { %v10320_v32 = vpop.eup %10319  ;;  %v1979_v44 = vpop.xlane.xlu0 %1978 }
 0x90b   :  { %v2041_v7 = vmul.bf16 1069105081, %v2022_v50  ;;  %v2009_v57 = vsub.f32 %v11732_v30, %v1979_v44  ;;  %9525 = vmatmul.mubr.msk.bf16.vlgmr.msra.gmra.mrb[56].mxu0 %vm728_vm1, %v2162_v42  ;;  %v2155_v5 = vpack.c.bf16 %v10320_v32, %v10318_v40 }
 0x90d   :  { %10325 = vpow.bf16 %v2041_v7  ;;  %v2021_v46 = vpack.c.bf16 %v2010_v0, %v2009_v57  ;;  %v2163_v17 = vmul.bf16 %v11754_v43, %v2155_v5 }
 0x90e   :  { %v1997_v13 = vpop.xlane.xlu0 %1996 }
 0x90f   :  { %v2038_v2 = vmul.bf16 1069105081, %v2021_v46  ;;  %9528 = vmatprep.mubr.msk.bf16.mxu0 %vm728_vm1, %v2163_v17  ;;  %v2015_v63 = vsub.f32 %v11738_v20, %v1997_v13 }
 0x911   :  { %v10322_v14 = vpop.eup %10321  ;;  %10327 = vpow.bf16 %v2038_v2 }
 0x912   :  { %v10324_v45 = vpop.eup %10323  ;;  %v1991_v59 = vpop.xlane.xlu0 %1990 }
 0x913   :  { %v2156_v35 = vpack.c.bf16 %v10324_v45, %v10322_v14  ;;  %v2013_v11 = vsub.f32 %v11740_v39, %v1991_v59 }
 0x915   :  { %v2164_v25 = vmul.bf16 %v11760_v58, %v2156_v35 }
 0x917   :  { %9529 = vmatmul.mubr.msk.bf16.gmra.mrb[60].mxu0 %vm728_vm1, %v2164_v25 }
 0x918   :  { %v11823_v56 = vpop.eup %10325 }
 0x919   :  { %v2059_v30 = vunpack.c.l.bf16 %v11823_v56  ;;  %v2060_v3 = vunpack.c.h.bf16 %v11823_v56 }
 0x91b   :  { %v2095_v61 = vsel %vm728_vm1, %v2059_v30, 0.0  ;;  %v2098_v18 = vsel %vm728_vm1, %v2060_v3, 0.0 }
 0x91c   :  { %v11828_v43 = vpop.eup %10327  ;;  %2096 = vadd.xlane.f32.xlu0 %v2095_v61 }
 0x91d   :  { %v2057_v1 = vunpack.c.l.bf16 %v11828_v43  ;;  %v2058_v31 = vunpack.c.h.bf16 %v11828_v43 }
 0x91f   :  { %v2089_v58 = vsel %vm728_vm1, %v2057_v1, 0.0  ;;  %v2092_v6 = vsel %vm728_vm1, %v2058_v31, 0.0 }
 0x920   :  { %2099 = vadd.xlane.f32.xlu0 %v2098_v18 }
 0x924   :  { %2090 = vadd.xlane.f32.xlu0 %v2089_v58 }
 0x928   :  { %2093 = vadd.xlane.f32.xlu0 %v2092_v6 }
 0x937   :  { %v2000_v52 = vpop.xlane.xlu1 %1999 }
 0x938   :  { %v2016_v38 = vsub.f32 %v11742_v37, %v2000_v52  ;;  %v2366_v37 = vpop.permute.xlu0 %2365 }
 0x939   :  { %v2387_v42 = vsel %vm549_vm0, %v2366_v37, 0 }
 0x93a   :  { %v2024_v8 = vpack.c.bf16 %v2016_v38, %v2015_v63 }
 0x93b   :  { %v1994_v15 = vpop.xlane.xlu1 %1993 }
 0x93c   :  { %v2047_v12 = vmul.bf16 1069105081, %v2024_v8  ;;  %v2014_v4 = vsub.f32 %v11744_v51, %v1994_v15  ;;  %v2265_v57 = vpop.permute.xlu0 %2264 }
 0x93e   :  { %10329 = vpow.bf16 %v2047_v12  ;;  %v2023_v47 = vpack.c.bf16 %v2014_v4, %v2013_v11  ;;  %2359 = vrot.lane.b32.xlu0 %v11092_v33, %s10886_s21 }
 0x93f   :  { %v2364_v54 = vpop.permute.xlu1 %2363 }
 0x940   :  { %v2044_v40 = vmul.bf16 1069105081, %v2023_v47  ;;  %9988 = vmatprep.subr.msk.bf16.mxu0 %vm549_vm0, %v2364_v54  ;;  %v2384_v20 = vsel %vm549_vm0, %v2364_v54, 0  ;;  %v2469_v14 = vpop.permute.xlu0 %2468 }
 0x941   :  { %9549 = vmatpush3.bf16.xpose.msra.mxu0 %v2384_v20  ;;  %v2489_v54 = vsel %vm549_vm0, %v2469_v14, 0 }
 0x942   :  { %10331 = vpow.bf16 %v2044_v40  ;;  %9989 = vmatprep.subr.msk.bf16.mxu0 %vm549_vm0, %v2366_v37 }
 0x943   :  { %v2259_v39 = vpop.permute.xlu1 %2258 }
 0x944   :  { %9532 = vmatprep.subr.bf16.mxu1 %v2259_v39 }
 0x945   :  { %9533 = vmatpush3.bf16.msra.mxu1 %v2259_v39 }
 0x947   :  { %v2261_v51 = vpop.permute.xlu1 %2260 }
 0x948   :  { %9534 = vmatprep.subr.bf16.mxu1 %v2261_v51 }
 0x949   :  { %v11845_v50 = vpop.eup %10329  ;;  %9535 = vmatpush3.bf16.msra.mxu1 %v2261_v51  ;;  %9551 = vmatpush3.bf16.xpose.msra.mxu0 %v2387_v42 }
 0x94a   :  { %v2064_v33 = vunpack.c.h.bf16 %v11845_v50  ;;  %v2063_v35 = vunpack.c.l.bf16 %v11845_v50 }
 0x94b   :  { %v2368_v32 = vpop.permute.xlu1 %2367 }
 0x94c   :  { %9990 = vmatprep.subr.msk.bf16.mxu0 %vm549_vm0, %v2368_v32  ;;  %v2110_v44 = vsel %vm728_vm1, %v2064_v33, 0.0  ;;  %v2390_v17 = vsel %vm549_vm0, %v2368_v32, 0  ;;  %v2107_v30 = vsel %vm728_vm1, %v2063_v35, 0.0 }
 0x94d   :  { %v11850_v0 = vpop.eup %10331  ;;  %2111 = vadd.xlane.f32.xlu1 %v2110_v44 }
 0x94e   :  { %v2061_v7 = vunpack.c.l.bf16 %v11850_v0  ;;  %v2062_v61 = vunpack.c.h.bf16 %v11850_v0 }
 0x94f   :  { %v2263_v5 = vpop.permute.xlu1 %2262 }
 0x950   :  { %9536 = vmatprep.subr.bf16.mxu1 %v2263_v5  ;;  %v2101_v46 = vsel %vm728_vm1, %v2061_v7, 0.0  ;;  %v2104_v18 = vsel %vm728_vm1, %v2062_v61, 0.0 }
 0x951   :  { %2102 = vadd.xlane.f32.xlu1 %v2101_v46  ;;  %9537 = vmatpush3.bf16.msra.mxu1 %v2263_v5 }
 0x952   :  { %9553 = vmatpush3.bf16.xpose.msra.mxu0 %v2390_v17  ;;  %9538 = vmatprep.subr.bf16.mxu1 %v2265_v57 }
 0x953   :  { %v2370_v2 = vpop.permute.xlu1 %2369 }
 0x954   :  { %9991 = vmatprep.subr.msk.bf16.mxu0 %vm549_vm0, %v2370_v2  ;;  %v2393_v25 = vsel %vm549_vm0, %v2370_v2, 0 }
 0x955   :  { %9539 = vmatpush3.bf16.msra.mxu1 %v2265_v57 }
 0x956   :  { %9992 = vmatprep.subr.msk.bf16.mxu1 %vm549_vm0, %v2469_v14 }
 0x957   :  { %v2356_v45 = vpop.permute.xlu1 %2355 }
 0x958   :  { %9556 = vmatprep.mubr.msk.bf16.mxu0 %vm549_vm0, %v2356_v45 }
 0x95a   :  { %9555 = vmatpush3.bf16.xpose.msra.mxu0 %v2393_v25 }
 0x95b   :  { %v2358_v3 = vpop.permute.xlu1 %2357 }
 0x95d   :  { %2108 = vadd.xlane.f32.xlu0 %v2107_v30 }
 0x95f   :  { %v2471_v13 = vpop.permute.xlu1 %2470 }
 0x960   :  { %v2492_v40 = vsel %vm549_vm0, %v2471_v13, 0 }
 0x961   :  { %9557 = vmatmul.mubr.msk.bf16.vlgmr.msra.gmra.mrb[64].mxu0 %vm549_vm0, %v2358_v3  ;;  %2105 = vadd.xlane.f32.xlu0 %v2104_v18 }
 0x962   :  { %2474 = vrot.lane.b32.xlu1 %v11199_v28, %s10886_s21 }
 0x963   :  { %v2362_v59 = vpop.permute.xlu1 %2361 }
 0x966   :  { %2462 = vrot.lane.b32.xlu1 %v11161_v48, %s10886_s21 }
 0x96a   :  { %2466 = vrot.lane.b32.xlu1 %v11197_v27, %s10886_s21 }
 0x977   :  { %2472 = vrot.lane.b32.xlu0 %v11185_v10, %s10886_s21 }
 0x97b   :  { %2460 = vrot.lane.b32.xlu0 %v11133_v23, %s10886_s21 }
 0x97f   :  { %2464 = vrot.lane.b32.xlu0 %v11183_v9, %s10886_s21 }
 0x9a9   :  { %v2097_v1 = vpop.xlane.xlu0 %2096 }
 0x9ad   :  { %v2100_v58 = vpop.xlane.xlu0 %2099 }
 0x9ae   :  { %v2118_v31 = vpack.c.bf16 %v2100_v58, %v2097_v1 }
 0x9b0   :  { %v2131_v28 = vunpack.c.l.bf16 %v2118_v31  ;;  %v2132_v52 = vunpack.c.h.bf16 %v2118_v31 }
 0x9b1   :  { %v2091_v6 = vpop.xlane.xlu0 %2090 }
 0x9b2   :  { %10333 = vrcp.f32 %v2131_v28 }
 0x9b3   :  { %10335 = vrcp.f32 %v2132_v52 }
 0x9b5   :  { %v2094_v48 = vpop.xlane.xlu0 %2093 }
 0x9b6   :  { %v2117_v63 = vpack.c.bf16 %v2094_v48, %v2091_v6 }
 0x9b8   :  { %v2129_v27 = vunpack.c.l.bf16 %v2117_v63  ;;  %v2130_v38 = vunpack.c.h.bf16 %v2117_v63 }
 0x9b9   :  { %v2360_v10 = vpop.permute.xlu0 %2359 }
 0x9ba   :  { %10337 = vrcp.f32 %v2129_v27  ;;  %9560 = vmatprep.mubr.msk.bf16.mxu0 %vm549_vm0, %v2360_v10 }
 0x9bb   :  { %10339 = vrcp.f32 %v2130_v38  ;;  %9561 = vmatmul.mubr.msk.bf16.gmra.mrb[68].mxu0 %vm549_vm0, %v2362_v59 }
 0x9bc   :  { %v10334_v23 = vpop.eup %10333 }
 0x9bd   :  { %v10336_v9 = vpop.eup %10335 }
 0x9be   :  { %v2158_v11 = vpack.c.bf16 %v10336_v9, %v10334_v23 }
 0x9c0   :  { %v2166_v47 = vmul.bf16 %v11823_v56, %v2158_v11 }
 0x9c4   :  { %v10338_v8 = vpop.eup %10337 }
 0x9c5   :  { %v10340_v15 = vpop.eup %10339 }
 0x9c6   :  { %v2157_v12 = vpack.c.bf16 %v10340_v15, %v10338_v8 }
 0x9c8   :  { %v2165_v4 = vmul.bf16 %v11828_v43, %v2157_v12 }
 0x9ca   :  { %9540 = vmatprep.mubr.msk.bf16.mxu1 %vm728_vm1, %v2165_v4 }
 0x9cb   :  { %9541 = vmatmul.mubr.msk.bf16.vlgmr.msra.gmra.mrb[72].mxu1 %vm728_vm1, %v2166_v47 }
 0x9cc   :  { %9565 = vmatpush3.bf16.xpose.msra.mxu1 %v2489_v54 }
 0x9cd   :  { %9993 = vmatprep.subr.msk.bf16.mxu1 %vm549_vm0, %v2471_v13 }
 0x9d4   :  { %9567 = vmatpush3.bf16.xpose.msra.mxu1 %v2492_v40 }
 0x9da   :  { %v2112_v42 = vpop.xlane.xlu1 %2111 }
 0x9de   :  { %v11885_v20 = vpop.f32.mrb[56].mxu0  ;;  %v2103_v14 = vpop.xlane.xlu1 %2102 }
 0x9df   :  { %v11887_v37 = vpop.f32.mrb[57].mxu0 }
 0x9e0   :  { %v11889_v39 = vpop.f32.mrb[58].mxu0 }
 0x9e1   :  { %v2348_v56 = vpack.c.bf16 %v11889_v39, %v11885_v20  ;;  %v11893_v43 = vpop.f32.mrb[59].mxu0  ;;  %v10080_v39 = vld [vmem:[#allocation7 + $0x18] sm:$0xff]  }
 0x9e2   :  { %v2347_v51 = vpack.c.bf16 %v11893_v43, %v11887_v37  ;;  %v2475_v1 = vpop.permute.xlu1 %2474 }
 0x9e3   :  { %v2498_v6 = vsel %vm549_vm0, %v2475_v1, 0 }
 0x9e6   :  { %v2463_v10 = vpop.permute.xlu1 %2462 }
 0x9ea   :  { %v11897_v33 = vpop.f32.mrb[60].mxu0  ;;  %v2109_v32 = vpop.xlane.xlu0 %2108 }
 0x9eb   :  { %v11899_v44 = vpop.f32.mrb[61].mxu0  ;;  %v2120_v7 = vpack.c.bf16 %v2112_v42, %v2109_v32  ;;  %v2467_v23 = vpop.permute.xlu1 %2466 }
 0x9ec   :  { %v11901_v57 = vpop.f32.mrb[62].mxu0 }
 0x9ed   :  { %v2135_v5 = vunpack.c.l.bf16 %v2120_v7  ;;  %v2136_v46 = vunpack.c.h.bf16 %v2120_v7  ;;  %v2350_v17 = vpack.c.bf16 %v11901_v57, %v11897_v33  ;;  %v11905_v2 = vpop.f32.mrb[63].mxu0  ;;  %v14539_v33 = vmov 0   ;;  %v14540_v57 = vld [vmem:[#allocation38_spill] sm:$0xff] }
 0x9ee   :  { %v2349_v45 = vpack.c.bf16 %v11905_v2, %v11899_v44  ;;  %v2106_v35 = vpop.xlane.xlu0 %2105  ;;  %v14543_v44 = vld [vmem:[#allocation39_spill] sm:$0xff]  ;;  %v14544_v2 = vld [vmem:[#allocation37_spill] sm:$0xff] }
 0x9ef   :  { %v2119_v25 = vpack.c.bf16 %v2106_v35, %v2103_v14  ;;  %10341 = vrcp.f32 %v2135_v5 }
 0x9f0   :  { %10343 = vrcp.f32 %v2136_v46 }
 0x9f1   :  { %v2133_v30 = vunpack.c.l.bf16 %v2119_v25  ;;  %v2134_v61 = vunpack.c.h.bf16 %v2119_v25 }
 0x9f2   :  { %v2473_v3 = vpop.permute.xlu0 %2472 }
 0x9f3   :  { %10345 = vrcp.f32 %v2133_v30  ;;  %9994 = vmatprep.subr.msk.bf16.mxu1 %vm549_vm0, %v2473_v3  ;;  %v2495_v18 = vsel %vm549_vm0, %v2473_v3, 0 }
 0x9f4   :  { %10347 = vrcp.f32 %v2134_v61  ;;  %9569 = vmatpush3.bf16.xpose.msra.mxu1 %v2495_v18 }
 0x9f5   :  { %9995 = vmatprep.subr.msk.bf16.mxu1 %vm549_vm0, %v2475_v1 }
 0x9f6   :  { %v2461_v38 = vpop.permute.xlu0 %2460 }
 0x9f9   :  { %v10342_v58 = vpop.eup %10341 }
 0x9fa   :  { %v10344_v31 = vpop.eup %10343  ;;  %v2465_v59 = vpop.permute.xlu0 %2464 }
 0x9fb   :  { %v2160_v52 = vpack.c.bf16 %v10344_v31, %v10342_v58 }
 0x9fc   :  { %9571 = vmatpush3.bf16.xpose.msra.mxu1 %v2498_v6 }
 0x9fd   :  { %v10346_v28 = vpop.eup %10345  ;;  %v2168_v27 = vmul.bf16 %v11845_v50, %v2160_v52 }
 0x9fe   :  { %v10348_v13 = vpop.eup %10347 }
 0x9ff   :  { %v2159_v48 = vpack.c.bf16 %v10348_v13, %v10346_v28 }
 0xa01   :  { %v2167_v63 = vmul.bf16 %v11850_v0, %v2159_v48 }
 0xa03   :  { %9544 = vmatprep.mubr.msk.bf16.mxu1 %vm728_vm1, %v2167_v63 }
 0xa04   :  { %9545 = vmatmul.mubr.msk.bf16.gmra.mrb[76].mxu1 %vm728_vm1, %v2168_v27 }
 0xa05   :  { %9572 = vmatprep.mubr.msk.bf16.mxu1 %vm549_vm0, %v2461_v38 }
 0xa0c   :  { %9573 = vmatmul.mubr.msk.bf16.vlgmr.msra.gmra.mrb[80].mxu1 %vm549_vm0, %v2463_v10 }
 0xa0d   :  { %9576 = vmatprep.mubr.msk.bf16.mxu1 %vm549_vm0, %v2465_v59 }
 0xa14   :  { %9577 = vmatmul.mubr.msk.bf16.gmra.mrb[84].mxu1 %vm549_vm0, %v2467_v23 }
 0xa34   :  { %v9558_v9 = vpop.f32.mrb[64].mxu0 }
 0xa35   :  { %v2429_v0 = vpop.f32.mrb[65].mxu0  ;;  %v2571_v12 = vsel %vm728_vm1, %v9558_v9, -inf }
 0xa36   :  { %v9559_v8 = vpop.f32.mrb[66].mxu0  ;;  %v2565_v50 = vsel %vm728_vm1, %v2429_v0, -inf }
 0xa37   :  { %2566 = vmax.xlane.f32.xlu0 %v2565_v50  ;;  %v2432_v15 = vpop.f32.mrb[67].mxu0  ;;  %v2574_v4 = vsel %vm728_vm1, %v9559_v8, -inf }
 0xa38   :  { %v2568_v11 = vsel %vm728_vm1, %v2432_v15, -inf }
 0xa39   :  { %2569 = vmax.xlane.f32.xlu1 %v2568_v11 }
 0xa3b   :  { %2572 = vmax.xlane.f32.xlu0 %v2571_v12 }
 0xa3f   :  { %2575 = vmax.xlane.f32.xlu0 %v2574_v4 }
 0xa8e   :  { %v11925_v47 = vpop.f32.mrb[68].mxu0 }
 0xa8f   :  { %v11927_v54 = vpop.f32.mrb[69].mxu0  ;;  %v2583_v5 = vsel %vm728_vm1, %v11925_v47, -inf }
 0xa90   :  { %v11929_v40 = vpop.f32.mrb[70].mxu0  ;;  %v2577_v42 = vsel %vm728_vm1, %v11927_v54, -inf }
 0xa91   :  { %2578 = vmax.xlane.f32.xlu0 %v2577_v42  ;;  %v2448_v32 = vpop.f32.mrb[71].mxu0  ;;  %v2586_v46 = vsel %vm728_vm1, %v11929_v40, -inf }
 0xa92   :  { %v2580_v7 = vsel %vm728_vm1, %v2448_v32, -inf }
 0xa93   :  { %2581 = vmax.xlane.f32.xlu1 %v2580_v7 }
 0xa95   :  { %2584 = vmax.xlane.f32.xlu0 %v2583_v5 }
 0xa97   :  { %2587 = vmax.xlane.f32.xlu1 %v2586_v46 }
 0xa9e   :  { %v11938_v14 = vpop.f32.mrb[72].mxu1 }
 0xa9f   :  { %v11940_v35 = vpop.f32.mrb[73].mxu1 }
 0xaa0   :  { %v11942_v25 = vpop.f32.mrb[74].mxu1 }
 0xaa1   :  { %v11946_v61 = vpop.f32.mrb[75].mxu1 }
 0xac4   :  { %v2567_v18 = vpop.xlane.xlu0 %2566 }
 0xac5   :  { %v2613_v58 = vsub.f32 %v2429_v0, %v2567_v18 }
 0xac6   :  { %v2570_v1 = vpop.xlane.xlu1 %2569 }
 0xac7   :  { %v2614_v31 = vsub.f32 %v2432_v15, %v2570_v1 }
 0xac8   :  { %v2573_v6 = vpop.xlane.xlu0 %2572 }
 0xac9   :  { %v2629_v28 = vpack.c.bf16 %v2614_v31, %v2613_v58  ;;  %v2615_v48 = vsub.f32 %v9558_v9, %v2573_v6 }
 0xacb   :  { %v2638_v13 = vmul.bf16 1069105081, %v2629_v28 }
 0xacc   :  { %v2576_v52 = vpop.xlane.xlu0 %2575 }
 0xacd   :  { %10349 = vpow.bf16 %v2638_v13  ;;  %v2616_v63 = vsub.f32 %v9559_v8, %v2576_v52 }
 0xacf   :  { %v2630_v27 = vpack.c.bf16 %v2616_v63, %v2615_v48 }
 0xad1   :  { %v2641_v38 = vmul.bf16 1069105081, %v2630_v27 }
 0xad3   :  { %10351 = vpow.bf16 %v2641_v38 }
 0xad7   :  { %v11950_v10 = vpop.f32.mrb[76].mxu1 }
 0xad8   :  { %v11952_v59 = vpop.eup %10349  ;;  %v11954_v23 = vpop.f32.mrb[77].mxu1 }
 0xad9   :  { %v11956_v50 = vpop.f32.mrb[78].mxu1  ;;  %v2662_v0 = vunpack.c.h.bf16 %v11952_v59  ;;  %v2661_v15 = vunpack.c.l.bf16 %v11952_v59 }
 0xada   :  { %v11962_v9 = vpop.f32.mrb[79].mxu1 }
 0xadb   :  { %v2680_v12 = vsel %vm728_vm1, %v2662_v0, 0.0  ;;  %v2677_v4 = vsel %vm728_vm1, %v2661_v15, 0.0 }
 0xadc   :  { %2681 = vadd.xlane.f32.xlu1 %v2680_v12  ;;  %2678 = vadd.xlane.f32.xlu0 %v2677_v4 }
 0xade   :  { %v11968_v42 = vpop.eup %10351 }
 0xadf   :  { %v11970_v7 = vpop.f32.mrb[80].mxu1  ;;  %v2664_v5 = vunpack.c.h.bf16 %v11968_v42  ;;  %v2663_v46 = vunpack.c.l.bf16 %v11968_v42 }
 0xae0   :  { %v11974_v18 = vpop.f32.mrb[81].mxu1 }
 0xae1   :  { %v11976_v1 = vpop.f32.mrb[82].mxu1  ;;  %v2686_v58 = vsel %vm728_vm1, %v2664_v5, 0.0  ;;  %v2683_v31 = vsel %vm728_vm1, %v2663_v46, 0.0 }
 0xae2   :  { %v11980_v6 = vpop.f32.mrb[83].mxu1  ;;  %2687 = vadd.xlane.f32.xlu1 %v2686_v58  ;;  %2684 = vadd.xlane.f32.xlu0 %v2683_v31 }
 0xae7   :  { %v11982_v28 = vpop.f32.mrb[84].mxu1 }
 0xae8   :  { %v11984_v13 = vpop.f32.mrb[85].mxu1 }
 0xae9   :  { %v11986_v52 = vpop.f32.mrb[86].mxu1 }
 0xaea   :  { %v11988_v48 = vpop.f32.mrb[87].mxu1 }
 0xb1e   :  { %v2579_v63 = vpop.xlane.xlu0 %2578 }
 0xb1f   :  { %v2617_v38 = vsub.f32 %v11927_v54, %v2579_v63 }
 0xb20   :  { %v2582_v27 = vpop.xlane.xlu1 %2581 }
 0xb21   :  { %v2618_v0 = vsub.f32 %v2448_v32, %v2582_v27  ;;  %v2589_v27 = vsel %vm728_vm1, %v11974_v18, -inf }
 0xb22   :  { %v2585_v15 = vpop.xlane.xlu0 %2584 }
 0xb23   :  { %v2631_v12 = vpack.c.bf16 %v2618_v0, %v2617_v38  ;;  %v2619_v46 = vsub.f32 %v11925_v47, %v2585_v15  ;;  %v2592_v38 = vsel %vm728_vm1, %v11980_v6, -inf  ;;  %v2607_v15 = vsel %vm728_vm1, %v11982_v28, -inf }
 0xb24   :  { %v2588_v4 = vpop.xlane.xlu1 %2587 }
 0xb25   :  { %v2644_v5 = vmul.bf16 1069105081, %v2631_v12  ;;  %v2620_v58 = vsub.f32 %v11929_v40, %v2588_v4  ;;  %v2595_v40 = vsel %vm728_vm1, %v11970_v7, -inf  ;;  %v2601_v12 = vsel %vm728_vm1, %v11984_v13, -inf }
 0xb27   :  { %10353 = vpow.bf16 %v2644_v5  ;;  %v2632_v31 = vpack.c.bf16 %v2620_v58, %v2619_v46 }
 0xb29   :  { %v2647_v8 = vmul.bf16 1069105081, %v2632_v31 }
 0xb2b   :  { %10355 = vpow.bf16 %v2647_v8 }
 0xb32   :  { %v11993_v11 = vpop.eup %10353 }
 0xb33   :  { %v2666_v3 = vunpack.c.h.bf16 %v11993_v11  ;;  %v2665_v30 = vunpack.c.l.bf16 %v11993_v11 }
 0xb35   :  { %v2692_v54 = vsel %vm728_vm1, %v2666_v3, 0.0  ;;  %v2689_v32 = vsel %vm728_vm1, %v2665_v30, 0.0  ;;  %v2598_v3 = vsel %vm728_vm1, %v11976_v1, -inf }
 0xb36   :  { %v11999_v63 = vpop.eup %10355  ;;  %2693 = vadd.xlane.f32.xlu1 %v2692_v54  ;;  %2690 = vadd.xlane.f32.xlu0 %v2689_v32 }
 0xb37   :  { %v2668_v47 = vunpack.c.h.bf16 %v11999_v63  ;;  %v2667_v30 = vunpack.c.l.bf16 %v11999_v63 }
 0xb39   :  { %v2698_v8 = vsel %vm728_vm1, %v2668_v47, 0.0  ;;  %v2695_v0 = vsel %vm728_vm1, %v2667_v30, 0.0  ;;  %v2610_v47 = vsel %vm728_vm1, %v11986_v52, -inf }
 0xb3a   :  { %2596 = vmax.xlane.f32.xlu0 %v2595_v40  ;;  %2699 = vadd.xlane.f32.xlu1 %v2698_v8 }
 0xb3e   :  { %2590 = vmax.xlane.f32.xlu0 %v2589_v27  ;;  %2599 = vmax.xlane.f32.xlu1 %v2598_v3 }
 0xb42   :  { %2593 = vmax.xlane.f32.xlu1 %v2592_v38  ;;  %2696 = vadd.xlane.f32.xlu0 %v2695_v0 }
 0xb46   :  { %2608 = vmax.xlane.f32.xlu0 %v2607_v15 }
 0xb4a   :  { %2602 = vmax.xlane.f32.xlu0 %v2601_v12 }
 0xb53   :  { %2783 = vrot.lane.b32.xlu1 %v11094_v34, %s10886_s21 }
 0xb57   :  { %2785 = vrot.lane.b32.xlu1 %v11118_v62, %s10886_s21 }
 0xb60   :  { %2781 = vrot.lane.b32.xlu0 %v11098_v36, %s10886_s21  ;;  %v2604_v36 = vsel %vm728_vm1, %v11988_v48, -inf }
 0xb69   :  { %v2679_v4 = vpop.xlane.xlu0 %2678  ;;  %v2682_v5 = vpop.xlane.xlu1 %2681 }
 0xb6a   :  { %v2725_v46 = vpack.c.bf16 %v2682_v5, %v2679_v4 }
 0xb6c   :  { %v2733_v58 = vunpack.c.l.bf16 %v2725_v46  ;;  %v2734_v31 = vunpack.c.h.bf16 %v2725_v46 }
 0xb6e   :  { %10357 = vrcp.f32 %v2733_v58 }
 0xb6f   :  { %10359 = vrcp.f32 %v2734_v31  ;;  %v2685_v62 = vpop.xlane.xlu0 %2684  ;;  %v2688_v8 = vpop.xlane.xlu1 %2687 }
 0xb78   :  { %v10358_v54 = vpop.eup %10357 }
 0xb79   :  { %v10360_v32 = vpop.eup %10359 }
 0xb7a   :  { %v2765_v40 = vpack.c.bf16 %v10360_v32, %v10358_v54 }
 0xb7b   :  { %2611 = vmax.xlane.f32.xlu1 %v2610_v47 }
 0xb7c   :  { %v2773_v34 = vmul.bf16 %v11952_v59, %v2765_v40 }
 0xb7e   :  { %9588 = vmatprep.mubr.msk.bf16.mxu0 %vm728_vm1, %v2773_v34 }
 0xb7f   :  { %2605 = vmax.xlane.f32.xlu1 %v2604_v36 }
 0xb90   :  { %2787 = vrot.lane.b32.xlu1 %v11114_v60, %s10886_s21 }
 0xbc3   :  { %v2691_v27 = vpop.xlane.xlu0 %2690  ;;  %v2694_v3 = vpop.xlane.xlu1 %2693 }
 0xbc7   :  { %v2597_v30 = vpop.xlane.xlu0 %2596  ;;  %v2700_v38 = vpop.xlane.xlu1 %2699 }
 0xbc8   :  { %v2623_v12 = vsub.f32 %v11970_v7, %v2597_v30 }
 0xbcb   :  { %v2591_v0 = vpop.xlane.xlu0 %2590  ;;  %v2600_v15 = vpop.xlane.xlu1 %2599 }
 0xbcc   :  { %v2624_v59 = vsub.f32 %v11976_v1, %v2600_v15  ;;  %v2621_v58 = vsub.f32 %v11974_v18, %v2591_v0 }
 0xbce   :  { %v2634_v4 = vpack.c.bf16 %v2624_v59, %v2623_v12 }
 0xbcf   :  { %v2697_v5 = vpop.xlane.xlu0 %2696  ;;  %v2594_v46 = vpop.xlane.xlu1 %2593 }
 0xbd0   :  { %v2653_v31 = vmul.bf16 1069105081, %v2634_v4  ;;  %v2622_v60 = vsub.f32 %v11980_v6, %v2594_v46 }
 0xbd2   :  { %10361 = vpow.bf16 %v2653_v31  ;;  %v2633_v54 = vpack.c.bf16 %v2622_v60, %v2621_v58  ;;  %v2726_v58 = vpack.c.bf16 %v2688_v8, %v2685_v62  ;;  %v2727_v31 = vpack.c.bf16 %v2694_v3, %v2691_v27 }
 0xbd3   :  { %v2609_v32 = vpop.xlane.xlu0 %2608  ;;  %v2784_v34 = vpop.permute.xlu1 %2783 }
 0xbd4   :  { %v2650_v47 = vmul.bf16 1069105081, %v2633_v54  ;;  %v2735_v60 = vunpack.c.l.bf16 %v2726_v58  ;;  %v2736_v54 = vunpack.c.h.bf16 %v2726_v58 }
 0xbd6   :  { %10363 = vpow.bf16 %v2650_v47  ;;  %v2737_v47 = vunpack.c.l.bf16 %v2727_v31 }
 0xbd7   :  { %v2603_v40 = vpop.xlane.xlu0 %2602  ;;  %v2786_v0 = vpop.permute.xlu1 %2785  ;;  %10365 = vrcp.f32 %v2735_v60 }
 0xbd8   :  { %10367 = vrcp.f32 %v2736_v54 }
 0xbd9   :  { %10369 = vrcp.f32 %v2737_v47 }
 0xbdb   :  { %v2782_v36 = vpop.permute.xlu0 %2781 }
 0xbdc   :  { %9580 = vmatprep.subr.bf16.mxu0 %v2782_v36 }
 0xbdd   :  { %v12035_v7 = vpop.eup %10361  ;;  %9581 = vmatpush3.bf16.msra.mxu0 %v2782_v36  ;;  %v2728_v36 = vpack.c.bf16 %v2700_v38, %v2697_v5 }
 0xbde   :  { %9582 = vmatprep.subr.bf16.mxu0 %v2784_v34  ;;  %v2671_v1 = vunpack.c.l.bf16 %v12035_v7  ;;  %v2672_v30 = vunpack.c.h.bf16 %v12035_v7 }
 0xbe0   :  { %v2707_v18 = vsel %vm728_vm1, %v2671_v1, 0.0  ;;  %v2710_v12 = vsel %vm728_vm1, %v2672_v30, 0.0  ;;  %v2739_v1 = vunpack.c.l.bf16 %v2728_v36 }
 0xbe1   :  { %v12040_v6 = vpop.eup %10363  ;;  %2708 = vadd.xlane.f32.xlu0 %v2707_v18  ;;  %9583 = vmatpush3.bf16.msra.mxu0 %v2784_v34  ;;  %v2738_v34 = vunpack.c.h.bf16 %v2727_v31  ;;  %v2740_v18 = vunpack.c.h.bf16 %v2728_v36 }
 0xbe2   :  { %9584 = vmatprep.subr.bf16.mxu0 %v2786_v0  ;;  %v2670_v15 = vunpack.c.h.bf16 %v12040_v6  ;;  %v2669_v4 = vunpack.c.l.bf16 %v12040_v6 }
 0xbe3   :  { %10371 = vrcp.f32 %v2738_v34 }
 0xbe4   :  { %v2704_v59 = vsel %vm728_vm1, %v2670_v15, 0.0  ;;  %v2701_v46 = vsel %vm728_vm1, %v2669_v4, 0.0  ;;  %10373 = vrcp.f32 %v2739_v1  ;;  %v2625_v4 = vsub.f32 %v11984_v13, %v2603_v40 }
 0xbe5   :  { %2711 = vadd.xlane.f32.xlu0 %v2710_v12  ;;  %2705 = vadd.xlane.f32.xlu1 %v2704_v59  ;;  %v10366_v12 = vpop.eup %10365  ;;  %10375 = vrcp.f32 %v2740_v18 }
 0xbe6   :  { %9585 = vmatpush3.bf16.msra.mxu0 %v2786_v0  ;;  %v2627_v0 = vsub.f32 %v11982_v28, %v2609_v32  ;;  %v10368_v62 = vpop.eup %10367 }
 0xbe7   :  { %v10370_v27 = vpop.eup %10369 }
 0xbe9   :  { %2702 = vadd.xlane.f32.xlu0 %v2701_v46  ;;  %v2766_v46 = vpack.c.bf16 %v10368_v62, %v10366_v12  ;;  %v10078_v12 = vld [vmem:[#allocation7 + $0x8] sm:$0xff]  }
 0xbeb   :  { %v2774_v32 = vmul.bf16 %v11968_v42, %v2766_v46 }
 0xbed   :  { %v10372_v59 = vpop.eup %10371 }
 0xbee   :  { %v2767_v60 = vpack.c.bf16 %v10372_v59, %v10370_v27  ;;  %v10082_v27 = vld [vmem:[#allocation7 + $0x28] sm:$0xff]   ;;  %v10084_v59 = vld [vmem:[#allocation7 + $0x38] sm:$0xff]  }
 0xbf0   :  { %v2775_v47 = vmul.bf16 %v11993_v11, %v2767_v60 }
 0xc08   :  { %v2612_v30 = vpop.xlane.xlu1 %2611 }
 0xc09   :  { %v2628_v15 = vsub.f32 %v11986_v52, %v2612_v30  ;;  %v10374_v52 = vpop.eup %10373 }
 0xc0a   :  { %v10376_v54 = vpop.eup %10375 }
 0xc0b   :  { %v2636_v8 = vpack.c.bf16 %v2628_v15, %v2627_v0  ;;  %v2768_v13 = vpack.c.bf16 %v10376_v54, %v10374_v52 }
 0xc0c   :  { %v2606_v3 = vpop.xlane.xlu1 %2605 }
 0xc0d   :  { %v2659_v38 = vmul.bf16 1069105081, %v2636_v8  ;;  %v2626_v5 = vsub.f32 %v11988_v48, %v2606_v3  ;;  %v2776_v40 = vmul.bf16 %v11999_v63, %v2768_v13  ;;  %v14534_v63 = vpack.c.bf16 %v11641_v19, %v11634_v53  ;;  %v10083_v3 = vld [vmem:[#allocation7 + $0x30] sm:$0xff]  }
 0xc0f   :  { %10377 = vpow.bf16 %v2659_v38  ;;  %v2635_v58 = vpack.c.bf16 %v2626_v5, %v2625_v4 }
 0xc10   :  { %v2788_v31 = vpop.permute.xlu1 %2787 }
 0xc11   :  { %v2656_v28 = vmul.bf16 1069105081, %v2635_v58  ;;  %9586 = vmatprep.subr.bf16.mxu0 %v2788_v31 }
 0xc12   :  { %9587 = vmatpush3.bf16.msra.mxu0 %v2788_v31 }
 0xc13   :  { %10379 = vpow.bf16 %v2656_v28 }
 0xc15   :  { %9589 = vmatmul.mubr.msk.bf16.vlgmr.msra.gmra.mrb[72].mxu0 %vm728_vm1, %v2774_v32 }
 0xc16   :  { %9592 = vmatprep.mubr.msk.bf16.mxu0 %vm728_vm1, %v2775_v47 }
 0xc1a   :  { %v12055_v48 = vpop.eup %10377 }
 0xc1b   :  { %v2676_v34 = vunpack.c.h.bf16 %v12055_v48  ;;  %v2675_v36 = vunpack.c.l.bf16 %v12055_v48 }
 0xc1d   :  { %9593 = vmatmul.mubr.msk.bf16.gmra.mrb[76].mxu0 %vm728_vm1, %v2776_v40  ;;  %v2722_v42 = vsel %vm728_vm1, %v2676_v34, 0.0  ;;  %v2719_v1 = vsel %vm728_vm1, %v2675_v36, 0.0 }
 0xc1e   :  { %v12063_v11 = vpop.eup %10379  ;;  %2723 = vadd.xlane.f32.xlu1 %v2722_v42  ;;  %2720 = vadd.xlane.f32.xlu0 %v2719_v1 }
 0xc1f   :  { %v2673_v18 = vunpack.c.l.bf16 %v12063_v11  ;;  %v2674_v0 = vunpack.c.h.bf16 %v12063_v11 }
 0xc21   :  { %v2713_v30 = vsel %vm728_vm1, %v2673_v18, 0.0 }
 0xc22   :  { %2714 = vadd.xlane.f32.xlu0 %v2713_v30 }
 0xc2f   :  { %2872 = vrot.lane.b32.xlu1 %v11135_v24, %s10886_s21  ;;  %v2716_v24 = vsel %vm728_vm1, %v2674_v0, 0.0 }
 0xc33   :  { %2874 = vrot.lane.b32.xlu1 %v11168_v55, %s10886_s21 }
 0xc38   :  { %2870 = vrot.lane.b32.xlu0 %v11139_v26, %s10886_s21  ;;  %v14535_v26 = vpack.c.bf16 %v11637_v22, %v11632_v41  ;;  %v10079_v22 = vld [vmem:[#allocation7 + $0x10] sm:$0xff]  }
 0xc3c   :  { %2975 = vrot.lane.b32.xlu0 %v14534_v63, %s10886_s21 }
 0xc40   :  { %2999 = vrot.lane.b32.xlu0 %v2347_v51, %s10881_s0 }
 0xc57   :  { %2717 = vadd.xlane.f32.xlu1 %v2716_v24 }
 0xc68   :  { %2876 = vrot.lane.b32.xlu1 %v11163_v49, %s10886_s21  ;;  %v10077_v49 = vld [vmem:[#allocation7] sm:$0xff]  }
 0xc69   :  { %9612 = vmatprep.subr.bf16.mxu0 %v10077_v49 }
 0xc6a   :  { %9613 = vmatpush3.bf16.msra.mxu0 %v10077_v49 }
 0xc6b   :  { %9614 = vmatprep.subr.bf16.mxu0 %v10078_v12 }
 0xc6c   :  { %2977 = vrot.lane.b32.xlu1 %v14535_v26, %s10886_s21 }
 0xc6e   :  { %v2709_v55 = vpop.xlane.xlu0 %2708  ;;  %9615 = vmatpush3.bf16.msra.mxu0 %v10078_v12 }
 0xc6f   :  { %9616 = vmatprep.subr.bf16.mxu0 %v10079_v22 }
 0xc70   :  { %3001 = vrot.lane.b32.xlu1 %v2348_v56, %s10881_s0  ;;  %v10081_v56 = vld [vmem:[#allocation7 + $0x20] sm:$0xff]  }
 0xc72   :  { %v2712_v53 = vpop.xlane.xlu0 %2711  ;;  %v2706_v19 = vpop.xlane.xlu1 %2705  ;;  %9617 = vmatpush3.bf16.msra.mxu0 %v10079_v22 }
 0xc73   :  { %9618 = vmatprep.subr.bf16.mxu0 %v10080_v39  ;;  %v2730_v31 = vpack.c.bf16 %v2712_v53, %v2709_v55 }
 0xc75   :  { %v2743_v60 = vunpack.c.l.bf16 %v2730_v31  ;;  %v2744_v28 = vunpack.c.h.bf16 %v2730_v31 }
 0xc76   :  { %v2703_v37 = vpop.xlane.xlu0 %2702  ;;  %9619 = vmatpush3.bf16.msra.mxu0 %v10080_v39 }
 0xc77   :  { %v2729_v43 = vpack.c.bf16 %v2706_v19, %v2703_v37  ;;  %9620 = vmatprep.subr.bf16.mxu0 %v10081_v56 }
 0xc79   :  { %v2741_v51 = vunpack.c.l.bf16 %v2729_v43  ;;  %v2742_v15 = vunpack.c.h.bf16 %v2729_v43 }
 0xc7a   :  { %9621 = vmatpush3.bf16.msra.mxu0 %v10081_v56 }
 0xc7b   :  { %10381 = vrcp.f32 %v2741_v51  ;;  %9622 = vmatprep.subr.bf16.mxu0 %v10082_v27  ;;  %v14536_v51 = vpack.c.bf16 %v11659_v29, %v11653_v16 }
 0xc7c   :  { %10383 = vrcp.f32 %v2742_v15 }
 0xc7d   :  { %10385 = vrcp.f32 %v2743_v60 }
 0xc7e   :  { %9623 = vmatpush3.bf16.msra.mxu0 %v10082_v27  ;;  %10387 = vrcp.f32 %v2744_v28 }
 0xc7f   :  { %9624 = vmatprep.subr.bf16.mxu0 %v10083_v3 }
 0xc82   :  { %9625 = vmatpush3.bf16.msra.mxu0 %v10083_v3 }
 0xc83   :  { %9626 = vmatprep.subr.bf16.mxu0 %v10084_v59 }
 0xc85   :  { %v10382_v62 = vpop.eup %10381 }
 0xc86   :  { %v10384_v41 = vpop.eup %10383  ;;  %9627 = vmatpush3.bf16.msra.mxu0 %v10084_v59 }
 0xc87   :  { %v2769_v8 = vpack.c.bf16 %v10384_v41, %v10382_v62  ;;  %v10386_v54 = vpop.eup %10385 }
 0xc88   :  { %v10388_v13 = vpop.eup %10387 }
 0xc89   :  { %v2777_v20 = vmul.bf16 %v12040_v6, %v2769_v8  ;;  %v2770_v36 = vpack.c.bf16 %v10388_v13, %v10386_v54 }
 0xc8b   :  { %9604 = vmatprep.mubr.msk.bf16.mxu1 %vm728_vm1, %v2777_v20  ;;  %v2778_v24 = vmul.bf16 %v12035_v7, %v2770_v36  ;;  %v14537_v7 = vld [vmem:[#allocation35_spill] sm:$0xff]  ;;  %v14555_v36 = vld [vmem:[#allocation24_spill] sm:$0xff] }
 0xc8c   :  { %v14538_v49 = vpack.c.bf16 %v11666_v21, %v14537_v7 }
 0xcab   :  { %v2721_v6 = vpop.xlane.xlu0 %2720  ;;  %v2724_v4 = vpop.xlane.xlu1 %2723 }
 0xcac   :  { %v2732_v52 = vpack.c.bf16 %v2724_v4, %v2721_v6  ;;  %v14548_v4 = vld [vmem:[#allocation22_spill] sm:$0xff] }
 0xcae   :  { %v2747_v32 = vunpack.c.l.bf16 %v2732_v52  ;;  %v2748_v47 = vunpack.c.h.bf16 %v2732_v52 }
 0xcaf   :  { %v2715_v38 = vpop.xlane.xlu0 %2714  ;;  %v2873_v5 = vpop.permute.xlu1 %2872 }
 0xcb0   :  { %10389 = vrcp.f32 %v2747_v32 }
 0xcb1   :  { %10391 = vrcp.f32 %v2748_v47 }
 0xcb3   :  { %v2871_v46 = vpop.permute.xlu0 %2870  ;;  %v2875_v58 = vpop.permute.xlu1 %2874 }
 0xcb4   :  { %9596 = vmatprep.subr.bf16.mxu1 %v2871_v46 }
 0xcb5   :  { %9597 = vmatpush3.bf16.msra.mxu1 %v2871_v46 }
 0xcb6   :  { %9598 = vmatprep.subr.bf16.mxu1 %v2873_v5 }
 0xcb7   :  { %v2976_v3 = vpop.permute.xlu0 %2975 }
 0xcb9   :  { %9599 = vmatpush3.bf16.msra.mxu1 %v2873_v5 }
 0xcba   :  { %9600 = vmatprep.subr.bf16.mxu1 %v2875_v58  ;;  %v10390_v19 = vpop.eup %10389 }
 0xcbb   :  { %v10392_v43 = vpop.eup %10391  ;;  %v3000_v6 = vpop.permute.xlu0 %2999 }
 0xcbc   :  { %v2772_v39 = vpack.c.bf16 %v10392_v43, %v10390_v19 }
 0xcbd   :  { %9601 = vmatpush3.bf16.msra.mxu1 %v2875_v58 }
 0xcbe   :  { %v2780_v21 = vmul.bf16 %v12055_v48, %v2772_v39  ;;  %v14546_v48 = vpack.c.bf16 %v11942_v25, %v11938_v14  ;;  %v14551_v14 = vld [vmem:[#allocation21_spill] sm:$0xff]  ;;  %v14552_v25 = vld [vmem:[#allocation19_spill] sm:$0xff] }
 0xcbf   :  { %v14553_v60 = vpack.c.bf16 %v14551_v14, %v14552_v25  ;;  %v10717_v14 = vld [vmem:[#allocation2] sm:$0xff] }
 0xce4   :  { %v2718_v40 = vpop.xlane.xlu1 %2717 }
 0xce5   :  { %v2731_v34 = vpack.c.bf16 %v2718_v40, %v2715_v38  ;;  %v14549_v38 = vld [vmem:[#allocation20_spill] sm:$0xff] }
 0xce6   :  { %v14550_v5 = vpack.c.bf16 %v14548_v4, %v14549_v38  ;;  %v14571_v38 = vld [vmem:[#allocation29_spill] sm:$0xff] }
 0xce7   :  { %v2745_v42 = vunpack.c.l.bf16 %v2731_v34  ;;  %v2746_v1 = vunpack.c.h.bf16 %v2731_v34  ;;  %v14554_v34 = vld [vmem:[#allocation26_spill] sm:$0xff] }
 0xce8   :  { %v9590_v18 = vpop.f32.mrb[72].mxu0  ;;  %v2877_v30 = vpop.permute.xlu1 %2876  ;;  %v3041_v46 = vsel %vm549_vm0, %v14550_v5, %v2976_v3  ;;  %v14569_v3 = vld [vmem:[#allocation28_spill] sm:$0xff]  ;;  %v14572_v5 = vld [vmem:[#allocation27_spill] sm:$0xff] }
 0xce9   :  { %10393 = vrcp.f32 %v2745_v42  ;;  %v2839_v63 = vpop.f32.mrb[73].mxu0  ;;  %9602 = vmatprep.subr.bf16.mxu1 %v2877_v30  ;;  %v3064_v31 = vsel %vm728_vm1, %v3041_v46, %v3000_v6  ;;  %v14556_v42 = vpack.c.bf16 %v14554_v34, %v14555_v36  ;;  %v14573_v46 = vpack.c.bf16 %v14571_v38, %v14572_v5  ;;  %v10719_v34 = vld [vmem:[#allocation2 + $0x18] sm:$0xff]  ;;  %v10724_v5 = vld [vmem:[#allocation2 + $0x30] sm:$0xff] }
 0xcea   :  { %10395 = vrcp.f32 %v2746_v1  ;;  %v9591_v0 = vpop.f32.mrb[74].mxu0  ;;  %9603 = vmatpush3.bf16.msra.mxu1 %v2877_v30  ;;  %v14557_v30 = vld [vmem:[#allocation25_spill] sm:$0xff] }
 0xceb   :  { %v2960_v26 = vpack.c.bf16 %v9591_v0, %v9590_v18  ;;  %v2842_v55 = vpop.f32.mrb[75].mxu0  ;;  %v10088_v38 = vld [vmem:[#allocation8 + $0x10] ss:$8 sps:$4 sm:$0xff]  }
 0xcec   :  { %v2959_v53 = vpack.c.bf16 %v2842_v55, %v2839_v63  ;;  %v2978_v27 = vpop.permute.xlu1 %2977  ;;  %v14558_v63 = vld [vmem:[#allocation23_spill] sm:$0xff] }
 0xced   :  { %3025 = vrot.lane.b32.xlu1 %v2960_v26, %s10885_s20  ;;  %9605 = vmatmul.mubr.msk.bf16.vlgmr.msra.gmra.mrb[88].mxu1 %vm728_vm1, %v2778_v24  ;;  %v3044_v28 = vsel %vm549_vm0, %v14553_v60, %v2978_v27  ;;  %v14559_v0 = vpack.c.bf16 %v14557_v30, %v14558_v63 }
 0xcee   :  { %3023 = vrot.lane.b32.xlu0 %v2959_v53, %s10885_s20 }
 0xcf0   :  { %v9594_v37 = vpop.f32.mrb[76].mxu0  ;;  %v3002_v59 = vpop.permute.xlu1 %3001 }
 0xcf1   :  { %2981 = vrot.lane.b32.xlu1 %v14536_v51, %s10886_s21  ;;  %v2855_v15 = vpop.f32.mrb[77].mxu0 }
 0xcf2   :  { %2979 = vrot.lane.b32.xlu0 %v14538_v49, %s10886_s21  ;;  %v9595_v12 = vpop.f32.mrb[78].mxu0 }
 0xcf3   :  { %v10394_v62 = vpop.eup %10393  ;;  %v2962_v41 = vpack.c.bf16 %v9595_v12, %v9594_v37  ;;  %v2858_v22 = vpop.f32.mrb[79].mxu0 }
 0xcf4   :  { %v10396_v8 = vpop.eup %10395  ;;  %v2961_v20 = vpack.c.bf16 %v2858_v22, %v2855_v15 }
 0xcf5   :  { %3005 = vrot.lane.b32.xlu1 %v2350_v17, %s10881_s0  ;;  %v2771_v16 = vpack.c.bf16 %v10396_v8, %v10394_v62  ;;  %v14541_v17 = vld [vmem:[#allocation36_spill] sm:$0xff]  ;;  %v14560_v62 = vld [vmem:[#allocation42_spill] sm:$0xff]  ;;  %v14563_v8 = vld [vmem:[#allocation43_spill] sm:$0xff] }
 0xcf6   :  { %3003 = vrot.lane.b32.xlu0 %v2349_v45, %s10881_s0  ;;  %v14542_v56 = vpack.c.bf16 %v14540_v57, %v14541_v17  ;;  %v14545_v45 = vpack.c.bf16 %v14543_v44, %v14544_v2  ;;  %v14567_v57 = vpack.c.bf16 %v11962_v9, %v11954_v23  ;;  %v12189_v23 = vld [vmem:[%s14422_s4] ss:$0 sm:$0xff] }
 0xcf7   :  { %v2779_v29 = vmul.bf16 %v12063_v11, %v2771_v16  ;;  %v14547_v11 = vpack.c.bf16 %v11946_v61, %v11940_v35  ;;  %v3066_v61 = vsel %vm728_vm1, %v3044_v28, %v3002_v59 }
 0xcf9   :  { %9608 = vmatprep.mubr.msk.bf16.mxu1 %vm728_vm1, %v2779_v29  ;;  %3029 = vrot.lane.b32.xlu1 %v2962_v41, %s10885_s20  ;;  %v14561_v41 = vld [vmem:[#allocation40_spill] sm:$0xff]  ;;  %v14566_v29 = vpack.c.bf16 %v11956_v50, %v11950_v10  ;;  %v14568_v50 = vld [vmem:[#allocation30_spill] sm:$0xff] }
 0xcfa   :  { %9609 = vmatmul.mubr.msk.bf16.gmra.mrb[92].mxu1 %vm728_vm1, %v2780_v21  ;;  %3027 = vrot.lane.b32.xlu0 %v2961_v20, %s10885_s20  ;;  %v14562_v22 = vpack.c.bf16 %v14560_v62, %v14561_v41  ;;  %v14564_v20 = vld [vmem:[#allocation41_spill] sm:$0xff]  ;;  %v14570_v59 = vpack.c.bf16 %v14568_v50, %v14569_v3  ;;  %v14578_v41 = vld [vmem:[#allocation31_spill] sm:$0xff] }
 0xcfb   :  { %3706 = vmatprep.mubr.bf16.mxu1 %v14539_v33  ;;  %v14565_v39 = vpack.c.bf16 %v14563_v8, %v14564_v20  ;;  %v14577_v62 = vld [vmem:[#allocation33_spill] sm:$0xff] }
 0xcfd   :  { %2985 = vrot.lane.b32.xlu1 %v14542_v56, %s10886_s21 }
 0xcfe   :  { %2983 = vrot.lane.b32.xlu0 %v14545_v45, %s10886_s21 }
 0xd01   :  { %3009 = vrot.lane.b32.xlu1 %v14546_v48, %s10881_s0 }
 0xd02   :  { %3007 = vrot.lane.b32.xlu0 %v14547_v11, %s10881_s0 }
 0xd5f   :  { %v3026_v58 = vpop.permute.xlu1 %3025 }
 0xd60   :  { %v3024_v35 = vpop.permute.xlu0 %3023  ;;  %v3084_v32 = vsel %vm3079_vm2, %v3066_v61, %v3026_v58 }
 0xd61   :  { %v3081_v52 = vsel %vm3079_vm2, %v3064_v31, %v3024_v35 }
 0xd62   :  { %9628 = vmatprep.mubr.bf16.mxu0 %v3081_v52 }
 0xd63   :  { %9629 = vmatmul.mubr.bf16.vlgmr.msra.gmra.mrb[80].mxu0 %v3084_v32  ;;  %v2982_v54 = vpop.permute.xlu1 %2981 }
 0xd64   :  { %v2980_v47 = vpop.permute.xlu0 %2979  ;;  %v3050_v24 = vsel %vm549_vm0, %v14559_v0, %v2982_v54  ;;  %v10718_v54 = vld [vmem:[#allocation2 + $0x8] sm:$0xff] }
 0xd65   :  { %v3047_v1 = vsel %vm549_vm0, %v14556_v42, %v2980_v47 }
 0xd67   :  { %v3006_v13 = vpop.permute.xlu1 %3005 }
 0xd68   :  { %v3004_v40 = vpop.permute.xlu0 %3003  ;;  %v3070_v53 = vsel %vm728_vm1, %v3050_v24, %v3006_v13  ;;  %v10720_v24 = vld [vmem:[#allocation2 + $0x10] sm:$0xff] }
 0xd69   :  { %v3068_v26 = vsel %vm728_vm1, %v3047_v1, %v3004_v40 }
 0xd6b   :  { %v3030_v18 = vpop.permute.xlu1 %3029 }
 0xd6c   :  { %v3028_v55 = vpop.permute.xlu0 %3027  ;;  %v3090_v37 = vsel %vm3079_vm2, %v3070_v53, %v3030_v18 }
 0xd6d   :  { %v3087_v19 = vsel %vm3079_vm2, %v3068_v26, %v3028_v55 }
 0xd6e   :  { %9632 = vmatprep.mubr.bf16.mxu0 %v3087_v19 }
 0xd6f   :  { %9633 = vmatmul.mubr.bf16.gmra.mrb[84].mxu0 %v3090_v37  ;;  %v2986_v45 = vpop.permute.xlu1 %2985  ;;  %v14574_v37 = vld [vmem:[#allocation34_spill] sm:$0xff] }
 0xd70   :  { %v2984_v48 = vpop.permute.xlu0 %2983  ;;  %v3056_v58 = vsel %vm549_vm0, %v14573_v46, %v2986_v45  ;;  %v10722_v45 = vld [vmem:[#allocation2 + $0x20] sm:$0xff] }
 0xd71   :  { %v3053_v6 = vsel %vm549_vm0, %v14570_v59, %v2984_v48  ;;  %v10085_v59 = vld [vmem:[#allocation8] ss:$8 sps:$4 sm:$0xff]  }
 0xd73   :  { %v3010_v11 = vpop.permute.xlu1 %3009 }
 0xd74   :  { %v3008_v27 = vpop.permute.xlu0 %3007  ;;  %v3074_v35 = vsel %vm728_vm1, %v3056_v58, %v3010_v11 }
 0xd75   :  { %v3072_v31 = vsel %vm728_vm1, %v3053_v6, %v3008_v27  ;;  %v10087_v27 = vld [vmem:[#allocation8 + $0x4] ss:$8 sps:$4 sm:$0xff]  }
 0xd76   :  { %3674 = vmatprep.subr.bf16.mxu1 %v10087_v27 }
 0xd77   :  { %3675 = vmatpush1.bf16.msra.mxu1 %v10085_v59 }
 0xdc0   :  { %v9606_v43 = vpop.f32.mrb[88].mxu1 }
 0xdc1   :  { %v2928_v51 = vpop.f32.mrb[89].mxu1 }
 0xdc2   :  { %v9607_v15 = vpop.f32.mrb[90].mxu1 }
 0xdc3   :  { %v2964_v7 = vpack.c.bf16 %v9607_v15, %v9606_v43  ;;  %v2931_v49 = vpop.f32.mrb[91].mxu1  ;;  %v14575_v43 = vld [vmem:[#allocation32_spill] sm:$0xff] }
 0xdc4   :  { %v2963_v12 = vpack.c.bf16 %v2931_v49, %v2928_v51  ;;  %v14576_v51 = vpack.c.bf16 %v14574_v37, %v14575_v43 }
 0xdc5   :  { %3033 = vrot.lane.b32.xlu1 %v2964_v7, %s10885_s20 }
 0xdc6   :  { %3031 = vrot.lane.b32.xlu0 %v2963_v12, %s10885_s20 }
 0xdc9   :  { %2989 = vrot.lane.b32.xlu1 %v14562_v22, %s10886_s21  ;;  %v14579_v22 = vpack.c.bf16 %v14577_v62, %v14578_v41 }
 0xdca   :  { %2987 = vrot.lane.b32.xlu0 %v14565_v39, %s10886_s21 }
 0xdcd   :  { %v9610_v16 = vpop.f32.mrb[92].mxu1  ;;  %3013 = vrot.lane.b32.xlu1 %v14566_v29, %s10881_s0 }
 0xdce   :  { %v2944_v21 = vpop.f32.mrb[93].mxu1  ;;  %3011 = vrot.lane.b32.xlu0 %v14567_v57, %s10881_s0  ;;  %v10721_v57 = vld [vmem:[#allocation2 + $0x28] sm:$0xff] }
 0xdcf   :  { %v9611_v17 = vpop.f32.mrb[94].mxu1 }
 0xdd0   :  { %v2966_v56 = vpack.c.bf16 %v9611_v17, %v9610_v16  ;;  %v2947_v44 = vpop.f32.mrb[95].mxu1 }
 0xdd1   :  { %v2965_v2 = vpack.c.bf16 %v2947_v44, %v2944_v21 }
 0xdd2   :  { %3037 = vrot.lane.b32.xlu1 %v2966_v56, %s10885_s20 }
 0xdd3   :  { %3035 = vrot.lane.b32.xlu0 %v2965_v2, %s10885_s20 }
 0xe36   :  { %v9630_v10 = vpop.f32.mrb[80].mxu0 }
 0xe37   :  { %v3202_v9 = vpop.f32.mrb[81].mxu0  ;;  %v3034_v4 = vpop.permute.xlu1 %3033  ;;  %v3267_v26 = vadd.f32 %v10720_v24, %v9630_v10  ;;  %v10723_v10 = vld [vmem:[#allocation2 + $0x38] sm:$0xff] }
 0xe38   :  { %v3265_v25 = vadd.f32 %v10717_v14, %v3202_v9  ;;  %v3032_v60 = vpop.permute.xlu0 %3031  ;;  %v9631_v28 = vpop.f32.mrb[82].mxu0  ;;  %v3096_v13 = vsel %vm3079_vm2, %v3074_v35, %v3034_v4  ;;  %v10090_v9 = vld [vmem:[#allocation8 + $0x14] ss:$8 sps:$4 sm:$0xff]   ;;  %v10094_v35 = vld [vmem:[#allocation8 + $0x30] ss:$8 sps:$4 sm:$0xff]  }
 0xe39   :  { %v3205_v61 = vpop.f32.mrb[83].mxu0  ;;  %v3093_v52 = vsel %vm3079_vm2, %v3072_v31, %v3032_v60  ;;  %v3268_v36 = vadd.f32 %v10719_v34, %v9631_v28  ;;  %v12227_v29 = vadd.f32 %v12189_v23, %v3267_v26  ;;  %3676 = vmatprep.subr.bf16.mxu1 %v10090_v9  ;;  %v10093_v31 = vld [vmem:[#allocation8 + $0x24] ss:$8 sps:$4 sm:$0xff]   ;;  %v10096_v28 = vld [vmem:[#allocation8 + $0x34] ss:$8 sps:$4 sm:$0xff]  }
 0xe3a   :  { %v12199_v32 = vadd.f32 %v12189_v23, %v3265_v25  ;;  %v3266_v47 = vadd.f32 %v10718_v54, %v3205_v61  ;;  %9636 = vmatprep.mubr.bf16.mxu0 %v3093_v52  ;;  %3677 = vmatpush1.bf16.msra.mxu1 %v10088_v38  ;;  %v10091_v25 = vld [vmem:[#allocation8 + $0x20] ss:$8 sps:$4 sm:$0xff]   ;;  %v10099_v52 = vld [vmem:[#allocation8 + $0x44] ss:$8 sps:$4 sm:$0xff]  }
 0xe3b   :  { %9637 = vmatmul.mubr.bf16.gmra.mrb[88].mxu0 %v3096_v13  ;;  %v2990_v40 = vpop.permute.xlu1 %2989  ;;  %v12210_v63 = vadd.f32 %v12189_v23, %v3268_v36  ;;  %v3356_v11 = vmul.f32 %v12227_v29, %v12227_v29  ;;  %3678 = vmatprep.subr.bf16.mxu1 %v10093_v31  ;;  %v10097_v54 = vld [vmem:[#allocation8 + $0x40] ss:$8 sps:$4 sm:$0xff]   ;;  %v10100_v13 = vld [vmem:[#allocation8 + $0x50] ss:$8 sps:$4 sm:$0xff]   ;;  %v10108_v36 = vld [vmem:[#allocation8 + $0x74] ss:$8 sps:$4 sm:$0xff]  }
 0xe3c   :  { %v12203_v42 = vadd.f32 %v12189_v23, %v3266_v47  ;;  %v2988_v1 = vpop.permute.xlu0 %2987  ;;  %3306 = vadd.xlane.f32.xlu0 %v12199_v32  ;;  %v3354_v18 = vmul.f32 %v12199_v32, %v12199_v32  ;;  %v3062_v8 = vsel %vm549_vm0, %v14579_v22, %v2990_v40  ;;  %v10102_v47 = vld [vmem:[#allocation8 + $0x54] ss:$8 sps:$4 sm:$0xff]   ;;  %v10105_v40 = vld [vmem:[#allocation8 + $0x64] ss:$8 sps:$4 sm:$0xff]   ;;  %v10103_v34 = vld [vmem:[#allocation8 + $0x60] ss:$8 sps:$4 sm:$0xff]  }
 0xe3d   :  { %v3059_v15 = vsel %vm549_vm0, %v14576_v51, %v2988_v1  ;;  %v3357_v12 = vmul.f32 %v12210_v63, %v12210_v63  ;;  %v10106_v1 = vld [vmem:[#allocation8 + $0x70] ss:$8 sps:$4 sm:$0xff]  }
 0xe3e   :  { %3308 = vadd.xlane.f32.xlu1 %v12203_v42  ;;  %v3355_v53 = vmul.f32 %v12203_v42, %v12203_v42  ;;  %3679 = vmatpush1.bf16.msra.mxu1 %v10091_v25 }
 0xe3f   :  { %v3014_v30 = vpop.permute.xlu1 %3013  ;;  %3680 = vmatprep.subr.bf16.mxu1 %v10096_v28 }
 0xe40   :  { %v3012_v0 = vpop.permute.xlu0 %3011  ;;  %3370 = vadd.xlane.f32.xlu0 %v3354_v18  ;;  %v3078_v21 = vsel %vm728_vm1, %v3062_v8, %v3014_v30 }
 0xe41   :  { %v3076_v20 = vsel %vm728_vm1, %v3059_v15, %v3012_v0 }
 0xe42   :  { %3312 = vadd.xlane.f32.xlu1 %v12210_v63  ;;  %v9634_v55 = vpop.f32.mrb[84].mxu0  ;;  %3681 = vmatpush1.bf16.msra.mxu1 %v10094_v35 }
 0xe43   :  { %v3218_v19 = vpop.f32.mrb[85].mxu0  ;;  %v3271_v46 = vadd.f32 %v10724_v5, %v9634_v55  ;;  %3682 = vmatprep.subr.bf16.mxu1 %v10099_v52 }
 0xe44   :  { %v3038_v7 = vpop.permute.xlu1 %3037  ;;  %3372 = vadd.xlane.f32.xlu0 %v3355_v53  ;;  %v9635_v49 = vpop.f32.mrb[86].mxu0  ;;  %v3269_v48 = vadd.f32 %v10722_v45, %v3218_v19 }
 0xe45   :  { %v3036_v39 = vpop.permute.xlu0 %3035  ;;  %v3221_v16 = vpop.f32.mrb[87].mxu0  ;;  %v3102_v44 = vsel %vm3079_vm2, %v3078_v21, %v3038_v7  ;;  %v3272_v50 = vadd.f32 %v10723_v10, %v9635_v49  ;;  %v12254_v60 = vadd.f32 %v12189_v23, %v3271_v46 }
 0xe46   :  { %v3270_v17 = vadd.f32 %v10721_v57, %v3221_v16  ;;  %3376 = vadd.xlane.f32.xlu1 %v3357_v12  ;;  %v3099_v56 = vsel %vm3079_vm2, %v3076_v20, %v3036_v39  ;;  %v12242_v6 = vadd.f32 %v12189_v23, %v3269_v48  ;;  %3683 = vmatpush1.bf16.msra.mxu1 %v10097_v54 }
 0xe47   :  { %9640 = vmatprep.mubr.bf16.mxu0 %v3099_v56  ;;  %v12245_v4 = vadd.f32 %v12189_v23, %v3272_v50  ;;  %v3360_v61 = vmul.f32 %v12254_v60, %v12254_v60  ;;  %3684 = vmatprep.subr.bf16.mxu1 %v10102_v47 }
 0xe48   :  { %v12233_v2 = vadd.f32 %v12189_v23, %v3270_v17  ;;  %9641 = vmatmul.mubr.bf16.gmra.mrb[92].mxu0 %v3102_v44  ;;  %3310 = vadd.xlane.f32.xlu0 %v12227_v29  ;;  %v3358_v58 = vmul.f32 %v12242_v6, %v12242_v6 }
 0xe49   :  { %v3361_v14 = vmul.f32 %v12245_v4, %v12245_v4 }
 0xe4a   :  { %3316 = vadd.xlane.f32.xlu1 %v12233_v2  ;;  %v3359_v3 = vmul.f32 %v12233_v2, %v12233_v2  ;;  %3685 = vmatpush1.bf16.msra.mxu1 %v10100_v13 }
 0xe4b   :  { %3686 = vmatprep.subr.bf16.mxu1 %v10105_v40 }
 0xe4c   :  { %3374 = vadd.xlane.f32.xlu0 %v3356_v11 }
 0xe4e   :  { %3380 = vadd.xlane.f32.xlu1 %v3359_v3  ;;  %3687 = vmatpush1.bf16.msra.mxu1 %v10103_v34 }
 0xe4f   :  { %3688 = vmatprep.subr.bf16.mxu1 %v10108_v36 }
 0xe50   :  { %3314 = vadd.xlane.f32.xlu0 %v12242_v6 }
 0xe52   :  { %3320 = vadd.xlane.f32.xlu1 %v12245_v4  ;;  %3689 = vmatpush1.bf16.msra.mxu1 %v10106_v1 }
 0xe54   :  { %3378 = vadd.xlane.f32.xlu0 %v3358_v58 }
 0xe56   :  { %3384 = vadd.xlane.f32.xlu1 %v3361_v14  ;;  %v12267_v14 = vld [vmem:[%s14427_s9] ss:$0 sm:$0xff] }
 0xe58   :  { %3318 = vadd.xlane.f32.xlu0 %v12254_v60 }
 0xe5c   :  { %3382 = vadd.xlane.f32.xlu0 %v3360_v61 }
 0xec9   :  { %v3307_v18 = vpop.xlane.xlu0 %3306 }
 0xeca   :  { %v3338_v30 = vmul.f32 0.0078125, %v3307_v18  ;;  %v12274_v18 = vld [vmem:[%s14428_s10] ss:$0 sm:$0xff] }
 0xecb   :  { %v3309_v0 = vpop.xlane.xlu1 %3308 }
 0xecc   :  { %v3418_v26 = vmul.f32 %v3338_v30, %v3338_v30  ;;  %v3339_v55 = vmul.f32 0.0078125, %v3309_v0  ;;  %v3450_v50 = vsub.f32 %v12199_v32, %v3338_v30 }
 0xecd   :  { %v3371_v24 = vpop.xlane.xlu0 %3370 }
 0xece   :  { %v3402_v53 = vmul.f32 0.0078125, %v3371_v24  ;;  %v3419_v15 = vmul.f32 %v3339_v55, %v3339_v55  ;;  %v3451_v25 = vsub.f32 %v12203_v42, %v3339_v55 }
 0xecf   :  { %v3313_v19 = vpop.xlane.xlu1 %3312 }
 0xed0   :  { %v3434_v37 = vsub.f32 %v3402_v53, %v3418_v26  ;;  %v3341_v43 = vmul.f32 0.0078125, %v3313_v19 }
 0xed1   :  { %v3373_v51 = vpop.xlane.xlu0 %3372 }
 0xed2   :  { %v3466_v7 = vadd.f32 1e-05, %v3434_v37  ;;  %v3403_v49 = vmul.f32 0.0078125, %v3373_v51  ;;  %v3421_v62 = vmul.f32 %v3341_v43, %v3341_v43  ;;  %v3453_v42 = vsub.f32 %v12210_v63, %v3341_v43 }
 0xed3   :  { %v3377_v12 = vpop.xlane.xlu1 %3376 }
 0xed4   :  { %10397 = vrsqrt.f32 %v3466_v7  ;;  %v3435_v41 = vsub.f32 %v3403_v49, %v3419_v15  ;;  %v3405_v22 = vmul.f32 0.0078125, %v3377_v12 }
 0xed5   :  { %v3311_v8 = vpop.xlane.xlu0 %3310 }
 0xed6   :  { %v3467_v20 = vadd.f32 1e-05, %v3435_v41  ;;  %v3437_v39 = vsub.f32 %v3405_v22, %v3421_v62  ;;  %v3340_v16 = vmul.f32 0.0078125, %v3311_v8 }
 0xed7   :  { %v3317_v21 = vpop.xlane.xlu1 %3316 }
 0xed8   :  { %10399 = vrsqrt.f32 %v3467_v20  ;;  %v3469_v57 = vadd.f32 1e-05, %v3437_v39  ;;  %v12259_v17 = vmul.f32 0.0078125, %v3317_v21  ;;  %v3420_v44 = vmul.f32 %v3340_v16, %v3340_v16 }
 0xed9   :  { %v3375_v56 = vpop.xlane.xlu0 %3374  ;;  %v3452_v15 = vsub.f32 %v12227_v29, %v3340_v16 }
 0xeda   :  { %10401 = vrsqrt.f32 %v3469_v57  ;;  %v3404_v45 = vmul.f32 0.0078125, %v3375_v56  ;;  %v3423_v11 = vmul.f32 %v12259_v17, %v12259_v17  ;;  %v3455_v20 = vsub.f32 %v12233_v2, %v12259_v17 }
 0xedb   :  { %v3381_v48 = vpop.xlane.xlu1 %3380 }
 0xedc   :  { %v3436_v27 = vsub.f32 %v3404_v45, %v3420_v44  ;;  %v3407_v10 = vmul.f32 0.0078125, %v3381_v48 }
 0xedd   :  { %v3315_v3 = vpop.xlane.xlu0 %3314 }
 0xede   :  { %v10398_v59 = vpop.eup %10397  ;;  %v3468_v9 = vadd.f32 1e-05, %v3436_v27  ;;  %v3439_v38 = vsub.f32 %v3407_v10, %v3423_v11  ;;  %v3342_v5 = vmul.f32 0.0078125, %v3315_v3 }
 0xedf   :  { %v3498_v46 = vmul.f32 %v10398_v59, %v3450_v50  ;;  %v3321_v58 = vpop.xlane.xlu1 %3320 }
 0xee0   :  { %10403 = vrsqrt.f32 %v3468_v9  ;;  %v3471_v31 = vadd.f32 1e-05, %v3439_v38  ;;  %v3345_v28 = vmul.f32 0.0078125, %v3321_v58  ;;  %v3422_v32 = vmul.f32 %v3342_v5, %v3342_v5 }
 0xee1   :  { %v3379_v35 = vpop.xlane.xlu0 %3378  ;;  %v3520_v13 = vmul.f32 %v12267_v14, %v3498_v46  ;;  %v3454_v56 = vsub.f32 %v12242_v6, %v3342_v5 }
 0xee2   :  { %v10400_v61 = vpop.eup %10399  ;;  %10405 = vrsqrt.f32 %v3471_v31  ;;  %v3406_v52 = vmul.f32 0.0078125, %v3379_v35  ;;  %v3425_v34 = vmul.f32 %v3345_v28, %v3345_v28  ;;  %v3457_v11 = vsub.f32 %v12245_v4, %v3345_v28  ;;  %v10725_v28 = vld [vmem:[#allocation2 + $0x40] sm:$0xff] }
 0xee3   :  { %v3499_v54 = vmul.f32 %v10400_v61, %v3451_v25  ;;  %v3385_v47 = vpop.xlane.xlu1 %3384  ;;  %v12279_v53 = vadd.f32 %v12274_v18, %v3520_v13 }
 0xee4   :  { %v10402_v40 = vpop.eup %10401  ;;  %v3438_v36 = vsub.f32 %v3406_v52, %v3422_v32  ;;  %v3409_v1 = vmul.f32 0.0078125, %v3385_v47 }
 0xee5   :  { %v3319_v30 = vpop.xlane.xlu0 %3318  ;;  %v3521_v0 = vmul.f32 %v12267_v14, %v3499_v54  ;;  %v3501_v37 = vmul.f32 %v10402_v40, %v3453_v42  ;;  %v10726_v54 = vld [vmem:[#allocation2 + $0x48] sm:$0xff]  ;;  %v10727_v40 = vld [vmem:[#allocation2 + $0x50] sm:$0xff] }
 0xee6   :  { %v3470_v24 = vadd.f32 1e-05, %v3438_v36  ;;  %v3441_v26 = vsub.f32 %v3409_v1, %v3425_v34  ;;  %v3344_v55 = vmul.f32 0.0078125, %v3319_v30  ;;  %v10728_v1 = vld [vmem:[#allocation2 + $0x58] sm:$0xff] }
 0xee7   :  { %v12282_v19 = vadd.f32 %v12274_v18, %v3521_v0  ;;  %v3523_v41 = vmul.f32 %v12267_v14, %v3501_v37 }
 0xee8   :  { %10407 = vrsqrt.f32 %v3470_v24  ;;  %v3473_v51 = vadd.f32 1e-05, %v3441_v26  ;;  %v3424_v49 = vmul.f32 %v3344_v55, %v3344_v55  ;;  %v3456_v3 = vsub.f32 %v12254_v60, %v3344_v55 }
 0xee9   :  { %v3383_v7 = vpop.xlane.xlu0 %3382  ;;  %v3558_v63 = vpack.c.bf16 %v12282_v19, %v12279_v53  ;;  %v12296_v21 = vadd.f32 %v12274_v18, %v3523_v41 }
 0xeea   :  { %v10404_v43 = vpop.eup %10403  ;;  %10409 = vrsqrt.f32 %v3473_v51  ;;  %v3408_v12 = vmul.f32 0.0078125, %v3383_v7  ;;  %v10729_v51 = vld [vmem:[#allocation2 + $0x60] sm:$0xff] }
 0xeeb   :  { %3707 = vmatmul.mubr.bf16.vlgmr.msra.gmra.mrb[96].mxu1 %v3558_v63  ;;  %v3500_v62 = vmul.f32 %v10404_v43, %v3452_v15  ;;  %v10730_v43 = vld [vmem:[#allocation2 + $0x68] sm:$0xff] }
 0xeec   :  { %v10406_v22 = vpop.eup %10405  ;;  %v3440_v8 = vsub.f32 %v3408_v12, %v3424_v49  ;;  %3716 = vmatprep.mubr.bf16.mxu1 %v14539_v33 }
 0xeed   :  { %v3522_v29 = vmul.f32 %v12267_v14, %v3500_v62  ;;  %v3503_v57 = vmul.f32 %v10406_v22, %v3455_v20  ;;  %v10731_v22 = vld [vmem:[#allocation2 + $0x70] sm:$0xff] }
 0xeee   :  { %v3472_v39 = vadd.f32 1e-05, %v3440_v8 }
 0xeef   :  { %v12293_v16 = vadd.f32 %v12274_v18, %v3522_v29  ;;  %v3525_v2 = vmul.f32 %v12267_v14, %v3503_v57  ;;  %v10732_v29 = vld [vmem:[#allocation2 + $0x78] sm:$0xff] }
 0xef0   :  { %10411 = vrsqrt.f32 %v3472_v39 }
 0xef1   :  { %v3559_v44 = vpack.c.bf16 %v12296_v21, %v12293_v16  ;;  %v12309_v6 = vadd.f32 %v12274_v18, %v3525_v2  ;;  %v10111_v2 = vld [vmem:[#allocation10 + $0x48] sm:$0xff]  }
 0xef2   :  { %v10408_v45 = vpop.eup %10407 }
 0xef3   :  { %3717 = vmatmul.mubr.bf16.gmra.mrb[100].mxu1 %v3559_v44  ;;  %v3502_v48 = vmul.f32 %v10408_v45, %v3454_v56  ;;  %v10109_v56 = vld [vmem:[#allocation10 + $0x40] sm:$0xff]  }
 0xef4   :  { %v10410_v17 = vpop.eup %10409  ;;  %3726 = vmatprep.mubr.bf16.mxu1 %v14539_v33  ;;  %v10110_v45 = vld [vmem:[#allocation10] sm:$0xff]   ;;  %9036 = vmatprep.subr.bf16.mxu0 %v10109_v56 }
 0xef5   :  { %v3524_v27 = vmul.f32 %v12267_v14, %v3502_v48  ;;  %v3505_v50 = vmul.f32 %v10410_v17, %v3457_v11  ;;  %9037 = vmatpush3.bf16.msra.mxu0 %v10110_v45  ;;  %v10112_v11 = vld [vmem:[#allocation10 + $0x8] sm:$0xff]  }
 0xef6   :  { %9038 = vmatprep.subr.bf16.mxu0 %v10111_v2 }
 0xef7   :  { %v12306_v10 = vadd.f32 %v12274_v18, %v3524_v27  ;;  %v3527_v5 = vmul.f32 %v12267_v14, %v3505_v50  ;;  %v10113_v50 = vld [vmem:[#allocation10 + $0x50] sm:$0xff]  }
 0xef9   :  { %v3560_v59 = vpack.c.bf16 %v12309_v6, %v12306_v10  ;;  %v12321_v58 = vadd.f32 %v12274_v18, %v3527_v5  ;;  %9039 = vmatpush3.bf16.msra.mxu0 %v10112_v11  ;;  %v10119_v5 = vld [vmem:[#allocation10 + $0x68] sm:$0xff]  }
 0xefa   :  { %v10412_v9 = vpop.eup %10411  ;;  %9040 = vmatprep.subr.bf16.mxu0 %v10113_v50 }
 0xefb   :  { %3727 = vmatmul.mubr.bf16.gmra.mrb[104].mxu1 %v3560_v59  ;;  %v3504_v38 = vmul.f32 %v10412_v9, %v3456_v3  ;;  %v10115_v3 = vld [vmem:[#allocation10 + $0x58] sm:$0xff]   ;;  %v10117_v9 = vld [vmem:[#allocation10 + $0x60] sm:$0xff]  }
 0xefc   :  { %3736 = vmatprep.mubr.bf16.mxu1 %v14539_v33  ;;  %v10116_v59 = vld [vmem:[#allocation10 + $0x18] sm:$0xff]  }
 0xefd   :  { %v3526_v4 = vmul.f32 %v12267_v14, %v3504_v38  ;;  %v10118_v38 = vld [vmem:[#allocation10 + $0x20] sm:$0xff]  }
 0xeff   :  { %v12318_v46 = vadd.f32 %v12274_v18, %v3526_v4  ;;  %v10120_v4 = vld [vmem:[#allocation10 + $0x28] sm:$0xff]  }
 0xf01   :  { %v3561_v60 = vpack.c.bf16 %v12321_v58, %v12318_v46 }
 0xf03   :  { %3737 = vmatmul.mubr.bf16.gmra.mrb[108].mxu1 %v3561_v60  ;;  %v10121_v60 = vld [vmem:[#allocation10 + $0x70] sm:$0xff]  }
 0xf04   :  { %3746 = vmatprep.mubr.bf16.mxu1 %v14539_v33 }
 0xf0e   :  { %v9638_v31 = vpop.f32.mrb[88].mxu0 }
 0xf0f   :  { %v3234_v25 = vpop.f32.mrb[89].mxu0  ;;  %v3275_v34 = vadd.f32 %v10727_v40, %v9638_v31  ;;  %v10122_v31 = vld [vmem:[#allocation10 + $0x30] sm:$0xff]  }
 0xf10   :  { %v3273_v35 = vadd.f32 %v10725_v28, %v3234_v25  ;;  %v9639_v61 = vpop.f32.mrb[90].mxu0  ;;  %v10123_v25 = vld [vmem:[#allocation10 + $0x78] sm:$0xff]  }
 0xf11   :  { %v3237_v32 = vpop.f32.mrb[91].mxu0  ;;  %v3276_v42 = vadd.f32 %v10728_v1, %v9639_v61  ;;  %v12339_v0 = vadd.f32 %v12189_v23, %v3275_v34  ;;  %v10124_v28 = vld [vmem:[#allocation10 + $0x38] sm:$0xff]  }
 0xf12   :  { %v12327_v52 = vadd.f32 %v12189_v23, %v3273_v35  ;;  %v3274_v47 = vadd.f32 %v10726_v54, %v3237_v32 }
 0xf13   :  { %v12342_v26 = vadd.f32 %v12189_v23, %v3276_v42  ;;  %v3364_v63 = vmul.f32 %v12339_v0, %v12339_v0 }
 0xf14   :  { %v12330_v13 = vadd.f32 %v12189_v23, %v3274_v47  ;;  %3322 = vadd.xlane.f32.xlu0 %v12327_v52  ;;  %v3362_v36 = vmul.f32 %v12327_v52, %v12327_v52 }
 0xf15   :  { %v3365_v12 = vmul.f32 %v12342_v26, %v12342_v26 }
 0xf16   :  { %3324 = vadd.xlane.f32.xlu1 %v12330_v13  ;;  %v3363_v30 = vmul.f32 %v12330_v13, %v12330_v13 }
 0xf18   :  { %3386 = vadd.xlane.f32.xlu0 %v3362_v36 }
 0xf1a   :  { %3388 = vadd.xlane.f32.xlu1 %v3363_v30 }
 0xf1b   :  { %v9642_v24 = vpop.f32.mrb[92].mxu0 }
 0xf1c   :  { %v3250_v55 = vpop.f32.mrb[93].mxu0  ;;  %3326 = vadd.xlane.f32.xlu0 %v12339_v0  ;;  %v3279_v8 = vadd.f32 %v10731_v22, %v9642_v24 }
 0xf1d   :  { %v9643_v37 = vpop.f32.mrb[94].mxu0  ;;  %v3277_v15 = vadd.f32 %v10729_v51, %v3250_v55 }
 0xf1e   :  { %v3253_v7 = vpop.f32.mrb[95].mxu0  ;;  %3328 = vadd.xlane.f32.xlu1 %v12342_v26  ;;  %v3280_v39 = vadd.f32 %v10732_v29, %v9643_v37  ;;  %v12363_v44 = vadd.f32 %v12189_v23, %v3279_v8 }
 0xf1f   :  { %v3278_v49 = vadd.f32 %v10730_v43, %v3253_v7  ;;  %v12351_v62 = vadd.f32 %v12189_v23, %v3277_v15 }
 0xf20   :  { %3390 = vadd.xlane.f32.xlu0 %v3364_v63  ;;  %v12366_v48 = vadd.f32 %v12189_v23, %v3280_v39  ;;  %v3368_v17 = vmul.f32 %v12363_v44, %v12363_v44 }
 0xf21   :  { %v12354_v41 = vadd.f32 %v12189_v23, %v3278_v49  ;;  %v3366_v20 = vmul.f32 %v12351_v62, %v12351_v62  ;;  %v10114_v23 = vld [vmem:[#allocation10 + $0x10] sm:$0xff]  }
 0xf22   :  { %3392 = vadd.xlane.f32.xlu1 %v3365_v12  ;;  %v3369_v27 = vmul.f32 %v12366_v48, %v12366_v48  ;;  %9041 = vmatpush3.bf16.msra.mxu0 %v10114_v23 }
 0xf23   :  { %v3367_v57 = vmul.f32 %v12354_v41, %v12354_v41  ;;  %9042 = vmatprep.subr.bf16.mxu0 %v10115_v3 }
 0xf24   :  { %3330 = vadd.xlane.f32.xlu0 %v12351_v62 }
 0xf26   :  { %3332 = vadd.xlane.f32.xlu1 %v12354_v41  ;;  %9043 = vmatpush3.bf16.msra.mxu0 %v10116_v59 }
 0xf27   :  { %9044 = vmatprep.subr.bf16.mxu0 %v10117_v9 }
 0xf28   :  { %3394 = vadd.xlane.f32.xlu0 %v3366_v20 }
 0xf2a   :  { %3396 = vadd.xlane.f32.xlu1 %v3367_v57  ;;  %9045 = vmatpush3.bf16.msra.mxu0 %v10118_v38 }
 0xf2b   :  { %9046 = vmatprep.subr.bf16.mxu0 %v10119_v5 }
 0xf2c   :  { %3334 = vadd.xlane.f32.xlu0 %v12363_v44 }
 0xf2e   :  { %3336 = vadd.xlane.f32.xlu1 %v12366_v48  ;;  %9047 = vmatpush3.bf16.msra.mxu0 %v10120_v4 }
 0xf2f   :  { %9048 = vmatprep.subr.bf16.mxu0 %v10121_v60 }
 0xf30   :  { %3398 = vadd.xlane.f32.xlu0 %v3368_v17 }
 0xf32   :  { %3400 = vadd.xlane.f32.xlu1 %v3369_v27  ;;  %9049 = vmatpush3.bf16.msra.mxu0 %v10122_v31 }
 0xf33   :  { %9050 = vmatprep.subr.bf16.mxu0 %v10123_v25 }
 0xf36   :  { %9051 = vmatpush3.bf16.msra.mxu0 %v10124_v28 }
 0xfa1   :  { %v3323_v35 = vpop.xlane.xlu0 %3322 }
 0xfa2   :  { %v3346_v61 = vmul.f32 0.0078125, %v3323_v35 }
 0xfa3   :  { %v3325_v32 = vpop.xlane.xlu1 %3324 }
 0xfa4   :  { %v3347_v54 = vmul.f32 0.0078125, %v3325_v32  ;;  %v3426_v40 = vmul.f32 %v3346_v61, %v3346_v61  ;;  %v3458_v11 = vsub.f32 %v12327_v52, %v3346_v61  ;;  %v3582_v52 = vld [vmem:[%s14424_s6] sm:$0x3] }
 0xfa5   :  { %v3387_v47 = vpop.xlane.xlu0 %3386 }
 0xfa6   :  { %v3410_v34 = vmul.f32 0.0078125, %v3387_v47  ;;  %v3427_v1 = vmul.f32 %v3347_v54, %v3347_v54  ;;  %v3459_v9 = vsub.f32 %v12330_v13, %v3347_v54  ;;  %v14580_v54 = vld [vmem:[#allocation17_spill] sm:$0xff] }
 0xfa7   :  { %v3389_v36 = vpop.xlane.xlu1 %3388 }
 0xfa8   :  { %v3442_v42 = vsub.f32 %v3410_v34, %v3426_v40  ;;  %v3411_v30 = vmul.f32 0.0078125, %v3389_v36  ;;  %v12399_v34 = vrot.slane %v3582_v52, %v14580_v54 }
 0xfa9   :  { %v3327_v24 = vpop.xlane.xlu0 %3326 }
 0xfaa   :  { %v3474_v55 = vadd.f32 1e-05, %v3442_v42  ;;  %v3443_v37 = vsub.f32 %v3411_v30, %v3427_v1  ;;  %v12374_v51 = vmul.f32 0.0078125, %v3327_v24  ;;  %v14581_v42 = vld [vmem:[#allocation18_spill] sm:$0xff] }
 0xfab   :  { %v3329_v15 = vpop.xlane.xlu1 %3328  ;;  %v12403_v30 = vrot.slane %v3582_v52, %v14581_v42 }
 0xfac   :  { %10413 = vrsqrt.f32 %v3474_v55  ;;  %v3475_v7 = vadd.f32 1e-05, %v3443_v37  ;;  %v12376_v63 = vmul.f32 0.0078125, %v3329_v15  ;;  %v3428_v49 = vmul.f32 %v12374_v51, %v12374_v51 }
 0xfad   :  { %v3391_v43 = vpop.xlane.xlu0 %3390 }
 0xfae   :  { %10415 = vrsqrt.f32 %v3475_v7  ;;  %v3412_v12 = vmul.f32 0.0078125, %v3391_v43  ;;  %v3429_v8 = vmul.f32 %v12376_v63, %v12376_v63  ;;  %v3460_v43 = vsub.f32 %v12339_v0, %v12374_v51 }
 0xfaf   :  { %v3393_v22 = vpop.xlane.xlu1 %3392 }
 0xfb0   :  { %v3444_v20 = vsub.f32 %v3412_v12, %v3428_v49  ;;  %v3413_v29 = vmul.f32 0.0078125, %v3393_v22 }
 0xfb1   :  { %v3331_v39 = vpop.xlane.xlu0 %3330 }
 0xfb2   :  { %v3476_v57 = vadd.f32 1e-05, %v3444_v20  ;;  %v3445_v56 = vsub.f32 %v3413_v29, %v3429_v8  ;;  %v12382_v45 = vmul.f32 0.0078125, %v3331_v39  ;;  %v3461_v8 = vsub.f32 %v12342_v26, %v12376_v63 }
 0xfb3   :  { %v3333_v2 = vpop.xlane.xlu1 %3332 }
 0xfb4   :  { %10417 = vrsqrt.f32 %v3476_v57  ;;  %v3477_v17 = vadd.f32 1e-05, %v3445_v56  ;;  %v12385_v27 = vmul.f32 0.0078125, %v3333_v2  ;;  %v3430_v3 = vmul.f32 %v12382_v45, %v12382_v45 }
 0xfb5   :  { %v3395_v50 = vpop.xlane.xlu0 %3394 }
 0xfb6   :  { %v10414_v23 = vpop.eup %10413  ;;  %10419 = vrsqrt.f32 %v3477_v17  ;;  %v3414_v59 = vmul.f32 0.0078125, %v3395_v50  ;;  %v3431_v60 = vmul.f32 %v12385_v27, %v12385_v27 }
 0xfb7   :  { %v3397_v38 = vpop.xlane.xlu1 %3396  ;;  %v3506_v5 = vmul.f32 %v10414_v23, %v3458_v11 }
 0xfb8   :  { %v10416_v4 = vpop.eup %10415  ;;  %v3446_v31 = vsub.f32 %v3414_v59, %v3430_v3  ;;  %v3415_v25 = vmul.f32 0.0078125, %v3397_v38 }
 0xfb9   :  { %v3335_v28 = vpop.xlane.xlu0 %3334  ;;  %v3507_v35 = vmul.f32 %v10416_v4, %v3459_v9  ;;  %v3528_v61 = vmul.f32 %v12267_v14, %v3506_v5 }
 0xfba   :  { %v3478_v32 = vadd.f32 1e-05, %v3446_v31  ;;  %v3447_v47 = vsub.f32 %v3415_v25, %v3431_v60  ;;  %v12396_v40 = vmul.f32 0.0078125, %v3335_v28  ;;  %v3462_v28 = vsub.f32 %v12351_v62, %v12382_v45 }
 0xfbb   :  { %v3337_v13 = vpop.xlane.xlu1 %3336  ;;  %v3529_v36 = vmul.f32 %v12267_v14, %v3507_v35  ;;  %v12408_v37 = vadd.f32 %v12274_v18, %v3528_v61 }
 0xfbc   :  { %10421 = vrsqrt.f32 %v3478_v32  ;;  %v3479_v1 = vadd.f32 1e-05, %v3447_v47  ;;  %v12405_v24 = vmul.f32 0.0078125, %v3337_v13  ;;  %v3432_v49 = vmul.f32 %v12396_v40, %v12396_v40 }
 0xfbd   :  { %v3399_v55 = vpop.xlane.xlu0 %3398  ;;  %v12411_v15 = vadd.f32 %v12274_v18, %v3529_v36 }
 0xfbe   :  { %v10418_v7 = vpop.eup %10417  ;;  %10423 = vrsqrt.f32 %v3479_v1  ;;  %v3416_v12 = vmul.f32 0.0078125, %v3399_v55  ;;  %v3708_v22 = vpop.f32.mrb[96].mxu1  ;;  %v3433_v20 = vmul.f32 %v12405_v24, %v12405_v24  ;;  %v3463_v1 = vsub.f32 %v12354_v41, %v12385_v27 }
 0xfbf   :  { %v3709_v29 = vadd.f32 %v3708_v22, %v12399_v34  ;;  %v3710_v39 = vpop.f32.mrb[97].mxu1  ;;  %v3401_v57 = vpop.xlane.xlu1 %3400  ;;  %v3562_v56 = vpack.c.bf16 %v12411_v15, %v12408_v37  ;;  %v3508_v50 = vmul.f32 %v10418_v7, %v3460_v43 }
 0xfc0   :  { %v10420_v0 = vpop.eup %10419  ;;  %v3448_v51 = vsub.f32 %v3416_v12, %v3432_v49  ;;  %v3711_v2 = vadd.f32 %v3710_v39, %v12403_v30  ;;  %v3417_v17 = vmul.f32 0.0078125, %v3401_v57  ;;  %v3712_v11 = vpop.f32.mrb[98].mxu1 }
 0xfc1   :  { %v3713_v23 = vadd.f32 %v3712_v11, %v12399_v34  ;;  %v3714_v26 = vpop.f32.mrb[99].mxu1  ;;  %3747 = vmatmul.mubr.bf16.gmra.mrb[112].mxu1 %v3562_v56  ;;  %v3509_v63 = vmul.f32 %v10420_v0, %v3461_v8  ;;  %v3787_v38 = vmax.f32 %v3709_v29, 0.0  ;;  %v3530_v4 = vmul.f32 %v12267_v14, %v3508_v50 }
 0xfc2   :  { %v3480_v3 = vadd.f32 1e-05, %v3448_v51  ;;  %v3449_v59 = vsub.f32 %v3417_v17, %v3433_v20  ;;  %v3715_v9 = vadd.f32 %v3714_v26, %v12403_v30  ;;  %3756 = vmatprep.mubr.bf16.mxu1 %v14539_v33  ;;  %v3788_v31 = vmax.f32 %v3711_v2, 0.0 }
 0xfc3   :  { %v3789_v5 = vmax.f32 %v3713_v23, 0.0  ;;  %v3531_v60 = vmul.f32 %v12267_v14, %v3509_v63  ;;  %v12433_v61 = vadd.f32 %v12274_v18, %v3530_v4  ;;  %v3464_v51 = vsub.f32 %v12363_v44, %v12396_v40 }
 0xfc4   :  { %10425 = vrsqrt.f32 %v3480_v3  ;;  %v3481_v25 = vadd.f32 1e-05, %v3449_v59  ;;  %v3790_v52 = vmax.f32 %v3715_v9, 0.0  ;;  %v3465_v63 = vsub.f32 %v12366_v48, %v12405_v24 }
 0xfc5   :  { %v3819_v35 = vpack.c.bf16 %v3789_v5, %v3787_v38  ;;  %v12436_v32 = vadd.f32 %v12274_v18, %v3531_v60 }
 0xfc6   :  { %v10422_v47 = vpop.eup %10421  ;;  %10427 = vrsqrt.f32 %v3481_v25  ;;  %v3820_v13 = vpack.c.bf16 %v3790_v52, %v3788_v31  ;;  %v3718_v36 = vpop.f32.mrb[100].mxu1 }
 0xfc7   :  { %v3719_v55 = vadd.f32 %v3718_v36, %v12399_v34  ;;  %v3720_v7 = vpop.f32.mrb[101].mxu1  ;;  %v3563_v62 = vpack.c.bf16 %v12436_v32, %v12433_v61  ;;  %v3510_v45 = vmul.f32 %v10422_v47, %v3462_v28 }
 0xfc8   :  { %v10424_v43 = vpop.eup %10423  ;;  %v3721_v49 = vadd.f32 %v3720_v7, %v12403_v30  ;;  %v3722_v12 = vpop.f32.mrb[102].mxu1  ;;  %4002 = vmatprep.mubr.bf16.mxu0 %v3820_v13 }
 0xfc9   :  { %v3723_v22 = vadd.f32 %v3722_v12, %v12399_v34  ;;  %v3724_v8 = vpop.f32.mrb[103].mxu1  ;;  %3757 = vmatmul.mubr.bf16.gmra.mrb[116].mxu1 %v3563_v62  ;;  %4003 = vmatmul.mubr.bf16.vlgmr.msra.gmra.mrb[96].mxu0 %v3819_v35  ;;  %v3511_v20 = vmul.f32 %v10424_v43, %v3463_v1  ;;  %v3532_v41 = vmul.f32 %v12267_v14, %v3510_v45  ;;  %v3791_v29 = vmax.f32 %v3719_v55, 0.0 }
 0xfca   :  { %v3725_v27 = vadd.f32 %v3724_v8, %v12403_v30  ;;  %3766 = vmatprep.mubr.bf16.mxu1 %v14539_v33  ;;  %v3792_v56 = vmax.f32 %v3721_v49, 0.0 }
 0xfcb   :  { %v3793_v39 = vmax.f32 %v3723_v22, 0.0  ;;  %v3533_v57 = vmul.f32 %v12267_v14, %v3511_v20  ;;  %v12452_v17 = vadd.f32 %v12274_v18, %v3532_v41 }
 0xfcc   :  { %v3794_v0 = vmax.f32 %v3725_v27, 0.0 }
 0xfcd   :  { %v3821_v2 = vpack.c.bf16 %v3793_v39, %v3791_v29  ;;  %v12455_v11 = vadd.f32 %v12274_v18, %v3533_v57  ;;  %v10125_v57 = vld [vmem:[#allocation5 + $0xc0] ss:$12 sps:$4 sm:$0xff]  }
 0xfce   :  { %v10426_v50 = vpop.eup %10425  ;;  %v3822_v23 = vpack.c.bf16 %v3794_v0, %v3792_v56  ;;  %v3728_v26 = vpop.f32.mrb[104].mxu1  ;;  %v10127_v56 = vld [vmem:[#allocation5 + $0xc4] ss:$12 sps:$4 sm:$0xff]  }
 0xfcf   :  { %v3729_v3 = vadd.f32 %v3728_v26, %v12399_v34  ;;  %v3730_v59 = vpop.f32.mrb[105].mxu1  ;;  %v3564_v9 = vpack.c.bf16 %v12455_v11, %v12452_v17  ;;  %v3512_v44 = vmul.f32 %v10426_v50, %v3464_v51  ;;  %4524 = vmatprep.subr.bf16.mxu1 %v10127_v56 }
 0xfd0   :  { %v10428_v40 = vpop.eup %10427  ;;  %v3731_v38 = vadd.f32 %v3730_v59, %v12403_v30  ;;  %v3732_v5 = vpop.f32.mrb[106].mxu1  ;;  %4010 = vmatprep.mubr.bf16.mxu0 %v3822_v23  ;;  %4525 = vmatpush1.bf16.msra.mxu1 %v10125_v57 }
 0xfd1   :  { %v3733_v4 = vadd.f32 %v3732_v5, %v12399_v34  ;;  %v3734_v60 = vpop.f32.mrb[107].mxu1  ;;  %3767 = vmatmul.mubr.bf16.gmra.mrb[120].mxu1 %v3564_v9  ;;  %4011 = vmatmul.mubr.bf16.gmra.mrb[100].mxu0 %v3821_v2  ;;  %v3513_v31 = vmul.f32 %v10428_v40, %v3465_v63  ;;  %v3534_v48 = vmul.f32 %v12267_v14, %v3512_v44  ;;  %v3795_v25 = vmax.f32 %v3729_v3, 0.0 }
 0xfd2   :  { %v3735_v24 = vadd.f32 %v3734_v60, %v12403_v30  ;;  %3776 = vmatprep.mubr.bf16.mxu1 %v14539_v33  ;;  %v3796_v35 = vmax.f32 %v3731_v38, 0.0 }
 0xfd3   :  { %v3797_v52 = vmax.f32 %v3733_v4, 0.0  ;;  %v3535_v28 = vmul.f32 %v12267_v14, %v3513_v31  ;;  %v12469_v36 = vadd.f32 %v12274_v18, %v3534_v48 }
 0xfd4   :  { %v3798_v47 = vmax.f32 %v3735_v24, 0.0  ;;  %v12489_v24 = vld [vmem:[%s14426_s8] ss:$0 sm:$0xff] }
 0xfd5   :  { %v3823_v13 = vpack.c.bf16 %v3797_v52, %v3795_v25  ;;  %v12472_v1 = vadd.f32 %v12274_v18, %v3535_v28 }
 0xfd6   :  { %v3824_v55 = vpack.c.bf16 %v3798_v47, %v3796_v35  ;;  %v3738_v7 = vpop.f32.mrb[108].mxu1 }
 0xfd7   :  { %v3739_v62 = vadd.f32 %v3738_v7, %v12399_v34  ;;  %v3740_v45 = vpop.f32.mrb[109].mxu1  ;;  %v3565_v43 = vpack.c.bf16 %v12472_v1, %v12469_v36 }
 0xfd8   :  { %v3741_v49 = vadd.f32 %v3740_v45, %v12403_v30  ;;  %v3742_v14 = vpop.f32.mrb[110].mxu1  ;;  %4018 = vmatprep.mubr.bf16.mxu0 %v3824_v55 }
 0xfd9   :  { %v3743_v12 = vadd.f32 %v3742_v14, %v12399_v34  ;;  %v3744_v22 = vpop.f32.mrb[111].mxu1  ;;  %3777 = vmatmul.mubr.bf16.gmra.mrb[124].mxu1 %v3565_v43  ;;  %4019 = vmatmul.mubr.bf16.gmra.mrb[104].mxu0 %v3823_v13  ;;  %v3799_v8 = vmax.f32 %v3739_v62, 0.0 }
 0xfda   :  { %v3745_v18 = vadd.f32 %v3744_v22, %v12403_v30  ;;  %4556 = vmatprep.mubr.bf16.mxu1 %v14539_v33  ;;  %v3800_v41 = vmax.f32 %v3741_v49, 0.0 }
 0xfdb   :  { %v3801_v20 = vmax.f32 %v3743_v12, 0.0 }
 0xfdc   :  { %v3802_v27 = vmax.f32 %v3745_v18, 0.0 }
 0xfdd   :  { %v3825_v29 = vpack.c.bf16 %v3801_v20, %v3799_v8 }
 0xfde   :  { %v3826_v39 = vpack.c.bf16 %v3802_v27, %v3800_v41 }
 0xfe0   :  { %4026 = vmatprep.mubr.bf16.mxu0 %v3826_v39 }
 0xfe1   :  { %4027 = vmatmul.mubr.bf16.gmra.mrb[108].mxu0 %v3825_v29 }
0x1094   :  { %v3748_v0 = vpop.f32.mrb[112].mxu1 }
0x1095   :  { %v3749_v51 = vadd.f32 %v3748_v0, %v12399_v34  ;;  %v3750_v2 = vpop.f32.mrb[113].mxu1 }
0x1096   :  { %v3751_v50 = vadd.f32 %v3750_v2, %v12403_v30  ;;  %v3752_v23 = vpop.f32.mrb[114].mxu1 }
0x1097   :  { %v3753_v26 = vadd.f32 %v3752_v23, %v12399_v34  ;;  %v3754_v63 = vpop.f32.mrb[115].mxu1  ;;  %v3803_v59 = vmax.f32 %v3749_v51, 0.0 }
0x1098   :  { %v3755_v3 = vadd.f32 %v3754_v63, %v12403_v30  ;;  %v3804_v44 = vmax.f32 %v3751_v50, 0.0 }
0x1099   :  { %v3805_v9 = vmax.f32 %v3753_v26, 0.0 }
0x109a   :  { %v3806_v40 = vmax.f32 %v3755_v3, 0.0 }
0x109b   :  { %v3827_v38 = vpack.c.bf16 %v3805_v9, %v3803_v59 }
0x109c   :  { %v3828_v5 = vpack.c.bf16 %v3806_v40, %v3804_v44  ;;  %v3758_v4 = vpop.f32.mrb[116].mxu1  ;;  %v9052_v60 = vpop.f32.mrb[96].mxu0 }
0x109d   :  { %v3759_v31 = vadd.f32 %v3758_v4, %v12399_v34  ;;  %v3760_v48 = vpop.f32.mrb[117].mxu1  ;;  %v9053_v25 = vpop.f32.mrb[97].mxu0 }
0x109e   :  { %v3761_v52 = vadd.f32 %v3760_v48, %v12403_v30  ;;  %v9054_v28 = vadd.f32 %v9053_v25, %v9052_v60  ;;  %v3762_v35 = vpop.f32.mrb[118].mxu1  ;;  %v9055_v47 = vpop.f32.mrb[98].mxu0  ;;  %4034 = vmatprep.mubr.bf16.mxu0 %v3828_v5 }
0x109f   :  { %v3763_v13 = vadd.f32 %v3762_v35, %v12399_v34  ;;  %v3764_v55 = vpop.f32.mrb[119].mxu1  ;;  %v9056_v7 = vpop.f32.mrb[99].mxu0  ;;  %4035 = vmatmul.mubr.bf16.gmra.mrb[112].mxu0 %v3827_v38  ;;  %v3807_v49 = vmax.f32 %v3759_v31, 0.0 }
0x10a0   :  { %v4005_v62 = vadd.f32 %v9054_v28, %v12489_v24  ;;  %v3765_v45 = vadd.f32 %v3764_v55, %v12403_v30  ;;  %v9057_v43 = vadd.f32 %v9056_v7, %v9055_v47  ;;  %v3808_v12 = vmax.f32 %v3761_v52, 0.0 }
0x10a1   :  { %v3809_v14 = vmax.f32 %v3763_v13, 0.0 }
0x10a2   :  { %v3810_v22 = vmax.f32 %v3765_v45, 0.0  ;;  %v4008_v18 = vadd.f32 %v9057_v43, %v12489_v24  ;;  %v12497_v8 = vadd.f32 %v4005_v62, %v12279_v53 }
0x10a3   :  { %v3829_v20 = vpack.c.bf16 %v3809_v14, %v3807_v49 }
0x10a4   :  { %v3830_v41 = vpack.c.bf16 %v3810_v22, %v3808_v12  ;;  %4085 = vadd.xlane.f32.xlu0 %v12497_v8  ;;  %v3768_v27 = vpop.f32.mrb[120].mxu1  ;;  %v9058_v29 = vpop.f32.mrb[100].mxu0  ;;  %v12501_v39 = vadd.f32 %v4008_v18, %v12282_v19  ;;  %v4133_v23 = vmul.f32 %v12497_v8, %v12497_v8 }
0x10a5   :  { %v3769_v57 = vadd.f32 %v3768_v27, %v12399_v34  ;;  %v3770_v56 = vpop.f32.mrb[121].mxu1  ;;  %v9059_v0 = vpop.f32.mrb[101].mxu0 }
0x10a6   :  { %v3771_v51 = vadd.f32 %v3770_v56, %v12403_v30  ;;  %v9060_v2 = vadd.f32 %v9059_v0, %v9058_v29  ;;  %4087 = vadd.xlane.f32.xlu1 %v12501_v39  ;;  %v3772_v53 = vpop.f32.mrb[122].mxu1  ;;  %v9061_v50 = vpop.f32.mrb[102].mxu0  ;;  %4042 = vmatprep.mubr.bf16.mxu0 %v3830_v41  ;;  %v4134_v44 = vmul.f32 %v12501_v39, %v12501_v39 }
0x10a7   :  { %v3773_v26 = vadd.f32 %v3772_v53, %v12399_v34  ;;  %v3774_v63 = vpop.f32.mrb[123].mxu1  ;;  %v9062_v19 = vpop.f32.mrb[103].mxu0  ;;  %4043 = vmatmul.mubr.bf16.gmra.mrb[116].mxu0 %v3829_v20  ;;  %v3811_v40 = vmax.f32 %v3769_v57, 0.0 }
0x10a8   :  { %v4013_v3 = vadd.f32 %v9060_v2, %v12489_v24  ;;  %v3775_v59 = vadd.f32 %v3774_v63, %v12403_v30  ;;  %v9063_v9 = vadd.f32 %v9062_v19, %v9061_v50  ;;  %4149 = vadd.xlane.f32.xlu0 %v4133_v23  ;;  %v3812_v5 = vmax.f32 %v3771_v51, 0.0  ;;  %v10130_v50 = vld [vmem:[#allocation5 + $0xdc] ss:$12 sps:$4 sm:$0xff]  }
0x10a9   :  { %v3813_v38 = vmax.f32 %v3773_v26, 0.0  ;;  %4526 = vmatprep.subr.bf16.mxu1 %v10130_v50 }
0x10aa   :  { %v3814_v4 = vmax.f32 %v3775_v59, 0.0  ;;  %v4016_v60 = vadd.f32 %v9063_v9, %v12489_v24  ;;  %4151 = vadd.xlane.f32.xlu1 %v4134_v44  ;;  %v12515_v31 = vadd.f32 %v4013_v3, %v12293_v16  ;;  %v10133_v9 = vld [vmem:[#allocation5 + $0xf4] ss:$12 sps:$4 sm:$0xff]  }
0x10ab   :  { %v3831_v48 = vpack.c.bf16 %v3813_v38, %v3811_v40  ;;  %v10134_v44 = vld [vmem:[#allocation5 + $0xc8] ss:$12 sps:$4 sm:$0xff]  }
0x10ac   :  { %v3832_v25 = vpack.c.bf16 %v3814_v4, %v3812_v5  ;;  %4089 = vadd.xlane.f32.xlu0 %v12515_v31  ;;  %v3778_v52 = vpop.f32.mrb[124].mxu1  ;;  %v9064_v28 = vpop.f32.mrb[104].mxu0  ;;  %v12519_v35 = vadd.f32 %v4016_v60, %v12296_v21  ;;  %v4135_v43 = vmul.f32 %v12515_v31, %v12515_v31  ;;  %v10131_v5 = vld [vmem:[#allocation5 + $0xf0] ss:$12 sps:$4 sm:$0xff]   ;;  %9644 = vmatprep.subr.bf16.mxu0 %v10134_v44  ;;  %v10137_v60 = vld [vmem:[#allocation5 + $0x10c] ss:$12 sps:$4 sm:$0xff]  }
0x10ad   :  { %v3779_v47 = vadd.f32 %v3778_v52, %v12399_v34  ;;  %v3780_v13 = vpop.f32.mrb[125].mxu1  ;;  %v9065_v55 = vpop.f32.mrb[105].mxu0  ;;  %9645 = vmatpush3.bf16.msra.mxu0 %v10134_v44  ;;  %v10135_v52 = vld [vmem:[#allocation5 + $0x108] ss:$12 sps:$4 sm:$0xff]  }
0x10ae   :  { %v3781_v7 = vadd.f32 %v3780_v13, %v12403_v30  ;;  %v9066_v62 = vadd.f32 %v9065_v55, %v9064_v28  ;;  %4091 = vadd.xlane.f32.xlu1 %v12519_v35  ;;  %v3782_v16 = vpop.f32.mrb[126].mxu1  ;;  %v9067_v45 = vpop.f32.mrb[106].mxu0  ;;  %4050 = vmatprep.mubr.bf16.mxu0 %v3832_v25  ;;  %v4136_v20 = vmul.f32 %v12519_v35, %v12519_v35  ;;  %v10142_v28 = vld [vmem:[#allocation5 + $0xf8] ss:$12 sps:$4 sm:$0xff]   ;;  %v10145_v13 = vld [vmem:[#allocation5 + $0x13c] ss:$12 sps:$4 sm:$0xff]  }
0x10af   :  { %v3783_v49 = vadd.f32 %v3782_v16, %v12399_v34  ;;  %v3784_v14 = vpop.f32.mrb[127].mxu1  ;;  %v9068_v21 = vpop.f32.mrb[107].mxu0  ;;  %4051 = vmatmul.mubr.bf16.gmra.mrb[120].mxu0 %v3831_v48  ;;  %v3815_v41 = vmax.f32 %v3779_v47, 0.0  ;;  %v10138_v48 = vld [vmem:[#allocation5 + $0xe0] ss:$12 sps:$4 sm:$0xff]  }
0x10b0   :  { %v4021_v12 = vadd.f32 %v9066_v62, %v12489_v24  ;;  %v3785_v22 = vadd.f32 %v3784_v14, %v12403_v30  ;;  %v9069_v18 = vadd.f32 %v9068_v21, %v9067_v45  ;;  %4153 = vadd.xlane.f32.xlu0 %v4135_v43  ;;  %v3816_v29 = vmax.f32 %v3781_v7, 0.0  ;;  %9646 = vmatprep.subr.bf16.mxu0 %v10138_v48  ;;  %v10139_v47 = vld [vmem:[#allocation5 + $0x120] ss:$12 sps:$4 sm:$0xff]   ;;  %v10146_v55 = vld [vmem:[#allocation5 + $0x110] ss:$12 sps:$4 sm:$0xff]  }
0x10b1   :  { %v3817_v27 = vmax.f32 %v3783_v49, 0.0  ;;  %9647 = vmatpush3.bf16.msra.mxu0 %v10138_v48  ;;  %v10143_v7 = vld [vmem:[#allocation5 + $0x138] ss:$12 sps:$4 sm:$0xff]   ;;  %v10149_v62 = vld [vmem:[#allocation5 + $0x154] ss:$12 sps:$4 sm:$0xff]  }
0x10b2   :  { %v3818_v57 = vmax.f32 %v3785_v22, 0.0  ;;  %v4024_v56 = vadd.f32 %v9069_v18, %v12489_v24  ;;  %4155 = vadd.xlane.f32.xlu1 %v4136_v20  ;;  %v12533_v34 = vadd.f32 %v4021_v12, %v12306_v10  ;;  %v10128_v10 = vld [vmem:[#allocation5 + $0xd8] ss:$12 sps:$4 sm:$0xff]   ;;  %9648 = vmatprep.subr.bf16.mxu0 %v10142_v28  ;;  %v10150_v16 = vld [vmem:[#allocation5 + $0x128] ss:$12 sps:$4 sm:$0xff]  }
0x10b3   :  { %v3833_v0 = vpack.c.bf16 %v3817_v27, %v3815_v41  ;;  %4527 = vmatpush1.bf16.msra.mxu1 %v10128_v10  ;;  %v10147_v45 = vld [vmem:[#allocation5 + $0x150] ss:$12 sps:$4 sm:$0xff]   ;;  %v10153_v43 = vld [vmem:[#allocation5 + $0x16c] ss:$12 sps:$4 sm:$0xff]   ;;  %v10151_v14 = vld [vmem:[#allocation5 + $0x168] ss:$12 sps:$4 sm:$0xff]  }
0x10b4   :  { %v3834_v51 = vpack.c.bf16 %v3818_v57, %v3816_v29  ;;  %4093 = vadd.xlane.f32.xlu0 %v12533_v34  ;;  %v9070_v30 = vpop.f32.mrb[108].mxu0  ;;  %v12537_v2 = vadd.f32 %v4024_v56, %v12309_v6  ;;  %v4137_v63 = vmul.f32 %v12533_v34, %v12533_v34  ;;  %4528 = vmatprep.subr.bf16.mxu1 %v10133_v9  ;;  %v10154_v49 = vld [vmem:[#allocation5 + $0x140] ss:$12 sps:$4 sm:$0xff]   ;;  %v10155_v21 = vld [vmem:[#allocation5 + $0x158] ss:$12 sps:$4 sm:$0xff]  }
0x10b5   :  { %v9071_v53 = vpop.f32.mrb[109].mxu0  ;;  %9649 = vmatpush3.bf16.msra.mxu0 %v10142_v28  ;;  %v10156_v12 = vld [vmem:[#allocation5 + $0x170] ss:$12 sps:$4 sm:$0xff]  }
0x10b6   :  { %v9072_v23 = vadd.f32 %v9071_v53, %v9070_v30  ;;  %4095 = vadd.xlane.f32.xlu1 %v12537_v2  ;;  %v9073_v26 = vpop.f32.mrb[110].mxu0  ;;  %4058 = vmatprep.mubr.bf16.mxu0 %v3834_v51  ;;  %v4138_v6 = vmul.f32 %v12537_v2, %v12537_v2 }
0x10b7   :  { %v9074_v19 = vpop.f32.mrb[111].mxu0  ;;  %4059 = vmatmul.mubr.bf16.gmra.mrb[124].mxu0 %v3833_v0  ;;  %4529 = vmatpush1.bf16.msra.mxu1 %v10131_v5 }
0x10b8   :  { %v4029_v3 = vadd.f32 %v9072_v23, %v12489_v24  ;;  %v9075_v59 = vadd.f32 %v9074_v19, %v9073_v26  ;;  %4157 = vadd.xlane.f32.xlu0 %v4137_v63  ;;  %4530 = vmatprep.subr.bf16.mxu1 %v10137_v60 }
0x10b9   :  { %9650 = vmatprep.subr.bf16.mxu0 %v10146_v55 }
0x10ba   :  { %v4032_v40 = vadd.f32 %v9075_v59, %v12489_v24  ;;  %4159 = vadd.xlane.f32.xlu1 %v4138_v6  ;;  %v12547_v38 = vadd.f32 %v4029_v3, %v12318_v46  ;;  %9651 = vmatpush3.bf16.msra.mxu0 %v10146_v55 }
0x10bb   :  { %4531 = vmatpush1.bf16.msra.mxu1 %v10135_v52  ;;  %9652 = vmatprep.subr.bf16.mxu0 %v10150_v16 }
0x10bc   :  { %4097 = vadd.xlane.f32.xlu0 %v12547_v38  ;;  %v12551_v4 = vadd.f32 %v4032_v40, %v12321_v58  ;;  %v4139_v25 = vmul.f32 %v12547_v38, %v12547_v38  ;;  %v10141_v58 = vld [vmem:[#allocation5 + $0x124] ss:$12 sps:$4 sm:$0xff]  }
0x10bd   :  { %4532 = vmatprep.subr.bf16.mxu1 %v10141_v58 }
0x10be   :  { %4099 = vadd.xlane.f32.xlu1 %v12551_v4  ;;  %v4140_v46 = vmul.f32 %v12551_v4, %v12551_v4  ;;  %9653 = vmatpush3.bf16.msra.mxu0 %v10150_v16  ;;  %v12568_v16 = vld [vmem:[%s14429_s11] ss:$0 sm:$0xff] }
0x10bf   :  { %4533 = vmatpush1.bf16.msra.mxu1 %v10139_v47  ;;  %9654 = vmatprep.subr.bf16.mxu0 %v10154_v49 }
0x10c0   :  { %4161 = vadd.xlane.f32.xlu0 %v4139_v25  ;;  %4534 = vmatprep.subr.bf16.mxu1 %v10145_v13 }
0x10c2   :  { %4163 = vadd.xlane.f32.xlu1 %v4140_v46  ;;  %9655 = vmatpush3.bf16.msra.mxu0 %v10154_v49 }
0x10c3   :  { %4535 = vmatpush1.bf16.msra.mxu1 %v10143_v7  ;;  %9656 = vmatprep.subr.bf16.mxu0 %v10155_v21 }
0x10c4   :  { %4536 = vmatprep.subr.bf16.mxu1 %v10149_v62 }
0x10c6   :  { %9657 = vmatpush3.bf16.msra.mxu0 %v10155_v21 }
0x10c7   :  { %4537 = vmatpush1.bf16.msra.mxu1 %v10147_v45  ;;  %9658 = vmatprep.subr.bf16.mxu0 %v10156_v12 }
0x10c8   :  { %4538 = vmatprep.subr.bf16.mxu1 %v10153_v43 }
0x10ca   :  { %9659 = vmatpush3.bf16.msra.mxu0 %v10156_v12 }
0x10cb   :  { %4539 = vmatpush1.bf16.msra.mxu1 %v10151_v14 }
0x1131   :  { %v4086_v22 = vpop.xlane.xlu0 %4085 }
0x1132   :  { %v4117_v18 = vmul.f32 0.0078125, %v4086_v22 }
0x1133   :  { %v4088_v20 = vpop.xlane.xlu1 %4087 }
0x1134   :  { %v4118_v41 = vmul.f32 0.0078125, %v4088_v20  ;;  %v4197_v29 = vmul.f32 %v4117_v18, %v4117_v18  ;;  %v4229_v28 = vsub.f32 %v12497_v8, %v4117_v18 }
0x1135   :  { %v4150_v27 = vpop.xlane.xlu0 %4149 }
0x1136   :  { %v4181_v57 = vmul.f32 0.0078125, %v4150_v27  ;;  %v4198_v0 = vmul.f32 %v4118_v41, %v4118_v41  ;;  %v4230_v45 = vsub.f32 %v12501_v39, %v4118_v41 }
0x1137   :  { %v4152_v56 = vpop.xlane.xlu1 %4151 }
0x1138   :  { %v4213_v51 = vsub.f32 %v4181_v57, %v4197_v29  ;;  %v4182_v30 = vmul.f32 0.0078125, %v4152_v56  ;;  %v12577_v56 = vld [vmem:[%s14430_s12] ss:$0 sm:$0xff] }
0x1139   :  { %v4090_v53 = vpop.xlane.xlu0 %4089 }
0x113a   :  { %v4245_v50 = vadd.f32 1e-05, %v4213_v51  ;;  %v4214_v23 = vsub.f32 %v4182_v30, %v4198_v0  ;;  %v4119_v26 = vmul.f32 0.0078125, %v4090_v53 }
0x113b   :  { %v4092_v63 = vpop.xlane.xlu1 %4091 }
0x113c   :  { %10429 = vrsqrt.f32 %v4245_v50  ;;  %v4246_v10 = vadd.f32 1e-05, %v4214_v23  ;;  %v4120_v19 = vmul.f32 0.0078125, %v4092_v63  ;;  %v4199_v59 = vmul.f32 %v4119_v26, %v4119_v26 }
0x113d   :  { %v4154_v3 = vpop.xlane.xlu0 %4153  ;;  %v4231_v51 = vsub.f32 %v12515_v31, %v4119_v26 }
0x113e   :  { %10431 = vrsqrt.f32 %v4246_v10  ;;  %v4183_v6 = vmul.f32 0.0078125, %v4154_v3  ;;  %v4200_v44 = vmul.f32 %v4120_v19, %v4120_v19 }
0x113f   :  { %v4156_v9 = vpop.xlane.xlu1 %4155 }
0x1140   :  { %v4215_v40 = vsub.f32 %v4183_v6, %v4199_v59  ;;  %v4184_v5 = vmul.f32 0.0078125, %v4156_v9  ;;  %v4232_v59 = vsub.f32 %v12519_v35, %v4120_v19 }
0x1141   :  { %v4094_v60 = vpop.xlane.xlu0 %4093 }
0x1142   :  { %v4247_v48 = vadd.f32 1e-05, %v4215_v40  ;;  %v4216_v25 = vsub.f32 %v4184_v5, %v4200_v44  ;;  %v12558_v52 = vmul.f32 0.0078125, %v4094_v60 }
0x1143   :  { %v4096_v46 = vpop.xlane.xlu1 %4095 }
0x1144   :  { %10433 = vrsqrt.f32 %v4247_v48  ;;  %v4248_v58 = vadd.f32 1e-05, %v4216_v25  ;;  %v12561_v47 = vmul.f32 0.0078125, %v4096_v46  ;;  %v4201_v7 = vmul.f32 %v12558_v52, %v12558_v52 }
0x1145   :  { %v4158_v13 = vpop.xlane.xlu0 %4157 }
0x1146   :  { %v10430_v55 = vpop.eup %10429  ;;  %10435 = vrsqrt.f32 %v4248_v58  ;;  %v4185_v62 = vmul.f32 0.0078125, %v4158_v13  ;;  %v4202_v8 = vmul.f32 %v12561_v47, %v12561_v47  ;;  %v4233_v58 = vsub.f32 %v12533_v34, %v12558_v52 }
0x1147   :  { %v4277_v43 = vmul.f32 %v10430_v55, %v4229_v28  ;;  %v4160_v49 = vpop.xlane.xlu1 %4159 }
0x1148   :  { %v10432_v14 = vpop.eup %10431  ;;  %v4217_v21 = vsub.f32 %v4185_v62, %v4201_v7  ;;  %v4186_v12 = vmul.f32 0.0078125, %v4160_v49  ;;  %v4234_v7 = vsub.f32 %v12537_v2, %v12561_v47 }
0x1149   :  { %v4278_v22 = vmul.f32 %v10432_v14, %v4230_v45  ;;  %v4098_v18 = vpop.xlane.xlu0 %4097  ;;  %v4299_v20 = vmul.f32 %v12568_v16, %v4277_v43 }
0x114a   :  { %v4249_v27 = vadd.f32 1e-05, %v4217_v21  ;;  %v4218_v29 = vsub.f32 %v4186_v12, %v4202_v8  ;;  %v4123_v57 = vmul.f32 0.0078125, %v4098_v18 }
0x114b   :  { %v4100_v39 = vpop.xlane.xlu1 %4099  ;;  %v4300_v41 = vmul.f32 %v12568_v16, %v4278_v22  ;;  %v12582_v50 = vadd.f32 %v12577_v56, %v4299_v20 }
0x114c   :  { %10437 = vrsqrt.f32 %v4249_v27  ;;  %v4250_v0 = vadd.f32 1e-05, %v4218_v29  ;;  %v4124_v30 = vmul.f32 0.0078125, %v4100_v39  ;;  %v4203_v10 = vmul.f32 %v4123_v57, %v4123_v57 }
0x114d   :  { %v4162_v53 = vpop.xlane.xlu0 %4161  ;;  %14582 = vst [vmem:[#allocation35_spill] sm:$0xff] %v12582_v50  ;;  %v12585_v23 = vadd.f32 %v12577_v56, %v4300_v41  ;;  %v4235_v14 = vsub.f32 %v12547_v38, %v4123_v57 }
0x114e   :  { %v10434_v63 = vpop.eup %10433  ;;  %10439 = vrsqrt.f32 %v4250_v0  ;;  %v4187_v3 = vmul.f32 0.0078125, %v4162_v53  ;;  %v4204_v26 = vmul.f32 %v4124_v30, %v4124_v30  ;;  %v4236_v21 = vsub.f32 %v12551_v4, %v4124_v30 }
0x114f   :  { %14583 = vst [vmem:[#allocation38_spill] sm:$0xff] %v12585_v23  ;;  %v4164_v6 = vpop.xlane.xlu1 %4163  ;;  %v4337_v9 = vpack.c.bf16 %v12585_v23, %v12582_v50  ;;  %v4279_v44 = vmul.f32 %v10434_v63, %v4231_v51 }
0x1150   :  { %v10436_v31 = vpop.eup %10435  ;;  %v4219_v40 = vsub.f32 %v4187_v3, %v4203_v10  ;;  %v4188_v5 = vmul.f32 0.0078125, %v4164_v6 }
0x1151   :  { %4557 = vmatmul.mubr.bf16.vlgmr.msra.gmra.mrb[128].mxu1 %v4337_v9  ;;  %9660 = vmatprep.mubr.bf16.mxu0 %v4337_v9  ;;  %v4280_v60 = vmul.f32 %v10436_v31, %v4232_v59  ;;  %v4301_v48 = vmul.f32 %v12568_v16, %v4279_v44 }
0x1152   :  { %v4251_v25 = vadd.f32 1e-05, %v4219_v40  ;;  %v4220_v46 = vsub.f32 %v4188_v5, %v4204_v26  ;;  %4566 = vmatprep.mubr.bf16.mxu1 %v14539_v33 }
0x1153   :  { %v4302_v35 = vmul.f32 %v12568_v16, %v4280_v60  ;;  %v12596_v28 = vadd.f32 %v12577_v56, %v4301_v48 }
0x1154   :  { %10441 = vrsqrt.f32 %v4251_v25  ;;  %v4252_v19 = vadd.f32 1e-05, %v4220_v46 }
0x1155   :  { %14584 = vst [vmem:[#allocation36_spill] sm:$0xff] %v12596_v28  ;;  %v12599_v13 = vadd.f32 %v12577_v56, %v4302_v35 }
0x1156   :  { %v10438_v55 = vpop.eup %10437  ;;  %10443 = vrsqrt.f32 %v4252_v19 }
0x1157   :  { %14585 = vst [vmem:[#allocation39_spill] sm:$0xff] %v12599_v13  ;;  %v4338_v62 = vpack.c.bf16 %v12599_v13, %v12596_v28  ;;  %v4281_v45 = vmul.f32 %v10438_v55, %v4233_v58 }
0x1158   :  { %v10440_v43 = vpop.eup %10439 }
0x1159   :  { %4567 = vmatmul.mubr.bf16.gmra.mrb[132].mxu1 %v4338_v62  ;;  %9661 = vmatmul.mubr.bf16.vlgmr.msra.gmra.mrb[128].mxu0 %v4338_v62  ;;  %v4282_v49 = vmul.f32 %v10440_v43, %v4234_v7  ;;  %v4303_v34 = vmul.f32 %v12568_v16, %v4281_v45 }
0x115a   :  { %4576 = vmatprep.mubr.bf16.mxu1 %v14539_v33 }
0x115b   :  { %v4304_v52 = vmul.f32 %v12568_v16, %v4282_v49  ;;  %v12610_v8 = vadd.f32 %v12577_v56, %v4303_v34 }
0x115d   :  { %14586 = vst [vmem:[#allocation37_spill] sm:$0xff] %v12610_v8  ;;  %v12613_v2 = vadd.f32 %v12577_v56, %v4304_v52 }
0x115e   :  { %v10442_v47 = vpop.eup %10441 }
0x115f   :  { %14587 = vst [vmem:[#allocation22_spill] sm:$0xff] %v12613_v2  ;;  %v4339_v12 = vpack.c.bf16 %v12613_v2, %v12610_v8  ;;  %v4283_v22 = vmul.f32 %v10442_v47, %v4235_v14 }
0x1160   :  { %v10444_v18 = vpop.eup %10443 }
0x1161   :  { %4577 = vmatmul.mubr.bf16.gmra.mrb[136].mxu1 %v4339_v12  ;;  %9664 = vmatprep.mubr.bf16.mxu0 %v4339_v12  ;;  %v4284_v20 = vmul.f32 %v10444_v18, %v4236_v21  ;;  %v4305_v27 = vmul.f32 %v12568_v16, %v4283_v22 }
0x1162   :  { %4586 = vmatprep.mubr.bf16.mxu1 %v14539_v33 }
0x1163   :  { %v4306_v38 = vmul.f32 %v12568_v16, %v4284_v20  ;;  %v12622_v29 = vadd.f32 %v12577_v56, %v4305_v27 }
0x1165   :  { %14588 = vst [vmem:[#allocation20_spill] sm:$0xff] %v12622_v29  ;;  %v12625_v57 = vadd.f32 %v12577_v56, %v4306_v38 }
0x1167   :  { %14589 = vst [vmem:[#allocation21_spill] sm:$0xff] %v12625_v57  ;;  %v4340_v4 = vpack.c.bf16 %v12625_v57, %v12622_v29 }
0x1169   :  { %4587 = vmatmul.mubr.bf16.gmra.mrb[140].mxu1 %v4340_v4  ;;  %9665 = vmatmul.mubr.bf16.gmra.mrb[132].mxu0 %v4340_v4 }
0x116a   :  { %4596 = vmatprep.mubr.bf16.mxu1 %v14539_v33 }
0x1172   :  { %v9076_v39 = vpop.f32.mrb[112].mxu0 }
0x1173   :  { %v9077_v41 = vpop.f32.mrb[113].mxu0 }
0x1174   :  { %v9078_v0 = vadd.f32 %v9077_v41, %v9076_v39  ;;  %v9079_v51 = vpop.f32.mrb[114].mxu0 }
0x1175   :  { %v9080_v30 = vpop.f32.mrb[115].mxu0 }
0x1176   :  { %v4037_v53 = vadd.f32 %v9078_v0, %v12489_v24  ;;  %v9081_v63 = vadd.f32 %v9080_v30, %v9079_v51 }
0x1178   :  { %v4040_v10 = vadd.f32 %v9081_v63, %v12489_v24  ;;  %v12633_v3 = vadd.f32 %v4037_v53, %v12408_v37 }
0x117a   :  { %4101 = vadd.xlane.f32.xlu0 %v12633_v3  ;;  %v9082_v59 = vpop.f32.mrb[116].mxu0  ;;  %v12637_v6 = vadd.f32 %v4040_v10, %v12411_v15  ;;  %v4141_v26 = vmul.f32 %v12633_v3, %v12633_v3 }
0x117b   :  { %v9083_v9 = vpop.f32.mrb[117].mxu0 }
0x117c   :  { %v9084_v44 = vadd.f32 %v9083_v9, %v9082_v59  ;;  %4103 = vadd.xlane.f32.xlu1 %v12637_v6  ;;  %v9085_v31 = vpop.f32.mrb[118].mxu0  ;;  %v4142_v37 = vmul.f32 %v12637_v6, %v12637_v6 }
0x117d   :  { %v9086_v40 = vpop.f32.mrb[119].mxu0 }
0x117e   :  { %v4045_v5 = vadd.f32 %v9084_v44, %v12489_v24  ;;  %v9087_v60 = vadd.f32 %v9086_v40, %v9085_v31  ;;  %4165 = vadd.xlane.f32.xlu0 %v4141_v26 }
0x1180   :  { %v4048_v48 = vadd.f32 %v9087_v60, %v12489_v24  ;;  %4167 = vadd.xlane.f32.xlu1 %v4142_v37  ;;  %v12647_v15 = vadd.f32 %v4045_v5, %v12433_v61 }
0x1182   :  { %4105 = vadd.xlane.f32.xlu0 %v12647_v15  ;;  %v9088_v25 = vpop.f32.mrb[120].mxu0  ;;  %v12651_v46 = vadd.f32 %v4048_v48, %v12436_v32  ;;  %v4143_v55 = vmul.f32 %v12647_v15, %v12647_v15 }
0x1183   :  { %v9089_v35 = vpop.f32.mrb[121].mxu0 }
0x1184   :  { %v9090_v19 = vadd.f32 %v9089_v35, %v9088_v25  ;;  %4107 = vadd.xlane.f32.xlu1 %v12651_v46  ;;  %v9091_v58 = vpop.f32.mrb[122].mxu0  ;;  %v4144_v61 = vmul.f32 %v12651_v46, %v12651_v46 }
0x1185   :  { %v9092_v7 = vpop.f32.mrb[123].mxu0 }
0x1186   :  { %v4053_v62 = vadd.f32 %v9090_v19, %v12489_v24  ;;  %v9093_v45 = vadd.f32 %v9092_v7, %v9091_v58  ;;  %4169 = vadd.xlane.f32.xlu0 %v4143_v55 }
0x1188   :  { %v4056_v43 = vadd.f32 %v9093_v45, %v12489_v24  ;;  %4171 = vadd.xlane.f32.xlu1 %v4144_v61  ;;  %v12661_v32 = vadd.f32 %v4053_v62, %v12452_v17 }
0x118a   :  { %4109 = vadd.xlane.f32.xlu0 %v12661_v32  ;;  %v9094_v49 = vpop.f32.mrb[124].mxu0  ;;  %v12665_v34 = vadd.f32 %v4056_v43, %v12455_v11  ;;  %v4145_v21 = vmul.f32 %v12661_v32, %v12661_v32 }
0x118b   :  { %v9095_v52 = vpop.f32.mrb[125].mxu0 }
0x118c   :  { %v9096_v14 = vadd.f32 %v9095_v52, %v9094_v49  ;;  %4111 = vadd.xlane.f32.xlu1 %v12665_v34  ;;  %v9097_v47 = vpop.f32.mrb[126].mxu0  ;;  %v4146_v17 = vmul.f32 %v12665_v34, %v12665_v34 }
0x118d   :  { %v9098_v12 = vpop.f32.mrb[127].mxu0 }
0x118e   :  { %v4061_v22 = vadd.f32 %v9096_v14, %v12489_v24  ;;  %v9099_v18 = vadd.f32 %v9098_v12, %v9097_v47  ;;  %4173 = vadd.xlane.f32.xlu0 %v4145_v21 }
0x1190   :  { %v4064_v20 = vadd.f32 %v9099_v18, %v12489_v24  ;;  %4175 = vadd.xlane.f32.xlu1 %v4146_v17  ;;  %v12675_v11 = vadd.f32 %v4061_v22, %v12469_v36 }
0x1192   :  { %4113 = vadd.xlane.f32.xlu0 %v12675_v11  ;;  %v12679_v27 = vadd.f32 %v4064_v20, %v12472_v1  ;;  %v4147_v38 = vmul.f32 %v12675_v11, %v12675_v11 }
0x1194   :  { %4115 = vadd.xlane.f32.xlu1 %v12679_v27  ;;  %v4148_v4 = vmul.f32 %v12679_v27, %v12679_v27 }
0x1196   :  { %4177 = vadd.xlane.f32.xlu0 %v4147_v38 }
0x1198   :  { %4179 = vadd.xlane.f32.xlu1 %v4148_v4 }
0x1207   :  { %v4102_v24 = vpop.xlane.xlu0 %4101 }
0x1208   :  { %v4125_v39 = vmul.f32 0.0078125, %v4102_v24 }
0x1209   :  { %v4104_v41 = vpop.xlane.xlu1 %4103 }
0x120a   :  { %v4126_v36 = vmul.f32 0.0078125, %v4104_v41  ;;  %v4205_v51 = vmul.f32 %v4125_v39, %v4125_v39  ;;  %v4237_v49 = vsub.f32 %v12633_v3, %v4125_v39  ;;  %v8734_v39 = vld [vmem:[%s14420_s2 + $0x3] sm:$0x7] }
0x120b   :  { %v4166_v0 = vpop.xlane.xlu0 %4165 }
0x120c   :  { %v4189_v30 = vmul.f32 0.0078125, %v4166_v0  ;;  %v4206_v1 = vmul.f32 %v4126_v36, %v4126_v36  ;;  %v4238_v22 = vsub.f32 %v12637_v6, %v4126_v36 }
0x120d   :  { %v4168_v53 = vpop.xlane.xlu1 %4167 }
0x120e   :  { %v4221_v63 = vsub.f32 %v4189_v30, %v4205_v51  ;;  %v4190_v10 = vmul.f32 0.0078125, %v4168_v53 }
0x120f   :  { %v4106_v59 = vpop.xlane.xlu0 %4105 }
0x1210   :  { %v4253_v9 = vadd.f32 1e-05, %v4221_v63  ;;  %v4222_v44 = vsub.f32 %v4190_v10, %v4206_v1  ;;  %v12686_v31 = vmul.f32 0.0078125, %v4106_v59  ;;  %v12712_v63 = vrot.slane %v8734_v39, %v14580_v54 }
0x1211   :  { %v4108_v26 = vpop.xlane.xlu1 %4107 }
0x1212   :  { %10445 = vrsqrt.f32 %v4253_v9  ;;  %v4254_v40 = vadd.f32 1e-05, %v4222_v44  ;;  %v12688_v5 = vmul.f32 0.0078125, %v4108_v26  ;;  %v4207_v37 = vmul.f32 %v12686_v31, %v12686_v31 }
0x1213   :  { %v4170_v60 = vpop.xlane.xlu0 %4169  ;;  %v12717_v9 = vrot.slane %v8734_v39, %v14581_v42 }
0x1214   :  { %10447 = vrsqrt.f32 %v4254_v40  ;;  %v4191_v48 = vmul.f32 0.0078125, %v4170_v60  ;;  %v4208_v35 = vmul.f32 %v12688_v5, %v12688_v5  ;;  %v4239_v60 = vsub.f32 %v12647_v15, %v12686_v31 }
0x1215   :  { %v4172_v25 = vpop.xlane.xlu1 %4171 }
0x1216   :  { %v4223_v19 = vsub.f32 %v4191_v48, %v4207_v37  ;;  %v4192_v58 = vmul.f32 0.0078125, %v4172_v25 }
0x1217   :  { %v4110_v55 = vpop.xlane.xlu0 %4109 }
0x1218   :  { %v4255_v7 = vadd.f32 1e-05, %v4223_v19  ;;  %v4224_v62 = vsub.f32 %v4192_v58, %v4208_v35  ;;  %v12694_v45 = vmul.f32 0.0078125, %v4110_v55  ;;  %v4240_v35 = vsub.f32 %v12651_v46, %v12688_v5 }
0x1219   :  { %v4112_v61 = vpop.xlane.xlu1 %4111 }
0x121a   :  { %10449 = vrsqrt.f32 %v4255_v7  ;;  %v4256_v43 = vadd.f32 1e-05, %v4224_v62  ;;  %v12697_v52 = vmul.f32 0.0078125, %v4112_v61  ;;  %v4209_v21 = vmul.f32 %v12694_v45, %v12694_v45 }
0x121b   :  { %v4174_v14 = vpop.xlane.xlu0 %4173 }
0x121c   :  { %v10446_v47 = vpop.eup %10445  ;;  %10451 = vrsqrt.f32 %v4256_v43  ;;  %v4193_v12 = vmul.f32 0.0078125, %v4174_v14  ;;  %v4210_v38 = vmul.f32 %v12697_v52, %v12697_v52 }
0x121d   :  { %v4176_v18 = vpop.xlane.xlu1 %4175  ;;  %v4285_v17 = vmul.f32 %v10446_v47, %v4237_v49 }
0x121e   :  { %v10448_v20 = vpop.eup %10447  ;;  %v4225_v4 = vsub.f32 %v4193_v12, %v4209_v21  ;;  %v4194_v24 = vmul.f32 0.0078125, %v4176_v18 }
0x121f   :  { %v4114_v3 = vpop.xlane.xlu0 %4113  ;;  %v4286_v41 = vmul.f32 %v10448_v20, %v4238_v22  ;;  %v4307_v0 = vmul.f32 %v12568_v16, %v4285_v17 }
0x1220   :  { %v4257_v51 = vadd.f32 1e-05, %v4225_v4  ;;  %v4226_v30 = vsub.f32 %v4194_v24, %v4210_v38  ;;  %v12708_v53 = vmul.f32 0.0078125, %v4114_v3  ;;  %v14592_v24 = vld [vmem:[#allocation16_spill] sm:$0xff] }
0x1221   :  { %v4116_v6 = vpop.xlane.xlu1 %4115  ;;  %v4308_v36 = vmul.f32 %v12568_v16, %v4286_v41  ;;  %v12720_v44 = vadd.f32 %v12577_v56, %v4307_v0  ;;  %v14593_v3 = vsub.s32 2, %v14592_v24  ;;  %v4241_v0 = vsub.f32 %v12661_v32, %v12694_v45 }
0x1222   :  { %10453 = vrsqrt.f32 %v4257_v51  ;;  %v4258_v1 = vadd.f32 1e-05, %v4226_v30  ;;  %v12714_v10 = vmul.f32 0.0078125, %v4116_v6  ;;  %v4211_v37 = vmul.f32 %v12708_v53, %v12708_v53 }
0x1223   :  { %v4178_v59 = vpop.xlane.xlu0 %4177  ;;  %14590 = vst [vmem:[#allocation19_spill] sm:$0xff] %v12720_v44  ;;  %v12723_v26 = vadd.f32 %v12577_v56, %v4308_v36  ;;  %v12748_v41 = vrot.slane %v8734_v39, %v14593_v3 }
0x1224   :  { %v10450_v40 = vpop.eup %10449  ;;  %10455 = vrsqrt.f32 %v4258_v1  ;;  %v4195_v48 = vmul.f32 0.0078125, %v4178_v59  ;;  %v4558_v25 = vpop.f32.mrb[128].mxu1  ;;  %v4212_v19 = vmul.f32 %v12714_v10, %v12714_v10  ;;  %v4242_v59 = vsub.f32 %v12665_v34, %v12697_v52 }
0x1225   :  { %14591 = vst [vmem:[#allocation26_spill] sm:$0xff] %v12723_v26  ;;  %v4560_v58 = vpop.f32.mrb[129].mxu1  ;;  %v4180_v55 = vpop.xlane.xlu1 %4179  ;;  %v4341_v7 = vpack.c.bf16 %v12723_v26, %v12720_v44  ;;  %v4559_v15 = vadd.f32 %v4558_v25, %v12712_v63  ;;  %v4287_v49 = vmul.f32 %v10450_v40, %v4239_v60  ;;  %v4244_v24 = vsub.f32 %v12679_v27, %v12714_v10 }
0x1226   :  { %v10452_v62 = vpop.eup %10451  ;;  %v4227_v61 = vsub.f32 %v4195_v48, %v4211_v37  ;;  %v4196_v31 = vmul.f32 0.0078125, %v4180_v55  ;;  %v4562_v43 = vpop.f32.mrb[130].mxu1  ;;  %v4561_v14 = vadd.f32 %v4560_v58, %v12717_v9 }
0x1227   :  { %v4563_v47 = vadd.f32 %v4562_v43, %v12712_v63  ;;  %v4564_v46 = vpop.f32.mrb[131].mxu1  ;;  %4597 = vmatmul.mubr.bf16.gmra.mrb[144].mxu1 %v4341_v7  ;;  %9668 = vmatprep.mubr.bf16.mxu0 %v4341_v7  ;;  %v4288_v5 = vmul.f32 %v10452_v62, %v4240_v35  ;;  %v4309_v18 = vmul.f32 %v12568_v16, %v4287_v49 }
0x1228   :  { %v4259_v21 = vadd.f32 1e-05, %v4227_v61  ;;  %v4228_v12 = vsub.f32 %v4196_v31, %v4212_v19  ;;  %v4565_v22 = vadd.f32 %v4564_v46, %v12717_v9  ;;  %4606 = vmatprep.mubr.bf16.mxu1 %v14539_v33 }
0x1229   :  { %v12741_v17 = vpack.c.bf16 %v4563_v47, %v4559_v15  ;;  %v4310_v20 = vmul.f32 %v12568_v16, %v4288_v5  ;;  %v12753_v51 = vadd.f32 %v12577_v56, %v4309_v18 }
0x122a   :  { %10457 = vrsqrt.f32 %v4259_v21  ;;  %v4260_v38 = vadd.f32 1e-05, %v4228_v12  ;;  %v12744_v4 = vpack.c.bf16 %v4565_v22, %v4561_v14  ;;  %v4243_v21 = vsub.f32 %v12675_v11, %v12708_v53 }
0x122b   :  { %14594 = vst [vmem:[#allocation24_spill] sm:$0xff] %v12753_v51  ;;  %v12756_v30 = vadd.f32 %v12577_v56, %v4310_v20 }
0x122c   :  { %v10454_v6 = vpop.eup %10453  ;;  %10459 = vrsqrt.f32 %v4260_v38  ;;  %v4568_v36 = vpop.f32.mrb[132].mxu1  ;;  %9996 = vmatprep.subr.msk.bf16.mxu0 %vm549_vm0, %v12744_v4  ;;  %v4771_v39 = vsel %vm549_vm0, %v12744_v4, 0 }
0x122d   :  { %14595 = vst [vmem:[#allocation25_spill] sm:$0xff] %v12756_v30  ;;  %v9662_v1 = vpop.f32.mrb[128].mxu0  ;;  %v4570_v32 = vpop.f32.mrb[133].mxu1  ;;  %9677 = vmatpush3.bf16.xpose.msra.mxu0 %v4771_v39  ;;  %v4342_v40 = vpack.c.bf16 %v12756_v30, %v12753_v51  ;;  %v4289_v60 = vmul.f32 %v10454_v6, %v4241_v0  ;;  %v4569_v48 = vadd.f32 %v4568_v36, %v12712_v63 }
0x122e   :  { %v4671_v45 = vpop.f32.mrb[129].mxu0  ;;  %v10456_v37 = vpop.eup %10455  ;;  %v4680_v25 = vadd.f32 %v9662_v1, %v12748_v41  ;;  %v4571_v35 = vadd.f32 %v4570_v32, %v12717_v9 }
0x122f   :  { %v4572_v19 = vpop.f32.mrb[134].mxu1  ;;  %v9663_v58 = vpop.f32.mrb[130].mxu0  ;;  %4607 = vmatmul.mubr.bf16.gmra.mrb[148].mxu1 %v4342_v40  ;;  %9669 = vmatmul.mubr.bf16.gmra.mrb[136].mxu0 %v4342_v40  ;;  %v4290_v62 = vmul.f32 %v10456_v37, %v4242_v59  ;;  %v4672_v61 = vadd.f32 %v4671_v45, %v12748_v41  ;;  %v4311_v43 = vmul.f32 %v12568_v16, %v4289_v60 }
0x1230   :  { %v4573_v55 = vadd.f32 %v4572_v19, %v12712_v63  ;;  %v4683_v34 = vadd.f32 %v9663_v58, %v12748_v41  ;;  %v4574_v52 = vpop.f32.mrb[135].mxu1  ;;  %v4674_v7 = vpop.f32.mrb[131].mxu0  ;;  %4616 = vmatprep.mubr.bf16.mxu1 %v14539_v33 }
0x1231   :  { %v4575_v15 = vadd.f32 %v4574_v52, %v12717_v9  ;;  %v4675_v31 = vadd.f32 %v4674_v7, %v12748_v41  ;;  %v4312_v47 = vmul.f32 %v12568_v16, %v4290_v62  ;;  %v12788_v12 = vadd.f32 %v12577_v56, %v4311_v43 }
0x1232   :  { %v12776_v49 = vpack.c.bf16 %v4573_v55, %v4569_v48  ;;  %v12778_v14 = vpack.c.bf16 %v4683_v34, %v4680_v25 }
0x1233   :  { %v12781_v46 = vpack.c.bf16 %v4575_v15, %v4571_v35  ;;  %v12783_v5 = vpack.c.bf16 %v4675_v31, %v4672_v61  ;;  %14596 = vst [vmem:[#allocation23_spill] sm:$0xff] %v12788_v12  ;;  %v12791_v22 = vadd.f32 %v12577_v56, %v4312_v47 }
0x1234   :  { %v10458_v18 = vpop.eup %10457  ;;  %v4578_v20 = vpop.f32.mrb[136].mxu1 }
0x1235   :  { %14597 = vst [vmem:[#allocation42_spill] sm:$0xff] %v12791_v22  ;;  %9997 = vmatprep.subr.msk.bf16.mxu0 %vm549_vm0, %v12781_v46  ;;  %v4774_v38 = vsel %vm549_vm0, %v12781_v46, 0  ;;  %v4580_v3 = vpop.f32.mrb[137].mxu1  ;;  %v4343_v11 = vpack.c.bf16 %v12791_v22, %v12788_v12  ;;  %v4291_v53 = vmul.f32 %v10458_v18, %v4243_v21  ;;  %v4579_v6 = vadd.f32 %v4578_v20, %v12712_v63 }
0x1236   :  { %9679 = vmatpush3.bf16.xpose.msra.mxu0 %v4774_v38  ;;  %v10460_v0 = vpop.eup %10459  ;;  %v4582_v36 = vpop.f32.mrb[138].mxu1  ;;  %v4581_v27 = vadd.f32 %v4580_v3, %v12717_v9 }
0x1237   :  { %v4583_v1 = vadd.f32 %v4582_v36, %v12712_v63  ;;  %v4584_v39 = vpop.f32.mrb[139].mxu1  ;;  %4617 = vmatmul.mubr.bf16.gmra.mrb[152].mxu1 %v4343_v11  ;;  %9672 = vmatprep.mubr.bf16.mxu0 %v4343_v11  ;;  %v4292_v59 = vmul.f32 %v10460_v0, %v4244_v24  ;;  %v4313_v32 = vmul.f32 %v12568_v16, %v4291_v53 }
0x1238   :  { %v4585_v10 = vadd.f32 %v4584_v39, %v12717_v9  ;;  %4626 = vmatprep.mubr.bf16.mxu1 %v14539_v33 }
0x1239   :  { %v12807_v45 = vpack.c.bf16 %v4583_v1, %v4579_v6  ;;  %v4314_v40 = vmul.f32 %v12568_v16, %v4292_v59  ;;  %v12813_v37 = vadd.f32 %v12577_v56, %v4313_v32 }
0x123a   :  { %v12810_v60 = vpack.c.bf16 %v4585_v10, %v4581_v27 }
0x123b   :  { %14598 = vst [vmem:[#allocation40_spill] sm:$0xff] %v12813_v37  ;;  %v12816_v48 = vadd.f32 %v12577_v56, %v4314_v40 }
0x123c   :  { %v4588_v25 = vpop.f32.mrb[140].mxu1  ;;  %v9666_v35 = vpop.f32.mrb[132].mxu0  ;;  %9998 = vmatprep.subr.msk.bf16.mxu0 %vm549_vm0, %v12810_v60  ;;  %v4777_v19 = vsel %vm549_vm0, %v12810_v60, 0 }
0x123d   :  { %14599 = vst [vmem:[#allocation43_spill] sm:$0xff] %v12816_v48  ;;  %v4590_v58 = vpop.f32.mrb[141].mxu1  ;;  %v4687_v55 = vpop.f32.mrb[133].mxu0  ;;  %v4344_v16 = vpack.c.bf16 %v12816_v48, %v12813_v37  ;;  %v4589_v34 = vadd.f32 %v4588_v25, %v12712_v63  ;;  %v4696_v56 = vadd.f32 %v9666_v35, %v12748_v41 }
0x123e   :  { %9681 = vmatpush3.bf16.xpose.msra.mxu0 %v4777_v19  ;;  %v4592_v52 = vpop.f32.mrb[142].mxu1  ;;  %v9667_v7 = vpop.f32.mrb[134].mxu0  ;;  %v4591_v43 = vadd.f32 %v4590_v58, %v12717_v9  ;;  %v4688_v47 = vadd.f32 %v4687_v55, %v12748_v41 }
0x123f   :  { %v4593_v62 = vadd.f32 %v4592_v52, %v12712_v63  ;;  %v4699_v61 = vadd.f32 %v9667_v7, %v12748_v41  ;;  %v4594_v15 = vpop.f32.mrb[143].mxu1  ;;  %4627 = vmatmul.mubr.bf16.gmra.mrb[156].mxu1 %v4344_v16  ;;  %v4690_v31 = vpop.f32.mrb[135].mxu0  ;;  %9673 = vmatmul.mubr.bf16.gmra.mrb[140].mxu0 %v4344_v16 }
0x1240   :  { %v4595_v21 = vadd.f32 %v4594_v15, %v12717_v9  ;;  %v4691_v18 = vadd.f32 %v4690_v31, %v12748_v41  ;;  %9684 = vmatprep.mubr.msk.bf16.mxu0 %vm549_vm0, %v12741_v17 }
0x1241   :  { %v12834_v20 = vpack.c.bf16 %v4593_v62, %v4589_v34  ;;  %v12836_v38 = vpack.c.bf16 %v4699_v61, %v4696_v56 }
0x1242   :  { %v12838_v24 = vpack.c.bf16 %v4595_v21, %v4591_v43  ;;  %v12840_v3 = vpack.c.bf16 %v4691_v18, %v4688_v47 }
0x1244   :  { %9999 = vmatprep.subr.msk.bf16.mxu0 %vm549_vm0, %v12838_v24  ;;  %v4780_v11 = vsel %vm549_vm0, %v12838_v24, 0 }
0x1246   :  { %9683 = vmatpush3.bf16.xpose.msra.mxu0 %v4780_v11 }
0x1247   :  { %9708 = vmatprep.subr.bf16.mxu0 %v12783_v5 }
0x124d   :  { %9685 = vmatmul.mubr.msk.bf16.vlgmr.msra.gmra.mrb[144].mxu0 %vm549_vm0, %v12776_v49 }
0x124e   :  { %9688 = vmatprep.mubr.msk.bf16.mxu0 %vm549_vm0, %v12807_v45  ;;  %9709 = vmatpush3.bf16.msra.mxu0 %v12783_v5 }
0x124f   :  { %9710 = vmatprep.subr.bf16.mxu0 %v12778_v14 }
0x1252   :  { %9711 = vmatpush3.bf16.msra.mxu0 %v12778_v14 }
0x1253   :  { %9712 = vmatprep.subr.bf16.mxu0 %v12840_v3 }
0x1255   :  { %9689 = vmatmul.mubr.msk.bf16.gmra.mrb[148].mxu0 %vm549_vm0, %v12834_v20 }
0x1256   :  { %9713 = vmatpush3.bf16.msra.mxu0 %v12840_v3 }
0x1257   :  { %9714 = vmatprep.subr.bf16.mxu0 %v12836_v38 }
0x125a   :  { %9715 = vmatpush3.bf16.msra.mxu0 %v12836_v38 }
0x12fa   :  { %v4598_v53 = vpop.f32.mrb[144].mxu1 }
0x12fb   :  { %v4600_v0 = vpop.f32.mrb[145].mxu1  ;;  %v4599_v36 = vadd.f32 %v4598_v53, %v12712_v63 }
0x12fc   :  { %v4602_v6 = vpop.f32.mrb[146].mxu1  ;;  %v4601_v59 = vadd.f32 %v4600_v0, %v12717_v9 }
0x12fd   :  { %v4603_v1 = vadd.f32 %v4602_v6, %v12712_v63  ;;  %v4604_v39 = vpop.f32.mrb[147].mxu1 }
0x12fe   :  { %v4605_v32 = vadd.f32 %v4604_v39, %v12717_v9 }
0x12ff   :  { %v12864_v27 = vpack.c.bf16 %v4603_v1, %v4599_v36 }
0x1300   :  { %v12866_v10 = vpack.c.bf16 %v4605_v32, %v4601_v59 }
0x1301   :  { %9700 = vmatprep.mubr.msk.bf16.mxu1 %vm549_vm0, %v12864_v27 }
0x1302   :  { %v4608_v40 = vpop.f32.mrb[148].mxu1  ;;  %v9670_v25 = vpop.f32.mrb[136].mxu0  ;;  %10000 = vmatprep.subr.msk.bf16.mxu1 %vm549_vm0, %v12866_v10  ;;  %v4860_v35 = vsel %vm549_vm0, %v12866_v10, 0 }
0x1303   :  { %v4610_v19 = vpop.f32.mrb[149].mxu1  ;;  %v4703_v58 = vpop.f32.mrb[137].mxu0  ;;  %9693 = vmatpush3.bf16.xpose.msra.mxu1 %v4860_v35  ;;  %v4609_v34 = vadd.f32 %v4608_v40, %v12712_v63  ;;  %v4712_v52 = vadd.f32 %v9670_v25, %v12748_v41 }
0x1304   :  { %v4612_v55 = vpop.f32.mrb[150].mxu1  ;;  %v9671_v16 = vpop.f32.mrb[138].mxu0  ;;  %v4611_v15 = vadd.f32 %v4610_v19, %v12717_v9  ;;  %v4704_v31 = vadd.f32 %v4703_v58, %v12748_v41 }
0x1305   :  { %v4613_v7 = vadd.f32 %v4612_v55, %v12712_v63  ;;  %v4715_v56 = vadd.f32 %v9671_v16, %v12748_v41  ;;  %v4614_v62 = vpop.f32.mrb[151].mxu1  ;;  %v4706_v61 = vpop.f32.mrb[139].mxu0 }
0x1306   :  { %v4615_v43 = vadd.f32 %v4614_v62, %v12717_v9  ;;  %v4707_v47 = vadd.f32 %v4706_v61, %v12748_v41 }
0x1307   :  { %v12882_v21 = vpack.c.bf16 %v4613_v7, %v4609_v34  ;;  %v12884_v18 = vpack.c.bf16 %v4715_v56, %v4712_v52 }
0x1308   :  { %v12886_v11 = vpack.c.bf16 %v4615_v43, %v4611_v15  ;;  %v12888_v53 = vpack.c.bf16 %v4707_v47, %v4704_v31 }
0x130a   :  { %v4618_v0 = vpop.f32.mrb[152].mxu1  ;;  %10001 = vmatprep.subr.msk.bf16.mxu1 %vm549_vm0, %v12886_v11  ;;  %v4863_v6 = vsel %vm549_vm0, %v12886_v11, 0 }
0x130b   :  { %v4620_v36 = vpop.f32.mrb[153].mxu1  ;;  %9695 = vmatpush3.bf16.xpose.msra.mxu1 %v4863_v6  ;;  %v4619_v39 = vadd.f32 %v4618_v0, %v12712_v63 }
0x130c   :  { %v4622_v1 = vpop.f32.mrb[154].mxu1  ;;  %v4621_v40 = vadd.f32 %v4620_v36, %v12717_v9 }
0x130d   :  { %v4623_v59 = vadd.f32 %v4622_v1, %v12712_v63  ;;  %v4624_v32 = vpop.f32.mrb[155].mxu1 }
0x130e   :  { %v4625_v25 = vadd.f32 %v4624_v32, %v12717_v9 }
0x130f   :  { %v12898_v35 = vpack.c.bf16 %v4623_v59, %v4619_v39 }
0x1310   :  { %v12900_v19 = vpack.c.bf16 %v4625_v25, %v4621_v40 }
0x1312   :  { %v4628_v58 = vpop.f32.mrb[156].mxu1  ;;  %v9674_v55 = vpop.f32.mrb[140].mxu0  ;;  %10002 = vmatprep.subr.msk.bf16.mxu1 %vm549_vm0, %v12900_v19  ;;  %v4866_v16 = vsel %vm549_vm0, %v12900_v19, 0 }
0x1313   :  { %v4630_v34 = vpop.f32.mrb[157].mxu1  ;;  %v4719_v52 = vpop.f32.mrb[141].mxu0  ;;  %9697 = vmatpush3.bf16.xpose.msra.mxu1 %v4866_v16  ;;  %v4629_v62 = vadd.f32 %v4628_v58, %v12712_v63  ;;  %v4728_v61 = vadd.f32 %v9674_v55, %v12748_v41 }
0x1314   :  { %v4632_v7 = vpop.f32.mrb[158].mxu1  ;;  %v9675_v56 = vpop.f32.mrb[142].mxu0  ;;  %v4631_v0 = vadd.f32 %v4630_v34, %v12717_v9  ;;  %v4720_v6 = vadd.f32 %v4719_v52, %v12748_v41 }
0x1315   :  { %v4633_v15 = vadd.f32 %v4632_v7, %v12712_v63  ;;  %v4731_v31 = vadd.f32 %v9675_v56, %v12748_v41  ;;  %v4634_v43 = vpop.f32.mrb[159].mxu1  ;;  %v4722_v47 = vpop.f32.mrb[143].mxu0 }
0x1316   :  { %v4635_v36 = vadd.f32 %v4634_v43, %v12717_v9  ;;  %v4723_v1 = vadd.f32 %v4722_v47, %v12748_v41 }
0x1317   :  { %v12914_v39 = vpack.c.bf16 %v4633_v15, %v4629_v62  ;;  %v12916_v59 = vpack.c.bf16 %v4731_v31, %v4728_v61 }
0x1318   :  { %v12918_v32 = vpack.c.bf16 %v4635_v36, %v4631_v0  ;;  %v12920_v40 = vpack.c.bf16 %v4723_v1, %v4720_v6 }
0x131a   :  { %10003 = vmatprep.subr.msk.bf16.mxu1 %vm549_vm0, %v12918_v32  ;;  %v4869_v63 = vsel %vm549_vm0, %v12918_v32, 0 }
0x131b   :  { %9699 = vmatpush3.bf16.xpose.msra.mxu1 %v4869_v63 }
0x131c   :  { %9724 = vmatprep.subr.bf16.mxu1 %v12888_v53 }
0x1320   :  { %v9686_v9 = vpop.f32.mrb[144].mxu0 }
0x1321   :  { %v4816_v25 = vpop.f32.mrb[145].mxu0  ;;  %v4942_v41 = vsel %vm728_vm1, %v9686_v9, -inf }
0x1322   :  { %4943 = vmax.xlane.f32.xlu0 %v4942_v41  ;;  %v9687_v58 = vpop.f32.mrb[146].mxu0  ;;  %9701 = vmatmul.mubr.msk.bf16.vlgmr.msra.gmra.mrb[160].mxu1 %vm549_vm0, %v12882_v21  ;;  %v4936_v34 = vsel %vm728_vm1, %v4816_v25, -inf }
0x1323   :  { %v4819_v55 = vpop.f32.mrb[147].mxu0  ;;  %v4945_v16 = vsel %vm728_vm1, %v9687_v58, -inf  ;;  %9704 = vmatprep.mubr.msk.bf16.mxu1 %vm549_vm0, %v12898_v35  ;;  %9725 = vmatpush3.bf16.msra.mxu1 %v12888_v53 }
0x1324   :  { %4946 = vmax.xlane.f32.xlu1 %v4945_v16  ;;  %9726 = vmatprep.subr.bf16.mxu1 %v12884_v18  ;;  %v4939_v52 = vsel %vm728_vm1, %v4819_v55, -inf }
0x1326   :  { %4937 = vmax.xlane.f32.xlu0 %v4936_v34 }
0x1327   :  { %9727 = vmatpush3.bf16.msra.mxu1 %v12884_v18 }
0x1328   :  { %4940 = vmax.xlane.f32.xlu1 %v4939_v52  ;;  %v9690_v7 = vpop.f32.mrb[148].mxu0  ;;  %9728 = vmatprep.subr.bf16.mxu1 %v12920_v40 }
0x1329   :  { %v4832_v56 = vpop.f32.mrb[149].mxu0  ;;  %v4954_v62 = vsel %vm728_vm1, %v9690_v7, -inf }
0x132a   :  { %4955 = vmax.xlane.f32.xlu0 %v4954_v62  ;;  %v9691_v61 = vpop.f32.mrb[150].mxu0  ;;  %9705 = vmatmul.mubr.msk.bf16.gmra.mrb[164].mxu1 %vm549_vm0, %v12914_v39  ;;  %v4948_v43 = vsel %vm728_vm1, %v4832_v56, -inf }
0x132b   :  { %v4835_v15 = vpop.f32.mrb[151].mxu0  ;;  %v4957_v31 = vsel %vm728_vm1, %v9691_v61, -inf  ;;  %9729 = vmatpush3.bf16.msra.mxu1 %v12920_v40 }
0x132c   :  { %4958 = vmax.xlane.f32.xlu1 %v4957_v31  ;;  %9730 = vmatprep.subr.bf16.mxu1 %v12916_v59  ;;  %v4951_v47 = vsel %vm728_vm1, %v4835_v15, -inf }
0x132e   :  { %4949 = vmax.xlane.f32.xlu0 %v4948_v43 }
0x132f   :  { %9731 = vmatpush3.bf16.msra.mxu1 %v12916_v59 }
0x1330   :  { %4952 = vmax.xlane.f32.xlu1 %v4951_v47 }
0x13af   :  { %v4944_v0 = vpop.xlane.xlu0 %4943 }
0x13b0   :  { %v4986_v36 = vsub.f32 %v9686_v9, %v4944_v0 }
0x13b1   :  { %v4947_v6 = vpop.xlane.xlu1 %4946 }
0x13b2   :  { %v4987_v1 = vsub.f32 %v9687_v58, %v4947_v6 }
0x13b3   :  { %v4938_v63 = vpop.xlane.xlu0 %4937 }
0x13b4   :  { %v5001_v41 = vpack.c.bf16 %v4987_v1, %v4986_v36  ;;  %v4984_v52 = vsub.f32 %v4816_v25, %v4938_v63 }
0x13b5   :  { %v4941_v16 = vpop.xlane.xlu1 %4940 }
0x13b6   :  { %v5012_v34 = vmul.bf16 1069105081, %v5001_v41  ;;  %v4985_v62 = vsub.f32 %v4819_v55, %v4941_v16 }
0x13b7   :  { %v4956_v31 = vpop.xlane.xlu0 %4955 }
0x13b8   :  { %10461 = vpow.bf16 %v5012_v34  ;;  %v5000_v42 = vpack.c.bf16 %v4985_v62, %v4984_v52  ;;  %v4990_v48 = vsub.f32 %v9690_v7, %v4956_v31 }
0x13b9   :  { %v4959_v54 = vpop.xlane.xlu1 %4958 }
0x13ba   :  { %v5009_v43 = vmul.bf16 1069105081, %v5000_v42  ;;  %v4991_v37 = vsub.f32 %v9691_v61, %v4959_v54 }
0x13bb   :  { %v4950_v47 = vpop.xlane.xlu0 %4949 }
0x13bc   :  { %10463 = vpow.bf16 %v5009_v43  ;;  %v5003_v22 = vpack.c.bf16 %v4991_v37, %v4990_v48  ;;  %v4988_v9 = vsub.f32 %v4832_v56, %v4950_v47 }
0x13bd   :  { %v4953_v12 = vpop.xlane.xlu1 %4952 }
0x13be   :  { %v5018_v30 = vmul.bf16 1069105081, %v5003_v22  ;;  %v4989_v58 = vsub.f32 %v4835_v15, %v4953_v12 }
0x13c0   :  { %10465 = vpow.bf16 %v5018_v30  ;;  %v5002_v0 = vpack.c.bf16 %v4989_v58, %v4988_v9 }
0x13c2   :  { %v5015_v6 = vmul.bf16 1069105081, %v5002_v0 }
0x13c3   :  { %v12948_v36 = vpop.eup %10461 }
0x13c4   :  { %10467 = vpow.bf16 %v5015_v6  ;;  %v5034_v25 = vunpack.c.l.bf16 %v12948_v36  ;;  %v5035_v55 = vunpack.c.h.bf16 %v12948_v36 }
0x13c6   :  { %v5054_v42 = vsel %vm728_vm1, %v5034_v25, 0.0  ;;  %v5057_v54 = vsel %vm728_vm1, %v5035_v55, 0.0 }
0x13c7   :  { %v12954_v7 = vpop.eup %10463  ;;  %5055 = vadd.xlane.f32.xlu0 %v5054_v42  ;;  %5058 = vadd.xlane.f32.xlu1 %v5057_v54 }
0x13c8   :  { %v5032_v12 = vunpack.c.l.bf16 %v12954_v7  ;;  %v5033_v30 = vunpack.c.h.bf16 %v12954_v7 }
0x13ca   :  { %v5048_v22 = vsel %vm728_vm1, %v5032_v12, 0.0  ;;  %v5051_v37 = vsel %vm728_vm1, %v5033_v30, 0.0 }
0x13cb   :  { %v12960_v48 = vpop.eup %10465  ;;  %5049 = vadd.xlane.f32.xlu0 %v5048_v22  ;;  %5052 = vadd.xlane.f32.xlu1 %v5051_v37 }
0x13cc   :  { %v5038_v56 = vunpack.c.l.bf16 %v12960_v48  ;;  %v5039_v61 = vunpack.c.h.bf16 %v12960_v48 }
0x13ce   :  { %v5066_v15 = vsel %vm728_vm1, %v5038_v56, 0.0  ;;  %v5069_v1 = vsel %vm728_vm1, %v5039_v61, 0.0 }
0x13cf   :  { %v12966_v63 = vpop.eup %10467  ;;  %5067 = vadd.xlane.f32.xlu0 %v5066_v15  ;;  %5070 = vadd.xlane.f32.xlu1 %v5069_v1 }
0x13d0   :  { %v5037_v41 = vunpack.c.h.bf16 %v12966_v63  ;;  %v5036_v16 = vunpack.c.l.bf16 %v12966_v63 }
0x13d2   :  { %v5063_v34 = vsel %vm728_vm1, %v5037_v41, 0.0  ;;  %v5060_v52 = vsel %vm728_vm1, %v5036_v16, 0.0 }
0x13d3   :  { %5064 = vadd.xlane.f32.xlu1 %v5063_v34  ;;  %5061 = vadd.xlane.f32.xlu0 %v5060_v52 }
0x13f5   :  { %v12972_v62 = vpop.f32.mrb[160].mxu1 }
0x13f6   :  { %v12974_v31 = vpop.f32.mrb[161].mxu1  ;;  %v4966_v43 = vsel %vm728_vm1, %v12972_v62, -inf }
0x13f7   :  { %4967 = vmax.xlane.f32.xlu0 %v4966_v43  ;;  %v12978_v47 = vpop.f32.mrb[162].mxu1  ;;  %v4960_v0 = vsel %vm728_vm1, %v12974_v31, -inf }
0x13f8   :  { %v12980_v9 = vpop.f32.mrb[163].mxu1  ;;  %v4969_v58 = vsel %vm728_vm1, %v12978_v47, -inf }
0x13f9   :  { %4970 = vmax.xlane.f32.xlu1 %v4969_v58  ;;  %v4963_v6 = vsel %vm728_vm1, %v12980_v9, -inf }
0x13fb   :  { %4961 = vmax.xlane.f32.xlu0 %v4960_v0 }
0x13fd   :  { %4964 = vmax.xlane.f32.xlu1 %v4963_v6  ;;  %v12988_v25 = vpop.f32.mrb[164].mxu1 }
0x13fe   :  { %v12990_v55 = vpop.f32.mrb[165].mxu1  ;;  %v4978_v42 = vsel %vm728_vm1, %v12988_v25, -inf }
0x13ff   :  { %4979 = vmax.xlane.f32.xlu0 %v4978_v42  ;;  %v12994_v54 = vpop.f32.mrb[166].mxu1  ;;  %v4972_v30 = vsel %vm728_vm1, %v12990_v55, -inf }
0x1400   :  { %v12996_v12 = vpop.f32.mrb[167].mxu1  ;;  %v4981_v22 = vsel %vm728_vm1, %v12994_v54, -inf }
0x1401   :  { %v4975_v37 = vsel %vm728_vm1, %v12996_v12, -inf }
0x1403   :  { %4973 = vmax.xlane.f32.xlu0 %v4972_v30 }
0x140e   :  { %5332 = vrot.lane.b32.xlu1 %v12781_v46, %s10885_s20 }
0x1412   :  { %5334 = vrot.lane.b32.xlu1 %v12810_v60, %s10885_s20 }
0x1416   :  { %5336 = vrot.lane.b32.xlu1 %v12838_v24, %s10885_s20 }
0x1419   :  { %5330 = vrot.lane.b32.xlu0 %v12744_v4, %s10885_s20 }
0x143a   :  { %4982 = vmax.xlane.f32.xlu1 %v4981_v22 }
0x143e   :  { %4976 = vmax.xlane.f32.xlu1 %v4975_v37 }
0x1454   :  { %v5056_v56 = vpop.xlane.xlu0 %5055  ;;  %v5059_v61 = vpop.xlane.xlu1 %5058 }
0x1455   :  { %v5097_v15 = vpack.c.bf16 %v5059_v61, %v5056_v56 }
0x1457   :  { %v5106_v1 = vunpack.c.l.bf16 %v5097_v15  ;;  %v5107_v41 = vunpack.c.h.bf16 %v5097_v15 }
0x1458   :  { %v5050_v16 = vpop.xlane.xlu0 %5049  ;;  %v5053_v34 = vpop.xlane.xlu1 %5052 }
0x1459   :  { %v5096_v52 = vpack.c.bf16 %v5053_v34, %v5050_v16  ;;  %10469 = vrcp.f32 %v5106_v1 }
0x145a   :  { %10471 = vrcp.f32 %v5107_v41 }
0x145b   :  { %v5104_v43 = vunpack.c.l.bf16 %v5096_v52  ;;  %v5105_v58 = vunpack.c.h.bf16 %v5096_v52 }
0x145c   :  { %v5068_v0 = vpop.xlane.xlu0 %5067  ;;  %v5071_v6 = vpop.xlane.xlu1 %5070 }
0x145d   :  { %10473 = vrcp.f32 %v5104_v43  ;;  %v5099_v42 = vpack.c.bf16 %v5071_v6, %v5068_v0 }
0x145e   :  { %10475 = vrcp.f32 %v5105_v58 }
0x145f   :  { %v5110_v30 = vunpack.c.l.bf16 %v5099_v42  ;;  %v5111_v22 = vunpack.c.h.bf16 %v5099_v42 }
0x1460   :  { %v5062_v37 = vpop.xlane.xlu0 %5061  ;;  %v5065_v51 = vpop.xlane.xlu1 %5064 }
0x1461   :  { %v5098_v26 = vpack.c.bf16 %v5065_v51, %v5062_v37  ;;  %10477 = vrcp.f32 %v5110_v30 }
0x1462   :  { %10479 = vrcp.f32 %v5111_v22 }
0x1463   :  { %v5108_v56 = vunpack.c.l.bf16 %v5098_v26  ;;  %v5109_v61 = vunpack.c.h.bf16 %v5098_v26  ;;  %v10470_v15 = vpop.eup %10469 }
0x1464   :  { %v10472_v16 = vpop.eup %10471 }
0x1465   :  { %10481 = vrcp.f32 %v5108_v56  ;;  %v5137_v34 = vpack.c.bf16 %v10472_v16, %v10470_v15 }
0x1466   :  { %10483 = vrcp.f32 %v5109_v61 }
0x1467   :  { %v10474_v1 = vpop.eup %10473  ;;  %v5145_v0 = vmul.bf16 %v12948_v36, %v5137_v34 }
0x1468   :  { %v10476_v41 = vpop.eup %10475 }
0x1469   :  { %v5136_v52 = vpack.c.bf16 %v10476_v41, %v10474_v1 }
0x146b   :  { %v5144_v43 = vmul.bf16 %v12954_v7, %v5136_v52  ;;  %v10478_v58 = vpop.eup %10477 }
0x146c   :  { %v10480_v6 = vpop.eup %10479 }
0x146d   :  { %9716 = vmatprep.mubr.msk.bf16.mxu0 %vm728_vm1, %v5144_v43  ;;  %v5139_v42 = vpack.c.bf16 %v10480_v6, %v10478_v58 }
0x146e   :  { %9717 = vmatmul.mubr.msk.bf16.vlgmr.msra.gmra.mrb[152].mxu0 %vm728_vm1, %v5145_v0 }
0x146f   :  { %v10482_v51 = vpop.eup %10481  ;;  %v5147_v37 = vmul.bf16 %v12960_v48, %v5139_v42 }
0x1470   :  { %v10484_v26 = vpop.eup %10483 }
0x1471   :  { %v5138_v30 = vpack.c.bf16 %v10484_v26, %v10482_v51 }
0x1473   :  { %v5146_v22 = vmul.bf16 %v12966_v63, %v5138_v30 }
0x1475   :  { %9720 = vmatprep.mubr.msk.bf16.mxu0 %vm728_vm1, %v5146_v22 }
0x1476   :  { %9721 = vmatmul.mubr.msk.bf16.gmra.mrb[156].mxu0 %vm728_vm1, %v5147_v37 }
0x1484   :  { %v4968_v7 = vpop.xlane.xlu0 %4967 }
0x1485   :  { %v4994_v36 = vsub.f32 %v12972_v62, %v4968_v7 }
0x1486   :  { %v4971_v56 = vpop.xlane.xlu1 %4970 }
0x1487   :  { %v4995_v61 = vsub.f32 %v12978_v47, %v4971_v56 }
0x1488   :  { %v4962_v15 = vpop.xlane.xlu0 %4961 }
0x1489   :  { %v5005_v16 = vpack.c.bf16 %v4995_v61, %v4994_v36  ;;  %v4992_v34 = vsub.f32 %v12974_v31, %v4962_v15 }
0x148a   :  { %v4965_v1 = vpop.xlane.xlu1 %4964 }
0x148b   :  { %v5024_v41 = vmul.bf16 1069105081, %v5005_v16  ;;  %v4993_v63 = vsub.f32 %v12980_v9, %v4965_v1 }
0x148c   :  { %v4980_v52 = vpop.xlane.xlu0 %4979 }
0x148d   :  { %10485 = vpow.bf16 %v5024_v41  ;;  %v5004_v48 = vpack.c.bf16 %v4993_v63, %v4992_v34  ;;  %v4998_v16 = vsub.f32 %v12988_v25, %v4980_v52 }
0x148e   :  { %v5333_v47 = vpop.permute.xlu1 %5332 }
0x148f   :  { %v5021_v43 = vmul.bf16 1069105081, %v5004_v48  ;;  %v5354_v30 = vsel %vm549_vm0, %v5333_v47, 0 }
0x1490   :  { %v4974_v58 = vpop.xlane.xlu0 %4973 }
0x1491   :  { %10487 = vpow.bf16 %v5021_v43  ;;  %v4996_v63 = vsub.f32 %v12990_v55, %v4974_v58 }
0x1492   :  { %v5335_v37 = vpop.permute.xlu1 %5334 }
0x1493   :  { %v5357_v56 = vsel %vm549_vm0, %v5335_v37, 0 }
0x1494   :  { %v5331_v0 = vpop.permute.xlu0 %5330 }
0x1495   :  { %10004 = vmatprep.subr.msk.bf16.mxu0 %vm549_vm0, %v5331_v0  ;;  %v5351_v62 = vsel %vm549_vm0, %v5331_v0, 0 }
0x1496   :  { %9741 = vmatpush3.bf16.xpose.msra.mxu0 %v5351_v62  ;;  %v5337_v36 = vpop.permute.xlu1 %5336 }
0x1497   :  { %10005 = vmatprep.subr.msk.bf16.mxu0 %vm549_vm0, %v5333_v47  ;;  %v5360_v61 = vsel %vm549_vm0, %v5337_v36, 0 }
0x1498   :  { %v13027_v6 = vpop.eup %10485 }
0x1499   :  { %v5042_v31 = vunpack.c.l.bf16 %v13027_v6  ;;  %v5043_v9 = vunpack.c.h.bf16 %v13027_v6 }
0x149b   :  { %v5078_v51 = vsel %vm728_vm1, %v5042_v31, 0.0  ;;  %v5081_v26 = vsel %vm728_vm1, %v5043_v9, 0.0 }
0x149c   :  { %v13033_v42 = vpop.eup %10487  ;;  %5079 = vadd.xlane.f32.xlu0 %v5078_v51  ;;  %5082 = vadd.xlane.f32.xlu1 %v5081_v26 }
0x149d   :  { %v5040_v22 = vunpack.c.l.bf16 %v13033_v42  ;;  %v5041_v47 = vunpack.c.h.bf16 %v13033_v42 }
0x149e   :  { %9743 = vmatpush3.bf16.xpose.msra.mxu0 %v5354_v30 }
0x149f   :  { %10006 = vmatprep.subr.msk.bf16.mxu0 %vm549_vm0, %v5335_v37  ;;  %v5072_v7 = vsel %vm728_vm1, %v5040_v22, 0.0  ;;  %v5075_v31 = vsel %vm728_vm1, %v5041_v47, 0.0 }
0x14a0   :  { %5073 = vadd.xlane.f32.xlu0 %v5072_v7 }
0x14a6   :  { %9745 = vmatpush3.bf16.xpose.msra.mxu0 %v5357_v56 }
0x14a7   :  { %10007 = vmatprep.subr.msk.bf16.mxu0 %vm549_vm0, %v5337_v36 }
0x14ad   :  { %5320 = vrot.lane.b32.xlu1 %v12776_v49, %s10885_s20 }
0x14ae   :  { %9747 = vmatpush3.bf16.xpose.msra.mxu0 %v5360_v61 }
0x14b1   :  { %5443 = vrot.lane.b32.xlu1 %v12866_v10, %s10885_s20 }
0x14b6   :  { %5318 = vrot.lane.b32.xlu0 %v12741_v17, %s10885_s20 }
0x14c7   :  { %v4983_v15 = vpop.xlane.xlu1 %4982 }
0x14c8   :  { %v4999_v1 = vsub.f32 %v12994_v54, %v4983_v15 }
0x14ca   :  { %v5007_v41 = vpack.c.bf16 %v4999_v1, %v4998_v16 }
0x14cb   :  { %v4977_v34 = vpop.xlane.xlu1 %4976 }
0x14cc   :  { %v5030_v48 = vmul.bf16 1069105081, %v5007_v41  ;;  %v4997_v43 = vsub.f32 %v12996_v12, %v4977_v34 }
0x14ce   :  { %10489 = vpow.bf16 %v5030_v48  ;;  %v5006_v0 = vpack.c.bf16 %v4997_v43, %v4996_v63 }
0x14d0   :  { %v5027_v62 = vmul.bf16 1069105081, %v5006_v0 }
0x14d2   :  { %10491 = vpow.bf16 %v5027_v62 }
0x14d5   :  { %5076 = vadd.xlane.f32.xlu1 %v5075_v31 }
0x14d9   :  { %v13054_v9 = vpop.eup %10489 }
0x14da   :  { %v5046_v25 = vunpack.c.l.bf16 %v13054_v9  ;;  %v5047_v55 = vunpack.c.h.bf16 %v13054_v9 }
0x14dc   :  { %v5090_v54 = vsel %vm728_vm1, %v5046_v25, 0.0  ;;  %v5093_v12 = vsel %vm728_vm1, %v5047_v55, 0.0 }
0x14dd   :  { %v13059_v52 = vpop.eup %10491  ;;  %5091 = vadd.xlane.f32.xlu0 %v5090_v54 }
0x14de   :  { %v5045_v58 = vunpack.c.h.bf16 %v13059_v52  ;;  %v5044_v26 = vunpack.c.l.bf16 %v13059_v52 }
0x14e0   :  { %v5087_v51 = vsel %vm728_vm1, %v5045_v58, 0.0  ;;  %v5084_v30 = vsel %vm728_vm1, %v5044_v26, 0.0 }
0x14e1   :  { %5094 = vadd.xlane.f32.xlu0 %v5093_v12 }
0x14e5   :  { %5088 = vadd.xlane.f32.xlu0 %v5087_v51 }
0x14e6   :  { %5445 = vrot.lane.b32.xlu1 %v12886_v11, %s10885_s20 }
0x14fb   :  { %5447 = vrot.lane.b32.xlu0 %v12900_v19, %s10885_s20 }
0x14ff   :  { %5324 = vrot.lane.b32.xlu0 %v12834_v20, %s10885_s20 }
0x1503   :  { %5431 = vrot.lane.b32.xlu0 %v12864_v27, %s10885_s20 }
0x1507   :  { %5435 = vrot.lane.b32.xlu0 %v12898_v35, %s10885_s20 }
0x150a   :  { %5085 = vadd.xlane.f32.xlu1 %v5084_v30 }
0x150b   :  { %5760 = vrot.lane.b32.xlu0 %v12783_v5, %s10885_s20 }
0x151b   :  { %5322 = vrot.lane.b32.xlu1 %v12807_v45, %s10885_s20 }
0x151f   :  { %5449 = vrot.lane.b32.xlu1 %v12918_v32, %s10885_s20 }
0x1523   :  { %5433 = vrot.lane.b32.xlu1 %v12882_v21, %s10885_s20 }
0x1527   :  { %5437 = vrot.lane.b32.xlu1 %v12914_v39, %s10885_s20 }
0x1529   :  { %v5080_v22 = vpop.xlane.xlu0 %5079  ;;  %v5083_v37 = vpop.xlane.xlu1 %5082 }
0x152a   :  { %v5101_v25 = vpack.c.bf16 %v5083_v37, %v5080_v22 }
0x152b   :  { %5762 = vrot.lane.b32.xlu1 %v12778_v14, %s10885_s20 }
0x152c   :  { %v5114_v54 = vunpack.c.l.bf16 %v5101_v25  ;;  %v5115_v55 = vunpack.c.h.bf16 %v5101_v25 }
0x152d   :  { %v5074_v7 = vpop.xlane.xlu0 %5073  ;;  %v5321_v56 = vpop.permute.xlu1 %5320 }
0x152e   :  { %10493 = vrcp.f32 %v5114_v54 }
0x152f   :  { %5764 = vrot.lane.b32.xlu1 %v12840_v3, %s10885_s20  ;;  %10495 = vrcp.f32 %v5115_v55 }
0x1531   :  { %v5319_v36 = vpop.permute.xlu0 %5318  ;;  %v5444_v61 = vpop.permute.xlu1 %5443 }
0x1532   :  { %9748 = vmatprep.mubr.msk.bf16.mxu0 %vm549_vm0, %v5319_v36  ;;  %10008 = vmatprep.subr.msk.bf16.mxu1 %vm549_vm0, %v5444_v61  ;;  %v5464_v25 = vsel %vm549_vm0, %v5444_v61, 0 }
0x1533   :  { %9749 = vmatmul.mubr.msk.bf16.vlgmr.msra.gmra.mrb[160].mxu0 %vm549_vm0, %v5321_v56 }
0x1538   :  { %v10494_v56 = vpop.eup %10493 }
0x1539   :  { %v10496_v62 = vpop.eup %10495 }
0x153a   :  { %v5141_v44 = vpack.c.bf16 %v10496_v62, %v10494_v56 }
0x153c   :  { %v5149_v37 = vmul.bf16 %v13027_v6, %v5141_v44 }
0x1541   :  { %v13093_v15 = vpop.f32.mrb[152].mxu0 }
0x1542   :  { %14600 = vst [vmem:[#allocation41_spill] sm:$0xff] %v13093_v15  ;;  %v13095_v16 = vpop.f32.mrb[153].mxu0 }
0x1543   :  { %14601 = vst [vmem:[#allocation30_spill] sm:$0xff] %v13095_v16  ;;  %v13097_v1 = vpop.f32.mrb[154].mxu0 }
0x1544   :  { %14602 = vst [vmem:[#allocation28_spill] sm:$0xff] %v13097_v1  ;;  %v13101_v34 = vpop.f32.mrb[155].mxu0 }
0x1545   :  { %14603 = vst [vmem:[#allocation29_spill] sm:$0xff] %v13101_v34 }
0x1549   :  { %v13105_v48 = vpop.f32.mrb[156].mxu0 }
0x154a   :  { %14604 = vst [vmem:[#allocation27_spill] sm:$0xff] %v13105_v48  ;;  %v13107_v43 = vpop.f32.mrb[157].mxu0 }
0x154b   :  { %14605 = vst [vmem:[#allocation34_spill] sm:$0xff] %v13107_v43  ;;  %v13109_v0 = vpop.f32.mrb[158].mxu0 }
0x154c   :  { %14606 = vst [vmem:[#allocation32_spill] sm:$0xff] %v13109_v0  ;;  %v13113_v47 = vpop.f32.mrb[159].mxu0 }
0x154d   :  { %14607 = vst [vmem:[#allocation33_spill] sm:$0xff] %v13113_v47 }
0x1562   :  { %v5077_v12 = vpop.xlane.xlu1 %5076 }
0x1563   :  { %v5100_v58 = vpack.c.bf16 %v5077_v12, %v5074_v7 }
0x1565   :  { %v5112_v51 = vunpack.c.l.bf16 %v5100_v58  ;;  %v5113_v26 = vunpack.c.h.bf16 %v5100_v58 }
0x1566   :  { %v5446_v54 = vpop.permute.xlu1 %5445 }
0x1567   :  { %10497 = vrcp.f32 %v5112_v51  ;;  %v5467_v62 = vsel %vm549_vm0, %v5446_v54, 0 }
0x1568   :  { %10499 = vrcp.f32 %v5113_v26 }
0x156a   :  { %v5092_v30 = vpop.xlane.xlu0 %5091 }
0x156e   :  { %v5095_v36 = vpop.xlane.xlu0 %5094 }
0x1571   :  { %v10498_v41 = vpop.eup %10497 }
0x1572   :  { %v10500_v63 = vpop.eup %10499  ;;  %v5089_v29 = vpop.xlane.xlu0 %5088 }
0x1573   :  { %v5140_v31 = vpack.c.bf16 %v10500_v63, %v10498_v41  ;;  %v5103_v41 = vpack.c.bf16 %v5095_v36, %v5092_v30 }
0x1575   :  { %v5148_v22 = vmul.bf16 %v13033_v42, %v5140_v31  ;;  %v5118_v61 = vunpack.c.l.bf16 %v5103_v41  ;;  %v5119_v63 = vunpack.c.h.bf16 %v5103_v41 }
0x1576   :  { %v5448_v7 = vpop.permute.xlu0 %5447 }
0x1577   :  { %9732 = vmatprep.mubr.msk.bf16.mxu1 %vm728_vm1, %v5148_v22  ;;  %v5470_v6 = vsel %vm549_vm0, %v5448_v7, 0  ;;  %10501 = vrcp.f32 %v5118_v61 }
0x1578   :  { %9733 = vmatmul.mubr.msk.bf16.vlgmr.msra.gmra.mrb[168].mxu1 %vm728_vm1, %v5149_v37  ;;  %10503 = vrcp.f32 %v5119_v63 }
0x1579   :  { %9757 = vmatpush3.bf16.xpose.msra.mxu1 %v5464_v25 }
0x157a   :  { %10009 = vmatprep.subr.msk.bf16.mxu1 %vm549_vm0, %v5446_v54  ;;  %v5325_v55 = vpop.permute.xlu0 %5324 }
0x157e   :  { %v5432_v12 = vpop.permute.xlu0 %5431 }
0x1581   :  { %9759 = vmatpush3.bf16.xpose.msra.mxu1 %v5467_v62  ;;  %v10502_v36 = vpop.eup %10501 }
0x1582   :  { %10010 = vmatprep.subr.msk.bf16.mxu1 %vm549_vm0, %v5448_v7  ;;  %v5436_v42 = vpop.permute.xlu0 %5435 }
0x1586   :  { %v5761_v44 = vpop.permute.xlu0 %5760 }
0x1587   :  { %9772 = vmatprep.subr.bf16.mxu0 %v5761_v44 }
0x1588   :  { %9773 = vmatpush3.bf16.msra.mxu0 %v5761_v44 }
0x1589   :  { %9761 = vmatpush3.bf16.xpose.msra.mxu1 %v5470_v6 }
0x1597   :  { %v5086_v31 = vpop.xlane.xlu1 %5085 }
0x1598   :  { %v5102_v58 = vpack.c.bf16 %v5089_v29, %v5086_v31  ;;  %v10504_v29 = vpop.eup %10503 }
0x1599   :  { %v5143_v62 = vpack.c.bf16 %v10504_v29, %v10502_v36 }
0x159a   :  { %v5116_v51 = vunpack.c.l.bf16 %v5102_v58  ;;  %v5117_v26 = vunpack.c.h.bf16 %v5102_v58 }
0x159b   :  { %v5323_v56 = vpop.permute.xlu1 %5322  ;;  %v5151_v61 = vmul.bf16 %v13054_v9, %v5143_v62 }
0x159c   :  { %10505 = vrcp.f32 %v5116_v51  ;;  %9752 = vmatprep.mubr.msk.bf16.mxu0 %vm549_vm0, %v5323_v56 }
0x159d   :  { %10507 = vrcp.f32 %v5117_v26  ;;  %9753 = vmatmul.mubr.msk.bf16.gmra.mrb[164].mxu0 %vm549_vm0, %v5325_v55 }
0x159f   :  { %v5450_v22 = vpop.permute.xlu1 %5449 }
0x15a0   :  { %10011 = vmatprep.subr.msk.bf16.mxu1 %vm549_vm0, %v5450_v22  ;;  %v5473_v30 = vsel %vm549_vm0, %v5450_v22, 0 }
0x15a1   :  { %9763 = vmatpush3.bf16.xpose.msra.mxu1 %v5473_v30 }
0x15a3   :  { %v5434_v37 = vpop.permute.xlu1 %5433 }
0x15a6   :  { %v10506_v7 = vpop.eup %10505 }
0x15a7   :  { %v10508_v25 = vpop.eup %10507  ;;  %v5438_v54 = vpop.permute.xlu1 %5437 }
0x15a8   :  { %v5142_v44 = vpack.c.bf16 %v10508_v25, %v10506_v7 }
0x15aa   :  { %v5150_v6 = vmul.bf16 %v13059_v52, %v5142_v44 }
0x15ab   :  { %v5763_v41 = vpop.permute.xlu1 %5762 }
0x15ac   :  { %9736 = vmatprep.mubr.msk.bf16.mxu1 %vm728_vm1, %v5150_v6  ;;  %9774 = vmatprep.subr.bf16.mxu0 %v5763_v41 }
0x15ad   :  { %9737 = vmatmul.mubr.msk.bf16.gmra.mrb[172].mxu1 %vm728_vm1, %v5151_v61  ;;  %9775 = vmatpush3.bf16.msra.mxu0 %v5763_v41 }
0x15ae   :  { %9764 = vmatprep.mubr.msk.bf16.mxu1 %vm549_vm0, %v5432_v12 }
0x15af   :  { %v5765_v55 = vpop.permute.xlu1 %5764 }
0x15b0   :  { %9776 = vmatprep.subr.bf16.mxu0 %v5765_v55 }
0x15b1   :  { %9777 = vmatpush3.bf16.msra.mxu0 %v5765_v55 }
0x15b5   :  { %9765 = vmatmul.mubr.msk.bf16.vlgmr.msra.gmra.mrb[176].mxu1 %vm549_vm0, %v5434_v37 }
0x15b6   :  { %9768 = vmatprep.mubr.msk.bf16.mxu1 %vm549_vm0, %v5436_v42 }
0x15bd   :  { %9769 = vmatmul.mubr.msk.bf16.gmra.mrb[180].mxu1 %vm549_vm0, %v5438_v54 }
0x1606   :  { %v9750_v52 = vpop.f32.mrb[160].mxu0 }
0x1607   :  { %v5396_v63 = vpop.f32.mrb[161].mxu0  ;;  %v5546_v9 = vsel %vm728_vm1, %v9750_v52, -inf }
0x1608   :  { %5547 = vmax.xlane.f32.xlu0 %v5546_v9  ;;  %v9751_v31 = vpop.f32.mrb[162].mxu0  ;;  %v5540_v12 = vsel %vm728_vm1, %v5396_v63, -inf }
0x1609   :  { %v5399_v58 = vpop.f32.mrb[163].mxu0  ;;  %v5549_v26 = vsel %vm728_vm1, %v9751_v31, -inf }
0x160a   :  { %v5543_v51 = vsel %vm728_vm1, %v5399_v58, -inf }
0x160b   :  { %5544 = vmax.xlane.f32.xlu1 %v5543_v51 }
0x160c   :  { %5541 = vmax.xlane.f32.xlu0 %v5540_v12 }
0x1610   :  { %5550 = vmax.xlane.f32.xlu0 %v5549_v26 }
0x164b   :  { %v13142_v56 = vpop.f32.mrb[168].mxu1 }
0x164c   :  { %14608 = vst [vmem:[#allocation31_spill] sm:$0xff] %v13142_v56  ;;  %v13144_v42 = vpop.f32.mrb[169].mxu1 }
0x164d   :  { %14609 = vst [vmem:[#allocation16_spill] sm:$0xff] %v13144_v42  ;;  %v13146_v22 = vpop.f32.mrb[170].mxu1 }
0x164e   :  { %14610 = vst [vmem:[#allocation44_spill] sm:$0xff] %v13146_v22  ;;  %v13150_v36 = vpop.f32.mrb[171].mxu1 }
0x164f   :  { %14611 = vst [vmem:[#allocation45_spill] sm:$0xff] %v13150_v36 }
0x1670   :  { %v9754_v29 = vpop.f32.mrb[164].mxu0 }
0x1671   :  { %v13154_v7 = vpop.f32.mrb[165].mxu0  ;;  %v5558_v25 = vsel %vm728_vm1, %v9754_v29, -inf }
0x1672   :  { %5559 = vmax.xlane.f32.xlu0 %v5558_v25  ;;  %v9755_v54 = vpop.f32.mrb[166].mxu0  ;;  %v5552_v6 = vsel %vm728_vm1, %v13154_v7, -inf }
0x1673   :  { %v5415_v62 = vpop.f32.mrb[167].mxu0  ;;  %v5561_v44 = vsel %vm728_vm1, %v9755_v54, -inf }
0x1674   :  { %5562 = vmax.xlane.f32.xlu1 %v5561_v44  ;;  %v5555_v41 = vsel %vm728_vm1, %v5415_v62, -inf }
0x1676   :  { %5553 = vmax.xlane.f32.xlu0 %v5552_v6 }
0x1678   :  { %5556 = vmax.xlane.f32.xlu1 %v5555_v41 }
0x1680   :  { %v13161_v61 = vpop.f32.mrb[172].mxu1 }
0x1681   :  { %14612 = vst [vmem:[#allocation46_spill] sm:$0xff] %v13161_v61  ;;  %v13163_v55 = vpop.f32.mrb[173].mxu1 }
0x1682   :  { %14613 = vst [vmem:[#allocation47_spill] sm:$0xff] %v13163_v55  ;;  %v13165_v9 = vpop.f32.mrb[174].mxu1 }
0x1683   :  { %14614 = vst [vmem:[#allocation48_spill] sm:$0xff] %v13165_v9  ;;  %v13169_v12 = vpop.f32.mrb[175].mxu1 }
0x1684   :  { %14615 = vst [vmem:[#allocation49_spill] sm:$0xff] %v13169_v12 }
0x1688   :  { %v13173_v25 = vpop.f32.mrb[176].mxu1 }
0x1689   :  { %v13175_v44 = vpop.f32.mrb[177].mxu1 }
0x168a   :  { %v13177_v6 = vpop.f32.mrb[178].mxu1 }
0x168b   :  { %v13179_v41 = vpop.f32.mrb[179].mxu1 }
0x1690   :  { %v13181_v30 = vpop.f32.mrb[180].mxu1 }
0x1691   :  { %v13183_v37 = vpop.f32.mrb[181].mxu1 }
0x1692   :  { %v13185_v57 = vpop.f32.mrb[182].mxu1 }
0x1693   :  { %v13187_v51 = vpop.f32.mrb[183].mxu1 }
0x1695   :  { %v5548_v8 = vpop.xlane.xlu0 %5547 }
0x1696   :  { %v5590_v28 = vsub.f32 %v9750_v52, %v5548_v8 }
0x1698   :  { %v5545_v2 = vpop.xlane.xlu1 %5544 }
0x1699   :  { %v5589_v61 = vsub.f32 %v5399_v58, %v5545_v2  ;;  %v5542_v26 = vpop.xlane.xlu0 %5541 }
0x169a   :  { %v5588_v9 = vsub.f32 %v5396_v63, %v5542_v26 }
0x169c   :  { %v5604_v55 = vpack.c.bf16 %v5589_v61, %v5588_v9 }
0x169d   :  { %v5551_v12 = vpop.xlane.xlu0 %5550 }
0x169e   :  { %v5591_v13 = vsub.f32 %v9751_v31, %v5551_v12  ;;  %v5613_v23 = vmul.bf16 1069105081, %v5604_v55 }
0x16a0   :  { %v5605_v50 = vpack.c.bf16 %v5591_v13, %v5590_v28  ;;  %10509 = vpow.bf16 %v5613_v23 }
0x16a2   :  { %v5616_v56 = vmul.bf16 1069105081, %v5605_v50 }
0x16a4   :  { %10511 = vpow.bf16 %v5616_v56 }
0x16ab   :  { %v13189_v22 = vpop.eup %10509 }
0x16ac   :  { %v5637_v8 = vunpack.c.h.bf16 %v13189_v22  ;;  %v5636_v52 = vunpack.c.l.bf16 %v13189_v22 }
0x16ae   :  { %v5655_v50 = vsel %vm728_vm1, %v5637_v8, 0.0  ;;  %v5652_v23 = vsel %vm728_vm1, %v5636_v52, 0.0 }
0x16af   :  { %v13191_v42 = vpop.eup %10511 }
0x16b0   :  { %v5638_v36 = vunpack.c.l.bf16 %v13191_v42  ;;  %v5639_v48 = vunpack.c.h.bf16 %v13191_v42 }
0x16b2   :  { %v5658_v2 = vsel %vm728_vm1, %v5638_v36, 0.0  ;;  %v5661_v63 = vsel %vm728_vm1, %v5639_v48, 0.0 }
0x16b3   :  { %5659 = vadd.xlane.f32.xlu0 %v5658_v2  ;;  %5662 = vadd.xlane.f32.xlu1 %v5661_v63 }
0x16b7   :  { %5656 = vadd.xlane.f32.xlu1 %v5655_v50  ;;  %5653 = vadd.xlane.f32.xlu0 %v5652_v23 }
0x16ff   :  { %v5560_v28 = vpop.xlane.xlu0 %5559 }
0x1700   :  { %v5594_v31 = vsub.f32 %v9754_v29, %v5560_v28  ;;  %v5573_v28 = vsel %vm728_vm1, %v13177_v6, -inf }
0x1701   :  { %v5563_v13 = vpop.xlane.xlu1 %5562 }
0x1702   :  { %v5595_v58 = vsub.f32 %v9755_v54, %v5563_v13  ;;  %v5570_v13 = vsel %vm728_vm1, %v13173_v25, -inf }
0x1703   :  { %v5554_v56 = vpop.xlane.xlu0 %5553 }
0x1704   :  { %v5607_v36 = vpack.c.bf16 %v5595_v58, %v5594_v31  ;;  %v5592_v55 = vsub.f32 %v13154_v7, %v5554_v56  ;;  %v5567_v31 = vsel %vm728_vm1, %v13179_v41, -inf  ;;  %v5564_v58 = vsel %vm728_vm1, %v13175_v44, -inf }
0x1705   :  { %v5557_v61 = vpop.xlane.xlu1 %5556  ;;  %v5582_v56 = vsel %vm728_vm1, %v13181_v30, -inf }
0x1706   :  { %v5622_v48 = vmul.bf16 1069105081, %v5607_v36  ;;  %v5593_v9 = vsub.f32 %v5415_v62, %v5557_v61  ;;  %v5576_v36 = vsel %vm728_vm1, %v13183_v37, -inf }
0x1708   :  { %10513 = vpow.bf16 %v5622_v48  ;;  %v5606_v12 = vpack.c.bf16 %v5593_v9, %v5592_v55 }
0x170a   :  { %v5619_v26 = vmul.bf16 1069105081, %v5606_v12 }
0x170c   :  { %10515 = vpow.bf16 %v5619_v26 }
0x1713   :  { %v13202_v2 = vpop.eup %10513 }
0x1714   :  { %v5642_v63 = vunpack.c.l.bf16 %v13202_v2  ;;  %v5643_v29 = vunpack.c.h.bf16 %v13202_v2 }
0x1716   :  { %v5670_v8 = vsel %vm728_vm1, %v5642_v63, 0.0  ;;  %v5673_v7 = vsel %vm728_vm1, %v5643_v29, 0.0 }
0x1717   :  { %v13207_v54 = vpop.eup %10515  ;;  %5671 = vadd.xlane.f32.xlu0 %v5670_v8 }
0x1718   :  { %v5640_v52 = vunpack.c.l.bf16 %v13207_v54  ;;  %v5641_v50 = vunpack.c.h.bf16 %v13207_v54 }
0x171a   :  { %v5664_v62 = vsel %vm728_vm1, %v5640_v52, 0.0  ;;  %v5667_v23 = vsel %vm728_vm1, %v5641_v50, 0.0  ;;  %v5579_v50 = vsel %vm728_vm1, %v13187_v51, -inf }
0x171b   :  { %5674 = vadd.xlane.f32.xlu0 %v5673_v7  ;;  %5665 = vadd.xlane.f32.xlu1 %v5664_v62  ;;  %v5585_v7 = vsel %vm728_vm1, %v13185_v57, -inf }
0x171f   :  { %5668 = vadd.xlane.f32.xlu0 %v5667_v23  ;;  %5574 = vmax.xlane.f32.xlu1 %v5573_v28 }
0x1723   :  { %5571 = vmax.xlane.f32.xlu0 %v5570_v13  ;;  %5568 = vmax.xlane.f32.xlu1 %v5567_v31 }
0x1727   :  { %5565 = vmax.xlane.f32.xlu0 %v5564_v58 }
0x172b   :  { %5583 = vmax.xlane.f32.xlu0 %v5582_v56 }
0x172f   :  { %5577 = vmax.xlane.f32.xlu0 %v5576_v36 }
0x1734   :  { %5766 = vrot.lane.b32.xlu1 %v12836_v38, %s10885_s20 }
0x1740   :  { %v5660_v61 = vpop.xlane.xlu0 %5659  ;;  %v5663_v48 = vpop.xlane.xlu1 %5662 }
0x1744   :  { %v5654_v55 = vpop.xlane.xlu0 %5653  ;;  %v5657_v9 = vpop.xlane.xlu1 %5656 }
0x1745   :  { %v5700_v12 = vpack.c.bf16 %v5657_v9, %v5654_v55  ;;  %5960 = vrot.lane.b32.xlu0 %v12781_v46, %s10881_s0 }
0x1747   :  { %v5708_v26 = vunpack.c.l.bf16 %v5700_v12  ;;  %v5709_v63 = vunpack.c.h.bf16 %v5700_v12 }
0x1749   :  { %10517 = vrcp.f32 %v5708_v26  ;;  %5859 = vrot.lane.b32.xlu0 %v12916_v59, %s10885_s20 }
0x174a   :  { %10519 = vrcp.f32 %v5709_v63 }
0x1753   :  { %v10518_v8 = vpop.eup %10517 }
0x1754   :  { %v10520_v29 = vpop.eup %10519 }
0x1755   :  { %v5740_v52 = vpack.c.bf16 %v10520_v29, %v10518_v8 }
0x1757   :  { %v5748_v62 = vmul.bf16 %v13189_v22, %v5740_v52  ;;  %v5701_v22 = vpack.c.bf16 %v5663_v48, %v5660_v61 }
0x1758   :  { %5586 = vmax.xlane.f32.xlu1 %v5585_v7 }
0x1759   :  { %9780 = vmatprep.mubr.msk.bf16.mxu0 %vm728_vm1, %v5748_v62  ;;  %v5710_v23 = vunpack.c.l.bf16 %v5701_v22  ;;  %v5711_v28 = vunpack.c.h.bf16 %v5701_v22 }
0x175b   :  { %10521 = vrcp.f32 %v5710_v23 }
0x175c   :  { %5580 = vmax.xlane.f32.xlu1 %v5579_v50  ;;  %10523 = vrcp.f32 %v5711_v28 }
0x1765   :  { %v10522_v63 = vpop.eup %10521 }
0x1766   :  { %v10524_v52 = vpop.eup %10523 }
0x1767   :  { %v5741_v50 = vpack.c.bf16 %v10524_v52, %v10522_v63 }
0x176d   :  { %5958 = vrot.lane.b32.xlu1 %v12744_v4, %s10881_s0 }
0x1771   :  { %5853 = vrot.lane.b32.xlu1 %v12888_v53, %s10885_s20 }
0x1775   :  { %5855 = vrot.lane.b32.xlu1 %v12884_v18, %s10885_s20 }
0x1779   :  { %5962 = vrot.lane.b32.xlu1 %v12810_v60, %s10881_s0 }
0x177d   :  { %5857 = vrot.lane.b32.xlu1 %v12920_v40, %s10885_s20 }
0x1781   :  { %5964 = vrot.lane.b32.xlu1 %v12838_v24, %s10881_s0 }
0x1785   :  { %5950 = vrot.lane.b32.xlu1 %v12741_v17, %s10881_s0 }
0x1789   :  { %5952 = vrot.lane.b32.xlu1 %v12776_v49, %s10881_s0 }
0x178d   :  { %6065 = vrot.lane.b32.xlu1 %v12886_v11, %s10881_s0 }
0x17a4   :  { %v5672_v13 = vpop.xlane.xlu0 %5671 }
0x17a8   :  { %v5675_v31 = vpop.xlane.xlu0 %5674  ;;  %v5666_v58 = vpop.xlane.xlu1 %5665 }
0x17a9   :  { %v5703_v56 = vpack.c.bf16 %v5675_v31, %v5672_v13 }
0x17ab   :  { %v5714_v36 = vunpack.c.l.bf16 %v5703_v56  ;;  %v5715_v55 = vunpack.c.h.bf16 %v5703_v56  ;;  %v5749_v56 = vmul.bf16 %v13191_v42, %v5741_v50 }
0x17ac   :  { %v5669_v9 = vpop.xlane.xlu0 %5668  ;;  %v5575_v12 = vpop.xlane.xlu1 %5574 }
0x17ad   :  { %v5702_v26 = vpack.c.bf16 %v5669_v9, %v5666_v58  ;;  %10525 = vrcp.f32 %v5714_v36  ;;  %v5599_v7 = vsub.f32 %v13177_v6, %v5575_v12 }
0x17ae   :  { %10527 = vrcp.f32 %v5715_v55 }
0x17af   :  { %v5712_v8 = vunpack.c.l.bf16 %v5702_v26  ;;  %v5713_v29 = vunpack.c.h.bf16 %v5702_v26 }
0x17b0   :  { %v5572_v61 = vpop.xlane.xlu0 %5571  ;;  %v5569_v48 = vpop.xlane.xlu1 %5568 }
0x17b1   :  { %10529 = vrcp.f32 %v5712_v8  ;;  %v5598_v62 = vsub.f32 %v13173_v25, %v5572_v61  ;;  %v5597_v31 = vsub.f32 %v13179_v41, %v5569_v48 }
0x17b2   :  { %10531 = vrcp.f32 %v5713_v29 }
0x17b3   :  { %v5609_v22 = vpack.c.bf16 %v5599_v7, %v5598_v62 }
0x17b4   :  { %v5566_v23 = vpop.xlane.xlu0 %5565  ;;  %v5767_v28 = vpop.permute.xlu1 %5766 }
0x17b5   :  { %v5628_v13 = vmul.bf16 1069105081, %v5609_v22  ;;  %v5596_v58 = vsub.f32 %v13175_v44, %v5566_v23  ;;  %9778 = vmatprep.subr.bf16.mxu0 %v5767_v28 }
0x17b6   :  { %9779 = vmatpush3.bf16.msra.mxu0 %v5767_v28 }
0x17b7   :  { %10533 = vpow.bf16 %v5628_v13  ;;  %v5608_v36 = vpack.c.bf16 %v5597_v31, %v5596_v58  ;;  %v10526_v55 = vpop.eup %10525 }
0x17b8   :  { %v10528_v6 = vpop.eup %10527  ;;  %v5584_v50 = vpop.xlane.xlu0 %5583 }
0x17b9   :  { %v5625_v9 = vmul.bf16 1069105081, %v5608_v36  ;;  %9781 = vmatmul.mubr.msk.bf16.vlgmr.msra.gmra.mrb[168].mxu0 %vm728_vm1, %v5749_v56  ;;  %v5743_v26 = vpack.c.bf16 %v10528_v6, %v10526_v55  ;;  %v5602_v23 = vsub.f32 %v13181_v30, %v5584_v50 }
0x17bb   :  { %v10530_v25 = vpop.eup %10529  ;;  %10535 = vpow.bf16 %v5625_v9  ;;  %v5751_v44 = vmul.bf16 %v13202_v2, %v5743_v26 }
0x17bc   :  { %v10532_v12 = vpop.eup %10531  ;;  %v5578_v13 = vpop.xlane.xlu0 %5577 }
0x17bd   :  { %v5742_v63 = vpack.c.bf16 %v10532_v12, %v10530_v25  ;;  %v5600_v56 = vsub.f32 %v13183_v37, %v5578_v13 }
0x17bf   :  { %v5750_v41 = vmul.bf16 %v13207_v54, %v5742_v63 }
0x17c1   :  { %9784 = vmatprep.mubr.msk.bf16.mxu0 %vm728_vm1, %v5750_v41 }
0x17c2   :  { %v13265_v8 = vpop.eup %10533  ;;  %9785 = vmatmul.mubr.msk.bf16.gmra.mrb[172].mxu0 %vm728_vm1, %v5751_v44 }
0x17c3   :  { %v5646_v42 = vunpack.c.l.bf16 %v13265_v8  ;;  %v5647_v52 = vunpack.c.h.bf16 %v13265_v8 }
0x17c5   :  { %v5682_v29 = vsel %vm728_vm1, %v5646_v42, 0.0  ;;  %v5685_v48 = vsel %vm728_vm1, %v5647_v52, 0.0 }
0x17c6   :  { %v13271_v61 = vpop.eup %10535  ;;  %5683 = vadd.xlane.f32.xlu0 %v5682_v29 }
0x17c7   :  { %v5644_v54 = vunpack.c.l.bf16 %v13271_v61  ;;  %v5645_v7 = vunpack.c.h.bf16 %v13271_v61 }
0x17c9   :  { %v5676_v2 = vsel %vm728_vm1, %v5644_v54, 0.0  ;;  %v5679_v62 = vsel %vm728_vm1, %v5645_v7, 0.0 }
0x17ca   :  { %5686 = vadd.xlane.f32.xlu0 %v5685_v48 }
0x17ce   :  { %5677 = vadd.xlane.f32.xlu0 %v5676_v2 }
0x17d2   :  { %5680 = vadd.xlane.f32.xlu0 %v5679_v62 }
0x17e5   :  { %v5587_v22 = vpop.xlane.xlu1 %5586 }
0x17e6   :  { %v5603_v28 = vsub.f32 %v13185_v57, %v5587_v22  ;;  %v5961_v57 = vpop.permute.xlu0 %5960 }
0x17e8   :  { %v5611_v31 = vpack.c.bf16 %v5603_v28, %v5602_v23  ;;  %6063 = vrot.lane.b32.xlu0 %v12866_v10, %s10881_s0 }
0x17e9   :  { %v5581_v58 = vpop.xlane.xlu1 %5580 }
0x17ea   :  { %v5634_v36 = vmul.bf16 1069105081, %v5611_v31  ;;  %v5601_v55 = vsub.f32 %v13187_v51, %v5581_v58  ;;  %v5982_v51 = vsel %vm549_vm0, %v5961_v57, 0  ;;  %v5860_v54 = vpop.permute.xlu0 %5859 }
0x17ec   :  { %10537 = vpow.bf16 %v5634_v36  ;;  %v5610_v6 = vpack.c.bf16 %v5601_v55, %v5600_v56 }
0x17ed   :  { %v5959_v9 = vpop.permute.xlu1 %5958 }
0x17ee   :  { %v5631_v25 = vmul.bf16 1069105081, %v5610_v6  ;;  %10012 = vmatprep.subr.msk.bf16.mxu0 %vm549_vm0, %v5959_v9  ;;  %v5979_v30 = vsel %vm549_vm0, %v5959_v9, 0 }
0x17ef   :  { %9805 = vmatpush3.bf16.xpose.msra.mxu0 %v5979_v30 }
0x17f0   :  { %10539 = vpow.bf16 %v5631_v25  ;;  %10013 = vmatprep.subr.msk.bf16.mxu0 %vm549_vm0, %v5961_v57 }
0x17f1   :  { %v5854_v12 = vpop.permute.xlu1 %5853 }
0x17f2   :  { %9788 = vmatprep.subr.bf16.mxu1 %v5854_v12 }
0x17f3   :  { %9789 = vmatpush3.bf16.msra.mxu1 %v5854_v12 }
0x17f5   :  { %v5856_v37 = vpop.permute.xlu1 %5855 }
0x17f6   :  { %9790 = vmatprep.subr.bf16.mxu1 %v5856_v37 }
0x17f7   :  { %v13288_v26 = vpop.eup %10537  ;;  %9791 = vmatpush3.bf16.msra.mxu1 %v5856_v37  ;;  %9807 = vmatpush3.bf16.xpose.msra.mxu0 %v5982_v51 }
0x17f8   :  { %v5651_v63 = vunpack.c.h.bf16 %v13288_v26  ;;  %v5650_v62 = vunpack.c.l.bf16 %v13288_v26 }
0x17f9   :  { %v5963_v41 = vpop.permute.xlu1 %5962 }
0x17fa   :  { %10014 = vmatprep.subr.msk.bf16.mxu0 %vm549_vm0, %v5963_v41  ;;  %v5697_v44 = vsel %vm728_vm1, %v5651_v63, 0.0  ;;  %v5985_v2 = vsel %vm549_vm0, %v5963_v41, 0  ;;  %v5694_v22 = vsel %vm728_vm1, %v5650_v62, 0.0 }
0x17fb   :  { %v13293_v42 = vpop.eup %10539  ;;  %5698 = vadd.xlane.f32.xlu1 %v5697_v44 }
0x17fc   :  { %v5648_v29 = vunpack.c.l.bf16 %v13293_v42  ;;  %v5649_v23 = vunpack.c.h.bf16 %v13293_v42 }
0x17fd   :  { %v5858_v52 = vpop.permute.xlu1 %5857 }
0x17fe   :  { %9792 = vmatprep.subr.bf16.mxu1 %v5858_v52  ;;  %v5688_v48 = vsel %vm728_vm1, %v5648_v29, 0.0  ;;  %v5691_v13 = vsel %vm728_vm1, %v5649_v23, 0.0 }
0x17ff   :  { %5689 = vadd.xlane.f32.xlu1 %v5688_v48  ;;  %9793 = vmatpush3.bf16.msra.mxu1 %v5858_v52 }
0x1800   :  { %9809 = vmatpush3.bf16.xpose.msra.mxu0 %v5985_v2  ;;  %9794 = vmatprep.subr.bf16.mxu1 %v5860_v54 }
0x1801   :  { %v5965_v7 = vpop.permute.xlu1 %5964 }
0x1802   :  { %10015 = vmatprep.subr.msk.bf16.mxu0 %vm549_vm0, %v5965_v7  ;;  %v5988_v28 = vsel %vm549_vm0, %v5965_v7, 0 }
0x1803   :  { %9795 = vmatpush3.bf16.msra.mxu1 %v5860_v54 }
0x1805   :  { %v5951_v50 = vpop.permute.xlu1 %5950 }
0x1806   :  { %9812 = vmatprep.mubr.msk.bf16.mxu0 %vm549_vm0, %v5951_v50 }
0x1807   :  { %5695 = vadd.xlane.f32.xlu0 %v5694_v22 }
0x1808   :  { %9811 = vmatpush3.bf16.xpose.msra.mxu0 %v5988_v28 }
0x1809   :  { %v5953_v31 = vpop.permute.xlu1 %5952 }
0x180b   :  { %5692 = vadd.xlane.f32.xlu0 %v5691_v13 }
0x180d   :  { %v6066_v7 = vpop.permute.xlu1 %6065 }
0x180e   :  { %v6087_v62 = vsel %vm549_vm0, %v6066_v7, 0 }
0x180f   :  { %9813 = vmatmul.mubr.msk.bf16.vlgmr.msra.gmra.mrb[176].mxu0 %vm549_vm0, %v5953_v31 }
0x1810   :  { %5954 = vrot.lane.b32.xlu1 %v12807_v45, %s10881_s0 }
0x1814   :  { %6069 = vrot.lane.b32.xlu1 %v12918_v32, %s10881_s0 }
0x1818   :  { %6057 = vrot.lane.b32.xlu1 %v12882_v21, %s10881_s0 }
0x181c   :  { %6061 = vrot.lane.b32.xlu1 %v12914_v39, %s10881_s0 }
0x1820   :  { %6378 = vrot.lane.b32.xlu1 %v12778_v14, %s10881_s0 }
0x1821   :  { %6067 = vrot.lane.b32.xlu0 %v12900_v19, %s10881_s0 }
0x1824   :  { %6380 = vrot.lane.b32.xlu1 %v12840_v3, %s10881_s0 }
0x1825   :  { %5956 = vrot.lane.b32.xlu0 %v12834_v20, %s10881_s0 }
0x1829   :  { %6055 = vrot.lane.b32.xlu0 %v12864_v27, %s10881_s0 }
0x182d   :  { %6059 = vrot.lane.b32.xlu0 %v12898_v35, %s10881_s0 }
0x1831   :  { %6376 = vrot.lane.b32.xlu0 %v12783_v5, %s10881_s0 }
0x1853   :  { %v5684_v58 = vpop.xlane.xlu0 %5683 }
0x1857   :  { %v5687_v56 = vpop.xlane.xlu0 %5686 }
0x1858   :  { %v5705_v36 = vpack.c.bf16 %v5687_v56, %v5684_v58 }
0x185a   :  { %v5718_v6 = vunpack.c.l.bf16 %v5705_v36  ;;  %v5719_v9 = vunpack.c.h.bf16 %v5705_v36 }
0x185b   :  { %v5678_v55 = vpop.xlane.xlu0 %5677 }
0x185c   :  { %10541 = vrcp.f32 %v5718_v6 }
0x185d   :  { %10543 = vrcp.f32 %v5719_v9 }
0x185f   :  { %v5681_v25 = vpop.xlane.xlu0 %5680 }
0x1860   :  { %v5704_v30 = vpack.c.bf16 %v5681_v25, %v5678_v55 }
0x1862   :  { %v5716_v57 = vunpack.c.l.bf16 %v5704_v30  ;;  %v5717_v12 = vunpack.c.h.bf16 %v5704_v30 }
0x1863   :  { %v6064_v37 = vpop.permute.xlu0 %6063 }
0x1864   :  { %10545 = vrcp.f32 %v5716_v57  ;;  %10016 = vmatprep.subr.msk.bf16.mxu1 %vm549_vm0, %v6064_v37  ;;  %v6084_v2 = vsel %vm549_vm0, %v6064_v37, 0 }
0x1865   :  { %10547 = vrcp.f32 %v5717_v12 }
0x1866   :  { %v10542_v51 = vpop.eup %10541 }
0x1867   :  { %v10544_v63 = vpop.eup %10543 }
0x1868   :  { %v5745_v29 = vpack.c.bf16 %v10544_v63, %v10542_v51 }
0x186a   :  { %v5753_v54 = vmul.bf16 %v13265_v8, %v5745_v29 }
0x186e   :  { %v10546_v41 = vpop.eup %10545 }
0x186f   :  { %v10548_v44 = vpop.eup %10547 }
0x1870   :  { %v5744_v52 = vpack.c.bf16 %v10548_v44, %v10546_v41 }
0x1872   :  { %v5752_v48 = vmul.bf16 %v13271_v61, %v5744_v52 }
0x1874   :  { %9796 = vmatprep.mubr.msk.bf16.mxu1 %vm728_vm1, %v5752_v48 }
0x1875   :  { %9797 = vmatmul.mubr.msk.bf16.vlgmr.msra.gmra.mrb[184].mxu1 %vm728_vm1, %v5753_v54 }
0x1876   :  { %9821 = vmatpush3.bf16.xpose.msra.mxu1 %v6084_v2 }
0x1877   :  { %10017 = vmatprep.subr.msk.bf16.mxu1 %vm549_vm0, %v6066_v7 }
0x187e   :  { %9823 = vmatpush3.bf16.xpose.msra.mxu1 %v6087_v62 }
0x1888   :  { %v5699_v50 = vpop.xlane.xlu1 %5698 }
0x188c   :  { %v13336_v22 = vpop.f32.mrb[168].mxu0  ;;  %v5690_v23 = vpop.xlane.xlu1 %5689 }
0x188d   :  { %v13338_v61 = vpop.f32.mrb[169].mxu0 }
0x188e   :  { %v13340_v8 = vpop.f32.mrb[170].mxu0 }
0x188f   :  { %v13344_v13 = vpop.f32.mrb[171].mxu0 }
0x1890   :  { %v5955_v58 = vpop.permute.xlu1 %5954 }
0x1891   :  { %9816 = vmatprep.mubr.msk.bf16.mxu0 %vm549_vm0, %v5955_v58 }
0x1894   :  { %v5696_v56 = vpop.xlane.xlu0 %5695  ;;  %v6070_v41 = vpop.permute.xlu1 %6069 }
0x1895   :  { %v13349_v36 = vpop.f32.mrb[172].mxu0  ;;  %v5707_v55 = vpack.c.bf16 %v5699_v50, %v5696_v56 }
0x1896   :  { %v13351_v6 = vpop.f32.mrb[173].mxu0 }
0x1897   :  { %v5722_v9 = vunpack.c.l.bf16 %v5707_v55  ;;  %v5723_v25 = vunpack.c.h.bf16 %v5707_v55  ;;  %v13353_v30 = vpop.f32.mrb[174].mxu0 }
0x1898   :  { %v13357_v12 = vpop.f32.mrb[175].mxu0  ;;  %v5693_v37 = vpop.xlane.xlu0 %5692 }
0x1899   :  { %v5706_v63 = vpack.c.bf16 %v5693_v37, %v5690_v23  ;;  %10549 = vrcp.f32 %v5722_v9  ;;  %v6058_v54 = vpop.permute.xlu1 %6057  ;;  %v6093_v23 = vsel %vm549_vm0, %v6070_v41, 0 }
0x189a   :  { %10551 = vrcp.f32 %v5723_v25 }
0x189b   :  { %v5720_v44 = vunpack.c.l.bf16 %v5706_v63  ;;  %v5721_v29 = vunpack.c.h.bf16 %v5706_v63 }
0x189c   :  { %v6068_v52 = vpop.permute.xlu0 %6067 }
0x189d   :  { %10553 = vrcp.f32 %v5720_v44  ;;  %10018 = vmatprep.subr.msk.bf16.mxu1 %vm549_vm0, %v6068_v52  ;;  %v6090_v48 = vsel %vm549_vm0, %v6068_v52, 0  ;;  %v6062_v58 = vpop.permute.xlu1 %6061 }
0x189e   :  { %10555 = vrcp.f32 %v5721_v29  ;;  %9825 = vmatpush3.bf16.xpose.msra.mxu1 %v6090_v48 }
0x189f   :  { %10019 = vmatprep.subr.msk.bf16.mxu1 %vm549_vm0, %v6070_v41 }
0x18a0   :  { %v5957_v2 = vpop.permute.xlu0 %5956 }
0x18a1   :  { %9817 = vmatmul.mubr.msk.bf16.gmra.mrb[180].mxu0 %vm549_vm0, %v5957_v2  ;;  %v6379_v44 = vpop.permute.xlu1 %6378 }
0x18a3   :  { %v10550_v7 = vpop.eup %10549 }
0x18a4   :  { %v6056_v62 = vpop.permute.xlu0 %6055  ;;  %v10552_v50 = vpop.eup %10551 }
0x18a5   :  { %v5747_v25 = vpack.c.bf16 %v10552_v50, %v10550_v7  ;;  %v6381_v41 = vpop.permute.xlu1 %6380 }
0x18a6   :  { %9827 = vmatpush3.bf16.xpose.msra.mxu1 %v6093_v23 }
0x18a7   :  { %v10554_v56 = vpop.eup %10553  ;;  %v5755_v52 = vmul.bf16 %v13288_v26, %v5747_v25 }
0x18a8   :  { %v10556_v55 = vpop.eup %10555  ;;  %v6060_v9 = vpop.permute.xlu0 %6059 }
0x18a9   :  { %v5746_v37 = vpack.c.bf16 %v10556_v55, %v10554_v56 }
0x18ab   :  { %v5754_v63 = vmul.bf16 %v13293_v42, %v5746_v37 }
0x18ac   :  { %v6377_v29 = vpop.permute.xlu0 %6376 }
0x18ad   :  { %9800 = vmatprep.mubr.msk.bf16.mxu1 %vm728_vm1, %v5754_v63  ;;  %9836 = vmatprep.subr.bf16.mxu0 %v6377_v29 }
0x18ae   :  { %9801 = vmatmul.mubr.msk.bf16.gmra.mrb[188].mxu1 %vm728_vm1, %v5755_v52  ;;  %9837 = vmatpush3.bf16.msra.mxu0 %v6377_v29 }
0x18af   :  { %9828 = vmatprep.mubr.msk.bf16.mxu1 %vm549_vm0, %v6056_v62  ;;  %9838 = vmatprep.subr.bf16.mxu0 %v6379_v44 }
0x18b2   :  { %9839 = vmatpush3.bf16.msra.mxu0 %v6379_v44 }
0x18b3   :  { %9840 = vmatprep.subr.bf16.mxu0 %v6381_v41 }
0x18b6   :  { %9829 = vmatmul.mubr.msk.bf16.vlgmr.msra.gmra.mrb[192].mxu1 %vm549_vm0, %v6058_v54  ;;  %9841 = vmatpush3.bf16.msra.mxu0 %v6381_v41 }
0x18b7   :  { %9832 = vmatprep.mubr.msk.bf16.mxu1 %vm549_vm0, %v6060_v9 }
0x18be   :  { %9833 = vmatmul.mubr.msk.bf16.gmra.mrb[196].mxu1 %vm549_vm0, %v6062_v58 }
0x18e2   :  { %v9814_v26 = vpop.f32.mrb[176].mxu0 }
0x18e3   :  { %v6024_v42 = vpop.f32.mrb[177].mxu0  ;;  %v6166_v48 = vsel %vm728_vm1, %v9814_v26, -inf }
0x18e4   :  { %6167 = vmax.xlane.f32.xlu0 %v6166_v48  ;;  %v9815_v2 = vpop.f32.mrb[178].mxu0  ;;  %v6160_v50 = vsel %vm728_vm1, %v6024_v42, -inf }
0x18e5   :  { %v6027_v7 = vpop.f32.mrb[179].mxu0  ;;  %v6169_v54 = vsel %vm728_vm1, %v9815_v2, -inf }
0x18e6   :  { %v6163_v62 = vsel %vm728_vm1, %v6027_v7, -inf }
0x18e7   :  { %6164 = vmax.xlane.f32.xlu1 %v6163_v62 }
0x18e8   :  { %6161 = vmax.xlane.f32.xlu0 %v6160_v50 }
0x18ec   :  { %6170 = vmax.xlane.f32.xlu0 %v6169_v54 }
0x1948   :  { %v13378_v23 = vpop.f32.mrb[184].mxu1 }
0x1949   :  { %14616 = vst [vmem:[#allocation50_spill] sm:$0xff] %v13378_v23  ;;  %v13380_v56 = vpop.f32.mrb[185].mxu1 }
0x194a   :  { %14617 = vst [vmem:[#allocation51_spill] sm:$0xff] %v13380_v56  ;;  %v13382_v58 = vpop.f32.mrb[186].mxu1 }
0x194b   :  { %v13386_v9 = vpop.f32.mrb[187].mxu1 }
0x194c   :  { %14618 = vst [vmem:[#allocation52_spill] sm:$0xff] %v13386_v9 }
0x1971   :  { %v6168_v37 = vpop.xlane.xlu0 %6167 }
0x1972   :  { %v6210_v25 = vsub.f32 %v9814_v26, %v6168_v37 }
0x1974   :  { %v6165_v63 = vpop.xlane.xlu1 %6164  ;;  %v9818_v44 = vpop.f32.mrb[180].mxu0 }
0x1975   :  { %v6209_v29 = vsub.f32 %v6027_v7, %v6165_v63  ;;  %v6162_v52 = vpop.xlane.xlu0 %6161  ;;  %v6040_v41 = vpop.f32.mrb[181].mxu0  ;;  %v6178_v48 = vsel %vm728_vm1, %v9818_v44, -inf }
0x1976   :  { %v6208_v62 = vsub.f32 %v6024_v42, %v6162_v52  ;;  %6179 = vmax.xlane.f32.xlu0 %v6178_v48  ;;  %v9819_v50 = vpop.f32.mrb[182].mxu0  ;;  %v6172_v28 = vsel %vm728_vm1, %v6040_v41, -inf }
0x1977   :  { %v6043_v54 = vpop.f32.mrb[183].mxu0  ;;  %v6181_v51 = vsel %vm728_vm1, %v9819_v50, -inf }
0x1978   :  { %v6224_v55 = vpack.c.bf16 %v6209_v29, %v6208_v62  ;;  %6182 = vmax.xlane.f32.xlu1 %v6181_v51  ;;  %v6175_v7 = vsel %vm728_vm1, %v6043_v54, -inf }
0x1979   :  { %v6171_v57 = vpop.xlane.xlu0 %6170 }
0x197a   :  { %v6211_v31 = vsub.f32 %v9815_v2, %v6171_v57  ;;  %6173 = vmax.xlane.f32.xlu0 %v6172_v28  ;;  %v6233_v0 = vmul.bf16 1069105081, %v6224_v55 }
0x197c   :  { %v6225_v63 = vpack.c.bf16 %v6211_v31, %v6210_v25  ;;  %6176 = vmax.xlane.f32.xlu1 %v6175_v7  ;;  %10557 = vpow.bf16 %v6233_v0 }
0x197e   :  { %v6236_v43 = vmul.bf16 1069105081, %v6225_v63 }
0x1980   :  { %10559 = vpow.bf16 %v6236_v43 }
0x1981   :  { %v13394_v42 = vpop.f32.mrb[188].mxu1 }
0x1982   :  { %14619 = vst [vmem:[#allocation53_spill] sm:$0xff] %v13394_v42  ;;  %v13396_v52 = vpop.f32.mrb[189].mxu1 }
0x1983   :  { %14620 = vst [vmem:[#allocation54_spill] sm:$0xff] %v13396_v52  ;;  %v13398_v29 = vpop.f32.mrb[190].mxu1 }
0x1984   :  { %14621 = vst [vmem:[#allocation55_spill] sm:$0xff] %v13398_v29  ;;  %v13402_v26 = vpop.f32.mrb[191].mxu1 }
0x1985   :  { %14622 = vst [vmem:[#allocation56_spill] sm:$0xff] %v13402_v26 }
0x1987   :  { %v13408_v31 = vpop.eup %10557 }
0x1988   :  { %v6257_v7 = vunpack.c.h.bf16 %v13408_v31  ;;  %v6256_v63 = vunpack.c.l.bf16 %v13408_v31 }
0x1989   :  { %v13406_v57 = vpop.f32.mrb[192].mxu1 }
0x198a   :  { %v13410_v0 = vpop.f32.mrb[193].mxu1  ;;  %v6275_v52 = vsel %vm728_vm1, %v6257_v7, 0.0  ;;  %v6272_v26 = vsel %vm728_vm1, %v6256_v63, 0.0 }
0x198b   :  { %v13412_v43 = vpop.eup %10559  ;;  %v13414_v2 = vpop.f32.mrb[194].mxu1 }
0x198c   :  { %v13416_v55 = vpop.f32.mrb[195].mxu1  ;;  %v6258_v25 = vunpack.c.l.bf16 %v13412_v43  ;;  %v6259_v37 = vunpack.c.h.bf16 %v13412_v43 }
0x198e   :  { %v6278_v48 = vsel %vm728_vm1, %v6258_v25, 0.0  ;;  %v6281_v62 = vsel %vm728_vm1, %v6259_v37, 0.0 }
0x198f   :  { %6279 = vadd.xlane.f32.xlu0 %v6278_v48  ;;  %6282 = vadd.xlane.f32.xlu1 %v6281_v62 }
0x1991   :  { %v13424_v28 = vpop.f32.mrb[196].mxu1 }
0x1992   :  { %v13426_v51 = vpop.f32.mrb[197].mxu1 }
0x1993   :  { %v13430_v42 = vpop.f32.mrb[198].mxu1  ;;  %6276 = vadd.xlane.f32.xlu1 %v6275_v52  ;;  %6273 = vadd.xlane.f32.xlu0 %v6272_v26 }
0x1994   :  { %v13432_v25 = vpop.f32.mrb[199].mxu1 }
0x1a03   :  { %v6180_v37 = vpop.xlane.xlu0 %6179 }
0x1a04   :  { %v6214_v47 = vsub.f32 %v9818_v44, %v6180_v37 }
0x1a05   :  { %v6183_v29 = vpop.xlane.xlu1 %6182 }
0x1a06   :  { %v6215_v15 = vsub.f32 %v9819_v50, %v6183_v29  ;;  %v6193_v29 = vsel %vm728_vm1, %v13414_v2, -inf }
0x1a07   :  { %v6174_v48 = vpop.xlane.xlu0 %6173 }
0x1a08   :  { %v6227_v62 = vpack.c.bf16 %v6215_v15, %v6214_v47  ;;  %v6212_v34 = vsub.f32 %v6040_v41, %v6174_v48 }
0x1a09   :  { %v6177_v1 = vpop.xlane.xlu1 %6176 }
0x1a0a   :  { %v6242_v16 = vmul.bf16 1069105081, %v6227_v62  ;;  %v6213_v56 = vsub.f32 %v6043_v54, %v6177_v1  ;;  %v6187_v62 = vsel %vm728_vm1, %v13416_v55, -inf }
0x1a0c   :  { %10561 = vpow.bf16 %v6242_v16  ;;  %v6226_v7 = vpack.c.bf16 %v6213_v56, %v6212_v34 }
0x1a0e   :  { %v6239_v9 = vmul.bf16 1069105081, %v6226_v7  ;;  %v6184_v7 = vsel %vm728_vm1, %v13410_v0, -inf }
0x1a10   :  { %10563 = vpow.bf16 %v6239_v9 }
0x1a17   :  { %v13434_v63 = vpop.eup %10561 }
0x1a18   :  { %v6262_v52 = vunpack.c.l.bf16 %v13434_v63  ;;  %v6263_v23 = vunpack.c.h.bf16 %v13434_v63 }
0x1a1a   :  { %v6290_v26 = vsel %vm728_vm1, %v6262_v52, 0.0  ;;  %v6293_v16 = vsel %vm728_vm1, %v6263_v23, 0.0  ;;  %v6190_v23 = vsel %vm728_vm1, %v13406_v57, -inf  ;;  %v6202_v52 = vsel %vm728_vm1, %v13424_v28, -inf }
0x1a1b   :  { %v13439_v44 = vpop.eup %10563  ;;  %6291 = vadd.xlane.f32.xlu0 %v6290_v26 }
0x1a1c   :  { %v6280_v15 = vpop.xlane.xlu0 %6279  ;;  %v6283_v47 = vpop.xlane.xlu1 %6282  ;;  %v6260_v41 = vunpack.c.l.bf16 %v13439_v44  ;;  %v6261_v34 = vunpack.c.h.bf16 %v13439_v44 }
0x1a1e   :  { %v6284_v1 = vsel %vm728_vm1, %v6260_v41, 0.0  ;;  %v6287_v54 = vsel %vm728_vm1, %v6261_v34, 0.0 }
0x1a1f   :  { %6294 = vadd.xlane.f32.xlu0 %v6293_v16  ;;  %6285 = vadd.xlane.f32.xlu1 %v6284_v1  ;;  %v6196_v1 = vsel %vm728_vm1, %v13426_v51, -inf }
0x1a20   :  { %v6274_v56 = vpop.xlane.xlu0 %6273  ;;  %v6277_v9 = vpop.xlane.xlu1 %6276 }
0x1a21   :  { %v6320_v50 = vpack.c.bf16 %v6277_v9, %v6274_v56  ;;  %v6205_v56 = vsel %vm728_vm1, %v13430_v42, -inf }
0x1a23   :  { %v6328_v37 = vunpack.c.l.bf16 %v6320_v50  ;;  %v6329_v48 = vunpack.c.h.bf16 %v6320_v50  ;;  %6288 = vadd.xlane.f32.xlu0 %v6287_v54  ;;  %6194 = vmax.xlane.f32.xlu1 %v6193_v29 }
0x1a25   :  { %10565 = vrcp.f32 %v6328_v37 }
0x1a26   :  { %10567 = vrcp.f32 %v6329_v48 }
0x1a27   :  { %6191 = vmax.xlane.f32.xlu0 %v6190_v23  ;;  %6188 = vmax.xlane.f32.xlu1 %v6187_v62 }
0x1a2b   :  { %6185 = vmax.xlane.f32.xlu0 %v6184_v7 }
0x1a2f   :  { %v10566_v26 = vpop.eup %10565  ;;  %6203 = vmax.xlane.f32.xlu0 %v6202_v52 }
0x1a30   :  { %v10568_v41 = vpop.eup %10567 }
0x1a31   :  { %v6360_v16 = vpack.c.bf16 %v10568_v41, %v10566_v26 }
0x1a33   :  { %6197 = vmax.xlane.f32.xlu0 %v6196_v1  ;;  %v6368_v34 = vmul.bf16 %v13408_v31, %v6360_v16  ;;  %v6199_v31 = vsel %vm728_vm1, %v13432_v25, -inf }
0x1a35   :  { %9844 = vmatprep.mubr.msk.bf16.mxu0 %vm728_vm1, %v6368_v34 }
0x1a38   :  { %6382 = vrot.lane.b32.xlu1 %v12836_v38, %s10881_s0 }
0x1a49   :  { %6572 = vrot.lane.b32.xlu0 %v12781_v46, %s10886_s21 }
0x1a4d   :  { %6471 = vrot.lane.b32.xlu0 %v12916_v59, %s10881_s0 }
0x1a51   :  { %6675 = vrot.lane.b32.xlu0 %v12866_v10, %s10886_s21 }
0x1a5c   :  { %6206 = vmax.xlane.f32.xlu1 %v6205_v56 }
0x1a60   :  { %6200 = vmax.xlane.f32.xlu1 %v6199_v31 }
0x1a71   :  { %6570 = vrot.lane.b32.xlu1 %v12744_v4, %s10886_s21  ;;  %v6321_v4 = vpack.c.bf16 %v6283_v47, %v6280_v15 }
0x1a73   :  { %v6330_v46 = vunpack.c.l.bf16 %v6321_v4 }
0x1a75   :  { %6465 = vrot.lane.b32.xlu1 %v12888_v53, %s10881_s0  ;;  %10569 = vrcp.f32 %v6330_v46 }
0x1a79   :  { %6467 = vrot.lane.b32.xlu1 %v12884_v18, %s10881_s0 }
0x1a7d   :  { %6574 = vrot.lane.b32.xlu1 %v12810_v60, %s10886_s21  ;;  %v6331_v60 = vunpack.c.h.bf16 %v6321_v4 }
0x1a7f   :  { %10571 = vrcp.f32 %v6331_v60  ;;  %v10570_v48 = vpop.eup %10569 }
0x1a81   :  { %6469 = vrot.lane.b32.xlu1 %v12920_v40, %s10881_s0 }
0x1a85   :  { %6576 = vrot.lane.b32.xlu1 %v12838_v24, %s10886_s21 }
0x1a89   :  { %6562 = vrot.lane.b32.xlu1 %v12741_v17, %s10886_s21 }
0x1a8d   :  { %6564 = vrot.lane.b32.xlu1 %v12776_v49, %s10886_s21 }
0x1a91   :  { %6677 = vrot.lane.b32.xlu1 %v12886_v11, %s10886_s21 }
0x1a95   :  { %6568 = vrot.lane.b32.xlu1 %v12834_v20, %s10886_s21  ;;  %v10572_v20 = vpop.eup %10571 }
0x1a96   :  { %v6361_v52 = vpack.c.bf16 %v10572_v20, %v10570_v48 }
0x1a98   :  { %v6369_v31 = vmul.bf16 %v13412_v43, %v6361_v52 }
0x1aa8   :  { %v6292_v10 = vpop.xlane.xlu0 %6291 }
0x1aac   :  { %v6295_v9 = vpop.xlane.xlu0 %6294  ;;  %v6286_v24 = vpop.xlane.xlu1 %6285 }
0x1aad   :  { %v6323_v50 = vpack.c.bf16 %v6295_v9, %v6292_v10 }
0x1aaf   :  { %v6334_v54 = vunpack.c.l.bf16 %v6323_v50  ;;  %v6335_v17 = vunpack.c.h.bf16 %v6323_v50 }
0x1ab0   :  { %v6289_v29 = vpop.xlane.xlu0 %6288  ;;  %v6195_v37 = vpop.xlane.xlu1 %6194 }
0x1ab1   :  { %v6322_v49 = vpack.c.bf16 %v6289_v29, %v6286_v24  ;;  %10573 = vrcp.f32 %v6334_v54  ;;  %v6219_v62 = vsub.f32 %v13414_v2, %v6195_v37 }
0x1ab2   :  { %10575 = vrcp.f32 %v6335_v17 }
0x1ab3   :  { %v6332_v11 = vunpack.c.l.bf16 %v6322_v49  ;;  %v6333_v23 = vunpack.c.h.bf16 %v6322_v49 }
0x1ab4   :  { %v6192_v15 = vpop.xlane.xlu0 %6191  ;;  %v6189_v47 = vpop.xlane.xlu1 %6188 }
0x1ab5   :  { %10577 = vrcp.f32 %v6332_v11  ;;  %v6218_v7 = vsub.f32 %v13406_v57, %v6192_v15  ;;  %v6217_v34 = vsub.f32 %v13416_v55, %v6189_v47 }
0x1ab6   :  { %10579 = vrcp.f32 %v6333_v23 }
0x1ab7   :  { %v6229_v26 = vpack.c.bf16 %v6219_v62, %v6218_v7 }
0x1ab8   :  { %v6186_v41 = vpop.xlane.xlu0 %6185  ;;  %v6383_v16 = vpop.permute.xlu1 %6382 }
0x1ab9   :  { %v6248_v1 = vmul.bf16 1069105081, %v6229_v26  ;;  %v6216_v56 = vsub.f32 %v13410_v0, %v6186_v41  ;;  %9842 = vmatprep.subr.bf16.mxu0 %v6383_v16 }
0x1aba   :  { %9843 = vmatpush3.bf16.msra.mxu0 %v6383_v16 }
0x1abb   :  { %10581 = vpow.bf16 %v6248_v1  ;;  %v6228_v4 = vpack.c.bf16 %v6217_v34, %v6216_v56  ;;  %v10574_v46 = vpop.eup %10573 }
0x1abc   :  { %v10576_v2 = vpop.eup %10575  ;;  %v6204_v11 = vpop.xlane.xlu0 %6203 }
0x1abd   :  { %v6245_v60 = vmul.bf16 1069105081, %v6228_v4  ;;  %9845 = vmatmul.mubr.msk.bf16.vlgmr.msra.gmra.mrb[184].mxu0 %vm728_vm1, %v6369_v31  ;;  %v6363_v9 = vpack.c.bf16 %v10576_v2, %v10574_v46  ;;  %v6222_v20 = vsub.f32 %v13424_v28, %v6204_v11 }
0x1abf   :  { %v10578_v57 = vpop.eup %10577  ;;  %10583 = vpow.bf16 %v6245_v60  ;;  %v6371_v0 = vmul.bf16 %v13434_v63, %v6363_v9 }
0x1ac0   :  { %v10580_v10 = vpop.eup %10579  ;;  %v6198_v47 = vpop.xlane.xlu0 %6197 }
0x1ac1   :  { %v6362_v24 = vpack.c.bf16 %v10580_v10, %v10578_v57  ;;  %v6220_v52 = vsub.f32 %v13426_v51, %v6198_v47 }
0x1ac3   :  { %v6370_v55 = vmul.bf16 %v13439_v44, %v6362_v24 }
0x1ac5   :  { %9848 = vmatprep.mubr.msk.bf16.mxu0 %vm728_vm1, %v6370_v55 }
0x1ac6   :  { %v13501_v50 = vpop.eup %10581  ;;  %9849 = vmatmul.mubr.msk.bf16.gmra.mrb[188].mxu0 %vm728_vm1, %v6371_v0 }
0x1ac7   :  { %v6266_v43 = vunpack.c.l.bf16 %v13501_v50  ;;  %v6267_v17 = vunpack.c.h.bf16 %v13501_v50 }
0x1ac9   :  { %v6302_v54 = vsel %vm728_vm1, %v6266_v43, 0.0  ;;  %v6305_v37 = vsel %vm728_vm1, %v6267_v17, 0.0 }
0x1aca   :  { %v13507_v29 = vpop.eup %10583  ;;  %6303 = vadd.xlane.f32.xlu0 %v6302_v54 }
0x1acb   :  { %v6264_v44 = vunpack.c.l.bf16 %v13507_v29  ;;  %v6265_v49 = vunpack.c.h.bf16 %v13507_v29 }
0x1acd   :  { %v6296_v63 = vsel %vm728_vm1, %v6264_v44, 0.0  ;;  %v6299_v48 = vsel %vm728_vm1, %v6265_v49, 0.0 }
0x1ace   :  { %6306 = vadd.xlane.f32.xlu0 %v6305_v37 }
0x1ad2   :  { %6297 = vadd.xlane.f32.xlu0 %v6296_v63 }
0x1ad6   :  { %6300 = vadd.xlane.f32.xlu0 %v6299_v48 }
0x1ae9   :  { %v6207_v23 = vpop.xlane.xlu1 %6206 }
0x1aea   :  { %v6223_v15 = vsub.f32 %v13430_v42, %v6207_v23  ;;  %v6573_v42 = vpop.permute.xlu0 %6572 }
0x1aec   :  { %v6231_v62 = vpack.c.bf16 %v6223_v15, %v6222_v20  ;;  %6566 = vrot.lane.b32.xlu0 %v12807_v45, %s10886_s21 }
0x1aed   :  { %v6201_v7 = vpop.xlane.xlu1 %6200 }
0x1aee   :  { %v6254_v26 = vmul.bf16 1069105081, %v6231_v62  ;;  %v6221_v41 = vsub.f32 %v13432_v25, %v6201_v7  ;;  %v6594_v25 = vsel %vm549_vm0, %v6573_v42, 0  ;;  %v6472_v57 = vpop.permute.xlu0 %6471 }
0x1af0   :  { %10585 = vpow.bf16 %v6254_v26  ;;  %v6230_v16 = vpack.c.bf16 %v6221_v41, %v6220_v52 }
0x1af1   :  { %v6571_v1 = vpop.permute.xlu1 %6570 }
0x1af2   :  { %v6251_v34 = vmul.bf16 1069105081, %v6230_v16  ;;  %10020 = vmatprep.subr.msk.bf16.mxu0 %vm549_vm0, %v6571_v1  ;;  %v6591_v28 = vsel %vm549_vm0, %v6571_v1, 0  ;;  %v6676_v43 = vpop.permute.xlu0 %6675 }
0x1af3   :  { %9869 = vmatpush3.bf16.xpose.msra.mxu0 %v6591_v28 }
0x1af4   :  { %10587 = vpow.bf16 %v6251_v34  ;;  %10021 = vmatprep.subr.msk.bf16.mxu0 %vm549_vm0, %v6573_v42  ;;  %v6696_v42 = vsel %vm549_vm0, %v6676_v43, 0 }
0x1af5   :  { %v6466_v45 = vpop.permute.xlu1 %6465 }
0x1af6   :  { %9852 = vmatprep.subr.bf16.mxu1 %v6466_v45 }
0x1af7   :  { %9853 = vmatpush3.bf16.msra.mxu1 %v6466_v45 }
0x1af9   :  { %v6468_v51 = vpop.permute.xlu1 %6467 }
0x1afa   :  { %9854 = vmatprep.subr.bf16.mxu1 %v6468_v51 }
0x1afb   :  { %v13524_v56 = vpop.eup %10585  ;;  %9855 = vmatpush3.bf16.msra.mxu1 %v6468_v51  ;;  %9871 = vmatpush3.bf16.xpose.msra.mxu0 %v6594_v25 }
0x1afc   :  { %v6271_v31 = vunpack.c.h.bf16 %v13524_v56  ;;  %v6270_v0 = vunpack.c.l.bf16 %v13524_v56 }
0x1afd   :  { %v6575_v4 = vpop.permute.xlu1 %6574 }
0x1afe   :  { %10022 = vmatprep.subr.msk.bf16.mxu0 %vm549_vm0, %v6575_v4  ;;  %v6317_v46 = vsel %vm728_vm1, %v6271_v31, 0.0  ;;  %v6597_v24 = vsel %vm549_vm0, %v6575_v4, 0  ;;  %v6314_v17 = vsel %vm728_vm1, %v6270_v0, 0.0 }
0x1aff   :  { %v13529_v2 = vpop.eup %10587  ;;  %6318 = vadd.xlane.f32.xlu1 %v6317_v46 }
0x1b00   :  { %v6268_v60 = vunpack.c.l.bf16 %v13529_v2  ;;  %v6269_v37 = vunpack.c.h.bf16 %v13529_v2 }
0x1b01   :  { %v6470_v10 = vpop.permute.xlu1 %6469 }
0x1b02   :  { %9856 = vmatprep.subr.bf16.mxu1 %v6470_v10  ;;  %v6308_v9 = vsel %vm728_vm1, %v6268_v60, 0.0  ;;  %v6311_v63 = vsel %vm728_vm1, %v6269_v37, 0.0 }
0x1b03   :  { %6309 = vadd.xlane.f32.xlu1 %v6308_v9  ;;  %9857 = vmatpush3.bf16.msra.mxu1 %v6470_v10 }
0x1b04   :  { %9873 = vmatpush3.bf16.xpose.msra.mxu0 %v6597_v24  ;;  %9858 = vmatprep.subr.bf16.mxu1 %v6472_v57 }
0x1b05   :  { %v6577_v55 = vpop.permute.xlu1 %6576 }
0x1b06   :  { %10023 = vmatprep.subr.msk.bf16.mxu0 %vm549_vm0, %v6577_v55  ;;  %v6600_v44 = vsel %vm549_vm0, %v6577_v55, 0 }
0x1b07   :  { %9859 = vmatpush3.bf16.msra.mxu1 %v6472_v57 }
0x1b08   :  { %10024 = vmatprep.subr.msk.bf16.mxu1 %vm549_vm0, %v6676_v43 }
0x1b09   :  { %v6563_v54 = vpop.permute.xlu1 %6562 }
0x1b0a   :  { %9876 = vmatprep.mubr.msk.bf16.mxu0 %vm549_vm0, %v6563_v54 }
0x1b0b   :  { %6315 = vadd.xlane.f32.xlu0 %v6314_v17 }
0x1b0c   :  { %9875 = vmatpush3.bf16.xpose.msra.mxu0 %v6600_v44 }
0x1b0d   :  { %v6565_v49 = vpop.permute.xlu1 %6564 }
0x1b0f   :  { %6312 = vadd.xlane.f32.xlu0 %v6311_v63 }
0x1b11   :  { %v6678_v15 = vpop.permute.xlu1 %6677 }
0x1b12   :  { %v6699_v45 = vsel %vm549_vm0, %v6678_v15, 0 }
0x1b13   :  { %9877 = vmatmul.mubr.msk.bf16.vlgmr.msra.gmra.mrb[192].mxu0 %vm549_vm0, %v6565_v49 }
0x1b14   :  { %6681 = vrot.lane.b32.xlu1 %v12918_v32, %s10886_s21 }
0x1b15   :  { %v6569_v52 = vpop.permute.xlu1 %6568 }
0x1b18   :  { %6669 = vrot.lane.b32.xlu1 %v12882_v21, %s10886_s21 }
0x1b1c   :  { %6673 = vrot.lane.b32.xlu1 %v12914_v39, %s10886_s21 }
0x1b25   :  { %6679 = vrot.lane.b32.xlu0 %v12900_v19, %s10886_s21 }
0x1b29   :  { %6667 = vrot.lane.b32.xlu0 %v12864_v27, %s10886_s21 }
0x1b2d   :  { %6671 = vrot.lane.b32.xlu0 %v12898_v35, %s10886_s21 }
0x1b57   :  { %v6304_v48 = vpop.xlane.xlu0 %6303 }
0x1b5b   :  { %v6307_v11 = vpop.xlane.xlu0 %6306 }
0x1b5c   :  { %v6325_v23 = vpack.c.bf16 %v6307_v11, %v6304_v48 }
0x1b5e   :  { %v6338_v32 = vunpack.c.l.bf16 %v6325_v23  ;;  %v6339_v47 = vunpack.c.h.bf16 %v6325_v23 }
0x1b5f   :  { %v6298_v20 = vpop.xlane.xlu0 %6297 }
0x1b60   :  { %10589 = vrcp.f32 %v6338_v32 }
0x1b61   :  { %10591 = vrcp.f32 %v6339_v47 }
0x1b63   :  { %v6301_v21 = vpop.xlane.xlu0 %6300 }
0x1b64   :  { %v6324_v62 = vpack.c.bf16 %v6301_v21, %v6298_v20 }
0x1b66   :  { %v6336_v39 = vunpack.c.l.bf16 %v6324_v62  ;;  %v6337_v7 = vunpack.c.h.bf16 %v6324_v62 }
0x1b67   :  { %v6567_v19 = vpop.permute.xlu0 %6566 }
0x1b68   :  { %10593 = vrcp.f32 %v6336_v39  ;;  %9880 = vmatprep.mubr.msk.bf16.mxu0 %vm549_vm0, %v6567_v19 }
0x1b69   :  { %10595 = vrcp.f32 %v6337_v7  ;;  %9881 = vmatmul.mubr.msk.bf16.gmra.mrb[196].mxu0 %vm549_vm0, %v6569_v52 }
0x1b6a   :  { %v10590_v27 = vpop.eup %10589 }
0x1b6b   :  { %v10592_v35 = vpop.eup %10591 }
0x1b6c   :  { %v6365_v16 = vpack.c.bf16 %v10592_v35, %v10590_v27 }
0x1b6e   :  { %v6373_v28 = vmul.bf16 %v13501_v50, %v6365_v16 }
0x1b72   :  { %v10594_v26 = vpop.eup %10593 }
0x1b73   :  { %v10596_v41 = vpop.eup %10595 }
0x1b74   :  { %v6364_v1 = vpack.c.bf16 %v10596_v41, %v10594_v26 }
0x1b76   :  { %v6372_v34 = vmul.bf16 %v13507_v29, %v6364_v1 }
0x1b78   :  { %9860 = vmatprep.mubr.msk.bf16.mxu1 %vm728_vm1, %v6372_v34 }
0x1b79   :  { %9861 = vmatmul.mubr.msk.bf16.vlgmr.msra.gmra.mrb[200].mxu1 %vm728_vm1, %v6373_v28 }
0x1b7a   :  { %9885 = vmatpush3.bf16.xpose.msra.mxu1 %v6696_v42 }
0x1b7b   :  { %10025 = vmatprep.subr.msk.bf16.mxu1 %vm549_vm0, %v6678_v15 }
0x1b82   :  { %9887 = vmatpush3.bf16.xpose.msra.mxu1 %v6699_v45 }
0x1b8c   :  { %v6319_v46 = vpop.xlane.xlu1 %6318 }
0x1b90   :  { %v13564_v51 = vpop.f32.mrb[184].mxu0  ;;  %v6310_v24 = vpop.xlane.xlu1 %6309 }
0x1b91   :  { %v13566_v25 = vpop.f32.mrb[185].mxu0 }
0x1b92   :  { %v13568_v31 = vpop.f32.mrb[186].mxu0 }
0x1b93   :  { %v13572_v29 = vpop.f32.mrb[187].mxu0 }
0x1b94   :  { %v6554_v4 = vpack.c.bf16 %v13572_v29, %v13566_v25  ;;  %v6682_v20 = vpop.permute.xlu1 %6681 }
0x1b95   :  { %v6705_v47 = vsel %vm549_vm0, %v6682_v20, 0 }
0x1b98   :  { %v6316_v60 = vpop.xlane.xlu0 %6315  ;;  %v6670_v35 = vpop.permute.xlu1 %6669 }
0x1b99   :  { %v13576_v57 = vpop.f32.mrb[188].mxu0  ;;  %v6327_v10 = vpack.c.bf16 %v6319_v46, %v6316_v60 }
0x1b9a   :  { %v13578_v9 = vpop.f32.mrb[189].mxu0 }
0x1b9b   :  { %v6342_v55 = vunpack.c.l.bf16 %v6327_v10  ;;  %v6343_v0 = vunpack.c.h.bf16 %v6327_v10  ;;  %v13580_v43 = vpop.f32.mrb[190].mxu0 }
0x1b9c   :  { %v13584_v17 = vpop.f32.mrb[191].mxu0  ;;  %v6313_v37 = vpop.xlane.xlu0 %6312 }
0x1b9d   :  { %v6326_v63 = vpack.c.bf16 %v6313_v37, %v6310_v24  ;;  %10597 = vrcp.f32 %v6342_v55  ;;  %v6674_v41 = vpop.permute.xlu1 %6673 }
0x1b9e   :  { %10599 = vrcp.f32 %v6343_v0 }
0x1b9f   :  { %v6340_v49 = vunpack.c.l.bf16 %v6326_v63  ;;  %v6341_v48 = vunpack.c.h.bf16 %v6326_v63 }
0x1ba0   :  { %v6680_v11 = vpop.permute.xlu0 %6679 }
0x1ba1   :  { %10601 = vrcp.f32 %v6340_v49  ;;  %10026 = vmatprep.subr.msk.bf16.mxu1 %vm549_vm0, %v6680_v11  ;;  %v6702_v23 = vsel %vm549_vm0, %v6680_v11, 0 }
0x1ba2   :  { %10603 = vrcp.f32 %v6341_v48  ;;  %9889 = vmatpush3.bf16.xpose.msra.mxu1 %v6702_v23 }
0x1ba3   :  { %10027 = vmatprep.subr.msk.bf16.mxu1 %vm549_vm0, %v6682_v20 }
0x1ba4   :  { %v6668_v27 = vpop.permute.xlu0 %6667 }
0x1ba7   :  { %v10598_v32 = vpop.eup %10597 }
0x1ba8   :  { %v10600_v15 = vpop.eup %10599  ;;  %v6672_v26 = vpop.permute.xlu0 %6671 }
0x1ba9   :  { %v6367_v39 = vpack.c.bf16 %v10600_v15, %v10598_v32 }
0x1baa   :  { %9891 = vmatpush3.bf16.xpose.msra.mxu1 %v6705_v47 }
0x1bab   :  { %v10602_v21 = vpop.eup %10601  ;;  %v6375_v52 = vmul.bf16 %v13524_v56, %v6367_v39 }
0x1bac   :  { %v10604_v62 = vpop.eup %10603 }
0x1bad   :  { %v6366_v7 = vpack.c.bf16 %v10604_v62, %v10602_v21 }
0x1baf   :  { %v6374_v19 = vmul.bf16 %v13529_v2, %v6366_v7 }
0x1bb1   :  { %9864 = vmatprep.mubr.msk.bf16.mxu1 %vm728_vm1, %v6374_v19 }
0x1bb2   :  { %9865 = vmatmul.mubr.msk.bf16.gmra.mrb[204].mxu1 %vm728_vm1, %v6375_v52 }
0x1bb3   :  { %9892 = vmatprep.mubr.msk.bf16.mxu1 %vm549_vm0, %v6668_v27 }
0x1bba   :  { %9893 = vmatmul.mubr.msk.bf16.vlgmr.msra.gmra.mrb[208].mxu1 %vm549_vm0, %v6670_v35 }
0x1bbb   :  { %9896 = vmatprep.mubr.msk.bf16.mxu1 %vm549_vm0, %v6672_v26 }
0x1bc2   :  { %9897 = vmatmul.mubr.msk.bf16.gmra.mrb[212].mxu1 %vm549_vm0, %v6674_v41 }
0x1be6   :  { %v9878_v16 = vpop.f32.mrb[192].mxu0 }
0x1be7   :  { %v6636_v2 = vpop.f32.mrb[193].mxu0  ;;  %v6778_v56 = vsel %vm728_vm1, %v9878_v16, -inf }
0x1be8   :  { %6779 = vmax.xlane.f32.xlu0 %v6778_v56  ;;  %v9879_v1 = vpop.f32.mrb[194].mxu0  ;;  %v6772_v42 = vsel %vm728_vm1, %v6636_v2, -inf }
0x1be9   :  { %v6639_v34 = vpop.f32.mrb[195].mxu0  ;;  %v6781_v45 = vsel %vm728_vm1, %v9879_v1, -inf }
0x1bea   :  { %v6775_v28 = vsel %vm728_vm1, %v6639_v34, -inf }
0x1beb   :  { %6776 = vmax.xlane.f32.xlu1 %v6775_v28 }
0x1bec   :  { %6773 = vmax.xlane.f32.xlu0 %v6772_v42 }
0x1bf0   :  { %6782 = vmax.xlane.f32.xlu0 %v6781_v45 }
0x1c3c   :  { %v13604_v46 = vpop.f32.mrb[196].mxu0 }
0x1c3d   :  { %v13606_v60 = vpop.f32.mrb[197].mxu0  ;;  %v6790_v10 = vsel %vm728_vm1, %v13604_v46, -inf }
0x1c3e   :  { %6791 = vmax.xlane.f32.xlu0 %v6790_v10  ;;  %v9883_v24 = vpop.f32.mrb[198].mxu0  ;;  %v6784_v37 = vsel %vm728_vm1, %v13606_v60, -inf }
0x1c3f   :  { %v13610_v55 = vpop.f32.mrb[199].mxu0  ;;  %v6793_v0 = vsel %vm728_vm1, %v9883_v24, -inf }
0x1c40   :  { %6794 = vmax.xlane.f32.xlu1 %v6793_v0  ;;  %v6787_v63 = vsel %vm728_vm1, %v13610_v55, -inf }
0x1c42   :  { %6785 = vmax.xlane.f32.xlu0 %v6784_v37 }
0x1c44   :  { %6788 = vmax.xlane.f32.xlu1 %v6787_v63 }
0x1c4c   :  { %v13617_v49 = vpop.f32.mrb[200].mxu1 }
0x1c4d   :  { %v13619_v48 = vpop.f32.mrb[201].mxu1 }
0x1c4e   :  { %v13621_v11 = vpop.f32.mrb[202].mxu1 }
0x1c4f   :  { %v13625_v20 = vpop.f32.mrb[203].mxu1 }
0x1c75   :  { %v6780_v15 = vpop.xlane.xlu0 %6779 }
0x1c76   :  { %v6822_v52 = vsub.f32 %v9878_v16, %v6780_v15 }
0x1c78   :  { %v6777_v47 = vpop.xlane.xlu1 %6776 }
0x1c79   :  { %v6821_v21 = vsub.f32 %v6639_v34, %v6777_v47  ;;  %v6774_v62 = vpop.xlane.xlu0 %6773 }
0x1c7a   :  { %v6820_v39 = vsub.f32 %v6636_v2, %v6774_v62 }
0x1c7c   :  { %v6836_v7 = vpack.c.bf16 %v6821_v21, %v6820_v39 }
0x1c7d   :  { %v6783_v19 = vpop.xlane.xlu0 %6782 }
0x1c7e   :  { %v6823_v27 = vsub.f32 %v9879_v1, %v6783_v19  ;;  %v6845_v35 = vmul.bf16 1069105081, %v6836_v7 }
0x1c80   :  { %v6837_v26 = vpack.c.bf16 %v6823_v27, %v6822_v52  ;;  %10605 = vpow.bf16 %v6845_v35 }
0x1c82   :  { %v6848_v41 = vmul.bf16 1069105081, %v6837_v26 }
0x1c84   :  { %10607 = vpow.bf16 %v6848_v41 }
0x1c85   :  { %v13629_v56 = vpop.f32.mrb[204].mxu1 }
0x1c86   :  { %v13631_v28 = vpop.f32.mrb[205].mxu1 }
0x1c87   :  { %v13633_v42 = vpop.f32.mrb[206].mxu1 }
0x1c88   :  { %v13637_v45 = vpop.f32.mrb[207].mxu1 }
0x1c8b   :  { %v13643_v1 = vpop.eup %10605 }
0x1c8c   :  { %v6869_v39 = vunpack.c.h.bf16 %v13643_v1  ;;  %v6868_v7 = vunpack.c.l.bf16 %v13643_v1 }
0x1c8d   :  { %v13641_v2 = vpop.f32.mrb[208].mxu1 }
0x1c8e   :  { %v13645_v10 = vpop.f32.mrb[209].mxu1  ;;  %v6887_v27 = vsel %vm728_vm1, %v6869_v39, 0.0  ;;  %v6884_v35 = vsel %vm728_vm1, %v6868_v7, 0.0 }
0x1c8f   :  { %v13647_v0 = vpop.eup %10607  ;;  %v13649_v37 = vpop.f32.mrb[210].mxu1 }
0x1c90   :  { %v13651_v63 = vpop.f32.mrb[211].mxu1  ;;  %v6870_v15 = vunpack.c.l.bf16 %v13647_v0  ;;  %v6871_v47 = vunpack.c.h.bf16 %v13647_v0 }
0x1c92   :  { %v6890_v21 = vsel %vm728_vm1, %v6870_v15, 0.0  ;;  %v6893_v62 = vsel %vm728_vm1, %v6871_v47, 0.0 }
0x1c93   :  { %6891 = vadd.xlane.f32.xlu0 %v6890_v21  ;;  %6894 = vadd.xlane.f32.xlu1 %v6893_v62 }
0x1c95   :  { %v13659_v19 = vpop.f32.mrb[212].mxu1 }
0x1c96   :  { %v13661_v52 = vpop.f32.mrb[213].mxu1 }
0x1c97   :  { %v13665_v26 = vpop.f32.mrb[214].mxu1  ;;  %6888 = vadd.xlane.f32.xlu1 %v6887_v27  ;;  %6885 = vadd.xlane.f32.xlu0 %v6884_v35 }
0x1c98   :  { %v13667_v41 = vpop.f32.mrb[215].mxu1 }
0x1ccb   :  { %v6792_v15 = vpop.xlane.xlu0 %6791 }
0x1ccc   :  { %v6826_v16 = vsub.f32 %v13604_v46, %v6792_v15  ;;  %v6814_v15 = vsel %vm728_vm1, %v13659_v19, -inf }
0x1ccd   :  { %v6795_v47 = vpop.xlane.xlu1 %6794 }
0x1cce   :  { %v6827_v21 = vsub.f32 %v9883_v24, %v6795_v47  ;;  %v6808_v47 = vsel %vm728_vm1, %v13661_v52, -inf }
0x1ccf   :  { %v6786_v62 = vpop.xlane.xlu0 %6785 }
0x1cd0   :  { %v6839_v34 = vpack.c.bf16 %v6827_v21, %v6826_v16  ;;  %v6824_v23 = vsub.f32 %v13606_v60, %v6786_v62 }
0x1cd1   :  { %v6789_v32 = vpop.xlane.xlu1 %6788 }
0x1cd2   :  { %v6825_v39 = vsub.f32 %v13610_v55, %v6789_v32  ;;  %v6854_v44 = vmul.bf16 1069105081, %v6839_v34  ;;  %v6799_v32 = vsel %vm728_vm1, %v13651_v63, -inf }
0x1cd4   :  { %v6838_v7 = vpack.c.bf16 %v6825_v39, %v6824_v23  ;;  %10609 = vpow.bf16 %v6854_v44  ;;  %v6805_v44 = vsel %vm728_vm1, %v13649_v37, -inf  ;;  %v6796_v23 = vsel %vm728_vm1, %v13645_v10, -inf }
0x1cd6   :  { %v6851_v54 = vmul.bf16 1069105081, %v6838_v7 }
0x1cd8   :  { %10611 = vpow.bf16 %v6851_v54  ;;  %v6802_v54 = vsel %vm728_vm1, %v13641_v2, -inf }
0x1cdf   :  { %v13672_v27 = vpop.eup %10609 }
0x1ce0   :  { %v6875_v60 = vunpack.c.h.bf16 %v13672_v27 }
0x1ce2   :  { %v6905_v55 = vsel %vm728_vm1, %v6875_v60, 0.0  ;;  %v6817_v60 = vsel %vm728_vm1, %v13665_v26, -inf }
0x1ce3   :  { %v13674_v35 = vpop.eup %10611 }
0x1ce4   :  { %v6873_v50 = vunpack.c.h.bf16 %v13674_v35  ;;  %v6872_v46 = vunpack.c.l.bf16 %v13674_v35 }
0x1ce6   :  { %v6899_v24 = vsel %vm728_vm1, %v6873_v50, 0.0  ;;  %v6896_v16 = vsel %vm728_vm1, %v6872_v46, 0.0  ;;  %v6874_v50 = vunpack.c.l.bf16 %v13672_v27 }
0x1ce7   :  { %6900 = vadd.xlane.f32.xlu1 %v6899_v24  ;;  %6897 = vadd.xlane.f32.xlu0 %v6896_v16 }
0x1ce8   :  { %v6902_v34 = vsel %vm728_vm1, %v6874_v50, 0.0 }
0x1ceb   :  { %6906 = vadd.xlane.f32.xlu1 %v6905_v55  ;;  %6803 = vmax.xlane.f32.xlu0 %v6802_v54 }
0x1cef   :  { %6806 = vmax.xlane.f32.xlu1 %v6805_v44  ;;  %6797 = vmax.xlane.f32.xlu0 %v6796_v23 }
0x1cf3   :  { %6800 = vmax.xlane.f32.xlu1 %v6799_v32  ;;  %6903 = vadd.xlane.f32.xlu0 %v6902_v34 }
0x1cf7   :  { %6815 = vmax.xlane.f32.xlu0 %v6814_v15 }
0x1cfb   :  { %6809 = vmax.xlane.f32.xlu0 %v6808_v47 }
0x1d04   :  { %6990 = vrot.lane.b32.xlu1 %v12778_v14, %s10886_s21  ;;  %v6811_v14 = vsel %vm728_vm1, %v13667_v41, -inf }
0x1d08   :  { %6992 = vrot.lane.b32.xlu1 %v12840_v3, %s10886_s21 }
0x1d11   :  { %6988 = vrot.lane.b32.xlu0 %v12783_v5, %s10886_s21 }
0x1d20   :  { %v6892_v21 = vpop.xlane.xlu0 %6891  ;;  %v6895_v62 = vpop.xlane.xlu1 %6894 }
0x1d24   :  { %v6886_v39 = vpop.xlane.xlu0 %6885  ;;  %v6889_v7 = vpop.xlane.xlu1 %6888 }
0x1d25   :  { %v6932_v46 = vpack.c.bf16 %v6889_v7, %v6886_v39 }
0x1d27   :  { %v6940_v24 = vunpack.c.l.bf16 %v6932_v46  ;;  %v6941_v16 = vunpack.c.h.bf16 %v6932_v46 }
0x1d29   :  { %10613 = vrcp.f32 %v6940_v24 }
0x1d2a   :  { %10615 = vrcp.f32 %v6941_v16 }
0x1d2c   :  { %6818 = vmax.xlane.f32.xlu1 %v6817_v60 }
0x1d30   :  { %6812 = vmax.xlane.f32.xlu1 %v6811_v14 }
0x1d33   :  { %v10614_v3 = vpop.eup %10613 }
0x1d34   :  { %v10616_v55 = vpop.eup %10615 }
0x1d35   :  { %v6972_v5 = vpack.c.bf16 %v10616_v55, %v10614_v3 }
0x1d37   :  { %v6980_v54 = vmul.bf16 %v13643_v1, %v6972_v5 }
0x1d39   :  { %9908 = vmatprep.mubr.msk.bf16.mxu0 %vm728_vm1, %v6980_v54 }
0x1d41   :  { %6994 = vrot.lane.b32.xlu1 %v12836_v38, %s10886_s21 }
0x1d74   :  { %v6898_v44 = vpop.xlane.xlu0 %6897  ;;  %v6901_v23 = vpop.xlane.xlu1 %6900 }
0x1d78   :  { %v6804_v50 = vpop.xlane.xlu0 %6803  ;;  %v6907_v32 = vpop.xlane.xlu1 %6906 }
0x1d79   :  { %v6830_v47 = vsub.f32 %v13641_v2, %v6804_v50 }
0x1d7c   :  { %v6798_v34 = vpop.xlane.xlu0 %6797  ;;  %v6807_v15 = vpop.xlane.xlu1 %6806 }
0x1d7d   :  { %v6831_v39 = vsub.f32 %v13649_v37, %v6807_v15  ;;  %v6828_v1 = vsub.f32 %v13645_v10, %v6798_v34 }
0x1d7f   :  { %v6841_v7 = vpack.c.bf16 %v6831_v39, %v6830_v47 }
0x1d80   :  { %v6904_v46 = vpop.xlane.xlu0 %6903  ;;  %v6801_v24 = vpop.xlane.xlu1 %6800 }
0x1d81   :  { %v6860_v16 = vmul.bf16 1069105081, %v6841_v7  ;;  %v6829_v60 = vsub.f32 %v13651_v63, %v6801_v24 }
0x1d83   :  { %10617 = vpow.bf16 %v6860_v16  ;;  %v6840_v38 = vpack.c.bf16 %v6829_v60, %v6828_v1  ;;  %v6933_v1 = vpack.c.bf16 %v6895_v62, %v6892_v21  ;;  %v6934_v16 = vpack.c.bf16 %v6901_v23, %v6898_v44 }
0x1d84   :  { %v6816_v14 = vpop.xlane.xlu0 %6815  ;;  %v6991_v5 = vpop.permute.xlu1 %6990 }
0x1d85   :  { %v6857_v3 = vmul.bf16 1069105081, %v6840_v38  ;;  %v6942_v60 = vunpack.c.l.bf16 %v6933_v1  ;;  %v6943_v38 = vunpack.c.h.bf16 %v6933_v1 }
0x1d87   :  { %10619 = vpow.bf16 %v6857_v3  ;;  %v6944_v3 = vunpack.c.l.bf16 %v6934_v16 }
0x1d88   :  { %v6810_v55 = vpop.xlane.xlu0 %6809  ;;  %v6993_v34 = vpop.permute.xlu1 %6992  ;;  %10621 = vrcp.f32 %v6942_v60 }
0x1d89   :  { %10623 = vrcp.f32 %v6943_v38 }
0x1d8a   :  { %10625 = vrcp.f32 %v6944_v3 }
0x1d8c   :  { %v6989_v54 = vpop.permute.xlu0 %6988 }
0x1d8d   :  { %9900 = vmatprep.subr.bf16.mxu0 %v6989_v54 }
0x1d8e   :  { %v13714_v2 = vpop.eup %10617  ;;  %9901 = vmatpush3.bf16.msra.mxu0 %v6989_v54  ;;  %v6935_v54 = vpack.c.bf16 %v6907_v32, %v6904_v46 }
0x1d8f   :  { %9902 = vmatprep.subr.bf16.mxu0 %v6991_v5  ;;  %v6878_v37 = vunpack.c.l.bf16 %v13714_v2  ;;  %v6879_v50 = vunpack.c.h.bf16 %v13714_v2 }
0x1d91   :  { %v6914_v10 = vsel %vm728_vm1, %v6878_v37, 0.0  ;;  %v6917_v47 = vsel %vm728_vm1, %v6879_v50, 0.0  ;;  %v6946_v37 = vunpack.c.l.bf16 %v6935_v54 }
0x1d92   :  { %v13719_v63 = vpop.eup %10619  ;;  %6915 = vadd.xlane.f32.xlu0 %v6914_v10  ;;  %9903 = vmatpush3.bf16.msra.mxu0 %v6991_v5  ;;  %v6945_v5 = vunpack.c.h.bf16 %v6934_v16  ;;  %v6947_v10 = vunpack.c.h.bf16 %v6935_v54 }
0x1d93   :  { %9904 = vmatprep.subr.bf16.mxu0 %v6993_v34  ;;  %v6877_v15 = vunpack.c.h.bf16 %v13719_v63  ;;  %v6876_v7 = vunpack.c.l.bf16 %v13719_v63 }
0x1d94   :  { %10627 = vrcp.f32 %v6945_v5 }
0x1d95   :  { %v6911_v39 = vsel %vm728_vm1, %v6877_v15, 0.0  ;;  %v6908_v24 = vsel %vm728_vm1, %v6876_v7, 0.0  ;;  %10629 = vrcp.f32 %v6946_v37  ;;  %v6832_v7 = vsub.f32 %v13661_v52, %v6810_v55 }
0x1d96   :  { %6918 = vadd.xlane.f32.xlu0 %v6917_v47  ;;  %6912 = vadd.xlane.f32.xlu1 %v6911_v39  ;;  %v10622_v47 = vpop.eup %10621  ;;  %10631 = vrcp.f32 %v6947_v10 }
0x1d97   :  { %9905 = vmatpush3.bf16.msra.mxu0 %v6993_v34  ;;  %v6834_v34 = vsub.f32 %v13659_v19, %v6816_v14  ;;  %v10624_v21 = vpop.eup %10623 }
0x1d98   :  { %v10626_v44 = vpop.eup %10625 }
0x1d9a   :  { %6909 = vadd.xlane.f32.xlu0 %v6908_v24  ;;  %v6973_v24 = vpack.c.bf16 %v10624_v21, %v10622_v47  ;;  %v10158_v21 = vld [vmem:[#allocation7 + $0x48] sm:$0xff]  }
0x1d9c   :  { %v6981_v14 = vmul.bf16 %v13647_v0, %v6973_v24 }
0x1d9e   :  { %v10628_v39 = vpop.eup %10627 }
0x1d9f   :  { %v6974_v60 = vpack.c.bf16 %v10628_v39, %v10626_v44  ;;  %v10162_v39 = vld [vmem:[#allocation7 + $0x68] sm:$0xff]  }
0x1da1   :  { %v6982_v3 = vmul.bf16 %v13674_v35, %v6974_v60 }
0x1db9   :  { %v6819_v50 = vpop.xlane.xlu1 %6818 }
0x1dba   :  { %v6835_v15 = vsub.f32 %v13665_v26, %v6819_v50  ;;  %v10630_v26 = vpop.eup %10629 }
0x1dbb   :  { %v10632_v38 = vpop.eup %10631 }
0x1dbc   :  { %v6843_v62 = vpack.c.bf16 %v6835_v15, %v6834_v34  ;;  %v6975_v52 = vpack.c.bf16 %v10632_v38, %v10630_v26 }
0x1dbd   :  { %v6813_v23 = vpop.xlane.xlu1 %6812 }
0x1dbe   :  { %v6866_v32 = vmul.bf16 1069105081, %v6843_v62  ;;  %v6833_v46 = vsub.f32 %v13667_v41, %v6813_v23  ;;  %v6983_v55 = vmul.bf16 %v13672_v27, %v6975_v52  ;;  %v14623_v27 = vpack.c.bf16 %v13344_v13, %v13338_v61  ;;  %v10161_v23 = vld [vmem:[#allocation7 + $0x60] sm:$0xff]  }
0x1dbf   :  { %v14625_v61 = vpack.c.bf16 %v13568_v31, %v13564_v51  ;;  %v10160_v31 = vld [vmem:[#allocation7 + $0x58] sm:$0xff]  }
0x1dc0   :  { %10633 = vpow.bf16 %v6866_v32  ;;  %v6842_v1 = vpack.c.bf16 %v6833_v46, %v6832_v7  ;;  %v10163_v7 = vld [vmem:[#allocation7 + $0x70] sm:$0xff]   ;;  %v10164_v32 = vld [vmem:[#allocation7 + $0x78] sm:$0xff]  }
0x1dc1   :  { %v6995_v16 = vpop.permute.xlu1 %6994 }
0x1dc2   :  { %v6863_v19 = vmul.bf16 1069105081, %v6842_v1  ;;  %9906 = vmatprep.subr.bf16.mxu0 %v6995_v16 }
0x1dc3   :  { %9907 = vmatpush3.bf16.msra.mxu0 %v6995_v16 }
0x1dc4   :  { %10635 = vpow.bf16 %v6863_v19 }
0x1dc6   :  { %9909 = vmatmul.mubr.msk.bf16.vlgmr.msra.gmra.mrb[200].mxu0 %vm728_vm1, %v6981_v14 }
0x1dc7   :  { %9912 = vmatprep.mubr.msk.bf16.mxu0 %vm728_vm1, %v6982_v3 }
0x1dcb   :  { %v13734_v41 = vpop.eup %10633 }
0x1dcc   :  { %v6883_v5 = vunpack.c.h.bf16 %v13734_v41  ;;  %v6882_v54 = vunpack.c.l.bf16 %v13734_v41 }
0x1dce   :  { %9913 = vmatmul.mubr.msk.bf16.gmra.mrb[204].mxu0 %vm728_vm1, %v6983_v55  ;;  %v6929_v0 = vsel %vm728_vm1, %v6883_v5, 0.0  ;;  %v6926_v37 = vsel %vm728_vm1, %v6882_v54, 0.0 }
0x1dcf   :  { %v13742_v35 = vpop.eup %10635  ;;  %6930 = vadd.xlane.f32.xlu1 %v6929_v0  ;;  %6927 = vadd.xlane.f32.xlu0 %v6926_v37 }
0x1dd0   :  { %v6880_v10 = vunpack.c.l.bf16 %v13742_v35  ;;  %v6881_v34 = vunpack.c.h.bf16 %v13742_v35 }
0x1dd2   :  { %v6920_v50 = vsel %vm728_vm1, %v6880_v10, 0.0 }
0x1dd3   :  { %6921 = vadd.xlane.f32.xlu0 %v6920_v50 }
0x1de0   :  { %7079 = vrot.lane.b32.xlu1 %v12884_v18, %s10886_s21  ;;  %v6923_v18 = vsel %vm728_vm1, %v6881_v34, 0.0 }
0x1de4   :  { %7081 = vrot.lane.b32.xlu1 %v12920_v40, %s10886_s21 }
0x1de9   :  { %7077 = vrot.lane.b32.xlu0 %v12888_v53, %s10886_s21  ;;  %v14624_v53 = vpack.c.bf16 %v13340_v8, %v13336_v22  ;;  %v10159_v8 = vld [vmem:[#allocation7 + $0x50] sm:$0xff]  }
0x1ded   :  { %7182 = vrot.lane.b32.xlu0 %v14623_v27, %s10886_s21 }
0x1df1   :  { %7206 = vrot.lane.b32.xlu0 %v6554_v4, %s10881_s0 }
0x1e08   :  { %6924 = vadd.xlane.f32.xlu1 %v6923_v18 }
0x1e19   :  { %7083 = vrot.lane.b32.xlu1 %v12916_v59, %s10886_s21  ;;  %v10157_v59 = vld [vmem:[#allocation7 + $0x40] sm:$0xff]  }
0x1e1a   :  { %9932 = vmatprep.subr.bf16.mxu0 %v10157_v59 }
0x1e1b   :  { %9933 = vmatpush3.bf16.msra.mxu0 %v10157_v59 }
0x1e1c   :  { %9934 = vmatprep.subr.bf16.mxu0 %v10158_v21 }
0x1e1d   :  { %7184 = vrot.lane.b32.xlu1 %v14624_v53, %s10886_s21 }
0x1e1f   :  { %v6916_v40 = vpop.xlane.xlu0 %6915  ;;  %9935 = vmatpush3.bf16.msra.mxu0 %v10158_v21 }
0x1e20   :  { %9936 = vmatprep.subr.bf16.mxu0 %v10159_v8 }
0x1e21   :  { %7208 = vrot.lane.b32.xlu1 %v14625_v61, %s10881_s0 }
0x1e23   :  { %v6919_v13 = vpop.xlane.xlu0 %6918  ;;  %v6913_v25 = vpop.xlane.xlu1 %6912  ;;  %9937 = vmatpush3.bf16.msra.mxu0 %v10159_v8 }
0x1e24   :  { %9938 = vmatprep.subr.bf16.mxu0 %v10160_v31  ;;  %v6937_v19 = vpack.c.bf16 %v6919_v13, %v6916_v40 }
0x1e26   :  { %v6950_v26 = vunpack.c.l.bf16 %v6937_v19  ;;  %v6951_v14 = vunpack.c.h.bf16 %v6937_v19 }
0x1e27   :  { %v6910_v29 = vpop.xlane.xlu0 %6909  ;;  %9939 = vmatpush3.bf16.msra.mxu0 %v10160_v31 }
0x1e28   :  { %v6936_v4 = vpack.c.bf16 %v6913_v25, %v6910_v29  ;;  %9940 = vmatprep.subr.bf16.mxu0 %v10161_v23 }
0x1e2a   :  { %v6948_v15 = vunpack.c.l.bf16 %v6936_v4  ;;  %v6949_v47 = vunpack.c.h.bf16 %v6936_v4 }
0x1e2b   :  { %9941 = vmatpush3.bf16.msra.mxu0 %v10161_v23  ;;  %v14628_v23 = vpack.c.bf16 %v13580_v43, %v13576_v57  ;;  %v14630_v57 = vld [vmem:[#allocation50_spill] sm:$0xff] }
0x1e2c   :  { %10637 = vrcp.f32 %v6948_v15  ;;  %9942 = vmatprep.subr.bf16.mxu0 %v10162_v39  ;;  %v14631_v43 = vpack.c.bf16 %v13382_v58, %v14630_v57 }
0x1e2d   :  { %10639 = vrcp.f32 %v6949_v47  ;;  %v14626_v47 = vpack.c.bf16 %v13353_v30, %v13349_v36  ;;  %v14629_v30 = vpack.c.bf16 %v13584_v17, %v13578_v9  ;;  %v14632_v9 = vld [vmem:[#allocation52_spill] sm:$0xff]  ;;  %v14633_v17 = vld [vmem:[#allocation51_spill] sm:$0xff] }
0x1e2e   :  { %10641 = vrcp.f32 %v6950_v26  ;;  %v14640_v26 = vld [vmem:[#allocation28_spill] sm:$0xff] }
0x1e2f   :  { %9943 = vmatpush3.bf16.msra.mxu0 %v10162_v39  ;;  %10643 = vrcp.f32 %v6951_v14  ;;  %v14636_v39 = vpack.c.bf16 %v13625_v20, %v13619_v48 }
0x1e30   :  { %9944 = vmatprep.subr.bf16.mxu0 %v10163_v7 }
0x1e33   :  { %9945 = vmatpush3.bf16.msra.mxu0 %v10163_v7 }
0x1e34   :  { %9946 = vmatprep.subr.bf16.mxu0 %v10164_v32 }
0x1e36   :  { %v10638_v62 = vpop.eup %10637 }
0x1e37   :  { %v10640_v22 = vpop.eup %10639  ;;  %9947 = vmatpush3.bf16.msra.mxu0 %v10164_v32 }
0x1e38   :  { %v6976_v44 = vpack.c.bf16 %v10640_v22, %v10638_v62  ;;  %v10642_v52 = vpop.eup %10641 }
0x1e39   :  { %v10644_v5 = vpop.eup %10643 }
0x1e3a   :  { %v6984_v51 = vmul.bf16 %v13719_v63, %v6976_v44  ;;  %v6977_v37 = vpack.c.bf16 %v10644_v5, %v10642_v52 }
0x1e3c   :  { %9924 = vmatprep.mubr.msk.bf16.mxu1 %vm728_vm1, %v6984_v51  ;;  %v6985_v40 = vmul.bf16 %v13714_v2, %v6977_v37  ;;  %v14627_v2 = vpack.c.bf16 %v13357_v12, %v13351_v6  ;;  %v14644_v37 = vld [vmem:[#allocation34_spill] sm:$0xff] }
0x1e5c   :  { %v6928_v63 = vpop.xlane.xlu0 %6927  ;;  %v6931_v46 = vpop.xlane.xlu1 %6930 }
0x1e5d   :  { %v6939_v38 = vpack.c.bf16 %v6931_v46, %v6928_v63  ;;  %v14637_v46 = vld [vmem:[#allocation29_spill] sm:$0xff] }
0x1e5f   :  { %v6954_v3 = vunpack.c.l.bf16 %v6939_v38  ;;  %v6955_v55 = vunpack.c.h.bf16 %v6939_v38 }
0x1e60   :  { %v6922_v24 = vpop.xlane.xlu0 %6921  ;;  %v7080_v1 = vpop.permute.xlu1 %7079 }
0x1e61   :  { %10645 = vrcp.f32 %v6954_v3 }
0x1e62   :  { %10647 = vrcp.f32 %v6955_v55 }
0x1e64   :  { %v7078_v16 = vpop.permute.xlu0 %7077  ;;  %v7082_v60 = vpop.permute.xlu1 %7081 }
0x1e65   :  { %9916 = vmatprep.subr.bf16.mxu1 %v7078_v16 }
0x1e66   :  { %9917 = vmatpush3.bf16.msra.mxu1 %v7078_v16 }
0x1e67   :  { %9918 = vmatprep.subr.bf16.mxu1 %v7080_v1 }
0x1e68   :  { %v7183_v32 = vpop.permute.xlu0 %7182 }
0x1e6a   :  { %9919 = vmatpush3.bf16.msra.mxu1 %v7080_v1 }
0x1e6b   :  { %9920 = vmatprep.subr.bf16.mxu1 %v7082_v60  ;;  %v10646_v29 = vpop.eup %10645 }
0x1e6c   :  { %v10648_v15 = vpop.eup %10647  ;;  %v7207_v58 = vpop.permute.xlu0 %7206 }
0x1e6d   :  { %v6979_v31 = vpack.c.bf16 %v10648_v15, %v10646_v29 }
0x1e6e   :  { %9921 = vmatpush3.bf16.msra.mxu1 %v7082_v60 }
0x1e6f   :  { %v6987_v12 = vmul.bf16 %v13734_v41, %v6979_v31  ;;  %v14635_v41 = vpack.c.bf16 %v13621_v11, %v13617_v49  ;;  %v14641_v49 = vld [vmem:[#allocation41_spill] sm:$0xff]  ;;  %v14653_v31 = vld [vmem:[#allocation54_spill] sm:$0xff] }
0x1e70   :  { %v14642_v11 = vpack.c.bf16 %v14640_v26, %v14641_v49  ;;  %v14663_v26 = vld [vmem:[#allocation35_spill] sm:$0xff] }
0x1e95   :  { %v6925_v54 = vpop.xlane.xlu1 %6924 }
0x1e96   :  { %v6938_v0 = vpack.c.bf16 %v6925_v54, %v6922_v24  ;;  %v14638_v24 = vld [vmem:[#allocation30_spill] sm:$0xff] }
0x1e97   :  { %v14639_v1 = vpack.c.bf16 %v14637_v46, %v14638_v24  ;;  %v14660_v24 = vld [vmem:[#allocation44_spill] sm:$0xff] }
0x1e98   :  { %v6952_v10 = vunpack.c.l.bf16 %v6938_v0  ;;  %v6953_v50 = vunpack.c.h.bf16 %v6938_v0  ;;  %v14643_v0 = vld [vmem:[#allocation33_spill] sm:$0xff] }
0x1e99   :  { %v9910_v27 = vpop.f32.mrb[200].mxu0  ;;  %v7084_v34 = vpop.permute.xlu1 %7083  ;;  %v7248_v16 = vsel %vm549_vm0, %v14639_v1, %v7183_v32  ;;  %v14658_v32 = vld [vmem:[#allocation16_spill] sm:$0xff]  ;;  %v14661_v1 = vld [vmem:[#allocation31_spill] sm:$0xff] }
0x1e9a   :  { %10649 = vrcp.f32 %v6952_v10  ;;  %v7046_v18 = vpop.f32.mrb[201].mxu0  ;;  %9922 = vmatprep.subr.bf16.mxu1 %v7084_v34  ;;  %v7271_v19 = vsel %vm728_vm1, %v7248_v16, %v7207_v58  ;;  %v14645_v10 = vpack.c.bf16 %v14643_v0, %v14644_v37  ;;  %v14662_v16 = vpack.c.bf16 %v14660_v24, %v14661_v1  ;;  %v14665_v0 = vld [vmem:[#allocation39_spill] sm:$0xff]  ;;  %v14676_v1 = vld [vmem:[#allocation20_spill] sm:$0xff] }
0x1e9b   :  { %10651 = vrcp.f32 %v6953_v50  ;;  %v9911_v53 = vpop.f32.mrb[202].mxu0  ;;  %9923 = vmatpush3.bf16.msra.mxu1 %v7084_v34  ;;  %v14646_v34 = vld [vmem:[#allocation32_spill] sm:$0xff]  ;;  %v10168_v24 = vld [vmem:[#allocation8 + $0x90] ss:$8 sps:$4 sm:$0xff]  }
0x1e9c   :  { %v7167_v61 = vpack.c.bf16 %v9911_v53, %v9910_v27  ;;  %v7049_v13 = vpop.f32.mrb[203].mxu0 }
0x1e9d   :  { %v7166_v25 = vpack.c.bf16 %v7049_v13, %v7046_v18  ;;  %v7185_v7 = vpop.permute.xlu1 %7184  ;;  %v14647_v18 = vld [vmem:[#allocation27_spill] sm:$0xff] }
0x1e9e   :  { %7232 = vrot.lane.b32.xlu1 %v7167_v61, %s10885_s20  ;;  %9925 = vmatmul.mubr.msk.bf16.vlgmr.msra.gmra.mrb[216].mxu1 %vm728_vm1, %v6985_v40  ;;  %v7251_v14 = vsel %vm549_vm0, %v14642_v11, %v7185_v7  ;;  %v14648_v53 = vpack.c.bf16 %v14646_v34, %v14647_v18 }
0x1e9f   :  { %7230 = vrot.lane.b32.xlu0 %v7166_v25, %s10885_s20 }
0x1ea1   :  { %v9914_v4 = vpop.f32.mrb[204].mxu0  ;;  %v7209_v63 = vpop.permute.xlu1 %7208 }
0x1ea2   :  { %7188 = vrot.lane.b32.xlu1 %v14626_v47, %s10886_s21  ;;  %v7062_v59 = vpop.f32.mrb[205].mxu0  ;;  %v7273_v48 = vsel %vm728_vm1, %v7251_v14, %v7209_v63 }
0x1ea3   :  { %7186 = vrot.lane.b32.xlu0 %v14627_v2, %s10886_s21  ;;  %v9915_v21 = vpop.f32.mrb[206].mxu0 }
0x1ea4   :  { %v10650_v62 = vpop.eup %10649  ;;  %v7169_v22 = vpack.c.bf16 %v9915_v21, %v9914_v4  ;;  %v7065_v8 = vpop.f32.mrb[207].mxu0 }
0x1ea5   :  { %v10652_v44 = vpop.eup %10651  ;;  %v7168_v51 = vpack.c.bf16 %v7065_v8, %v7062_v59  ;;  %v14650_v8 = vld [vmem:[#allocation53_spill] sm:$0xff] }
0x1ea6   :  { %7212 = vrot.lane.b32.xlu1 %v14628_v23, %s10881_s0  ;;  %v6978_v36 = vpack.c.bf16 %v10652_v44, %v10650_v62 }
0x1ea7   :  { %7210 = vrot.lane.b32.xlu0 %v14629_v30, %s10881_s0  ;;  %v14655_v30 = vpack.c.bf16 %v13633_v42, %v13629_v56  ;;  %v14657_v42 = vld [vmem:[#allocation45_spill] sm:$0xff] }
0x1ea8   :  { %v6986_v6 = vmul.bf16 %v13742_v35, %v6978_v36  ;;  %v14634_v35 = vpack.c.bf16 %v14632_v9, %v14633_v17  ;;  %v14659_v63 = vpack.c.bf16 %v14657_v42, %v14658_v32 }
0x1eaa   :  { %9928 = vmatprep.mubr.msk.bf16.mxu1 %vm728_vm1, %v6986_v6  ;;  %7236 = vrot.lane.b32.xlu1 %v7169_v22, %s10885_s20  ;;  %v14649_v22 = vld [vmem:[#allocation55_spill] sm:$0xff] }
0x1eab   :  { %9929 = vmatmul.mubr.msk.bf16.gmra.mrb[220].mxu1 %vm728_vm1, %v6987_v12  ;;  %7234 = vrot.lane.b32.xlu0 %v7168_v51, %s10885_s20  ;;  %v14651_v44 = vpack.c.bf16 %v14649_v22, %v14650_v8  ;;  %v14652_v51 = vld [vmem:[#allocation56_spill] sm:$0xff]  ;;  %v14656_v12 = vpack.c.bf16 %v13637_v45, %v13631_v28  ;;  %v13868_v28 = vld [vmem:[%s14422_s4 + $0x1] ss:$0 sm:$0xff]  ;;  %v14671_v8 = vld [vmem:[#allocation46_spill] sm:$0xff] }
0x1eac   :  { %7918 = vmatprep.mubr.bf16.mxu1 %v14539_v33  ;;  %v14654_v23 = vpack.c.bf16 %v14652_v51, %v14653_v31  ;;  %v14670_v22 = vld [vmem:[#allocation48_spill] sm:$0xff] }
0x1eae   :  { %7192 = vrot.lane.b32.xlu1 %v14631_v43, %s10886_s21 }
0x1eaf   :  { %7190 = vrot.lane.b32.xlu0 %v14634_v35, %s10886_s21 }
0x1eb2   :  { %7216 = vrot.lane.b32.xlu1 %v14635_v41, %s10881_s0 }
0x1eb3   :  { %7214 = vrot.lane.b32.xlu0 %v14636_v39, %s10881_s0 }
0x1f10   :  { %v7233_v60 = vpop.permute.xlu1 %7232 }
0x1f11   :  { %v7231_v38 = vpop.permute.xlu0 %7230  ;;  %v7290_v3 = vsel %vm3079_vm2, %v7273_v48, %v7233_v60 }
0x1f12   :  { %v7287_v20 = vsel %vm3079_vm2, %v7271_v19, %v7231_v38 }
0x1f13   :  { %9948 = vmatprep.mubr.bf16.mxu0 %v7287_v20 }
0x1f14   :  { %9949 = vmatmul.mubr.bf16.vlgmr.msra.gmra.mrb[208].mxu0 %v7290_v3  ;;  %v7189_v52 = vpop.permute.xlu1 %7188 }
0x1f15   :  { %v7187_v55 = vpop.permute.xlu0 %7186  ;;  %v7257_v40 = vsel %vm549_vm0, %v14648_v53, %v7189_v52  ;;  %v14664_v52 = vld [vmem:[#allocation38_spill] sm:$0xff] }
0x1f16   :  { %v7254_v50 = vsel %vm549_vm0, %v14645_v10, %v7187_v55 }
0x1f18   :  { %v7213_v5 = vpop.permute.xlu1 %7212 }
0x1f19   :  { %v7211_v54 = vpop.permute.xlu0 %7210  ;;  %v7277_v25 = vsel %vm728_vm1, %v7257_v40, %v7213_v5  ;;  %v14666_v40 = vld [vmem:[#allocation36_spill] sm:$0xff] }
0x1f1a   :  { %v7275_v61 = vsel %vm728_vm1, %v7254_v50, %v7211_v54 }
0x1f1c   :  { %v7237_v27 = vpop.permute.xlu1 %7236 }
0x1f1d   :  { %v7235_v13 = vpop.permute.xlu0 %7234  ;;  %v7296_v4 = vsel %vm3079_vm2, %v7277_v25, %v7237_v27 }
0x1f1e   :  { %v7293_v29 = vsel %vm3079_vm2, %v7275_v61, %v7235_v13 }
0x1f1f   :  { %9952 = vmatprep.mubr.bf16.mxu0 %v7293_v29 }
0x1f20   :  { %9953 = vmatmul.mubr.bf16.gmra.mrb[212].mxu0 %v7296_v4  ;;  %v7193_v35 = vpop.permute.xlu1 %7192  ;;  %v14667_v4 = vld [vmem:[#allocation49_spill] sm:$0xff] }
0x1f21   :  { %v7191_v41 = vpop.permute.xlu0 %7190  ;;  %v7263_v60 = vsel %vm549_vm0, %v14662_v16, %v7193_v35  ;;  %v14674_v35 = vld [vmem:[#allocation37_spill] sm:$0xff] }
0x1f22   :  { %v7260_v58 = vsel %vm549_vm0, %v14659_v63, %v7191_v41  ;;  %v10165_v63 = vld [vmem:[#allocation8 + $0x80] ss:$8 sps:$4 sm:$0xff]  }
0x1f24   :  { %v7217_v39 = vpop.permute.xlu1 %7216 }
0x1f25   :  { %v7215_v7 = vpop.permute.xlu0 %7214  ;;  %v7281_v38 = vsel %vm728_vm1, %v7263_v60, %v7217_v39 }
0x1f26   :  { %v7279_v19 = vsel %vm728_vm1, %v7260_v58, %v7215_v7  ;;  %v10167_v7 = vld [vmem:[#allocation8 + $0x84] ss:$8 sps:$4 sm:$0xff]  }
0x1f27   :  { %7886 = vmatprep.subr.bf16.mxu1 %v10167_v7 }
0x1f28   :  { %7887 = vmatpush1.bf16.msra.mxu1 %v10165_v63 }
0x1f71   :  { %v9926_v15 = vpop.f32.mrb[216].mxu1 }
0x1f72   :  { %v7135_v47 = vpop.f32.mrb[217].mxu1 }
0x1f73   :  { %v9927_v59 = vpop.f32.mrb[218].mxu1 }
0x1f74   :  { %v7171_v2 = vpack.c.bf16 %v9927_v59, %v9926_v15  ;;  %v7138_v21 = vpop.f32.mrb[219].mxu1  ;;  %v14668_v15 = vld [vmem:[#allocation47_spill] sm:$0xff] }
0x1f75   :  { %v7170_v62 = vpack.c.bf16 %v7138_v21, %v7135_v47  ;;  %v14669_v47 = vpack.c.bf16 %v14667_v4, %v14668_v15 }
0x1f76   :  { %7240 = vrot.lane.b32.xlu1 %v7171_v2, %s10885_s20 }
0x1f77   :  { %7238 = vrot.lane.b32.xlu0 %v7170_v62, %s10885_s20 }
0x1f7a   :  { %7196 = vrot.lane.b32.xlu1 %v14651_v44, %s10886_s21  ;;  %v14672_v44 = vpack.c.bf16 %v14670_v22, %v14671_v8 }
0x1f7b   :  { %7194 = vrot.lane.b32.xlu0 %v14654_v23, %s10886_s21 }
0x1f7e   :  { %v9930_v36 = vpop.f32.mrb[220].mxu1  ;;  %7220 = vrot.lane.b32.xlu1 %v14655_v30, %s10881_s0 }
0x1f7f   :  { %v7151_v6 = vpop.f32.mrb[221].mxu1  ;;  %7218 = vrot.lane.b32.xlu0 %v14656_v12, %s10881_s0  ;;  %v14673_v12 = vld [vmem:[#allocation22_spill] sm:$0xff] }
0x1f80   :  { %v9931_v57 = vpop.f32.mrb[222].mxu1 }
0x1f81   :  { %v7173_v43 = vpack.c.bf16 %v9931_v57, %v9930_v36  ;;  %v7154_v9 = vpop.f32.mrb[223].mxu1 }
0x1f82   :  { %v7172_v17 = vpack.c.bf16 %v7154_v9, %v7151_v6 }
0x1f83   :  { %7244 = vrot.lane.b32.xlu1 %v7173_v43, %s10885_s20 }
0x1f84   :  { %7242 = vrot.lane.b32.xlu0 %v7172_v17, %s10885_s20 }
0x1fe7   :  { %v9950_v56 = vpop.f32.mrb[208].mxu0 }
0x1fe8   :  { %v7409_v45 = vpop.f32.mrb[209].mxu0  ;;  %v7241_v46 = vpop.permute.xlu1 %7240  ;;  %v7474_v61 = vadd.f32 %v9950_v56, %v14666_v40  ;;  %v14675_v56 = vld [vmem:[#allocation21_spill] sm:$0xff] }
0x1fe9   :  { %v7472_v49 = vadd.f32 %v7409_v45, %v14663_v26  ;;  %v7239_v11 = vpop.permute.xlu0 %7238  ;;  %v9951_v14 = vpop.f32.mrb[210].mxu0  ;;  %v7302_v5 = vsel %vm3079_vm2, %v7281_v38, %v7241_v46  ;;  %v10170_v45 = vld [vmem:[#allocation8 + $0x94] ss:$8 sps:$4 sm:$0xff]   ;;  %v10174_v38 = vld [vmem:[#allocation8 + $0xb0] ss:$8 sps:$4 sm:$0xff]  }
0x1fea   :  { %v7412_v48 = vpop.f32.mrb[211].mxu0  ;;  %v7299_v20 = vsel %vm3079_vm2, %v7279_v19, %v7239_v11  ;;  %v7475_v37 = vadd.f32 %v9951_v14, %v14665_v0  ;;  %v13910_v30 = vadd.f32 %v13868_v28, %v7474_v61  ;;  %7888 = vmatprep.subr.bf16.mxu1 %v10170_v45  ;;  %v10173_v19 = vld [vmem:[#allocation8 + $0xa4] ss:$8 sps:$4 sm:$0xff]   ;;  %v10176_v14 = vld [vmem:[#allocation8 + $0xb4] ss:$8 sps:$4 sm:$0xff]  }
0x1feb   :  { %v13879_v3 = vadd.f32 %v13868_v28, %v7472_v49  ;;  %v7473_v55 = vadd.f32 %v7412_v48, %v14664_v52  ;;  %9956 = vmatprep.mubr.bf16.mxu0 %v7299_v20  ;;  %7889 = vmatpush1.bf16.msra.mxu1 %v10168_v24  ;;  %v10171_v49 = vld [vmem:[#allocation8 + $0xa0] ss:$8 sps:$4 sm:$0xff]   ;;  %v10179_v20 = vld [vmem:[#allocation8 + $0xc4] ss:$8 sps:$4 sm:$0xff]  }
0x1fec   :  { %9957 = vmatmul.mubr.bf16.gmra.mrb[216].mxu0 %v7302_v5  ;;  %v7197_v54 = vpop.permute.xlu1 %7196  ;;  %v13892_v18 = vadd.f32 %v13868_v28, %v7475_v37  ;;  %v7566_v39 = vmul.f32 %v13910_v30, %v13910_v30  ;;  %7890 = vmatprep.subr.bf16.mxu1 %v10173_v19  ;;  %v10177_v52 = vld [vmem:[#allocation8 + $0xc0] ss:$8 sps:$4 sm:$0xff]   ;;  %v10180_v5 = vld [vmem:[#allocation8 + $0xd0] ss:$8 sps:$4 sm:$0xff]   ;;  %v10188_v37 = vld [vmem:[#allocation8 + $0xf4] ss:$8 sps:$4 sm:$0xff]  }
0x1fed   :  { %v13885_v10 = vadd.f32 %v13868_v28, %v7473_v55  ;;  %v7195_v50 = vpop.permute.xlu0 %7194  ;;  %7516 = vadd.xlane.f32.xlu0 %v13879_v3  ;;  %v7564_v27 = vmul.f32 %v13879_v3, %v13879_v3  ;;  %v7269_v51 = vsel %vm549_vm0, %v14672_v44, %v7197_v54  ;;  %v10182_v55 = vld [vmem:[#allocation8 + $0xd4] ss:$8 sps:$4 sm:$0xff]   ;;  %v10185_v54 = vld [vmem:[#allocation8 + $0xe4] ss:$8 sps:$4 sm:$0xff]   ;;  %v10183_v0 = vld [vmem:[#allocation8 + $0xe0] ss:$8 sps:$4 sm:$0xff]  }
0x1fee   :  { %v7266_v59 = vsel %vm549_vm0, %v14669_v47, %v7195_v50  ;;  %v7567_v62 = vmul.f32 %v13892_v18, %v13892_v18  ;;  %v10186_v50 = vld [vmem:[#allocation8 + $0xf0] ss:$8 sps:$4 sm:$0xff]  }
0x1fef   :  { %7518 = vadd.xlane.f32.xlu1 %v13885_v10  ;;  %v7565_v25 = vmul.f32 %v13885_v10, %v13885_v10  ;;  %7891 = vmatpush1.bf16.msra.mxu1 %v10171_v49 }
0x1ff0   :  { %v7221_v34 = vpop.permute.xlu1 %7220  ;;  %7892 = vmatprep.subr.bf16.mxu1 %v10176_v14 }
0x1ff1   :  { %v7219_v53 = vpop.permute.xlu0 %7218  ;;  %7580 = vadd.xlane.f32.xlu0 %v7564_v27  ;;  %v7285_v6 = vsel %vm728_vm1, %v7269_v51, %v7221_v34 }
0x1ff2   :  { %v7283_v31 = vsel %vm728_vm1, %v7266_v59, %v7219_v53 }
0x1ff3   :  { %7522 = vadd.xlane.f32.xlu1 %v13892_v18  ;;  %v9954_v13 = vpop.f32.mrb[212].mxu0  ;;  %7893 = vmatpush1.bf16.msra.mxu1 %v10174_v38 }
0x1ff4   :  { %v7425_v29 = vpop.f32.mrb[213].mxu0  ;;  %v7478_v16 = vadd.f32 %v9954_v13, %v14676_v1  ;;  %7894 = vmatprep.subr.bf16.mxu1 %v10179_v20 }
0x1ff5   :  { %v7245_v2 = vpop.permute.xlu1 %7244  ;;  %7582 = vadd.xlane.f32.xlu0 %v7565_v25  ;;  %v9955_v21 = vpop.f32.mrb[214].mxu0  ;;  %v7476_v41 = vadd.f32 %v7425_v29, %v14674_v35 }
0x1ff6   :  { %v7243_v23 = vpop.permute.xlu0 %7242  ;;  %v7428_v36 = vpop.f32.mrb[215].mxu0  ;;  %v7308_v9 = vsel %vm3079_vm2, %v7285_v6, %v7245_v2  ;;  %v7479_v42 = vadd.f32 %v9955_v21, %v14675_v56  ;;  %v13941_v11 = vadd.f32 %v13868_v28, %v7478_v16 }
0x1ff7   :  { %v7477_v57 = vadd.f32 %v7428_v36, %v14673_v12  ;;  %7586 = vadd.xlane.f32.xlu1 %v7567_v62  ;;  %v7305_v43 = vsel %vm3079_vm2, %v7283_v31, %v7243_v23  ;;  %v13928_v58 = vadd.f32 %v13868_v28, %v7476_v41  ;;  %7895 = vmatpush1.bf16.msra.mxu1 %v10177_v52 }
0x1ff8   :  { %9960 = vmatprep.mubr.bf16.mxu0 %v7305_v43  ;;  %v13931_v46 = vadd.f32 %v13868_v28, %v7479_v42  ;;  %v7570_v48 = vmul.f32 %v13941_v11, %v13941_v11  ;;  %7896 = vmatprep.subr.bf16.mxu1 %v10182_v55 }
0x1ff9   :  { %v13917_v17 = vadd.f32 %v13868_v28, %v7477_v57  ;;  %9961 = vmatmul.mubr.bf16.gmra.mrb[220].mxu0 %v7308_v9  ;;  %7520 = vadd.xlane.f32.xlu0 %v13910_v30  ;;  %v7568_v60 = vmul.f32 %v13928_v58, %v13928_v58 }
0x1ffa   :  { %v7571_v26 = vmul.f32 %v13931_v46, %v13931_v46 }
0x1ffb   :  { %7526 = vadd.xlane.f32.xlu1 %v13917_v17  ;;  %v7569_v32 = vmul.f32 %v13917_v17, %v13917_v17  ;;  %7897 = vmatpush1.bf16.msra.mxu1 %v10180_v5 }
0x1ffc   :  { %7898 = vmatprep.subr.bf16.mxu1 %v10185_v54 }
0x1ffd   :  { %7584 = vadd.xlane.f32.xlu0 %v7566_v39 }
0x1fff   :  { %7590 = vadd.xlane.f32.xlu1 %v7569_v32  ;;  %7899 = vmatpush1.bf16.msra.mxu1 %v10183_v0 }
0x2000   :  { %7900 = vmatprep.subr.bf16.mxu1 %v10188_v37 }
0x2001   :  { %7524 = vadd.xlane.f32.xlu0 %v13928_v58 }
0x2003   :  { %7530 = vadd.xlane.f32.xlu1 %v13931_v46  ;;  %7901 = vmatpush1.bf16.msra.mxu1 %v10186_v50 }
0x2005   :  { %7588 = vadd.xlane.f32.xlu0 %v7568_v60 }
0x2007   :  { %7594 = vadd.xlane.f32.xlu1 %v7571_v26  ;;  %v13954_v26 = vld [vmem:[%s14427_s9 + $0x1] ss:$0 sm:$0xff] }
0x2009   :  { %7528 = vadd.xlane.f32.xlu0 %v13941_v11 }
0x200d   :  { %7592 = vadd.xlane.f32.xlu0 %v7570_v48 }
0x207a   :  { %v7517_v27 = vpop.xlane.xlu0 %7516 }
0x207b   :  { %v7548_v34 = vmul.f32 0.0078125, %v7517_v27  ;;  %v13961_v27 = vld [vmem:[%s14428_s10 + $0x1] ss:$0 sm:$0xff] }
0x207c   :  { %v7519_v53 = vpop.xlane.xlu1 %7518 }
0x207d   :  { %v7628_v61 = vmul.f32 %v7548_v34, %v7548_v34  ;;  %v7549_v13 = vmul.f32 0.0078125, %v7519_v53  ;;  %v7660_v42 = vsub.f32 %v13879_v3, %v7548_v34 }
0x207e   :  { %v7581_v40 = vpop.xlane.xlu0 %7580 }
0x207f   :  { %v7612_v25 = vmul.f32 0.0078125, %v7581_v40  ;;  %v7629_v59 = vmul.f32 %v7549_v13, %v7549_v13  ;;  %v7661_v49 = vsub.f32 %v13885_v10, %v7549_v13 }
0x2080   :  { %v7523_v29 = vpop.xlane.xlu1 %7522 }
0x2081   :  { %v7644_v4 = vsub.f32 %v7612_v25, %v7628_v61  ;;  %v7551_v15 = vmul.f32 0.0078125, %v7523_v29 }
0x2082   :  { %v7583_v47 = vpop.xlane.xlu0 %7582 }
0x2083   :  { %v7676_v2 = vadd.f32 1e-05, %v7644_v4  ;;  %v7613_v21 = vmul.f32 0.0078125, %v7583_v47  ;;  %v7631_v22 = vmul.f32 %v7551_v15, %v7551_v15  ;;  %v7663_v10 = vsub.f32 %v13892_v18, %v7551_v15 }
0x2084   :  { %v7587_v62 = vpop.xlane.xlu1 %7586 }
0x2085   :  { %10653 = vrsqrt.f32 %v7676_v2  ;;  %v7645_v8 = vsub.f32 %v7613_v21, %v7629_v59  ;;  %v7615_v44 = vmul.f32 0.0078125, %v7587_v62 }
0x2086   :  { %v7521_v51 = vpop.xlane.xlu0 %7520 }
0x2087   :  { %v7677_v31 = vadd.f32 1e-05, %v7645_v8  ;;  %v7647_v23 = vsub.f32 %v7615_v44, %v7631_v22  ;;  %v7550_v36 = vmul.f32 0.0078125, %v7521_v51 }
0x2088   :  { %v7527_v6 = vpop.xlane.xlu1 %7526 }
0x2089   :  { %10655 = vrsqrt.f32 %v7677_v31  ;;  %v7679_v12 = vadd.f32 1e-05, %v7647_v23  ;;  %v13946_v57 = vmul.f32 0.0078125, %v7527_v6  ;;  %v7630_v9 = vmul.f32 %v7550_v36, %v7550_v36 }
0x208a   :  { %v7585_v43 = vpop.xlane.xlu0 %7584  ;;  %v7662_v59 = vsub.f32 %v13910_v30, %v7550_v36 }
0x208b   :  { %10657 = vrsqrt.f32 %v7679_v12  ;;  %v7614_v35 = vmul.f32 0.0078125, %v7585_v43  ;;  %v7633_v39 = vmul.f32 %v13946_v57, %v13946_v57  ;;  %v7665_v31 = vsub.f32 %v13917_v17, %v13946_v57 }
0x208c   :  { %v7591_v41 = vpop.xlane.xlu1 %7590 }
0x208d   :  { %v7646_v7 = vsub.f32 %v7614_v35, %v7630_v9  ;;  %v7617_v56 = vmul.f32 0.0078125, %v7591_v41 }
0x208e   :  { %v7525_v32 = vpop.xlane.xlu0 %7524 }
0x208f   :  { %v10654_v63 = vpop.eup %10653  ;;  %v7678_v45 = vadd.f32 1e-05, %v7646_v7  ;;  %v7649_v24 = vsub.f32 %v7617_v56, %v7633_v39  ;;  %v7552_v1 = vmul.f32 0.0078125, %v7525_v32 }
0x2090   :  { %v7708_v16 = vmul.f32 %v10654_v63, %v7660_v42  ;;  %v7531_v60 = vpop.xlane.xlu1 %7530 }
0x2091   :  { %10659 = vrsqrt.f32 %v7678_v45  ;;  %v7681_v19 = vadd.f32 1e-05, %v7649_v24  ;;  %v7555_v14 = vmul.f32 0.0078125, %v7531_v60  ;;  %v7632_v3 = vmul.f32 %v7552_v1, %v7552_v1 }
0x2092   :  { %v7589_v38 = vpop.xlane.xlu0 %7588  ;;  %v7730_v5 = vmul.f32 %v13954_v26, %v7708_v16  ;;  %v7664_v43 = vsub.f32 %v13928_v58, %v7552_v1 }
0x2093   :  { %v10656_v48 = vpop.eup %10655  ;;  %10661 = vrsqrt.f32 %v7681_v19  ;;  %v7616_v20 = vmul.f32 0.0078125, %v7589_v38  ;;  %v7635_v0 = vmul.f32 %v7555_v14, %v7555_v14  ;;  %v7667_v39 = vsub.f32 %v13931_v46, %v7555_v14  ;;  %v14677_v14 = vld [vmem:[#allocation19_spill] sm:$0xff] }
0x2094   :  { %v7709_v52 = vmul.f32 %v10656_v48, %v7661_v49  ;;  %v7595_v55 = vpop.xlane.xlu1 %7594  ;;  %v13966_v25 = vadd.f32 %v13961_v27, %v7730_v5 }
0x2095   :  { %v10658_v54 = vpop.eup %10657  ;;  %v7648_v37 = vsub.f32 %v7616_v20, %v7632_v3  ;;  %v7619_v50 = vmul.f32 0.0078125, %v7595_v55 }
0x2096   :  { %v7529_v34 = vpop.xlane.xlu0 %7528  ;;  %v7731_v53 = vmul.f32 %v13954_v26, %v7709_v52  ;;  %v7711_v4 = vmul.f32 %v10658_v54, %v7663_v10  ;;  %v14678_v52 = vld [vmem:[#allocation26_spill] sm:$0xff]  ;;  %v14679_v54 = vld [vmem:[#allocation24_spill] sm:$0xff] }
0x2097   :  { %v7680_v40 = vadd.f32 1e-05, %v7648_v37  ;;  %v7651_v61 = vsub.f32 %v7619_v50, %v7635_v0  ;;  %v7554_v13 = vmul.f32 0.0078125, %v7529_v34  ;;  %v14680_v50 = vld [vmem:[#allocation25_spill] sm:$0xff] }
0x2098   :  { %v13969_v29 = vadd.f32 %v13961_v27, %v7731_v53  ;;  %v7733_v8 = vmul.f32 %v13954_v26, %v7711_v4 }
0x2099   :  { %10663 = vrsqrt.f32 %v7680_v40  ;;  %v7683_v47 = vadd.f32 1e-05, %v7651_v61  ;;  %v7634_v21 = vmul.f32 %v7554_v13, %v7554_v13  ;;  %v7666_v32 = vsub.f32 %v13941_v11, %v7554_v13 }
0x209a   :  { %v7593_v2 = vpop.xlane.xlu0 %7592  ;;  %v7768_v18 = vpack.c.bf16 %v13969_v29, %v13966_v25  ;;  %v13983_v6 = vadd.f32 %v13961_v27, %v7733_v8 }
0x209b   :  { %v10660_v15 = vpop.eup %10659  ;;  %10665 = vrsqrt.f32 %v7683_v47  ;;  %v7618_v62 = vmul.f32 0.0078125, %v7593_v2  ;;  %v14681_v47 = vld [vmem:[#allocation23_spill] sm:$0xff] }
0x209c   :  { %7919 = vmatmul.mubr.bf16.vlgmr.msra.gmra.mrb[224].mxu1 %v7768_v18  ;;  %v7710_v22 = vmul.f32 %v10660_v15, %v7662_v59  ;;  %v14682_v15 = vld [vmem:[#allocation42_spill] sm:$0xff] }
0x209d   :  { %v10662_v44 = vpop.eup %10661  ;;  %v7650_v51 = vsub.f32 %v7618_v62, %v7634_v21  ;;  %7928 = vmatprep.mubr.bf16.mxu1 %v14539_v33 }
0x209e   :  { %v7732_v30 = vmul.f32 %v13954_v26, %v7710_v22  ;;  %v7713_v12 = vmul.f32 %v10662_v44, %v7665_v31  ;;  %v14683_v44 = vld [vmem:[#allocation40_spill] sm:$0xff] }
0x209f   :  { %v7682_v23 = vadd.f32 1e-05, %v7650_v51 }
0x20a0   :  { %v13980_v36 = vadd.f32 %v13961_v27, %v7732_v30  ;;  %v7735_v17 = vmul.f32 %v13954_v26, %v7713_v12  ;;  %v14684_v30 = vld [vmem:[#allocation43_spill] sm:$0xff] }
0x20a1   :  { %10667 = vrsqrt.f32 %v7682_v23 }
0x20a2   :  { %v7769_v9 = vpack.c.bf16 %v13983_v6, %v13980_v36  ;;  %v13996_v58 = vadd.f32 %v13961_v27, %v7735_v17  ;;  %v10191_v17 = vld [vmem:[#allocation10 + $0xc8] sm:$0xff]  }
0x20a3   :  { %v10664_v35 = vpop.eup %10663 }
0x20a4   :  { %7929 = vmatmul.mubr.bf16.gmra.mrb[228].mxu1 %v7769_v9  ;;  %v7712_v41 = vmul.f32 %v10664_v35, %v7664_v43  ;;  %v10189_v43 = vld [vmem:[#allocation10 + $0xc0] sm:$0xff]  }
0x20a5   :  { %v10666_v57 = vpop.eup %10665  ;;  %7938 = vmatprep.mubr.bf16.mxu1 %v14539_v33  ;;  %v10190_v35 = vld [vmem:[#allocation10 + $0x80] sm:$0xff]   ;;  %9260 = vmatprep.subr.bf16.mxu0 %v10189_v43 }
0x20a6   :  { %v7734_v7 = vmul.f32 %v13954_v26, %v7712_v41  ;;  %v7715_v42 = vmul.f32 %v10666_v57, %v7667_v39  ;;  %9261 = vmatpush3.bf16.msra.mxu0 %v10190_v35  ;;  %v10192_v39 = vld [vmem:[#allocation10 + $0x88] sm:$0xff]  }
0x20a7   :  { %9262 = vmatprep.subr.bf16.mxu0 %v10191_v17 }
0x20a8   :  { %v13993_v56 = vadd.f32 %v13961_v27, %v7734_v7  ;;  %v7737_v1 = vmul.f32 %v13954_v26, %v7715_v42  ;;  %v10193_v42 = vld [vmem:[#allocation10 + $0xd0] sm:$0xff]  }
0x20aa   :  { %v7770_v63 = vpack.c.bf16 %v13996_v58, %v13993_v56  ;;  %v14008_v60 = vadd.f32 %v13961_v27, %v7737_v1  ;;  %9263 = vmatpush3.bf16.msra.mxu0 %v10192_v39  ;;  %v10199_v1 = vld [vmem:[#allocation10 + $0xe8] sm:$0xff]  }
0x20ab   :  { %v10668_v45 = vpop.eup %10667  ;;  %9264 = vmatprep.subr.bf16.mxu0 %v10193_v42 }
0x20ac   :  { %7939 = vmatmul.mubr.bf16.gmra.mrb[232].mxu1 %v7770_v63  ;;  %v7714_v24 = vmul.f32 %v10668_v45, %v7666_v32  ;;  %v10195_v32 = vld [vmem:[#allocation10 + $0xd8] sm:$0xff]   ;;  %v10197_v45 = vld [vmem:[#allocation10 + $0xe0] sm:$0xff]  }
0x20ad   :  { %7948 = vmatprep.mubr.bf16.mxu1 %v14539_v33  ;;  %v10196_v63 = vld [vmem:[#allocation10 + $0x98] sm:$0xff]  }
0x20ae   :  { %v7736_v46 = vmul.f32 %v13954_v26, %v7714_v24  ;;  %v10198_v24 = vld [vmem:[#allocation10 + $0xa0] sm:$0xff]  }
0x20b0   :  { %v14005_v16 = vadd.f32 %v13961_v27, %v7736_v46  ;;  %v10200_v46 = vld [vmem:[#allocation10 + $0xa8] sm:$0xff]  }
0x20b2   :  { %v7771_v11 = vpack.c.bf16 %v14008_v60, %v14005_v16 }
0x20b4   :  { %7949 = vmatmul.mubr.bf16.gmra.mrb[236].mxu1 %v7771_v11  ;;  %v10201_v11 = vld [vmem:[#allocation10 + $0xf0] sm:$0xff]  }
0x20b5   :  { %7958 = vmatprep.mubr.bf16.mxu1 %v14539_v33 }
0x20bf   :  { %v9958_v19 = vpop.f32.mrb[216].mxu0 }
0x20c0   :  { %v7441_v49 = vpop.f32.mrb[217].mxu0  ;;  %v7482_v0 = vadd.f32 %v9958_v19, %v14679_v54  ;;  %v10202_v19 = vld [vmem:[#allocation10 + $0xb0] sm:$0xff]  }
0x20c1   :  { %v7480_v38 = vadd.f32 %v7441_v49, %v14677_v14  ;;  %v9959_v48 = vpop.f32.mrb[218].mxu0  ;;  %v10203_v49 = vld [vmem:[#allocation10 + $0xf8] sm:$0xff]  }
0x20c2   :  { %v7444_v3 = vpop.f32.mrb[219].mxu0  ;;  %v7483_v10 = vadd.f32 %v9959_v48, %v14680_v50  ;;  %v14030_v53 = vadd.f32 %v13868_v28, %v7482_v0  ;;  %v10204_v14 = vld [vmem:[#allocation10 + $0xb8] sm:$0xff]  }
0x20c3   :  { %v14015_v20 = vadd.f32 %v13868_v28, %v7480_v38  ;;  %v7481_v55 = vadd.f32 %v7444_v3, %v14678_v52 }
0x20c4   :  { %v14033_v61 = vadd.f32 %v13868_v28, %v7483_v10  ;;  %v7574_v18 = vmul.f32 %v14030_v53, %v14030_v53 }
0x20c5   :  { %v14019_v5 = vadd.f32 %v13868_v28, %v7481_v55  ;;  %7532 = vadd.xlane.f32.xlu0 %v14015_v20  ;;  %v7572_v37 = vmul.f32 %v14015_v20, %v14015_v20 }
0x20c6   :  { %v7575_v62 = vmul.f32 %v14033_v61, %v14033_v61 }
0x20c7   :  { %7534 = vadd.xlane.f32.xlu1 %v14019_v5  ;;  %v7573_v34 = vmul.f32 %v14019_v5, %v14019_v5 }
0x20c9   :  { %7596 = vadd.xlane.f32.xlu0 %v7572_v37 }
0x20cb   :  { %7598 = vadd.xlane.f32.xlu1 %v7573_v34 }
0x20cc   :  { %v9962_v40 = vpop.f32.mrb[220].mxu0 }
0x20cd   :  { %v7457_v13 = vpop.f32.mrb[221].mxu0  ;;  %7536 = vadd.xlane.f32.xlu0 %v14030_v53  ;;  %v7486_v51 = vadd.f32 %v9962_v40, %v14683_v44 }
0x20ce   :  { %v9963_v4 = vpop.f32.mrb[222].mxu0  ;;  %v7484_v59 = vadd.f32 %v7457_v13, %v14681_v47 }
0x20cf   :  { %v7460_v2 = vpop.f32.mrb[223].mxu0  ;;  %7538 = vadd.xlane.f32.xlu1 %v14033_v61  ;;  %v7487_v23 = vadd.f32 %v9963_v4, %v14684_v30  ;;  %v14058_v9 = vadd.f32 %v13868_v28, %v7486_v51 }
0x20d0   :  { %v7485_v21 = vadd.f32 %v7460_v2, %v14682_v15  ;;  %v14044_v22 = vadd.f32 %v13868_v28, %v7484_v59 }
0x20d1   :  { %7600 = vadd.xlane.f32.xlu0 %v7574_v18  ;;  %v14061_v41 = vadd.f32 %v13868_v28, %v7487_v23  ;;  %v7578_v57 = vmul.f32 %v14058_v9, %v14058_v9 }
0x20d2   :  { %v14047_v8 = vadd.f32 %v13868_v28, %v7485_v21  ;;  %v7576_v31 = vmul.f32 %v14044_v22, %v14044_v22  ;;  %v10194_v28 = vld [vmem:[#allocation10 + $0x90] sm:$0xff]  }
0x20d3   :  { %7602 = vadd.xlane.f32.xlu1 %v7575_v62  ;;  %v7579_v7 = vmul.f32 %v14061_v41, %v14061_v41  ;;  %9265 = vmatpush3.bf16.msra.mxu0 %v10194_v28 }
0x20d4   :  { %v7577_v12 = vmul.f32 %v14047_v8, %v14047_v8  ;;  %9266 = vmatprep.subr.bf16.mxu0 %v10195_v32 }
0x20d5   :  { %7540 = vadd.xlane.f32.xlu0 %v14044_v22 }
0x20d7   :  { %7542 = vadd.xlane.f32.xlu1 %v14047_v8  ;;  %9267 = vmatpush3.bf16.msra.mxu0 %v10196_v63 }
0x20d8   :  { %9268 = vmatprep.subr.bf16.mxu0 %v10197_v45 }
0x20d9   :  { %7604 = vadd.xlane.f32.xlu0 %v7576_v31 }
0x20db   :  { %7606 = vadd.xlane.f32.xlu1 %v7577_v12  ;;  %9269 = vmatpush3.bf16.msra.mxu0 %v10198_v24 }
0x20dc   :  { %9270 = vmatprep.subr.bf16.mxu0 %v10199_v1 }
0x20dd   :  { %7544 = vadd.xlane.f32.xlu0 %v14058_v9 }
0x20df   :  { %7546 = vadd.xlane.f32.xlu1 %v14061_v41  ;;  %9271 = vmatpush3.bf16.msra.mxu0 %v10200_v46 }
0x20e0   :  { %9272 = vmatprep.subr.bf16.mxu0 %v10201_v11 }
0x20e1   :  { %7608 = vadd.xlane.f32.xlu0 %v7578_v57 }
0x20e3   :  { %7610 = vadd.xlane.f32.xlu1 %v7579_v7  ;;  %9273 = vmatpush3.bf16.msra.mxu0 %v10202_v19 }
0x20e4   :  { %9274 = vmatprep.subr.bf16.mxu0 %v10203_v49 }
0x20e7   :  { %9275 = vmatpush3.bf16.msra.mxu0 %v10204_v14 }
0x2152   :  { %v7533_v38 = vpop.xlane.xlu0 %7532 }
0x2153   :  { %v7556_v48 = vmul.f32 0.0078125, %v7533_v38 }
0x2154   :  { %v7535_v3 = vpop.xlane.xlu1 %7534 }
0x2155   :  { %v7557_v52 = vmul.f32 0.0078125, %v7535_v3  ;;  %v7636_v54 = vmul.f32 %v7556_v48, %v7556_v48  ;;  %v7668_v39 = vsub.f32 %v14015_v20, %v7556_v48  ;;  %v8837_v20 = vld [vmem:[%s14424_s6 + $0x2] sm:$0x3] }
0x2156   :  { %v7597_v55 = vpop.xlane.xlu0 %7596 }
0x2157   :  { %v7620_v0 = vmul.f32 0.0078125, %v7597_v55  ;;  %v7637_v50 = vmul.f32 %v7557_v52, %v7557_v52  ;;  %v7669_v45 = vsub.f32 %v14019_v5, %v7557_v52  ;;  %v14685_v52 = vld [vmem:[#allocation17_spill] sm:$0xff] }
0x2158   :  { %v7599_v37 = vpop.xlane.xlu1 %7598 }
0x2159   :  { %v7652_v10 = vsub.f32 %v7620_v0, %v7636_v54  ;;  %v7621_v34 = vmul.f32 0.0078125, %v7599_v37  ;;  %v14094_v0 = vrot.slane %v8837_v20, %v14685_v52 }
0x215a   :  { %v7537_v40 = vpop.xlane.xlu0 %7536 }
0x215b   :  { %v7684_v13 = vadd.f32 1e-05, %v7652_v10  ;;  %v7653_v4 = vsub.f32 %v7621_v34, %v7637_v50  ;;  %v14069_v47 = vmul.f32 0.0078125, %v7537_v40  ;;  %v14686_v10 = vld [vmem:[#allocation18_spill] sm:$0xff] }
0x215c   :  { %v7539_v59 = vpop.xlane.xlu1 %7538  ;;  %v14098_v34 = vrot.slane %v8837_v20, %v14686_v10 }
0x215d   :  { %10669 = vrsqrt.f32 %v7684_v13  ;;  %v7685_v2 = vadd.f32 1e-05, %v7653_v4  ;;  %v14071_v18 = vmul.f32 0.0078125, %v7539_v59  ;;  %v7638_v21 = vmul.f32 %v14069_v47, %v14069_v47 }
0x215e   :  { %v7601_v15 = vpop.xlane.xlu0 %7600 }
0x215f   :  { %10671 = vrsqrt.f32 %v7685_v2  ;;  %v7622_v62 = vmul.f32 0.0078125, %v7601_v15  ;;  %v7639_v51 = vmul.f32 %v14071_v18, %v14071_v18  ;;  %v7670_v15 = vsub.f32 %v14030_v53, %v14069_v47 }
0x2160   :  { %v7603_v44 = vpop.xlane.xlu1 %7602 }
0x2161   :  { %v7654_v31 = vsub.f32 %v7622_v62, %v7638_v21  ;;  %v7623_v30 = vmul.f32 0.0078125, %v7603_v44 }
0x2162   :  { %v7541_v23 = vpop.xlane.xlu0 %7540 }
0x2163   :  { %v7686_v12 = vadd.f32 1e-05, %v7654_v31  ;;  %v7655_v43 = vsub.f32 %v7623_v30, %v7639_v51  ;;  %v14077_v35 = vmul.f32 0.0078125, %v7541_v23  ;;  %v7671_v51 = vsub.f32 %v14033_v61, %v14071_v18 }
0x2164   :  { %v7543_v17 = vpop.xlane.xlu1 %7542 }
0x2165   :  { %10673 = vrsqrt.f32 %v7686_v12  ;;  %v7687_v57 = vadd.f32 1e-05, %v7655_v43  ;;  %v14080_v7 = vmul.f32 0.0078125, %v7543_v17  ;;  %v7640_v32 = vmul.f32 %v14077_v35, %v14077_v35 }
0x2166   :  { %v7605_v42 = vpop.xlane.xlu0 %7604 }
0x2167   :  { %v10670_v28 = vpop.eup %10669  ;;  %10675 = vrsqrt.f32 %v7687_v57  ;;  %v7624_v63 = vmul.f32 0.0078125, %v7605_v42  ;;  %v7641_v11 = vmul.f32 %v14080_v7, %v14080_v7 }
0x2168   :  { %v7607_v24 = vpop.xlane.xlu1 %7606  ;;  %v7716_v1 = vmul.f32 %v10670_v28, %v7668_v39 }
0x2169   :  { %v10672_v46 = vpop.eup %10671  ;;  %v7656_v19 = vsub.f32 %v7624_v63, %v7640_v32  ;;  %v7625_v49 = vmul.f32 0.0078125, %v7607_v24 }
0x216a   :  { %v7545_v14 = vpop.xlane.xlu0 %7544  ;;  %v7717_v38 = vmul.f32 %v10672_v46, %v7669_v45  ;;  %v7738_v48 = vmul.f32 %v13954_v26, %v7716_v1 }
0x216b   :  { %v7688_v3 = vadd.f32 1e-05, %v7656_v19  ;;  %v7657_v55 = vsub.f32 %v7625_v49, %v7641_v11  ;;  %v14091_v54 = vmul.f32 0.0078125, %v7545_v14  ;;  %v7672_v14 = vsub.f32 %v14044_v22, %v14077_v35 }
0x216c   :  { %v7547_v5 = vpop.xlane.xlu1 %7546  ;;  %v7739_v37 = vmul.f32 %v13954_v26, %v7717_v38  ;;  %v14103_v4 = vadd.f32 %v13961_v27, %v7738_v48 }
0x216d   :  { %10677 = vrsqrt.f32 %v7688_v3  ;;  %v7689_v50 = vadd.f32 1e-05, %v7657_v55  ;;  %v14100_v40 = vmul.f32 0.0078125, %v7547_v5  ;;  %v7642_v21 = vmul.f32 %v14091_v54, %v14091_v54 }
0x216e   :  { %v7609_v13 = vpop.xlane.xlu0 %7608  ;;  %v14106_v59 = vadd.f32 %v13961_v27, %v7739_v37  ;;  %v7673_v37 = vsub.f32 %v14047_v8, %v14080_v7 }
0x216f   :  { %v10674_v2 = vpop.eup %10673  ;;  %10679 = vrsqrt.f32 %v7689_v50  ;;  %v7626_v62 = vmul.f32 0.0078125, %v7609_v13  ;;  %v7920_v44 = vpop.f32.mrb[224].mxu1  ;;  %v7643_v31 = vmul.f32 %v14100_v40, %v14100_v40 }
0x2170   :  { %v7921_v30 = vadd.f32 %v7920_v44, %v14094_v0  ;;  %v7922_v23 = vpop.f32.mrb[225].mxu1  ;;  %v7611_v12 = vpop.xlane.xlu1 %7610  ;;  %v7772_v43 = vpack.c.bf16 %v14106_v59, %v14103_v4  ;;  %v7718_v42 = vmul.f32 %v10674_v2, %v7670_v15 }
0x2171   :  { %v10676_v53 = vpop.eup %10675  ;;  %v7658_v47 = vsub.f32 %v7626_v62, %v7642_v21  ;;  %v7923_v17 = vadd.f32 %v7922_v23, %v14098_v34  ;;  %v7627_v57 = vmul.f32 0.0078125, %v7611_v12  ;;  %v7924_v39 = vpop.f32.mrb[226].mxu1 }
0x2172   :  { %v7925_v28 = vadd.f32 %v7924_v39, %v14094_v0  ;;  %v7926_v61 = vpop.f32.mrb[227].mxu1  ;;  %7959 = vmatmul.mubr.bf16.gmra.mrb[240].mxu1 %v7772_v43  ;;  %v7719_v18 = vmul.f32 %v10676_v53, %v7671_v51  ;;  %v7999_v24 = vmax.f32 %v7921_v30, 0.0  ;;  %v7740_v46 = vmul.f32 %v13954_v26, %v7718_v42 }
0x2173   :  { %v7690_v32 = vadd.f32 1e-05, %v7658_v47  ;;  %v7659_v63 = vsub.f32 %v7627_v57, %v7643_v31  ;;  %v7927_v45 = vadd.f32 %v7926_v61, %v14098_v34  ;;  %7968 = vmatprep.mubr.bf16.mxu1 %v14539_v33  ;;  %v8000_v19 = vmax.f32 %v7923_v17, 0.0 }
0x2174   :  { %v8001_v1 = vmax.f32 %v7925_v28, 0.0  ;;  %v7741_v11 = vmul.f32 %v13954_v26, %v7719_v18  ;;  %v14128_v48 = vadd.f32 %v13961_v27, %v7740_v46  ;;  %v7674_v43 = vsub.f32 %v14058_v9, %v14091_v54 }
0x2175   :  { %10681 = vrsqrt.f32 %v7690_v32  ;;  %v7691_v49 = vadd.f32 1e-05, %v7659_v63  ;;  %v8002_v20 = vmax.f32 %v7927_v45, 0.0  ;;  %v7675_v28 = vsub.f32 %v14061_v41, %v14100_v40 }
0x2176   :  { %v8031_v38 = vpack.c.bf16 %v8001_v1, %v7999_v24  ;;  %v14131_v3 = vadd.f32 %v13961_v27, %v7741_v11 }
0x2177   :  { %v10678_v55 = vpop.eup %10677  ;;  %10683 = vrsqrt.f32 %v7691_v49  ;;  %v8032_v5 = vpack.c.bf16 %v8002_v20, %v8000_v19  ;;  %v7930_v52 = vpop.f32.mrb[228].mxu1 }
0x2178   :  { %v7931_v50 = vadd.f32 %v7930_v52, %v14094_v0  ;;  %v7932_v10 = vpop.f32.mrb[229].mxu1  ;;  %v7773_v22 = vpack.c.bf16 %v14131_v3, %v14128_v48  ;;  %v7720_v35 = vmul.f32 %v10678_v55, %v7672_v14 }
0x2179   :  { %v10680_v13 = vpop.eup %10679  ;;  %v7933_v2 = vadd.f32 %v7932_v10, %v14098_v34  ;;  %v7934_v15 = vpop.f32.mrb[230].mxu1  ;;  %8216 = vmatprep.mubr.bf16.mxu0 %v8032_v5 }
0x217a   :  { %v7935_v21 = vadd.f32 %v7934_v15, %v14094_v0  ;;  %v7936_v62 = vpop.f32.mrb[231].mxu1  ;;  %7969 = vmatmul.mubr.bf16.gmra.mrb[244].mxu1 %v7773_v22  ;;  %8217 = vmatmul.mubr.bf16.vlgmr.msra.gmra.mrb[224].mxu0 %v8031_v38  ;;  %v7721_v44 = vmul.f32 %v10680_v13, %v7673_v37  ;;  %v7742_v8 = vmul.f32 %v13954_v26, %v7720_v35  ;;  %v8003_v51 = vmax.f32 %v7931_v50, 0.0 }
0x217b   :  { %v7937_v7 = vadd.f32 %v7936_v62, %v14098_v34  ;;  %7978 = vmatprep.mubr.bf16.mxu1 %v14539_v33  ;;  %v8004_v23 = vmax.f32 %v7933_v2, 0.0 }
0x217c   :  { %v8005_v31 = vmax.f32 %v7935_v21, 0.0  ;;  %v7743_v30 = vmul.f32 %v13954_v26, %v7721_v44  ;;  %v14147_v47 = vadd.f32 %v13961_v27, %v7742_v8 }
0x217d   :  { %v8006_v12 = vmax.f32 %v7937_v7, 0.0 }
0x217e   :  { %v8033_v53 = vpack.c.bf16 %v8005_v31, %v8003_v51  ;;  %v14150_v17 = vadd.f32 %v13961_v27, %v7743_v30 }
0x217f   :  { %v10682_v57 = vpop.eup %10681  ;;  %v8034_v39 = vpack.c.bf16 %v8006_v12, %v8004_v23  ;;  %v7940_v42 = vpop.f32.mrb[232].mxu1 }
0x2180   :  { %v7941_v61 = vadd.f32 %v7940_v42, %v14094_v0  ;;  %v7942_v18 = vpop.f32.mrb[233].mxu1  ;;  %v7774_v32 = vpack.c.bf16 %v14150_v17, %v14147_v47  ;;  %v7722_v9 = vmul.f32 %v10682_v57, %v7674_v43 }
0x2181   :  { %v10684_v54 = vpop.eup %10683  ;;  %v7943_v63 = vadd.f32 %v7942_v18, %v14098_v34  ;;  %v7944_v45 = vpop.f32.mrb[234].mxu1  ;;  %8224 = vmatprep.mubr.bf16.mxu0 %v8034_v39 }
0x2182   :  { %v7945_v24 = vadd.f32 %v7944_v45, %v14094_v0  ;;  %v7946_v1 = vpop.f32.mrb[235].mxu1  ;;  %7979 = vmatmul.mubr.bf16.gmra.mrb[248].mxu1 %v7774_v32  ;;  %8225 = vmatmul.mubr.bf16.gmra.mrb[228].mxu0 %v8033_v53  ;;  %v7723_v46 = vmul.f32 %v10684_v54, %v7675_v28  ;;  %v7744_v41 = vmul.f32 %v13954_v26, %v7722_v9  ;;  %v8007_v11 = vmax.f32 %v7941_v61, 0.0  ;;  %v14183_v45 = vld [vmem:[%s14426_s8 + $0x1] ss:$0 sm:$0xff] }
0x2183   :  { %v7947_v40 = vadd.f32 %v7946_v1, %v14098_v34  ;;  %7988 = vmatprep.mubr.bf16.mxu1 %v14539_v33  ;;  %v8008_v20 = vmax.f32 %v7943_v63, 0.0 }
0x2184   :  { %v8009_v19 = vmax.f32 %v7945_v24, 0.0  ;;  %v7745_v49 = vmul.f32 %v13954_v26, %v7723_v46  ;;  %v14164_v55 = vadd.f32 %v13961_v27, %v7744_v41 }
0x2185   :  { %v8010_v14 = vmax.f32 %v7947_v40, 0.0 }
0x2186   :  { %v8035_v38 = vpack.c.bf16 %v8009_v19, %v8007_v11  ;;  %v14167_v5 = vadd.f32 %v13961_v27, %v7745_v49 }
0x2187   :  { %v8036_v52 = vpack.c.bf16 %v8010_v14, %v8008_v20  ;;  %v7950_v37 = vpop.f32.mrb[236].mxu1 }
0x2188   :  { %v7951_v50 = vadd.f32 %v7950_v37, %v14094_v0  ;;  %v7952_v10 = vpop.f32.mrb[237].mxu1  ;;  %v7775_v33 = vpack.c.bf16 %v14167_v5, %v14164_v55 }
0x2189   :  { %v7953_v22 = vadd.f32 %v7952_v10, %v14098_v34  ;;  %v7954_v26 = vpop.f32.mrb[238].mxu1  ;;  %8232 = vmatprep.mubr.bf16.mxu0 %v8036_v52 }
0x218a   :  { %v7955_v35 = vadd.f32 %v7954_v26, %v14094_v0  ;;  %v7956_v13 = vpop.f32.mrb[239].mxu1  ;;  %7989 = vmatmul.mubr.bf16.gmra.mrb[252].mxu1 %v7775_v33  ;;  %8233 = vmatmul.mubr.bf16.gmra.mrb[232].mxu0 %v8035_v38  ;;  %v8011_v2 = vmax.f32 %v7951_v50, 0.0 }
0x218b   :  { %v7957_v27 = vadd.f32 %v7956_v13, %v14098_v34  ;;  %v8012_v21 = vmax.f32 %v7953_v22, 0.0 }
0x218c   :  { %v8013_v15 = vmax.f32 %v7955_v35, 0.0 }
0x218d   :  { %v8014_v62 = vmax.f32 %v7957_v27, 0.0 }
0x218e   :  { %v8037_v44 = vpack.c.bf16 %v8013_v15, %v8011_v2 }
0x218f   :  { %v8038_v8 = vpack.c.bf16 %v8014_v62, %v8012_v21 }
0x2191   :  { %8240 = vmatprep.mubr.bf16.mxu0 %v8038_v8 }
0x2192   :  { %8241 = vmatmul.mubr.bf16.gmra.mrb[236].mxu0 %v8037_v44 }
0x2245   :  { %v7960_v7 = vpop.f32.mrb[240].mxu1 }
0x2246   :  { %v7961_v51 = vadd.f32 %v7960_v7, %v14094_v0  ;;  %v7962_v31 = vpop.f32.mrb[241].mxu1 }
0x2247   :  { %v7963_v30 = vadd.f32 %v7962_v31, %v14098_v34  ;;  %v7964_v23 = vpop.f32.mrb[242].mxu1 }
0x2248   :  { %v7965_v12 = vadd.f32 %v7964_v23, %v14094_v0  ;;  %v7966_v43 = vpop.f32.mrb[243].mxu1  ;;  %v8015_v57 = vmax.f32 %v7961_v51, 0.0 }
0x2249   :  { %v7967_v53 = vadd.f32 %v7966_v43, %v14098_v34  ;;  %v8016_v42 = vmax.f32 %v7963_v30, 0.0 }
0x224a   :  { %v8017_v39 = vmax.f32 %v7965_v12, 0.0 }
0x224b   :  { %v8018_v28 = vmax.f32 %v7967_v53, 0.0 }
0x224c   :  { %v8039_v61 = vpack.c.bf16 %v8017_v39, %v8015_v57 }
0x224d   :  { %v8040_v18 = vpack.c.bf16 %v8018_v28, %v8016_v42  ;;  %v7970_v32 = vpop.f32.mrb[244].mxu1  ;;  %v9276_v9 = vpop.f32.mrb[224].mxu0 }
0x224e   :  { %v7971_v54 = vadd.f32 %v7970_v32, %v14094_v0  ;;  %v7972_v63 = vpop.f32.mrb[245].mxu1  ;;  %v9277_v24 = vpop.f32.mrb[225].mxu0 }
0x224f   :  { %v7973_v1 = vadd.f32 %v7972_v63, %v14098_v34  ;;  %v9278_v46 = vadd.f32 %v9277_v24, %v9276_v9  ;;  %v7974_v41 = vpop.f32.mrb[246].mxu1  ;;  %v9279_v40 = vpop.f32.mrb[226].mxu0  ;;  %8248 = vmatprep.mubr.bf16.mxu0 %v8040_v18 }
0x2250   :  { %v7975_v11 = vadd.f32 %v7974_v41, %v14094_v0  ;;  %v7976_v19 = vpop.f32.mrb[247].mxu1  ;;  %v9280_v49 = vpop.f32.mrb[227].mxu0  ;;  %8249 = vmatmul.mubr.bf16.gmra.mrb[240].mxu0 %v8039_v61  ;;  %v8019_v52 = vmax.f32 %v7971_v54, 0.0 }
0x2251   :  { %v8219_v20 = vadd.f32 %v9278_v46, %v14183_v45  ;;  %v7977_v14 = vadd.f32 %v7976_v19, %v14098_v34  ;;  %v9281_v38 = vadd.f32 %v9280_v49, %v9279_v40  ;;  %v8020_v50 = vmax.f32 %v7973_v1, 0.0 }
0x2252   :  { %v8021_v37 = vmax.f32 %v7975_v11, 0.0 }
0x2253   :  { %v8022_v10 = vmax.f32 %v7977_v14, 0.0  ;;  %v8222_v33 = vadd.f32 %v9281_v38, %v14183_v45  ;;  %v14191_v22 = vadd.f32 %v8219_v20, %v13966_v25 }
0x2254   :  { %v8041_v26 = vpack.c.bf16 %v8021_v37, %v8019_v52 }
0x2255   :  { %v8042_v35 = vpack.c.bf16 %v8022_v10, %v8020_v50  ;;  %8301 = vadd.xlane.f32.xlu0 %v14191_v22  ;;  %v7980_v13 = vpop.f32.mrb[248].mxu1  ;;  %v9282_v27 = vpop.f32.mrb[228].mxu0  ;;  %v14195_v2 = vadd.f32 %v8222_v33, %v13969_v29  ;;  %v8349_v51 = vmul.f32 %v14191_v22, %v14191_v22 }
0x2256   :  { %v7981_v15 = vadd.f32 %v7980_v13, %v14094_v0  ;;  %v7982_v21 = vpop.f32.mrb[249].mxu1  ;;  %v9283_v62 = vpop.f32.mrb[229].mxu0 }
0x2257   :  { %v7983_v44 = vadd.f32 %v7982_v21, %v14098_v34  ;;  %v9284_v8 = vadd.f32 %v9283_v62, %v9282_v27  ;;  %8303 = vadd.xlane.f32.xlu1 %v14195_v2  ;;  %v7984_v25 = vpop.f32.mrb[250].mxu1  ;;  %v9285_v7 = vpop.f32.mrb[230].mxu0  ;;  %8256 = vmatprep.mubr.bf16.mxu0 %v8042_v35  ;;  %v8350_v53 = vmul.f32 %v14195_v2, %v14195_v2 }
0x2258   :  { %v7985_v31 = vadd.f32 %v7984_v25, %v14094_v0  ;;  %v7986_v30 = vpop.f32.mrb[251].mxu1  ;;  %v9286_v29 = vpop.f32.mrb[231].mxu0  ;;  %8257 = vmatmul.mubr.bf16.gmra.mrb[244].mxu0 %v8041_v26  ;;  %v8023_v57 = vmax.f32 %v7981_v15, 0.0 }
0x2259   :  { %v8227_v23 = vadd.f32 %v9284_v8, %v14183_v45  ;;  %v7987_v12 = vadd.f32 %v7986_v30, %v14098_v34  ;;  %v9287_v43 = vadd.f32 %v9286_v29, %v9285_v7  ;;  %8365 = vadd.xlane.f32.xlu0 %v8349_v51  ;;  %v8024_v42 = vmax.f32 %v7983_v44, 0.0 }
0x225a   :  { %v8025_v39 = vmax.f32 %v7985_v31, 0.0 }
0x225b   :  { %v8026_v28 = vmax.f32 %v7987_v12, 0.0  ;;  %v8230_v61 = vadd.f32 %v9287_v43, %v14183_v45  ;;  %8367 = vadd.xlane.f32.xlu1 %v8350_v53  ;;  %v14209_v18 = vadd.f32 %v8227_v23, %v13980_v36 }
0x225c   :  { %v8043_v32 = vpack.c.bf16 %v8025_v39, %v8023_v57 }
0x225d   :  { %v8044_v9 = vpack.c.bf16 %v8026_v28, %v8024_v42  ;;  %8305 = vadd.xlane.f32.xlu0 %v14209_v18  ;;  %v7990_v54 = vpop.f32.mrb[252].mxu1  ;;  %v9288_v63 = vpop.f32.mrb[232].mxu0  ;;  %v14213_v24 = vadd.f32 %v8230_v61, %v13983_v6  ;;  %v8351_v49 = vmul.f32 %v14209_v18, %v14209_v18 }
0x225e   :  { %v7991_v1 = vadd.f32 %v7990_v54, %v14094_v0  ;;  %v7992_v46 = vpop.f32.mrb[253].mxu1  ;;  %v9289_v41 = vpop.f32.mrb[233].mxu0 }
0x225f   :  { %v7993_v40 = vadd.f32 %v7992_v46, %v14098_v34  ;;  %v9290_v11 = vadd.f32 %v9289_v41, %v9288_v63  ;;  %8307 = vadd.xlane.f32.xlu1 %v14213_v24  ;;  %v7994_v36 = vpop.f32.mrb[254].mxu1  ;;  %v9291_v19 = vpop.f32.mrb[234].mxu0  ;;  %8264 = vmatprep.mubr.bf16.mxu0 %v8044_v9  ;;  %v8352_v50 = vmul.f32 %v14213_v24, %v14213_v24 }
0x2260   :  { %v7995_v20 = vadd.f32 %v7994_v36, %v14094_v0  ;;  %v7996_v14 = vpop.f32.mrb[255].mxu1  ;;  %v9292_v6 = vpop.f32.mrb[235].mxu0  ;;  %8265 = vmatmul.mubr.bf16.gmra.mrb[248].mxu0 %v8043_v32  ;;  %v8027_v10 = vmax.f32 %v7991_v1, 0.0 }
0x2261   :  { %v8235_v38 = vadd.f32 %v9290_v11, %v14183_v45  ;;  %v7997_v52 = vadd.f32 %v7996_v14, %v14098_v34  ;;  %v9293_v37 = vadd.f32 %v9292_v6, %v9291_v19  ;;  %8369 = vadd.xlane.f32.xlu0 %v8351_v49  ;;  %v8028_v26 = vmax.f32 %v7993_v40, 0.0 }
0x2262   :  { %v8029_v33 = vmax.f32 %v7995_v20, 0.0 }
0x2263   :  { %v8030_v35 = vmax.f32 %v7997_v52, 0.0  ;;  %v8238_v13 = vadd.f32 %v9293_v37, %v14183_v45  ;;  %8371 = vadd.xlane.f32.xlu1 %v8352_v50  ;;  %v14227_v0 = vadd.f32 %v8235_v38, %v13993_v56 }
0x2264   :  { %v8045_v27 = vpack.c.bf16 %v8029_v33, %v8027_v10 }
0x2265   :  { %v8046_v15 = vpack.c.bf16 %v8030_v35, %v8028_v26  ;;  %8309 = vadd.xlane.f32.xlu0 %v14227_v0  ;;  %v9294_v34 = vpop.f32.mrb[236].mxu0  ;;  %v14231_v21 = vadd.f32 %v8238_v13, %v13996_v58  ;;  %v8353_v25 = vmul.f32 %v14227_v0, %v14227_v0 }
0x2266   :  { %v9295_v62 = vpop.f32.mrb[237].mxu0 }
0x2267   :  { %v9296_v44 = vadd.f32 %v9295_v62, %v9294_v34  ;;  %8311 = vadd.xlane.f32.xlu1 %v14231_v21  ;;  %v9297_v8 = vpop.f32.mrb[238].mxu0  ;;  %8272 = vmatprep.mubr.bf16.mxu0 %v8046_v15  ;;  %v8354_v31 = vmul.f32 %v14231_v21, %v14231_v21 }
0x2268   :  { %v9298_v7 = vpop.f32.mrb[239].mxu0  ;;  %8273 = vmatmul.mubr.bf16.gmra.mrb[252].mxu0 %v8045_v27 }
0x2269   :  { %v8243_v56 = vadd.f32 %v9296_v44, %v14183_v45  ;;  %v9299_v51 = vadd.f32 %v9298_v7, %v9297_v8  ;;  %8373 = vadd.xlane.f32.xlu0 %v8353_v25 }
0x226b   :  { %v8246_v58 = vadd.f32 %v9299_v51, %v14183_v45  ;;  %8375 = vadd.xlane.f32.xlu1 %v8354_v31  ;;  %v14241_v30 = vadd.f32 %v8243_v56, %v14005_v16 }
0x226d   :  { %8313 = vadd.xlane.f32.xlu0 %v14241_v30  ;;  %v14245_v29 = vadd.f32 %v8246_v58, %v14008_v60  ;;  %v8355_v23 = vmul.f32 %v14241_v30, %v14241_v30 }
0x226f   :  { %8315 = vadd.xlane.f32.xlu1 %v14245_v29  ;;  %v8356_v12 = vmul.f32 %v14245_v29, %v14245_v29 }
0x2271   :  { %8377 = vadd.xlane.f32.xlu0 %v8355_v23 }
0x2273   :  { %8379 = vadd.xlane.f32.xlu1 %v8356_v12 }
0x22e2   :  { %v8302_v43 = vpop.xlane.xlu0 %8301 }
0x22e3   :  { %v14252_v42 = vmul.f32 0.0078125, %v8302_v43 }
0x22e4   :  { %v8304_v53 = vpop.xlane.xlu1 %8303 }
0x22e5   :  { %v14256_v32 = vmul.f32 0.0078125, %v8304_v53  ;;  %v8413_v63 = vmul.f32 %v14252_v42, %v14252_v42 }
0x22e6   :  { %v8366_v57 = vpop.xlane.xlu0 %8365 }
0x22e7   :  { %v8397_v61 = vmul.f32 0.0078125, %v8366_v57  ;;  %v8414_v49 = vmul.f32 %v14256_v32, %v14256_v32 }
0x22e8   :  { %v8368_v16 = vpop.xlane.xlu1 %8367 }
0x22e9   :  { %v8398_v46 = vmul.f32 0.0078125, %v8368_v16  ;;  %v8429_v11 = vsub.f32 %v8397_v61, %v8413_v63 }
0x22ea   :  { %v8306_v39 = vpop.xlane.xlu0 %8305 }
0x22eb   :  { %v14254_v28 = vmul.f32 0.0078125, %v8306_v39  ;;  %v8430_v52 = vsub.f32 %v8398_v46, %v8414_v49  ;;  %v8461_v50 = vadd.f32 1e-05, %v8429_v11  ;;  %v8445_v49 = vsub.f32 %v14191_v22, %v14252_v42 }
0x22ec   :  { %v8308_v60 = vpop.xlane.xlu1 %8307 }
0x22ed   :  { %v14258_v9 = vmul.f32 0.0078125, %v8308_v60  ;;  %v8415_v41 = vmul.f32 %v14254_v28, %v14254_v28  ;;  %v8462_v15 = vadd.f32 1e-05, %v8430_v52  ;;  %10685 = vrsqrt.f32 %v8461_v50 }
0x22ee   :  { %v8370_v54 = vpop.xlane.xlu0 %8369  ;;  %v8447_v11 = vsub.f32 %v14209_v18, %v14254_v28 }
0x22ef   :  { %v8399_v1 = vmul.f32 0.0078125, %v8370_v54  ;;  %v8416_v36 = vmul.f32 %v14258_v9, %v14258_v9 }
0x22f0   :  { %v8372_v40 = vpop.xlane.xlu1 %8371 }
0x22f1   :  { %v8400_v19 = vmul.f32 0.0078125, %v8372_v40  ;;  %v8431_v20 = vsub.f32 %v8399_v1, %v8415_v41 }
0x22f2   :  { %v8310_v14 = vpop.xlane.xlu0 %8309 }
0x22f3   :  { %v8432_v6 = vsub.f32 %v8400_v19, %v8416_v36  ;;  %v8337_v38 = vmul.f32 0.0078125, %v8310_v14  ;;  %v8463_v10 = vadd.f32 1e-05, %v8431_v20  ;;  %v8448_v36 = vsub.f32 %v14213_v24, %v14258_v9  ;;  %v14281_v24 = vld [vmem:[%s14429_s11 + $0x1] ss:$0 sm:$0xff]  ;;  %s10887_s11 = smov [#allocation11]  }
0x22f4   :  { %v8312_v37 = vpop.xlane.xlu1 %8311  ;;  %v8446_v20 = vsub.f32 %v14195_v2, %v14256_v32 }
0x22f5   :  { %v8338_v33 = vmul.f32 0.0078125, %v8312_v37  ;;  %v8464_v35 = vadd.f32 1e-05, %v8432_v6  ;;  %v8417_v13 = vmul.f32 %v8337_v38, %v8337_v38  ;;  %10687 = vrsqrt.f32 %v8463_v10 }
0x22f6   :  { %v8374_v26 = vpop.xlane.xlu0 %8373  ;;  %v8449_v52 = vsub.f32 %v14227_v0, %v8337_v38 }
0x22f7   :  { %v8401_v27 = vmul.f32 0.0078125, %v8374_v26  ;;  %v8418_v62 = vmul.f32 %v8338_v33, %v8338_v33  ;;  %10689 = vrsqrt.f32 %v8464_v35  ;;  %v10686_v61 = vpop.eup %10685  ;;  %v8450_v37 = vsub.f32 %v14231_v21, %v8338_v33  ;;  %v14290_v21 = vld [vmem:[%s14430_s12 + $0x1] ss:$0 sm:$0xff]  ;;  %s8586_s12 = sshll.u32 %s10887_s11, 4  ;;  %s8587_s12 = int_to_ptr.vmem [resolvable:$true] %s8586_s12 }
0x22f8   :  { %v8376_v34 = vpop.xlane.xlu1 %8375  ;;  %10691 = vrsqrt.f32 %v8462_v15  ;;  %v8493_v10 = vmul.f32 %v10686_v61, %v8445_v49  ;;  %s10843_s25 = scalar_lea.vmem %s8587_s12, 32  ;;  %p10848_p13 = scmp.lt.s32.totalorder %s8587_s12, %s8587_s12 }
0x22f9   :  { %v8433_v44 = vsub.f32 %v8401_v27, %v8417_v13  ;;  %v8402_v8 = vmul.f32 0.0078125, %v8376_v34  ;;  %p10844_p12 = scmp.ne.s32.totalorder %s8587_s12, %s10843_s25  ;;  %p10849_p0 = scmp.lt.s32.totalorder %s10843_s25, %s10843_s25 }
0x22fa   :  { %v8314_v25 = vpop.xlane.xlu0 %8313  ;;  %v8515_v32 = vmul.f32 %v14281_v24, %v8493_v10 }
0x22fb   :  { %v8465_v7 = vadd.f32 1e-05, %v8433_v44  ;;  %v8434_v56 = vsub.f32 %v8402_v8, %v8418_v62  ;;  %v8339_v51 = vmul.f32 0.0078125, %v8314_v25  ;;  %p10850_p1 = por %p10849_p0, %p10848_p13 }
0x22fc   :  { %v8316_v31 = vpop.xlane.xlu1 %8315  ;;  %v8537_v62 = vadd.f32 %v14290_v21, %v8515_v32 }
0x22fd   :  { %10693 = vrsqrt.f32 %v8465_v7  ;;  %v8466_v58 = vadd.f32 1e-05, %v8434_v56  ;;  %v8340_v23 = vmul.f32 0.0078125, %v8316_v31  ;;  %v8419_v43 = vmul.f32 %v8339_v51, %v8339_v51  ;;  %p10851_p2 = pnand %p10850_p1, %p10844_p12 }
0x22fe   :  { %v8378_v12 = vpop.xlane.xlu0 %8377  ;;  %v8451_v33 = vsub.f32 %v14241_v30, %v8339_v51 }
0x22ff   :  { %10695 = vrsqrt.f32 %v8466_v58  ;;  %v8403_v53 = vmul.f32 0.0078125, %v8378_v12  ;;  %v8420_v16 = vmul.f32 %v8340_v23, %v8340_v23  ;;  %v10688_v1 = vpop.eup %10687  ;;  %v8452_v27 = vsub.f32 %v14245_v29, %v8340_v23 }
0x2300   :  { %v8380_v57 = vpop.xlane.xlu1 %8379  ;;  %v8495_v14 = vmul.f32 %v10688_v1, %v8447_v11 }
0x2301   :  { %v8435_v39 = vsub.f32 %v8403_v53, %v8419_v43  ;;  %v8404_v60 = vmul.f32 0.0078125, %v8380_v57  ;;  %v10690_v46 = vpop.eup %10689 }
0x2302   :  { %v10692_v40 = vpop.eup %10691  ;;  %v8496_v6 = vmul.f32 %v10690_v46, %v8448_v36  ;;  %v8517_v42 = vmul.f32 %v14281_v24, %v8495_v14 }
0x2303   :  { %v8467_v54 = vadd.f32 1e-05, %v8435_v39  ;;  %v8436_v63 = vsub.f32 %v8404_v60, %v8420_v16  ;;  %v8494_v18 = vmul.f32 %v10692_v40, %v8446_v20 }
0x2304   :  { %v8518_v2 = vmul.f32 %v14281_v24, %v8496_v6  ;;  %v8539_v35 = vadd.f32 %v14290_v21, %v8517_v42 }
0x2305   :  { %10697 = vrsqrt.f32 %v8467_v54  ;;  %v8468_v41 = vadd.f32 1e-05, %v8436_v63  ;;  %v8516_v0 = vmul.f32 %v14281_v24, %v8494_v18 }
0x2306   :  { %v8540_v13 = vadd.f32 %v14290_v21, %v8518_v2  ;;  %v8553_v56 = vmax.f32 %v8537_v62, %v8539_v35 }
0x2307   :  { %v10694_v19 = vpop.eup %10693  ;;  %10699 = vrsqrt.f32 %v8468_v41  ;;  %v8538_v44 = vadd.f32 %v14290_v21, %v8516_v0 }
0x2308   :  { %v8497_v28 = vmul.f32 %v10694_v19, %v8449_v52 }
0x2309   :  { %v10696_v50 = vpop.eup %10695  ;;  %v8554_v51 = vmax.f32 %v8538_v44, %v8540_v13 }
0x230a   :  { %v8498_v22 = vmul.f32 %v10696_v50, %v8450_v37  ;;  %v8519_v9 = vmul.f32 %v14281_v24, %v8497_v28 }
0x230c   :  { %v8520_v38 = vmul.f32 %v14281_v24, %v8498_v22  ;;  %v8541_v8 = vadd.f32 %v14290_v21, %v8519_v9 }
0x230e   :  { %v8542_v25 = vadd.f32 %v14290_v21, %v8520_v38  ;;  %v8555_v23 = vmax.f32 %v8553_v56, %v8541_v8 }
0x230f   :  { %v10698_v26 = vpop.eup %10697 }
0x2310   :  { %v8499_v15 = vmul.f32 %v10698_v26, %v8451_v33  ;;  %v8556_v12 = vmax.f32 %v8554_v51, %v8542_v25 }
0x2311   :  { %v10700_v34 = vpop.eup %10699 }
0x2312   :  { %v8521_v7 = vmul.f32 %v14281_v24, %v8499_v15  ;;  %v8500_v30 = vmul.f32 %v10700_v34, %v8452_v27 }
0x2314   :  { %v8543_v31 = vadd.f32 %v14290_v21, %v8521_v7  ;;  %v8522_v58 = vmul.f32 %v14281_v24, %v8500_v30 }
0x2316   :  { %v8544_v29 = vadd.f32 %v14290_v21, %v8522_v58  ;;  %v8557_v43 = vmax.f32 %v8555_v23, %v8543_v31 }
0x2318   :  { %v8558_v53 = vmax.f32 %v8556_v12, %v8544_v29 }
0x231a   :  { %v8559_v57 = vmax.f32 %v8557_v43, %v8558_v53 }
0x231c   :  { %v8560_v16 = vrot.slane %v8559_v57, 4 }
0x231e   :  { %v8561_v39 = vmax.f32 %v8559_v57, %v8560_v16 }
0x2320   :  { %v8562_v60 = vrot.slane %v8561_v39, 2 }
0x2322   :  { %v8563_v61 = vmax.f32 %v8561_v39, %v8562_v60 }
0x2323   :  { %v9300_v54 = vpop.f32.mrb[240].mxu0 }
0x2324   :  { %v9301_v63 = vpop.f32.mrb[241].mxu0  ;;  %v8564_v1 = vrot.slane %v8563_v61, 1 }
0x2325   :  { %v9302_v46 = vadd.f32 %v9301_v63, %v9300_v54  ;;  %v9303_v41 = vpop.f32.mrb[242].mxu0 }
0x2326   :  { %v9304_v40 = vpop.f32.mrb[243].mxu0  ;;  %v8565_v11 = vmax.f32 %v8563_v61, %v8564_v1 }
0x2327   :  { %v8251_v36 = vadd.f32 %v9302_v46, %v14183_v45  ;;  %v9305_v19 = vadd.f32 %v9304_v40, %v9303_v41 }
0x2328   :  { %8579 = vst [vmem:[#allocation11] sm:$0x1] %v8565_v11 }
0x2329   :  { %v8254_v49 = vadd.f32 %v9305_v19, %v14183_v45  ;;  %v14309_v20 = vadd.f32 %v8251_v36, %v14103_v4 }
0x232b   :  { %8317 = vadd.xlane.f32.xlu0 %v14309_v20  ;;  %v9306_v14 = vpop.f32.mrb[244].mxu0  ;;  %v14313_v6 = vadd.f32 %v8254_v49, %v14106_v59  ;;  %v8357_v10 = vmul.f32 %v14309_v20, %v14309_v20 }
0x232c   :  { %v9307_v52 = vpop.f32.mrb[245].mxu0 }
0x232d   :  { %v9308_v37 = vadd.f32 %v9307_v52, %v9306_v14  ;;  %8319 = vadd.xlane.f32.xlu1 %v14313_v6  ;;  %v9309_v50 = vpop.f32.mrb[246].mxu0  ;;  %v8358_v4 = vmul.f32 %v14313_v6, %v14313_v6 }
0x232e   :  { %v9310_v18 = vpop.f32.mrb[247].mxu0 }
0x232f   :  { %v8259_v28 = vadd.f32 %v9308_v37, %v14183_v45  ;;  %v9311_v22 = vadd.f32 %v9310_v18, %v9309_v50  ;;  %8381 = vadd.xlane.f32.xlu0 %v8357_v10 }
0x2331   :  { %v8262_v42 = vadd.f32 %v9311_v22, %v14183_v45  ;;  %8383 = vadd.xlane.f32.xlu1 %v8358_v4  ;;  %v14323_v59 = vadd.f32 %v8259_v28, %v14128_v48 }
0x2333   :  { %8321 = vadd.xlane.f32.xlu0 %v14323_v59  ;;  %v9312_v2 = vpop.f32.mrb[248].mxu0  ;;  %v14327_v32 = vadd.f32 %v8262_v42, %v14131_v3  ;;  %v8359_v33 = vmul.f32 %v14323_v59, %v14323_v59 }
0x2334   :  { %v9313_v0 = vpop.f32.mrb[249].mxu0 }
0x2335   :  { %v9314_v9 = vadd.f32 %v9313_v0, %v9312_v2  ;;  %8323 = vadd.xlane.f32.xlu1 %v14327_v32  ;;  %v9315_v38 = vpop.f32.mrb[250].mxu0  ;;  %v8360_v48 = vmul.f32 %v14327_v32, %v14327_v32 }
0x2336   :  { %v9316_v26 = vpop.f32.mrb[251].mxu0 }
0x2337   :  { %v8267_v35 = vadd.f32 %v9314_v9, %v14183_v45  ;;  %v9317_v13 = vadd.f32 %v9316_v26, %v9315_v38  ;;  %8385 = vadd.xlane.f32.xlu0 %v8359_v33 }
0x2339   :  { %v8270_v27 = vadd.f32 %v9317_v13, %v14183_v45  ;;  %8387 = vadd.xlane.f32.xlu1 %v8360_v48  ;;  %v14337_v3 = vadd.f32 %v8267_v35, %v14147_v47 }
0x233b   :  { %8325 = vadd.xlane.f32.xlu0 %v14337_v3  ;;  %v9318_v15 = vpop.f32.mrb[252].mxu0  ;;  %v14341_v34 = vadd.f32 %v8270_v27, %v14150_v17  ;;  %v8361_v25 = vmul.f32 %v14337_v3, %v14337_v3 }
0x233c   :  { %v9319_v62 = vpop.f32.mrb[253].mxu0 }
0x233d   :  { %v9320_v44 = vadd.f32 %v9319_v62, %v9318_v15  ;;  %8327 = vadd.xlane.f32.xlu1 %v14341_v34  ;;  %v9321_v8 = vpop.f32.mrb[254].mxu0  ;;  %v8362_v47 = vmul.f32 %v14341_v34, %v14341_v34 }
0x233e   :  { %v9322_v7 = vpop.f32.mrb[255].mxu0 }
0x233f   :  { %v8275_v30 = vadd.f32 %v9320_v44, %v14183_v45  ;;  %v9323_v56 = vadd.f32 %v9322_v7, %v9321_v8  ;;  %8389 = vadd.xlane.f32.xlu0 %v8361_v25 }
0x2341   :  { %v8278_v51 = vadd.f32 %v9323_v56, %v14183_v45  ;;  %8391 = vadd.xlane.f32.xlu1 %v8362_v47  ;;  %v14351_v17 = vadd.f32 %v8275_v30, %v14164_v55 }
0x2343   :  { %8329 = vadd.xlane.f32.xlu0 %v14351_v17  ;;  %v14355_v31 = vadd.f32 %v8278_v51, %v14167_v5  ;;  %v8363_v58 = vmul.f32 %v14351_v17, %v14351_v17 }
0x2345   :  { %8331 = vadd.xlane.f32.xlu1 %v14355_v31  ;;  %v8364_v29 = vmul.f32 %v14355_v31, %v14355_v31 }
0x2347   :  { %8393 = vadd.xlane.f32.xlu0 %v8363_v58 }
0x2349   :  { %8395 = vadd.xlane.f32.xlu1 %v8364_v29 }
0x23b8   :  { %v8318_v45 = vpop.xlane.xlu0 %8317 }
0x23b9   :  { %v14362_v53 = vmul.f32 0.0078125, %v8318_v45 }
0x23ba   :  { %v8320_v23 = vpop.xlane.xlu1 %8319 }
0x23bb   :  { %v14366_v39 = vmul.f32 0.0078125, %v8320_v23  ;;  %v8421_v54 = vmul.f32 %v14362_v53, %v14362_v53 }
0x23bc   :  { %v8382_v12 = vpop.xlane.xlu0 %8381 }
0x23bd   :  { %v8405_v16 = vmul.f32 0.0078125, %v8382_v12  ;;  %v8422_v19 = vmul.f32 %v14366_v39, %v14366_v39 }
0x23be   :  { %v8384_v55 = vpop.xlane.xlu1 %8383 }
0x23bf   :  { %v8406_v1 = vmul.f32 0.0078125, %v8384_v55  ;;  %v8437_v40 = vsub.f32 %v8405_v16, %v8421_v54 }
0x23c0   :  { %v8322_v43 = vpop.xlane.xlu0 %8321 }
0x23c1   :  { %v14364_v57 = vmul.f32 0.0078125, %v8322_v43  ;;  %v8438_v50 = vsub.f32 %v8406_v1, %v8422_v19  ;;  %v8469_v18 = vadd.f32 1e-05, %v8437_v40  ;;  %v8454_v1 = vsub.f32 %v14313_v6, %v14366_v39 }
0x23c2   :  { %v8324_v5 = vpop.xlane.xlu1 %8323 }
0x23c3   :  { %v14368_v60 = vmul.f32 0.0078125, %v8324_v5  ;;  %v8423_v46 = vmul.f32 %v14364_v57, %v14364_v57  ;;  %v8470_v9 = vadd.f32 1e-05, %v8438_v50  ;;  %10701 = vrsqrt.f32 %v8469_v18 }
0x23c4   :  { %v8386_v61 = vpop.xlane.xlu0 %8385  ;;  %v8455_v16 = vsub.f32 %v14323_v59, %v14364_v57 }
0x23c5   :  { %v8407_v63 = vmul.f32 0.0078125, %v8386_v61  ;;  %v8424_v11 = vmul.f32 %v14368_v60, %v14368_v60  ;;  %v8456_v61 = vsub.f32 %v14327_v32, %v14368_v60 }
0x23c6   :  { %v8388_v41 = vpop.xlane.xlu1 %8387 }
0x23c7   :  { %v8408_v36 = vmul.f32 0.0078125, %v8388_v41  ;;  %v8439_v49 = vsub.f32 %v8407_v63, %v8423_v46  ;;  %v8453_v63 = vsub.f32 %v14309_v20, %v14362_v53 }
0x23c8   :  { %v8326_v14 = vpop.xlane.xlu0 %8325 }
0x23c9   :  { %v8440_v52 = vsub.f32 %v8408_v36, %v8424_v11  ;;  %v8345_v37 = vmul.f32 0.0078125, %v8326_v14  ;;  %v8471_v28 = vadd.f32 1e-05, %v8439_v49 }
0x23ca   :  { %v8328_v10 = vpop.xlane.xlu1 %8327 }
0x23cb   :  { %v8346_v22 = vmul.f32 0.0078125, %v8328_v10  ;;  %v8472_v42 = vadd.f32 1e-05, %v8440_v52  ;;  %v8425_v2 = vmul.f32 %v8345_v37, %v8345_v37  ;;  %10703 = vrsqrt.f32 %v8471_v28 }
0x23cc   :  { %v8390_v4 = vpop.xlane.xlu0 %8389  ;;  %v8457_v40 = vsub.f32 %v14337_v3, %v8345_v37 }
0x23cd   :  { %v8409_v0 = vmul.f32 0.0078125, %v8390_v4  ;;  %v8426_v33 = vmul.f32 %v8346_v22, %v8346_v22  ;;  %10705 = vrsqrt.f32 %v8472_v42  ;;  %v10702_v29 = vpop.eup %10701  ;;  %v8458_v11 = vsub.f32 %v14341_v34, %v8346_v22 }
0x23ce   :  { %v8392_v38 = vpop.xlane.xlu1 %8391  ;;  %10707 = vrsqrt.f32 %v8470_v9  ;;  %v8501_v19 = vmul.f32 %v10702_v29, %v8453_v63 }
0x23cf   :  { %v8441_v26 = vsub.f32 %v8409_v0, %v8425_v2  ;;  %v8410_v35 = vmul.f32 0.0078125, %v8392_v38 }
0x23d0   :  { %v8330_v13 = vpop.xlane.xlu0 %8329  ;;  %v8523_v20 = vmul.f32 %v14281_v24, %v8501_v19 }
0x23d1   :  { %v8473_v48 = vadd.f32 1e-05, %v8441_v26  ;;  %v8442_v27 = vsub.f32 %v8410_v35, %v8426_v33  ;;  %v8347_v15 = vmul.f32 0.0078125, %v8330_v13 }
0x23d2   :  { %v8332_v62 = vpop.xlane.xlu1 %8331  ;;  %v8545_v18 = vadd.f32 %v14290_v21, %v8523_v20 }
0x23d3   :  { %10709 = vrsqrt.f32 %v8473_v48  ;;  %v8474_v44 = vadd.f32 1e-05, %v8442_v27  ;;  %v8348_v8 = vmul.f32 0.0078125, %v8332_v62  ;;  %v8427_v7 = vmul.f32 %v8347_v15, %v8347_v15 }
0x23d4   :  { %v8394_v25 = vpop.xlane.xlu0 %8393  ;;  %v8459_v3 = vsub.f32 %v14351_v17, %v8347_v15 }
0x23d5   :  { %10711 = vrsqrt.f32 %v8474_v44  ;;  %v8411_v30 = vmul.f32 0.0078125, %v8394_v25  ;;  %v8428_v47 = vmul.f32 %v8348_v8, %v8348_v8  ;;  %v10704_v12 = vpop.eup %10703  ;;  %v8460_v37 = vsub.f32 %v14355_v31, %v8348_v8 }
0x23d6   :  { %v8396_v56 = vpop.xlane.xlu1 %8395  ;;  %v8503_v46 = vmul.f32 %v10704_v12, %v8455_v16 }
0x23d7   :  { %v8443_v51 = vsub.f32 %v8411_v30, %v8427_v7  ;;  %v8412_v58 = vmul.f32 0.0078125, %v8396_v56  ;;  %v10706_v55 = vpop.eup %10705 }
0x23d8   :  { %v10708_v5 = vpop.eup %10707  ;;  %v8504_v41 = vmul.f32 %v10706_v55, %v8456_v61  ;;  %v8525_v32 = vmul.f32 %v14281_v24, %v8503_v46 }
0x23d9   :  { %v8475_v45 = vadd.f32 1e-05, %v8443_v51  ;;  %v8444_v23 = vsub.f32 %v8412_v58, %v8428_v47  ;;  %v8502_v59 = vmul.f32 %v10708_v5, %v8454_v1 }
0x23da   :  { %v8526_v60 = vmul.f32 %v14281_v24, %v8504_v41  ;;  %v8547_v14 = vadd.f32 %v14290_v21, %v8525_v32 }
0x23db   :  { %10713 = vrsqrt.f32 %v8475_v45  ;;  %v8476_v43 = vadd.f32 1e-05, %v8444_v23  ;;  %v8524_v6 = vmul.f32 %v14281_v24, %v8502_v59 }
0x23dc   :  { %v8548_v52 = vadd.f32 %v14290_v21, %v8526_v60  ;;  %v8566_v2 = vmax.f32 %v8545_v18, %v8547_v14 }
0x23dd   :  { %v10710_v54 = vpop.eup %10709  ;;  %10715 = vrsqrt.f32 %v8476_v43  ;;  %v8546_v28 = vadd.f32 %v14290_v21, %v8524_v6 }
0x23de   :  { %v8505_v57 = vmul.f32 %v10710_v54, %v8457_v40 }
0x23df   :  { %v10712_v36 = vpop.eup %10711  ;;  %v8567_v0 = vmax.f32 %v8546_v28, %v8548_v52 }
0x23e0   :  { %v8506_v49 = vmul.f32 %v10712_v36, %v8458_v11  ;;  %v8527_v53 = vmul.f32 %v14281_v24, %v8505_v57 }
0x23e2   :  { %v8528_v39 = vmul.f32 %v14281_v24, %v8506_v49  ;;  %v8549_v22 = vadd.f32 %v14290_v21, %v8527_v53 }
0x23e4   :  { %v8550_v4 = vadd.f32 %v14290_v21, %v8528_v39  ;;  %v8568_v33 = vmax.f32 %v8566_v2, %v8549_v22 }
0x23e5   :  { %v10714_v34 = vpop.eup %10713 }
0x23e6   :  { %v8507_v50 = vmul.f32 %v10714_v34, %v8459_v3  ;;  %v8569_v26 = vmax.f32 %v8567_v0, %v8550_v4 }
0x23e7   :  { %v10716_v10 = vpop.eup %10715 }
0x23e8   :  { %v8529_v42 = vmul.f32 %v14281_v24, %v8507_v50  ;;  %v8508_v17 = vmul.f32 %v10716_v10, %v8460_v37 }
0x23ea   :  { %v8551_v9 = vadd.f32 %v14290_v21, %v8529_v42  ;;  %v8530_v38 = vmul.f32 %v14281_v24, %v8508_v17 }
0x23ec   :  { %v8552_v31 = vadd.f32 %v14290_v21, %v8530_v38  ;;  %v8570_v35 = vmax.f32 %v8568_v33, %v8551_v9 }
0x23ee   :  { %v8571_v13 = vmax.f32 %v8569_v26, %v8552_v31 }
0x23f0   :  { %v8572_v48 = vmax.f32 %v8570_v35, %v8571_v13 }
0x23f2   :  { %v8573_v27 = vrot.slane %v8572_v48, 4 }
0x23f4   :  { %v8574_v15 = vmax.f32 %v8572_v48, %v8573_v27 }
0x23f6   :  { %v8575_v62 = vrot.slane %v8574_v15, 2 }
0x23f8   :  { %v8576_v44 = vmax.f32 %v8574_v15, %v8575_v62 }
0x23fa   :  { %v8577_v8 = vrot.slane %v8576_v44, 1 }
0x23fc   :  { %v8578_v25 = vmax.f32 %v8576_v44, %v8577_v8 }
0x23fe   :  { %8580 = vst [vmem:[#allocation11 + $0x1] sm:$0x1] %v8578_v25 }
0x23ff   :  { %10854 = shalt.err (!%p10851_p2)
}
0x2400   :  { %s10855_s27 = scalar_lea.hbm %s14431_s13, 32 }
0x2401   :  { %p10856_p3 = scmp.ne.s32.totalorder %s14431_s13, %s10855_s27  ;;  %p10859_p4 = scmp.lt.u32.totalorder %s10855_s27, %s14431_s13 }
0x2403   :  { %p10861_p5 = pnand %p10859_p4, %p10856_p3 }
0x2405   :  { %10864 = shalt.err (!%p10861_p5)
}
0x2406   :  { %s10888_s23 = smov 16   ;;  %s10889_s14 = smov 1  }
0x2407   :  { %8592 = dma.vmem_to_hbm [thread:$0]  %s8587_s12, 32, %s14431_s13, [#allocation4], %s10888_s23, %s10888_s23, %s10889_s14  }
0x2408   :  { %10871 = dma.done.wait [#allocation4], 32  }
0x2409   :  { %10872 = vsyncadd [#allocation4], 4294967264 }
0x240a   :  { %8596 = vsyncpa [#allocation3], 1 }
0x240b   :  { %8597 = vsyncpa [#allocation6], 1 }
0x240c   :  { %8598 = vsyncpa [#allocation9], 1 }
0x240d   :  { %8599 = vsyncpa [#allocation4], 1 }

</bundles_post_ra>
